<compile_context>
chip_gen: v7x
topology: tpu7x:2x2x1
jax: 0.10.0
libtpu: 0.0.40
codegen_flags: <defaults>
</compile_context>

<pallas_src>
import jax
import jax.numpy as jnp
from jax import lax
from jax.experimental import pallas as pl
from jax.experimental.pallas import tpu as pltpu

INPUT_SIZE = 28     # GRU input size
SEQ_LEN = 28        # timesteps (rows of the 28x28 image)
HIDDEN = 1024       # GRU hidden size
NUM_CLASSES = 10    # fc2 output


def _round_up(x, m):
    return ((x + m - 1) // m) * m


def _default_batch_tile():
    """128 rows fill a v5e MXU pass; 256 fills v6e/v7x's 256-wide MXU."""
    try:
        kind = jax.devices()[0].device_kind.lower()
    except Exception:
        return 128
    if ("v6" in kind) or ("v7" in kind) or ("7x" in kind):
        return 256
    return 128


def gru_kernel(gi_ref, w_hh_rz_ref, w_hh_n_ref, b_hh_n_ref, h_ref):
    """One GRU timestep per grid point; grid = (batch_tiles, T), T innermost.

       gi:      (tB, 3H) bf16   precomputed x_t @ W_ih^T + b_ih (+ b_hh folded into r,z cols)
       w_hh_rz: (H, 2H)  bf16   recurrent weights, r|z columns (VMEM-resident)
       w_hh_n:  (H, H)   bf16   recurrent weights, n column    (VMEM-resident)
       b_hh_n:  (1, H)   f32    recurrent n-gate bias (scaled by r, stays in-kernel)
       h:       (tB, H)  f32    output block; doubles as the hidden-state carry (resident
                                across the inner t axis, written back once per batch tile)."""
    H = w_hh_n_ref.shape[0]
    t = pl.program_id(1)

    @pl.when(t == 0)
    def _():
        h_ref[...] = jnp.zeros_like(h_ref)

    h = h_ref[...]                                         # (tB, H) f32
    gi = gi_ref[...].astype(jnp.float32)                   # (tB, 3H) f32 gate math
    h_b = h.astype(jnp.bfloat16)

    # Split the recurrent matmul by gate columns so the r/z activation math overlaps the
    # n-column MXU drain.  bf16 operands, f32 accumulation.
    gh_rz = jnp.dot(h_b, w_hh_rz_ref[...], preferred_element_type=jnp.float32)  # (tB, 2H)
    gh_n = jnp.dot(h_b, w_hh_n_ref[...], preferred_element_type=jnp.float32)    # (tB, H)

    r = jax.nn.sigmoid(gi[:, :H] + gh_rz[:, :H])
    z = jax.nn.sigmoid(gi[:, H:2 * H] + gh_rz[:, H:])
    n = jnp.tanh(gi[:, 2 * H:] + r * (gh_n + b_hh_n_ref[...]))
    h_ref[...] = (1.0 - z) * n + z * h


def recurrent_model_forward(x, params, *, batch_tile=None):
    """x: (B, 1, 28, 28) float32 (MNIST NCHW). Returns (B, 10) float32 logits."""
    B = x.shape[0]
    H = HIDDEN
    x = x.reshape(B, SEQ_LEN, INPUT_SIZE).astype(jnp.float32)     # x.view(B, 28, 28)

    if batch_tile is None:
        batch_tile = _default_batch_tile()

    # Pad the batch BEFORE the GI einsum (avoids re-copying the big (T, B, 3H) GI tensor).
    if B <= batch_tile:
        tB = _round_up(B, 16)          # bf16-friendly sublane multiple; single tile
        n_tiles = 1
    else:
        tB = batch_tile
        n_tiles = pl.cdiv(B, tB)
    b_pad = n_tiles * tB
    if b_pad != B:
        x = jnp.pad(x, ((0, b_pad - B), (0, 0), (0, 0)))

    # Hoisted input projection with folded biases: b_ih everywhere, plus b_hh in the r,z
    # columns (the n-gate b_hh must be scaled by r and stays inside the kernel).  Staged to
    # HBM in bf16 to halve the per-step GI DMA; the kernel promotes back to f32.
    bias = jnp.concatenate([params["b_ih"][:2 * H] + params["b_hh"][:2 * H],
                            params["b_ih"][2 * H:]])
    gi = (jnp.einsum("bti,gi->tbg", x, params["w_ih"]) + bias).astype(jnp.bfloat16)
    # gi: (T, b_pad, 3H) bf16, time-major.

    w_hh_t = params["w_hh"].T                                     # (H, 3H)
    w_hh_rz = w_hh_t[:, :2 * H].astype(jnp.bfloat16)              # (H, 2H)
    w_hh_n = w_hh_t[:, 2 * H:].astype(jnp.bfloat16)               # (H, H)
    b_hh_n = params["b_hh"][2 * H:].reshape(1, H)

    const2d = lambda b, t: (0, 0)
    h_final = pl.pallas_call(
        gru_kernel,
        out_shape=jax.ShapeDtypeStruct((b_pad, H), jnp.float32),
        grid=(n_tiles, SEQ_LEN),
        in_specs=[
            # One (tB, 3H) timestep slice per grid point; streamed/double-buffered.
            pl.BlockSpec((None, tB, 3 * H), lambda b, t: (t, b, 0)),
            pl.BlockSpec((H, 2 * H), const2d),                    # W_hh[:, r|z], resident
            pl.BlockSpec((H, H), const2d),                        # W_hh[:, n],   resident
            pl.BlockSpec((1, H), const2d),                        # b_hh[n]
        ],
        # Output block is the hidden-state carry: constant across t, written back per tile.
        out_specs=pl.BlockSpec((tB, H), lambda b, t: (b, 0)),
        compiler_params=pltpu.CompilerParams(
            dimension_semantics=("parallel", "arbitrary"),
            vmem_limit_bytes=32 << 20),
    )(gi, w_hh_rz, w_hh_n, b_hh_n)

    # Lane-dense (tB, 1024) writeback above; the tiny 1024x10 fc is a plain XLA matmul.
    return h_final[:B] @ params["w_fc"].T + params["b_fc"]


def reference_forward(x, params, *, match_kernel=False):
    """Pure-JAX reference. match_kernel=False: f32 torch.nn.GRU + Linear semantics.
       match_kernel=True: mirrors the kernel's bf16 GI staging / bf16 W_hh / f32 accumulation."""
    B = x.shape[0]
    H = HIDDEN
    x = x.reshape(B, SEQ_LEN, INPUT_SIZE).astype(jnp.float32)
    w_ih, w_hh = params["w_ih"], params["w_hh"]
    b_ih, b_hh = params["b_ih"], params["b_hh"]

    if match_kernel:
        bias = jnp.concatenate([b_ih[:2 * H] + b_hh[:2 * H], b_ih[2 * H:]])
        gi_all = (jnp.einsum("bti,gi->btg", x, w_ih) + bias).astype(jnp.bfloat16)
        w_hh_t = w_hh.T.astype(jnp.bfloat16)
        b_hh_n = b_hh[2 * H:]

        def step(h, gi_t):
            gi = gi_t.astype(jnp.float32)
            h_b = h.astype(jnp.bfloat16)
            gh = jnp.dot(h_b, w_hh_t, preferred_element_type=jnp.float32)
            r = jax.nn.sigmoid(gi[:, :H] + gh[:, :H])
            z = jax.nn.sigmoid(gi[:, H:2 * H] + gh[:, H:2 * H])
            n = jnp.tanh(gi[:, 2 * H:] + r * (gh[:, 2 * H:] + b_hh_n))
            return (1.0 - z) * n + z * h, None

        h0 = jnp.zeros((B, H), jnp.float32)
        h_final, _ = lax.scan(step, h0, jnp.transpose(gi_all, (1, 0, 2)))
    else:
        def step(h, x_t):
            gi = x_t @ w_ih.T + b_ih
            gh = h @ w_hh.T + b_hh
            r = jax.nn.sigmoid(gi[:, :H] + gh[:, :H])
            z = jax.nn.sigmoid(gi[:, H:2 * H] + gh[:, H:2 * H])
            n = jnp.tanh(gi[:, 2 * H:] + r * gh[:, 2 * H:])
            return (1.0 - z) * n + z * h, None

        h0 = jnp.zeros((B, H), jnp.float32)
        h_final, _ = lax.scan(step, h0, jnp.transpose(x, (1, 0, 2)))

    return h_final @ params["w_fc"].T + params["b_fc"]


def init_params(key):
    """Deterministic init; uniform(-1/sqrt(H), 1/sqrt(H)) like torch.nn.GRU/Linear."""
    k = 1.0 / jnp.sqrt(jnp.float32(HIDDEN))
    keys = jax.random.split(key, 6)
    u = lambda kk, shape: jax.random.uniform(kk, shape, jnp.float32, -k, k)
    return {
        "w_ih": u(keys[0], (3 * HIDDEN, INPUT_SIZE)),   # weight_ih_l0
        "w_hh": u(keys[1], (3 * HIDDEN, HIDDEN)),       # weight_hh_l0
        "b_ih": u(keys[2], (3 * HIDDEN,)),              # bias_ih_l0
        "b_hh": u(keys[3], (3 * HIDDEN,)),              # bias_hh_l0
        "w_fc": u(keys[4], (NUM_CLASSES, HIDDEN)),      # fc2.weight
        "b_fc": u(keys[5], (NUM_CLASSES,)),             # fc2.bias
    }


if __name__ == "__main__":
    key = jax.random.PRNGKey(0)
    pkey, xkey = jax.random.split(key)
    params = init_params(pkey)

    # --- small-shape smoke test (single batch tile) ---
    batch = 2
    x = jax.random.normal(xkey, (batch, 1, 28, 28), jnp.float32)   # MNIST NCHW
    out = jax.block_until_ready(recurrent_model_forward(x, params))
    assert out.shape == (batch, NUM_CLASSES)

    # Matched reference (bf16 GI staging + bf16 W_hh, f32 accumulation) -> tight agreement.
    ref_match = jax.block_until_ready(reference_forward(x, params, match_kernel=True))
    assert jnp.allclose(out, ref_match, rtol=1e-2, atol=1e-2), (out, ref_match)

    # Full-f32 PyTorch-semantics reference -> loose agreement (bf16 rounding).
    ref_f32 = jax.block_until_ready(reference_forward(x, params))
    assert jnp.allclose(out, ref_f32, rtol=5e-2, atol=5e-2), (out, ref_f32)

    # --- multi-tile path (batch grid + remainder padding) at a small forced tile ---
    x2 = jax.random.normal(jax.random.fold_in(xkey, 1), (34, 1, 28, 28), jnp.float32)
    out2 = jax.block_until_ready(recurrent_model_forward(x2, params, batch_tile=16))
    ref2 = jax.block_until_ready(reference_forward(x2, params, match_kernel=True))
    assert out2.shape == (34, NUM_CLASSES)
    assert jnp.allclose(out2, ref2, rtol=1e-2, atol=1e-2), (out2, ref2)

    print("KERNEL_OK")
</pallas_src>

<mosaic_0001>
module attributes {stable_mosaic.version = 11 : i64} {
  func.func @gru_kernel(%arg0: i32, %arg1: i32, %arg2: memref<1x16x3072xbf16, #tpu.memory_space<vmem>>, %arg3: memref<1024x2048xbf16, #tpu.memory_space<vmem>>, %arg4: memref<1024x1024xbf16, #tpu.memory_space<vmem>>, %arg5: memref<1x1024xf32, #tpu.memory_space<vmem>>, %arg6: memref<16x1024xf32, #tpu.memory_space<vmem>>) attributes {dimension_semantics = [#tpu.dimension_semantics<parallel>, #tpu.dimension_semantics<arbitrary>], iteration_bounds = array<i64: 1, 28>, scalar_prefetch = 0 : i64, scratch_operands = 0 : i64, tpu.core_type = #tpu.core_type<tc>, window_params = [{transform_indices = @transform_0, window_bounds = array<i64: 1, 16, 3072>}, {pipeline_mode = #tpu.pipeline_mode<synchronous>, transform_indices = @transform_1, window_bounds = array<i64: 1024, 2048>}, {pipeline_mode = #tpu.pipeline_mode<synchronous>, transform_indices = @transform_2, window_bounds = array<i64: 1024, 1024>}, {pipeline_mode = #tpu.pipeline_mode<synchronous>, transform_indices = @transform_3, window_bounds = array<i64: 1, 1024>}, {transform_indices = @transform_4, window_bounds = array<i64: 16, 1024>}]} {
    %c0_i32 = arith.constant 0 : i32
    %0 = arith.cmpi eq, %arg1, %c0_i32 : i32
    %1 = arith.extui %0 : i1 to i32
    %c0_i32_0 = arith.constant 0 : i32
    %2 = arith.cmpi ne, %1, %c0_i32_0 : i32
    scf.if %2 {
      %cst_17 = arith.constant 0.000000e+00 : f32
      %41 = vector.broadcast %cst_17 : f32 to vector<16x1024xf32>
      %c0_18 = arith.constant 0 : index
      %c0_19 = arith.constant 0 : index
      %42 = vector.load %arg6[%c0_18, %c0_19] : memref<16x1024xf32, #tpu.memory_space<vmem>>, vector<16x1024xf32>
      tpu.vector_store %arg6[%c0_18, %c0_19], %41 {strides = array<i32>} : memref<16x1024xf32, #tpu.memory_space<vmem>>, vector<16x1024xf32>,
    } else {
    }
    %c0 = arith.constant 0 : index
    %c0_1 = arith.constant 0 : index
    %3 = vector.load %arg6[%c0, %c0_1] : memref<16x1024xf32, #tpu.memory_space<vmem>>, vector<16x1024xf32>
    %c0_2 = arith.constant 0 : index
    %c0_3 = arith.constant 0 : index
    %c0_4 = arith.constant 0 : index
    %4 = vector.load %arg2[%c0_2, %c0_3, %c0_4] : memref<1x16x3072xbf16, #tpu.memory_space<vmem>>, vector<1x16x3072xbf16>
    %5 = vector.shape_cast %4 : vector<1x16x3072xbf16> to vector<16x3072xbf16>
    %6 = arith.extf %5 : vector<16x3072xbf16> to vector<16x3072xf32>
    %7 = arith.truncf %3 : vector<16x1024xf32> to vector<16x1024xbf16>
    %c0_5 = arith.constant 0 : index
    %c0_6 = arith.constant 0 : index
    %8 = vector.load %arg3[%c0_5, %c0_6] : memref<1024x2048xbf16, #tpu.memory_space<vmem>>, vector<1024x2048xbf16>
    %cst = arith.constant dense<0.000000e+00> : vector<16x2048xf32>
    %9 = tpu.matmul %7, %8, %cst {dimension_numbers = #tpu.dot_dimension_numbers<[1], [0], [0], [1], [0, 0, 1, 1], [], []>} : vector<16x1024xbf16>, vector<1024x2048xbf16>, vector<16x2048xf32> -> vector<16x2048xf32>
    %c0_7 = arith.constant 0 : index
    %c0_8 = arith.constant 0 : index
    %10 = vector.load %arg4[%c0_7, %c0_8] : memref<1024x1024xbf16, #tpu.memory_space<vmem>>, vector<1024x1024xbf16>
    %cst_9 = arith.constant dense<0.000000e+00> : vector<16x1024xf32>
    %11 = tpu.matmul %7, %10, %cst_9 {dimension_numbers = #tpu.dot_dimension_numbers<[1], [0], [0], [1], [0, 0, 1, 1], [], []>} : vector<16x1024xbf16>, vector<1024x1024xbf16>, vector<16x1024xf32> -> vector<16x1024xf32>
    %12 = vector.extract_strided_slice %6 {offsets = [0, 0], sizes = [16, 1024], strides = [1, 1]} : vector<16x3072xf32> to vector<16x1024xf32>
    %13 = vector.extract_strided_slice %9 {offsets = [0, 0], sizes = [16, 1024], strides = [1, 1]} : vector<16x2048xf32> to vector<16x1024xf32>
    %14 = arith.addf %12, %13 : vector<16x1024xf32>
    %15 = arith.negf %14 : vector<16x1024xf32>
    %16 = math.exp %15 : vector<16x1024xf32>
    %cst_10 = arith.constant 1.000000e+00 : f32
    %17 = vector.broadcast %cst_10 : f32 to vector<16x1024xf32>
    %18 = arith.addf %17, %16 : vector<16x1024xf32>
    %19 = arith.divf %17, %18 : vector<16x1024xf32>
    %20 = vector.extract_strided_slice %6 {offsets = [0, 1024], sizes = [16, 1024], strides = [1, 1]} : vector<16x3072xf32> to vector<16x1024xf32>
    %21 = vector.extract_strided_slice %9 {offsets = [0, 1024], sizes = [16, 1024], strides = [1, 1]} : vector<16x2048xf32> to vector<16x1024xf32>
    %22 = arith.addf %20, %21 : vector<16x1024xf32>
    %23 = arith.negf %22 : vector<16x1024xf32>
    %24 = math.exp %23 : vector<16x1024xf32>
    %cst_11 = arith.constant 1.000000e+00 : f32
    %25 = vector.broadcast %cst_11 : f32 to vector<16x1024xf32>
    %26 = arith.addf %25, %24 : vector<16x1024xf32>
    %27 = arith.divf %25, %26 : vector<16x1024xf32>
    %28 = vector.extract_strided_slice %6 {offsets = [0, 2048], sizes = [16, 1024], strides = [1, 1]} : vector<16x3072xf32> to vector<16x1024xf32>
    %c0_12 = arith.constant 0 : index
    %c0_13 = arith.constant 0 : index
    %29 = vector.load %arg5[%c0_12, %c0_13] : memref<1x1024xf32, #tpu.memory_space<vmem>>, vector<1x1024xf32>
    %30 = vector.broadcast %29 : vector<1x1024xf32> to vector<16x1024xf32>
    %31 = arith.addf %11, %30 : vector<16x1024xf32>
    %32 = arith.mulf %19, %31 : vector<16x1024xf32>
    %33 = arith.addf %28, %32 : vector<16x1024xf32>
    %34 = math.tanh %33 : vector<16x1024xf32>
    %cst_14 = arith.constant 1.000000e+00 : f32
    %35 = vector.broadcast %cst_14 : f32 to vector<16x1024xf32>
    %36 = arith.subf %35, %27 : vector<16x1024xf32>
    %37 = arith.mulf %36, %34 : vector<16x1024xf32>
    %38 = arith.mulf %27, %3 : vector<16x1024xf32>
    %39 = arith.addf %37, %38 : vector<16x1024xf32>
    %c0_15 = arith.constant 0 : index
    %c0_16 = arith.constant 0 : index
    %40 = vector.load %arg6[%c0_15, %c0_16] : memref<16x1024xf32, #tpu.memory_space<vmem>>, vector<16x1024xf32>
    tpu.vector_store %arg6[%c0_15, %c0_16], %39 {strides = array<i32>} : memref<16x1024xf32, #tpu.memory_space<vmem>>, vector<16x1024xf32>,
    return
  }
  func.func @transform_0(%arg0: i32, %arg1: i32) -> (i32, i32, i32) {
    %c0_i32 = arith.constant 0 : i32
    %c0_i32_0 = arith.constant 0 : i32
    return %arg1, %arg0, %c0_i32 : i32, i32, i32
  }
  func.func @transform_1(%arg0: i32, %arg1: i32) -> (i32, i32) {
    %c0_i32 = arith.constant 0 : i32
    %c0_i32_0 = arith.constant 0 : i32
    %c0_i32_1 = arith.constant 0 : i32
    return %c0_i32, %c0_i32_0 : i32, i32
  }
  func.func @transform_2(%arg0: i32, %arg1: i32) -> (i32, i32) {
    %c0_i32 = arith.constant 0 : i32
    %c0_i32_0 = arith.constant 0 : i32
    %c0_i32_1 = arith.constant 0 : i32
    return %c0_i32, %c0_i32_0 : i32, i32
  }
  func.func @transform_3(%arg0: i32, %arg1: i32) -> (i32, i32) {
    %c0_i32 = arith.constant 0 : i32
    %c0_i32_0 = arith.constant 0 : i32
    %c0_i32_1 = arith.constant 0 : i32
    return %c0_i32, %c0_i32_0 : i32, i32
  }
  func.func @transform_4(%arg0: i32, %arg1: i32) -> (i32, i32) {
    %c0_i32 = arith.constant 0 : i32
    %c0_i32_0 = arith.constant 0 : i32
    return %arg0, %c0_i32 : i32, i32
  }
}

</mosaic_0001>

<bundles_post_ra>
// kernel: tpu_custom_call.1
= control target key start
LH: loop header
LB: loop body
LE: loop exit
PB: predicated region body
PF: predicated region fallthrough
CT: control target
= control target key end

     0   :  { %9 = vsyncpa [#allocation3], 0  ;;  %s15113_s0 = inlined_call_operand.hbm [shape: bf16[28,16,3072], index: 0, kind: input, shape index: {}]   ;;  %s15114_s1 = inlined_call_operand.hbm [shape: bf16[1024,2048], index: 1, kind: input, shape index: {}]   ;;  %s15115_s2 = inlined_call_operand.hbm [shape: bf16[1024,1024], index: 2, kind: input, shape index: {}]   ;;  %s15116_s3 = inlined_call_operand.hbm [shape: f32[1,1024], index: 3, kind: input, shape index: {}]   ;;  %s15117_s4 = inlined_call_operand.hbm [shape: f32[16,1024], index: 4, kind: output, shape index: {}]  }
   0x1   :  { %11 = vsyncpa [#allocation3 + $0x1], 0 }
   0x2   :  { %12 = vsyncpa [#allocation6], 0 }
   0x3   :  { %13 = vsyncpa [#allocation9], 0 }
   0x4   :  { %14 = vsyncpa [#allocation4], 0  ;;  %s14434_s15 = smov 0   ;;  %s14436_s16 = smov 0  }
   0x5   :  { %s14438_s17 = smov 0   ;;  %s14440_s18 = smov 0  }
   0x6   :  { %s14442_s19 = smov 0   ;;  %s14444_s20 = smov 0  }
   0x7 LB: > { %s12166_s21 = sadd.s32 4294967295, %s14393_s20   ;;  %p54_p0 = scmp.ne.s32.totalorder %s14377_s16, %s14373_s15  ;;  %s14393_s20 = sphi %s14444_s20, %s20_s20   ;;  %s14389_s19 = sphi %s14442_s19, %s15159_s19   ;;  %s14385_s18 = sphi %s14440_s18, %s15158_s18   ;;  %s14381_s17 = sphi %s14438_s17, %s15157_s17   ;;  %s14377_s16 = sphi %s14436_s16, %s15156_s16   ;;  %s14373_s15 = sphi %s14434_s15, %s15155_s15  }
   0x8   : > { %p14466_p1 = scmp.eq.s32.totalorder %s12166_s21, 0  ;;  %p12167_p2 = scmp.ge.s32.totalorder %s14393_s20, 1 }
   0x9   : > { %p154_p3 = scmp.lt.s32.totalorder %s14393_s20, 29  ;;  %s14395_s25 = smov [#allocation5]  }
   0xa   : > { %s15126_s22 = scalar_select %p14466_p1, 1, 0 }
   0xb   : > { %p14474_p4 = por %p14466_p1, %p54_p0  ;;  %p14478_p5 = pnand %p12167_p2, %p154_p3 }
   0xc   : > { %s166_s26 = sshll.u32 %s14395_s25, 4  ;;  %s14396_s28 = smov [#allocation7]   ;;  %s167_s26 = int_to_ptr.vmem [resolvable:$true] %s166_s26 }
   0xd   : > { %s15127_s23 = scalar_select %p14474_p4, 1, 0 }
   0xe   : > { %s15128_s24 = scalar_select %p14478_p5, 1, 0 }
   0xf   : > { %p13931_p6 = pneg %p14478_p5  ;;  %s179_s29 = sshll.u32 %s14396_s28, 4  ;;  %s14490_s29 = int_to_ptr.vmem [resolvable:$true] %s179_s29 }
  0x10   : > { %s14191_s6 = scalar_lea.hbm %s15114_s1, 131072 }
  0x11   : > { %p14486_p7 = pnand %p13931_p6, %p14466_p1  ;;  %p14192_p8 = scmp.ne.s32.totalorder %s15114_s1, %s14191_s6 }
  0x12   : > { %p14198_p12 = scmp.lt.u32.totalorder %s14191_s6, %s15114_s1 }
  0x13   : > { %p14500_p9 = pneg %p14486_p7 }
  0x15   : > { %p14194_p10 = pnand %p14500_p9, %p14192_p8 }
  0x17   : > { %p14195_p11 = pneg %p14194_p10 }
  0x19   : > { %p14200_p13 = pnand %p14198_p12, %p14195_p11 }
  0x1b   : > { %14203 = shalt.err (!%p14200_p13)
}
  0x1c   : > { %s14204_s12 = scalar_lea.vmem %s167_s26, 131072  ;;  %p14212_p6 = scmp.lt.s32.totalorder %s167_s26, %s167_s26 }
  0x1d   : > { %p14205_p0 = scmp.ne.s32.totalorder %s167_s26, %s14204_s12  ;;  %p14213_p1 = scmp.lt.s32.totalorder %s14204_s12, %s14204_s12 }
  0x1f   : > { %p14207_p2 = pnand %p14205_p0, %p14500_p9  ;;  %p14214_p4 = por %p14213_p1, %p14212_p6 }
  0x21   : > { %p14208_p3 = pneg %p14207_p2 }
  0x23   : > { %p14215_p5 = pnand %p14214_p4, %p14208_p3 }
  0x25   : > { %14218 = shalt.err (!%p14215_p5)
}
  0x26   : > { %s14397_s13 = smov 1024   ;;  %s14398_s14 = smov 64  }
  0x27   : > { %13934 = dma.hbm_to_vmem [thread:$0]  (!%p14486_p7), %s15114_s1, 131072, %s167_s26, [#allocation6], %s14397_s13, %s14397_s13, %s14398_s14  }
  0x28   : > { %s14219_s5 = scalar_lea.hbm %s15115_s2, 65536 }
  0x29   : > { %p14220_p8 = scmp.ne.s32.totalorder %s15115_s2, %s14219_s5  ;;  %p14226_p5 = scmp.lt.u32.totalorder %s14219_s5, %s15115_s2 }
  0x2b   : > { %p14222_p1 = pnand %p14220_p8, %p14500_p9 }
  0x2d   : > { %p14223_p4 = pneg %p14222_p1 }
  0x2f   : > { %p14228_p10 = pnand %p14226_p5, %p14223_p4 }
  0x31   : > { %14231 = shalt.err (!%p14228_p10)
}
  0x32   : > { %s14232_s26 = scalar_lea.vmem %s14490_s29, 65536  ;;  %p14240_p0 = scmp.lt.s32.totalorder %s14490_s29, %s14490_s29 }
  0x33   : > { %p14233_p11 = scmp.ne.s32.totalorder %s14490_s29, %s14232_s26  ;;  %p14241_p2 = scmp.lt.s32.totalorder %s14232_s26, %s14232_s26 }
  0x35   : > { %p14235_p12 = pnand %p14233_p11, %p14500_p9  ;;  %p14242_p3 = por %p14241_p2, %p14240_p0 }
  0x37   : > { %p14236_p13 = pneg %p14235_p12 }
  0x39   : > { %p14243_p6 = pnand %p14242_p3, %p14236_p13 }
  0x3b   : > { %14246 = shalt.err (!%p14243_p6)
}
  0x3c   : > { %s14399_s11 = smov 512   ;;  %s14400_s12 = smov 32  }
  0x3d   : > { %13937 = dma.hbm_to_vmem [thread:$0]  (!%p14486_p7), %s15115_s2, 65536, %s14490_s29, [#allocation6], %s14399_s11, %s14399_s11, %s14400_s12  }
  0x3e   : > { %s14401_s15 = smov [#allocation8]   ;;  %s14247_s5 = scalar_lea.hbm %s15116_s3, 128 }
  0x3f   : > { %s193_s25 = sshll.u32 %s14401_s15, 4  ;;  %p14248_p8 = scmp.ne.s32.totalorder %s15116_s3, %s14247_s5  ;;  %s194_s25 = int_to_ptr.vmem [resolvable:$true] %s193_s25 }
  0x40   : > { %p14254_p5 = scmp.lt.u32.totalorder %s14247_s5, %s15116_s3 }
  0x41   : > { %p14250_p1 = pnand %p14248_p8, %p14500_p9 }
  0x43   : > { %p14251_p4 = pneg %p14250_p1 }
  0x45   : > { %p14256_p10 = pnand %p14254_p5, %p14251_p4 }
  0x47   : > { %14259 = shalt.err (!%p14256_p10)
}
  0x48   : > { %s14260_s29 = scalar_lea.vmem %s194_s25, 128  ;;  %p14268_p0 = scmp.lt.s32.totalorder %s194_s25, %s194_s25 }
  0x49   : > { %p14261_p11 = scmp.ne.s32.totalorder %s194_s25, %s14260_s29  ;;  %p14269_p2 = scmp.lt.s32.totalorder %s14260_s29, %s14260_s29 }
  0x4b   : > { %p14263_p12 = pnand %p14261_p11, %p14500_p9  ;;  %p14270_p3 = por %p14269_p2, %p14268_p0 }
  0x4d   : > { %p14264_p13 = pneg %p14263_p12 }
  0x4f   : > { %p14271_p6 = pnand %p14270_p3, %p14264_p13 }
  0x51   : > { %14274 = shalt.err (!%p14271_p6)
}
  0x52   : > { %13940 = dma.hbm_to_vmem [thread:$0]  (!%p14486_p7), %s15116_s3, 128, %s194_s25, [#allocation9]  }
  0x53   : > { %s29_s9 = sadd.s32 1, %s14389_s19  ;;  %s41_s12 = sadd.s32 1, %s14381_s17 }
  0x54   : > { %p30_p9 = scmp.ge.s32.totalorder %s29_s9, 28  ;;  %p48_p8 = scmp.ne.s32.totalorder %s14381_s17, %s14377_s16 }
  0x55   : > { %p49_p1 = scmp.eq.s32.totalorder %s14393_s20, 0  ;;  %p13948_p5 = scmp.lt.s32.totalorder %s14393_s20, 28 }
  0x56   : > { %s15161_s9 = smov (%p30_p9, %s29_s9), 0  ;;  %s204_s13 = sand.u32 1, %s14381_s17  }
  0x57   : > { %p50_p4 = por %p49_p1, %p48_p8  ;;  %s36_s27 = ssub.s32 %s14389_s19, %s15161_s9 }
  0x58   : > { %p39_p10 = scmp.eq.s32.totalorder %s36_s27, 0  ;;  %s13910_s14 = smul.u32 192, %s204_s13 }
  0x59   : > { %p14568_p11 = pnand %p13948_p5, %p50_p4  ;;  %s13911_s28 = smul.u32 3072, %s14389_s19 }
  0x5a   : > { %s14573_s25 = scalar_select %p39_p10, %s14381_s17, %s41_s12  }
  0x5b   : > { %s208_s30 = scalar_lea.vmem [#allocation2], %s13910_s14  ;;  %s14579_s8 = scalar_lea.hbm %s15113_s0, %s13911_s28 }
  0x5c   : > { %s218_s5 = sshll.u32 %s208_s30, 4  ;;  %s14583_s10 = scalar_lea.sflag [#allocation3], %s204_s13  ;;  %s14581_s5 = int_to_ptr.vmem [resolvable:$true] %s218_s5 }
  0x5d   : > { %s14275_s29 = scalar_lea.hbm %s14579_s8, 3072  ;;  %p14277_p12 = pneg %p14568_p11 }
  0x5e   : > { %p14276_p7 = scmp.ne.s32.totalorder %s14579_s8, %s14275_s29  ;;  %s14280_s12 = scalar_lea.hbm %s15113_s0, 86016 }
  0x5f   : > { %p14281_p2 = scmp.lt.u32.totalorder %s14579_s8, %s15113_s0  ;;  %p14282_p3 = scmp.lt.u32.totalorder %s14280_s12, %s14275_s29 }
  0x60   : > { %p14278_p13 = pnand %p14277_p12, %p14276_p7  ;;  %p14284_p9 = scmp.lt.u32.totalorder %s14275_s29, %s14579_s8 }
  0x61   : > { %p14283_p6 = por %p14282_p3, %p14281_p2 }
  0x62   : > { %p14279_p0 = pneg %p14278_p13 }
  0x63   : > { %p14285_p8 = por %p14284_p9, %p14283_p6 }
  0x65   : > { %p14286_p1 = pnand %p14285_p8, %p14279_p0 }
  0x67   : > { %14289 = shalt.err (!%p14286_p1)
}
  0x68   : > { %s14290_s13 = scalar_lea.vmem %s14581_s5, 3072  ;;  %s14402_s28 = smov [#allocation2]  }
  0x69   : > { %p14291_p4 = scmp.ne.s32.totalorder %s14581_s5, %s14290_s13  ;;  %s14295_s30 = sshll.u32 %s14402_s28, 4  ;;  %s14296_s30 = int_to_ptr.vmem [resolvable:$false] %s14295_s30 }
  0x6a   : > { %s14297_s6 = scalar_lea.vmem %s14296_s30, 6144  ;;  %p14298_p7 = scmp.lt.s32.totalorder %s14581_s5, %s14296_s30 }
  0x6b   : > { %p14293_p5 = pnand %p14291_p4, %p14277_p12  ;;  %p14299_p13 = scmp.lt.s32.totalorder %s14297_s6, %s14290_s13 }
  0x6d   : > { %p14294_p10 = pneg %p14293_p5  ;;  %p14300_p2 = por %p14299_p13, %p14298_p7 }
  0x6f   : > { %p14301_p3 = pnand %p14300_p2, %p14294_p10 }
  0x71   : > { %14304 = shalt.err (!%p14301_p3)
}
  0x72   : > { %s14403_s7 = smov 1536   ;;  %s14404_s29 = smov 96  }
  0x73   : > { %13944 = dma.hbm_to_vmem [thread:$0]  (!%p14568_p11), %s14579_s8, 3072, %s14581_s5, %s14583_s10, %s14403_s7, %s14403_s7, %s14404_s29  }
  0x74   : > { %p15132_p12 = scmp.ne.s32.totalorder %s15128_s24, 0 }
  0x76   : > { %230 = sbr.rel (%p15132_p12) target bundleno = 1941 (0x795), region = 36 }
  0x7d   : > { %s232_s26 = sand.u32 1, %s14377_s16   ;;  %p15133_p0 = scmp.ne.s32.totalorder %s15127_s23, 0 }
  0x7e   : > { %s13912_s11 = smul.u32 192, %s232_s26  ;;  %s233_s12 = scalar_lea.sflag [#allocation3], %s232_s26 }
  0x80   : > { %s14614_s27 = scalar_lea.vmem [#allocation2], %s13912_s11 }
  0x81   : > { %14356 = dma.done.wait (%p15133_p0), %s233_s12, 3072  }
  0x82   : > { %14358 = vsyncadd (%p15133_p0), %s233_s12, 4294964224  ;;  %p15134_p6 = scmp.ne.s32.totalorder %s15126_s22, 0 }
  0x84   : > { %14360 = dma.done.wait (%p15134_p6), [#allocation6], 196608  }
  0x85   : > { %14362 = vsyncadd (%p15134_p6), [#allocation6], 4294770688 }
  0x86   : > { %14364 = dma.done.wait (%p15134_p6), [#allocation9], 128  }
  0x87   : > { %14366 = vsyncadd (%p15134_p6), [#allocation9], 4294967168  ;;  %p12177_p11 = scmp.ne.s32.totalorder %s14385_s18, 0 }
  0x88   : > { %v14405_v0 = vmov (!%p12177_p11), 0.0  }
  0x89   : > { %273 = sbr.rel (%p12177_p11) target bundleno = 145 (0x91), region = 56  ;;  %274 = vst [vmem:[#allocation10] sm:$0xff] (!%p12177_p11), %v14405_v0  ;;  %275 = vst [vmem:[#allocation10 + $0x8] sm:$0xff] (!%p12177_p11), %v14405_v0 }
  0x8a   : > { %276 = vst [vmem:[#allocation10 + $0x10] sm:$0xff] (!%p12177_p11), %v14405_v0  ;;  %277 = vst [vmem:[#allocation10 + $0x18] sm:$0xff] (!%p12177_p11), %v14405_v0 }
  0x8b   : > { %278 = vst [vmem:[#allocation10 + $0x20] sm:$0xff] (!%p12177_p11), %v14405_v0  ;;  %279 = vst [vmem:[#allocation10 + $0x28] sm:$0xff] (!%p12177_p11), %v14405_v0 }
  0x8c   : > { %280 = vst [vmem:[#allocation10 + $0x30] sm:$0xff] (!%p12177_p11), %v14405_v0  ;;  %281 = vst [vmem:[#allocation10 + $0x38] sm:$0xff] (!%p12177_p11), %v14405_v0 }
  0x8d   : > { %282 = vst [vmem:[#allocation10 + $0x40] sm:$0xff] (!%p12177_p11), %v14405_v0  ;;  %283 = vst [vmem:[#allocation10 + $0x48] sm:$0xff] (!%p12177_p11), %v14405_v0 }
  0x8e   : > { %284 = vst [vmem:[#allocation10 + $0x50] sm:$0xff] (!%p12177_p11), %v14405_v0  ;;  %285 = vst [vmem:[#allocation10 + $0x58] sm:$0xff] (!%p12177_p11), %v14405_v0 }
  0x8f   : > { %286 = vst [vmem:[#allocation10 + $0x60] sm:$0xff] (!%p12177_p11), %v14405_v0  ;;  %287 = vst [vmem:[#allocation10 + $0x68] sm:$0xff] (!%p12177_p11), %v14405_v0 }
  0x90   : > { %288 = vst [vmem:[#allocation10 + $0x70] sm:$0xff] %v14405_v0  ;;  %289 = vst [vmem:[#allocation10 + $0x78] sm:$0xff] %v14405_v0 }
  0x91 PF: > { %v386_v1 = vld [vmem:[#allocation5] sm:$0xff]  ;;  %v387_v3 = vld [vmem:[#allocation5 + $0x8] sm:$0xff]  ;;  %v291_v54 = vld [vmem:[#allocation10 + $0x8] sm:$0xff]  ;;  %s14406_s18 = smov [#allocation10]   ;;  %p15069_p9 = scmp.eq.s32.totalorder %s12166_s21, 27 }
  0x92   : > { %v394_v2 = vld [vmem:[#allocation5 + $0x40] sm:$0xff]  ;;  %v395_v5 = vld [vmem:[#allocation5 + $0x48] sm:$0xff]  ;;  %s12070_s22 = sshll.u32 %s14406_s18, 4  ;;  %s12071_s22 = int_to_ptr.vmem [resolvable:$true] %s12070_s22 }
  0x93   : > { %v12179_v4 = vcombine.high %v386_v1, %v394_v2  ;;  %v12178_v6 = vcombine.low %v386_v1, %v394_v2  ;;  %v402_v7 = vld [vmem:[#allocation5 + $0x80] sm:$0xff]  ;;  %v12181_v9 = vcombine.high %v387_v3, %v395_v5  ;;  %v12180_v10 = vcombine.low %v387_v3, %v395_v5  ;;  %v403_v12 = vld [vmem:[#allocation5 + $0x88] sm:$0xff]  ;;  %s14305_s24 = scalar_lea.vmem %s12071_s22, 2048  ;;  %p14312_p5 = scmp.lt.s32.totalorder %s12071_s22, %s12071_s22 }
  0x94   : > { %v410_v8 = vld [vmem:[#allocation5 + $0xc0] sm:$0xff]  ;;  %v411_v13 = vld [vmem:[#allocation5 + $0xc8] sm:$0xff]  ;;  %p14306_p8 = scmp.ne.s32.totalorder %s12071_s22, %s14305_s24  ;;  %p14313_p10 = scmp.lt.s32.totalorder %s14305_s24, %s14305_s24 }
  0x95   : > { %v12195_v11 = vcombine.high %v402_v7, %v410_v8  ;;  %v418_v14 = vld [vmem:[#allocation5 + $0x100] sm:$0xff]  ;;  %6530 = vmatprep.subr.bf16.mxu0 %v12179_v4  ;;  %v12197_v15 = vcombine.high %v403_v12, %v411_v13  ;;  %v419_v17 = vld [vmem:[#allocation5 + $0x108] sm:$0xff]  ;;  %6702 = vmatprep.subr.bf16.mxu1 %v12181_v9  ;;  %v12194_v19 = vcombine.low %v402_v7, %v410_v8  ;;  %v299_v55 = vld [vmem:[#allocation10 + $0x48] sm:$0xff] }
  0x96   : > { %v426_v16 = vld [vmem:[#allocation5 + $0x140] sm:$0xff]  ;;  %v427_v18 = vld [vmem:[#allocation5 + $0x148] sm:$0xff]  ;;  %6531 = vmatpush1.bf16.msra.mxu0 %v12178_v6  ;;  %6703 = vmatpush1.bf16.msra.mxu1 %v12180_v10  ;;  %v12196_v20 = vcombine.low %v403_v12, %v411_v13  ;;  %v14629_v59 = vpack.c.bf16 %v299_v55, %v291_v54  ;;  %p14307_p1 = pnand %p14306_p8, %p15069_p9  ;;  %p14314_p7 = por %p14313_p10, %p14312_p5 }
  0x97   : > { %6532 = vmatprep.subr.bf16.mxu0 %v12195_v11  ;;  %v12211_v21 = vcombine.high %v418_v14, %v426_v16  ;;  %6704 = vmatprep.subr.bf16.mxu1 %v12197_v15  ;;  %v12213_v22 = vcombine.high %v419_v17, %v427_v18  ;;  %v434_v23 = vld [vmem:[#allocation5 + $0x180] sm:$0xff]  ;;  %v435_v25 = vld [vmem:[#allocation5 + $0x188] sm:$0xff]  ;;  %v12210_v27 = vcombine.low %v418_v14, %v426_v16 }
  0x98   : > { %v442_v24 = vld [vmem:[#allocation5 + $0x1c0] sm:$0xff]  ;;  %v443_v26 = vld [vmem:[#allocation5 + $0x1c8] sm:$0xff]  ;;  %v12212_v28 = vcombine.low %v419_v17, %v427_v18  ;;  %6562 = vmatprep.mubr.bf16.mxu0 %v14629_v59  ;;  %6734 = vmatprep.mubr.bf16.mxu1 %v14629_v59  ;;  %p14308_p4 = pneg %p14307_p1 }
  0x99   : > { %v12227_v29 = vcombine.high %v434_v23, %v442_v24  ;;  %v12229_v30 = vcombine.high %v435_v25, %v443_v26  ;;  %v450_v31 = vld [vmem:[#allocation5 + $0x200] sm:$0xff]  ;;  %v451_v33 = vld [vmem:[#allocation5 + $0x208] sm:$0xff]  ;;  %v12226_v35 = vcombine.low %v434_v23, %v442_v24  ;;  %v12228_v36 = vcombine.low %v435_v25, %v443_v26 }
  0x9a   : > { %6533 = vmatpush1.bf16.msra.mxu0 %v12194_v19  ;;  %6705 = vmatpush1.bf16.msra.mxu1 %v12196_v20  ;;  %v458_v32 = vld [vmem:[#allocation5 + $0x240] sm:$0xff]  ;;  %v459_v34 = vld [vmem:[#allocation5 + $0x248] sm:$0xff]  ;;  %p14315_p13 = pnand %p14314_p7, %p14308_p4 }
  0x9b   : > { %6534 = vmatprep.subr.bf16.mxu0 %v12211_v21  ;;  %6706 = vmatprep.subr.bf16.mxu1 %v12213_v22  ;;  %v12243_v37 = vcombine.high %v450_v31, %v458_v32  ;;  %v12245_v38 = vcombine.high %v451_v33, %v459_v34  ;;  %v466_v39 = vld [vmem:[#allocation5 + $0x280] sm:$0xff]  ;;  %v467_v41 = vld [vmem:[#allocation5 + $0x288] sm:$0xff]  ;;  %v12242_v43 = vcombine.low %v450_v31, %v458_v32 }
  0x9c   : > { %v474_v40 = vld [vmem:[#allocation5 + $0x2c0] sm:$0xff]  ;;  %v475_v42 = vld [vmem:[#allocation5 + $0x2c8] sm:$0xff]  ;;  %v12244_v44 = vcombine.low %v451_v33, %v459_v34 }
  0x9d   : > { %v12259_v45 = vcombine.high %v466_v39, %v474_v40  ;;  %v12261_v46 = vcombine.high %v467_v41, %v475_v42  ;;  %v482_v47 = vld [vmem:[#allocation5 + $0x300] sm:$0xff]  ;;  %v483_v49 = vld [vmem:[#allocation5 + $0x308] sm:$0xff]  ;;  %v12258_v51 = vcombine.low %v466_v39, %v474_v40  ;;  %v12260_v52 = vcombine.low %v467_v41, %v475_v42 }
  0x9e   : > { %6535 = vmatpush1.bf16.msra.mxu0 %v12210_v27  ;;  %6707 = vmatpush1.bf16.msra.mxu1 %v12212_v28  ;;  %v490_v48 = vld [vmem:[#allocation5 + $0x340] sm:$0xff]  ;;  %v491_v50 = vld [vmem:[#allocation5 + $0x348] sm:$0xff] }
  0x9f   : > { %6536 = vmatprep.subr.bf16.mxu0 %v12227_v29  ;;  %6708 = vmatprep.subr.bf16.mxu1 %v12229_v30  ;;  %v12275_v53 = vcombine.high %v482_v47, %v490_v48  ;;  %v12277_v56 = vcombine.high %v483_v49, %v491_v50  ;;  %v498_v57 = vld [vmem:[#allocation5 + $0x380] sm:$0xff]  ;;  %v499_v60 = vld [vmem:[#allocation5 + $0x388] sm:$0xff]  ;;  %v12274_v62 = vcombine.low %v482_v47, %v490_v48 }
  0xa0   : > { %v506_v58 = vld [vmem:[#allocation5 + $0x3c0] sm:$0xff]  ;;  %v507_v61 = vld [vmem:[#allocation5 + $0x3c8] sm:$0xff]  ;;  %v12276_v63 = vcombine.low %v483_v49, %v491_v50 }
  0xa1   : > { %v12291_v0 = vcombine.high %v498_v57, %v506_v58  ;;  %v12293_v1 = vcombine.high %v499_v60, %v507_v61  ;;  %v514_v2 = vld [vmem:[#allocation5 + $0x400] sm:$0xff]  ;;  %v515_v4 = vld [vmem:[#allocation5 + $0x408] sm:$0xff]  ;;  %v12290_v6 = vcombine.low %v498_v57, %v506_v58  ;;  %v12292_v7 = vcombine.low %v499_v60, %v507_v61 }
  0xa2   : > { %6537 = vmatpush1.bf16.msra.mxu0 %v12226_v35  ;;  %6709 = vmatpush1.bf16.msra.mxu1 %v12228_v36  ;;  %v522_v3 = vld [vmem:[#allocation5 + $0x440] sm:$0xff]  ;;  %v523_v5 = vld [vmem:[#allocation5 + $0x448] sm:$0xff] }
  0xa3   : > { %6538 = vmatprep.subr.bf16.mxu0 %v12243_v37  ;;  %6710 = vmatprep.subr.bf16.mxu1 %v12245_v38  ;;  %v12307_v8 = vcombine.high %v514_v2, %v522_v3  ;;  %v12309_v9 = vcombine.high %v515_v4, %v523_v5  ;;  %v530_v10 = vld [vmem:[#allocation5 + $0x480] sm:$0xff]  ;;  %v531_v12 = vld [vmem:[#allocation5 + $0x488] sm:$0xff]  ;;  %v12306_v14 = vcombine.low %v514_v2, %v522_v3 }
  0xa4   : > { %v538_v11 = vld [vmem:[#allocation5 + $0x4c0] sm:$0xff]  ;;  %v539_v13 = vld [vmem:[#allocation5 + $0x4c8] sm:$0xff]  ;;  %v12308_v15 = vcombine.low %v515_v4, %v523_v5 }
  0xa5   : > { %v12323_v16 = vcombine.high %v530_v10, %v538_v11  ;;  %v12325_v17 = vcombine.high %v531_v12, %v539_v13  ;;  %v546_v18 = vld [vmem:[#allocation5 + $0x500] sm:$0xff]  ;;  %v547_v20 = vld [vmem:[#allocation5 + $0x508] sm:$0xff]  ;;  %v12322_v22 = vcombine.low %v530_v10, %v538_v11  ;;  %v12324_v23 = vcombine.low %v531_v12, %v539_v13 }
  0xa6   : > { %6539 = vmatpush1.bf16.msra.mxu0 %v12242_v43  ;;  %6711 = vmatpush1.bf16.msra.mxu1 %v12244_v44  ;;  %v554_v19 = vld [vmem:[#allocation5 + $0x540] sm:$0xff]  ;;  %v555_v21 = vld [vmem:[#allocation5 + $0x548] sm:$0xff] }
  0xa7   : > { %6540 = vmatprep.subr.bf16.mxu0 %v12259_v45  ;;  %6712 = vmatprep.subr.bf16.mxu1 %v12261_v46  ;;  %v12339_v24 = vcombine.high %v546_v18, %v554_v19  ;;  %v12341_v25 = vcombine.high %v547_v20, %v555_v21  ;;  %v562_v26 = vld [vmem:[#allocation5 + $0x580] sm:$0xff]  ;;  %v563_v28 = vld [vmem:[#allocation5 + $0x588] sm:$0xff]  ;;  %v12338_v30 = vcombine.low %v546_v18, %v554_v19 }
  0xa8   : > { %v570_v27 = vld [vmem:[#allocation5 + $0x5c0] sm:$0xff]  ;;  %v571_v29 = vld [vmem:[#allocation5 + $0x5c8] sm:$0xff]  ;;  %v12340_v31 = vcombine.low %v547_v20, %v555_v21 }
  0xa9   : > { %v12355_v32 = vcombine.high %v562_v26, %v570_v27  ;;  %v12357_v33 = vcombine.high %v563_v28, %v571_v29  ;;  %v578_v34 = vld [vmem:[#allocation5 + $0x600] sm:$0xff]  ;;  %v579_v36 = vld [vmem:[#allocation5 + $0x608] sm:$0xff]  ;;  %v12354_v38 = vcombine.low %v562_v26, %v570_v27  ;;  %v12356_v39 = vcombine.low %v563_v28, %v571_v29 }
  0xaa   : > { %6541 = vmatpush1.bf16.msra.mxu0 %v12258_v51  ;;  %6713 = vmatpush1.bf16.msra.mxu1 %v12260_v52  ;;  %v586_v35 = vld [vmem:[#allocation5 + $0x640] sm:$0xff]  ;;  %v587_v37 = vld [vmem:[#allocation5 + $0x648] sm:$0xff] }
  0xab   : > { %6542 = vmatprep.subr.bf16.mxu0 %v12275_v53  ;;  %6714 = vmatprep.subr.bf16.mxu1 %v12277_v56  ;;  %v12371_v40 = vcombine.high %v578_v34, %v586_v35  ;;  %v12373_v41 = vcombine.high %v579_v36, %v587_v37  ;;  %v594_v42 = vld [vmem:[#allocation5 + $0x680] sm:$0xff]  ;;  %v595_v44 = vld [vmem:[#allocation5 + $0x688] sm:$0xff]  ;;  %v12370_v46 = vcombine.low %v578_v34, %v586_v35 }
  0xac   : > { %v602_v43 = vld [vmem:[#allocation5 + $0x6c0] sm:$0xff]  ;;  %v603_v45 = vld [vmem:[#allocation5 + $0x6c8] sm:$0xff]  ;;  %v12372_v47 = vcombine.low %v579_v36, %v587_v37 }
  0xad   : > { %v12387_v48 = vcombine.high %v594_v42, %v602_v43  ;;  %v12389_v49 = vcombine.high %v595_v44, %v603_v45  ;;  %v610_v50 = vld [vmem:[#allocation5 + $0x700] sm:$0xff]  ;;  %v611_v52 = vld [vmem:[#allocation5 + $0x708] sm:$0xff]  ;;  %v12386_v54 = vcombine.low %v594_v42, %v602_v43  ;;  %v12388_v55 = vcombine.low %v595_v44, %v603_v45 }
  0xae   : > { %6543 = vmatpush1.bf16.msra.mxu0 %v12274_v62  ;;  %6715 = vmatpush1.bf16.msra.mxu1 %v12276_v63  ;;  %v618_v51 = vld [vmem:[#allocation5 + $0x740] sm:$0xff]  ;;  %v619_v53 = vld [vmem:[#allocation5 + $0x748] sm:$0xff] }
  0xaf   : > { %6544 = vmatprep.subr.bf16.mxu0 %v12291_v0  ;;  %6716 = vmatprep.subr.bf16.mxu1 %v12293_v1  ;;  %v12403_v56 = vcombine.high %v610_v50, %v618_v51  ;;  %v12405_v57 = vcombine.high %v611_v52, %v619_v53  ;;  %v626_v58 = vld [vmem:[#allocation5 + $0x780] sm:$0xff]  ;;  %v627_v61 = vld [vmem:[#allocation5 + $0x788] sm:$0xff]  ;;  %v12402_v63 = vcombine.low %v610_v50, %v618_v51 }
  0xb0   : > { %v634_v60 = vld [vmem:[#allocation5 + $0x7c0] sm:$0xff]  ;;  %v635_v62 = vld [vmem:[#allocation5 + $0x7c8] sm:$0xff]  ;;  %v12404_v0 = vcombine.low %v611_v52, %v619_v53 }
  0xb1   : > { %v12419_v1 = vcombine.high %v626_v58, %v634_v60  ;;  %v12421_v2 = vcombine.high %v627_v61, %v635_v62  ;;  %v642_v3 = vld [vmem:[#allocation5 + $0x800] sm:$0xff]  ;;  %v643_v5 = vld [vmem:[#allocation5 + $0x808] sm:$0xff]  ;;  %v12420_v10 = vcombine.low %v627_v61, %v635_v62 }
  0xb2   : > { %6545 = vmatpush1.bf16.msra.mxu0 %v12290_v6  ;;  %6717 = vmatpush1.bf16.msra.mxu1 %v12292_v7  ;;  %v650_v4 = vld [vmem:[#allocation5 + $0x840] sm:$0xff]  ;;  %v651_v6 = vld [vmem:[#allocation5 + $0x848] sm:$0xff]  ;;  %v12418_v7 = vcombine.low %v626_v58, %v634_v60 }
  0xb3   : > { %6546 = vmatprep.subr.bf16.mxu0 %v12307_v8  ;;  %6718 = vmatprep.subr.bf16.mxu1 %v12309_v9  ;;  %v290_v8 = vld [vmem:[#allocation10] sm:$0xff]  ;;  %v12435_v11 = vcombine.high %v642_v3, %v650_v4  ;;  %v12437_v12 = vcombine.high %v643_v5, %v651_v6  ;;  %v658_v13 = vld [vmem:[#allocation5 + $0x880] sm:$0xff]  ;;  %v12434_v20 = vcombine.low %v642_v3, %v650_v4 }
  0xb4   : > { %v298_v9 = vld [vmem:[#allocation10 + $0x40] sm:$0xff]  ;;  %v293_v18 = vld [vmem:[#allocation10 + $0x18] sm:$0xff]  ;;  %v12436_v21 = vcombine.low %v643_v5, %v651_v6 }
  0xb5   : > { %v301_v19 = vld [vmem:[#allocation10 + $0x58] sm:$0xff]  ;;  %v675_v27 = vld [vmem:[#allocation5 + $0x908] sm:$0xff] }
  0xb6   : > { %6547 = vmatpush1.bf16.msra.mxu0 %v12306_v14  ;;  %6719 = vmatpush1.bf16.msra.mxu1 %v12308_v15  ;;  %v666_v14 = vld [vmem:[#allocation5 + $0x8c0] sm:$0xff]  ;;  %v659_v15 = vld [vmem:[#allocation5 + $0x888] sm:$0xff]  ;;  %v14635_v26 = vpack.c.bf16 %v301_v19, %v293_v18 }
  0xb7   : > { %6548 = vmatprep.subr.bf16.mxu0 %v12323_v16  ;;  %6720 = vmatprep.subr.bf16.mxu1 %v12325_v17  ;;  %v14633_v16 = vpack.c.bf16 %v298_v9, %v290_v8  ;;  %v667_v17 = vld [vmem:[#allocation5 + $0x8c8] sm:$0xff]  ;;  %v12450_v29 = vcombine.low %v658_v13, %v666_v14  ;;  %v698_v34 = vld [vmem:[#allocation5 + $0x9c0] sm:$0xff] }
  0xb8   : > { %v683_v28 = vld [vmem:[#allocation5 + $0x948] sm:$0xff]  ;;  %v714_v42 = vld [vmem:[#allocation5 + $0xa40] sm:$0xff] }
  0xb9   : > { %v691_v35 = vld [vmem:[#allocation5 + $0x988] sm:$0xff]  ;;  %v730_v50 = vld [vmem:[#allocation5 + $0xac0] sm:$0xff] }
  0xba   : > { %6549 = vmatpush1.bf16.msra.mxu0 %v12322_v22  ;;  %6721 = vmatpush1.bf16.msra.mxu1 %v12324_v23  ;;  %v12451_v22 = vcombine.high %v658_v13, %v666_v14  ;;  %v12453_v23 = vcombine.high %v659_v15, %v667_v17  ;;  %v699_v36 = vld [vmem:[#allocation5 + $0x9c8] sm:$0xff]  ;;  %v746_v58 = vld [vmem:[#allocation5 + $0xb40] sm:$0xff] }
  0xbb   : > { %6550 = vmatprep.subr.bf16.mxu0 %v12339_v24  ;;  %6722 = vmatprep.subr.bf16.mxu1 %v12341_v25  ;;  %v674_v24 = vld [vmem:[#allocation5 + $0x900] sm:$0xff]  ;;  %v707_v43 = vld [vmem:[#allocation5 + $0xa08] sm:$0xff] }
  0xbc   : > { %v682_v25 = vld [vmem:[#allocation5 + $0x940] sm:$0xff]  ;;  %v715_v44 = vld [vmem:[#allocation5 + $0xa48] sm:$0xff] }
  0xbd   : > { %v12466_v37 = vcombine.low %v674_v24, %v682_v25  ;;  %v723_v51 = vld [vmem:[#allocation5 + $0xa88] sm:$0xff]  ;;  %v762_v3 = vld [vmem:[#allocation5 + $0xbc0] sm:$0xff] }
  0xbe   : > { %6551 = vmatpush1.bf16.msra.mxu0 %v12338_v30  ;;  %6723 = vmatpush1.bf16.msra.mxu1 %v12340_v31  ;;  %v12452_v30 = vcombine.low %v659_v15, %v667_v17  ;;  %v12467_v31 = vcombine.high %v674_v24, %v682_v25  ;;  %v731_v52 = vld [vmem:[#allocation5 + $0xac8] sm:$0xff]  ;;  %v786_v19 = vld [vmem:[#allocation5 + $0xc80] sm:$0xff] }
  0xbf   : > { %6552 = vmatprep.subr.bf16.mxu0 %v12355_v32  ;;  %6724 = vmatprep.subr.bf16.mxu1 %v12357_v33  ;;  %v12469_v32 = vcombine.high %v675_v27, %v683_v28  ;;  %v690_v33 = vld [vmem:[#allocation5 + $0x980] sm:$0xff]  ;;  %v739_v60 = vld [vmem:[#allocation5 + $0xb08] sm:$0xff] }
  0xc0   : > { %v12482_v45 = vcombine.low %v690_v33, %v698_v34  ;;  %v747_v61 = vld [vmem:[#allocation5 + $0xb48] sm:$0xff] }
  0xc1   : > { %v755_v4 = vld [vmem:[#allocation5 + $0xb88] sm:$0xff] }
  0xc2   : > { %6553 = vmatpush1.bf16.msra.mxu0 %v12354_v38  ;;  %6725 = vmatpush1.bf16.msra.mxu1 %v12356_v39  ;;  %v12468_v38 = vcombine.low %v675_v27, %v683_v28  ;;  %v12483_v39 = vcombine.high %v690_v33, %v698_v34  ;;  %v763_v5 = vld [vmem:[#allocation5 + $0xbc8] sm:$0xff]  ;;  %v802_v28 = vld [vmem:[#allocation5 + $0xd00] sm:$0xff] }
  0xc3   : > { %6554 = vmatprep.subr.bf16.mxu0 %v12371_v40  ;;  %6726 = vmatprep.subr.bf16.mxu1 %v12373_v41  ;;  %v12485_v40 = vcombine.high %v691_v35, %v699_v36  ;;  %v706_v41 = vld [vmem:[#allocation5 + $0xa00] sm:$0xff]  ;;  %v12549_v9 = vcombine.high %v755_v4, %v763_v5  ;;  %v779_v13 = vld [vmem:[#allocation5 + $0xc48] sm:$0xff]  ;;  %v12548_v15 = vcombine.low %v755_v4, %v763_v5 }
  0xc4   : > { %v12498_v53 = vcombine.low %v706_v41, %v714_v42  ;;  %v882_v5 = vld [vmem:[#allocation5 + $0xf80] sm:$0xff] }
  0xc6   : > { %6555 = vmatpush1.bf16.msra.mxu0 %v12370_v46  ;;  %6727 = vmatpush1.bf16.msra.mxu1 %v12372_v47  ;;  %v12484_v46 = vcombine.low %v691_v35, %v699_v36  ;;  %v12499_v47 = vcombine.high %v706_v41, %v714_v42  ;;  %v818_v36 = vld [vmem:[#allocation5 + $0xd80] sm:$0xff] }
  0xc7   : > { %6556 = vmatprep.subr.bf16.mxu0 %v12387_v48  ;;  %6728 = vmatprep.subr.bf16.mxu1 %v12389_v49  ;;  %v12501_v48 = vcombine.high %v707_v43, %v715_v44  ;;  %v722_v49 = vld [vmem:[#allocation5 + $0xa80] sm:$0xff] }
  0xc8   : > { %v12514_v62 = vcombine.low %v722_v49, %v730_v50 }
  0xca   : > { %6557 = vmatpush1.bf16.msra.mxu0 %v12386_v54  ;;  %6729 = vmatpush1.bf16.msra.mxu1 %v12388_v55  ;;  %v12500_v54 = vcombine.low %v707_v43, %v715_v44  ;;  %v12515_v55 = vcombine.high %v722_v49, %v730_v50  ;;  %v834_v44 = vld [vmem:[#allocation5 + $0xe00] sm:$0xff] }
  0xcb   : > { %6558 = vmatprep.subr.bf16.mxu0 %v12403_v56  ;;  %6730 = vmatprep.subr.bf16.mxu1 %v12405_v57  ;;  %v12517_v56 = vcombine.high %v723_v51, %v731_v52  ;;  %v738_v57 = vld [vmem:[#allocation5 + $0xb00] sm:$0xff] }
  0xcc   : > { %v12530_v6 = vcombine.low %v738_v57, %v746_v58 }
  0xce   : > { %6559 = vmatpush1.bf16.msra.mxu0 %v12402_v63  ;;  %6731 = vmatpush1.bf16.msra.mxu1 %v12404_v0  ;;  %v12516_v63 = vcombine.low %v723_v51, %v731_v52  ;;  %v12531_v0 = vcombine.high %v738_v57, %v746_v58  ;;  %v850_v52 = vld [vmem:[#allocation5 + $0xe80] sm:$0xff] }
  0xcf   : > { %6560 = vmatprep.subr.bf16.mxu0 %v12419_v1  ;;  %6732 = vmatprep.subr.bf16.mxu1 %v12421_v2  ;;  %v12533_v1 = vcombine.high %v739_v60, %v747_v61  ;;  %v754_v2 = vld [vmem:[#allocation5 + $0xb80] sm:$0xff] }
  0xd0   : > { %v12547_v8 = vcombine.high %v754_v2, %v762_v3  ;;  %v12546_v14 = vcombine.low %v754_v2, %v762_v3 }
  0xd2   : > { %6561 = vmatpush1.bf16.msra.mxu0 %v12418_v7  ;;  %6733 = vmatpush1.bf16.msra.mxu1 %v12420_v10  ;;  %v12532_v7 = vcombine.low %v739_v60, %v747_v61  ;;  %v770_v10 = vld [vmem:[#allocation5 + $0xc00] sm:$0xff] }
  0xd3   : > { %6573 = vmatprep.subr.bf16.mxu0 %v12435_v11  ;;  %6745 = vmatprep.subr.bf16.mxu1 %v12437_v12  ;;  %v778_v11 = vld [vmem:[#allocation5 + $0xc40] sm:$0xff]  ;;  %v771_v12 = vld [vmem:[#allocation5 + $0xc08] sm:$0xff] }
  0xd4   : > { %v12563_v17 = vcombine.high %v770_v10, %v778_v11  ;;  %v12565_v18 = vcombine.high %v771_v12, %v779_v13  ;;  %v12564_v24 = vcombine.low %v771_v12, %v779_v13  ;;  %v866_v61 = vld [vmem:[#allocation5 + $0xf00] sm:$0xff] }
  0xd5   : > { %6563 = vmatmul.mubr.bf16.vlgmr.msra.gmra.mrb[0].mxu0 %v14633_v16  ;;  %6735 = vmatmul.mubr.bf16.vlgmr.msra.gmra.mrb[0].mxu1 %v14633_v16  ;;  %v898_v13 = vld [vmem:[#allocation5 + $0x1000] sm:$0xff] }
  0xd6   : > { %6574 = vmatpush1.bf16.msra.mxu0 %v12434_v20  ;;  %6746 = vmatpush1.bf16.msra.mxu1 %v12436_v21  ;;  %v794_v20 = vld [vmem:[#allocation5 + $0xcc0] sm:$0xff]  ;;  %v787_v21 = vld [vmem:[#allocation5 + $0xc88] sm:$0xff] }
  0xd7   : > { %6575 = vmatprep.subr.bf16.mxu0 %v12451_v22  ;;  %6747 = vmatprep.subr.bf16.mxu1 %v12453_v23  ;;  %v795_v22 = vld [vmem:[#allocation5 + $0xcc8] sm:$0xff]  ;;  %v12562_v23 = vcombine.low %v770_v10, %v778_v11  ;;  %v12579_v25 = vcombine.high %v786_v19, %v794_v20 }
  0xd8   : > { %6605 = vmatprep.mubr.bf16.mxu0 %v14635_v26  ;;  %6777 = vmatprep.mubr.bf16.mxu1 %v14635_v26  ;;  %v12581_v27 = vcombine.high %v787_v21, %v795_v22  ;;  %v12580_v33 = vcombine.low %v787_v21, %v795_v22 }
  0xda   : > { %6576 = vmatpush1.bf16.msra.mxu0 %v12450_v29  ;;  %6748 = vmatpush1.bf16.msra.mxu1 %v12452_v30  ;;  %v810_v29 = vld [vmem:[#allocation5 + $0xd40] sm:$0xff]  ;;  %v803_v30 = vld [vmem:[#allocation5 + $0xd08] sm:$0xff] }
  0xdb   : > { %6577 = vmatprep.subr.bf16.mxu0 %v12467_v31  ;;  %6749 = vmatprep.subr.bf16.mxu1 %v12469_v32  ;;  %v811_v31 = vld [vmem:[#allocation5 + $0xd48] sm:$0xff]  ;;  %v12578_v32 = vcombine.low %v786_v19, %v794_v20  ;;  %v12595_v34 = vcombine.high %v802_v28, %v810_v29  ;;  %v292_v19 = vld [vmem:[#allocation10 + $0x10] sm:$0xff] }
  0xdc   : > { %v12597_v35 = vcombine.high %v803_v30, %v811_v31  ;;  %v12596_v41 = vcombine.low %v803_v30, %v811_v31  ;;  %v300_v20 = vld [vmem:[#allocation10 + $0x50] sm:$0xff]  ;;  %v295_v30 = vld [vmem:[#allocation10 + $0x28] sm:$0xff] }
  0xdd   : > { %v303_v31 = vld [vmem:[#allocation10 + $0x68] sm:$0xff] }
  0xde   : > { %6578 = vmatpush1.bf16.msra.mxu0 %v12466_v37  ;;  %6750 = vmatpush1.bf16.msra.mxu1 %v12468_v38  ;;  %v826_v37 = vld [vmem:[#allocation5 + $0xdc0] sm:$0xff]  ;;  %v819_v38 = vld [vmem:[#allocation5 + $0xd88] sm:$0xff] }
  0xdf   : > { %6579 = vmatprep.subr.bf16.mxu0 %v12483_v39  ;;  %6751 = vmatprep.subr.bf16.mxu1 %v12485_v40  ;;  %v827_v39 = vld [vmem:[#allocation5 + $0xdc8] sm:$0xff]  ;;  %v12594_v40 = vcombine.low %v802_v28, %v810_v29  ;;  %v12611_v42 = vcombine.high %v818_v36, %v826_v37  ;;  %v14641_v28 = vpack.c.bf16 %v300_v20, %v292_v19 }
  0xe0   : > { %v12613_v43 = vcombine.high %v819_v38, %v827_v39  ;;  %v12612_v49 = vcombine.low %v819_v38, %v827_v39  ;;  %v923_v29 = vld [vmem:[#allocation5 + $0x10c8] sm:$0xff]  ;;  %v14643_v38 = vpack.c.bf16 %v303_v31, %v295_v30 }
  0xe1   : > { %v931_v39 = vld [vmem:[#allocation5 + $0x1108] sm:$0xff] }
  0xe2   : > { %6580 = vmatpush1.bf16.msra.mxu0 %v12482_v45  ;;  %6752 = vmatpush1.bf16.msra.mxu1 %v12484_v46  ;;  %v842_v45 = vld [vmem:[#allocation5 + $0xe40] sm:$0xff]  ;;  %v835_v46 = vld [vmem:[#allocation5 + $0xe08] sm:$0xff] }
  0xe3   : > { %6581 = vmatprep.subr.bf16.mxu0 %v12499_v47  ;;  %6753 = vmatprep.subr.bf16.mxu1 %v12501_v48  ;;  %v843_v47 = vld [vmem:[#allocation5 + $0xe48] sm:$0xff]  ;;  %v12610_v48 = vcombine.low %v818_v36, %v826_v37  ;;  %v12627_v50 = vcombine.high %v834_v44, %v842_v45  ;;  %v930_v36 = vld [vmem:[#allocation5 + $0x1100] sm:$0xff] }
  0xe4   : > { %v12629_v51 = vcombine.high %v835_v46, %v843_v47  ;;  %v12628_v57 = vcombine.low %v835_v46, %v843_v47  ;;  %v938_v37 = vld [vmem:[#allocation5 + $0x1140] sm:$0xff]  ;;  %v947_v47 = vld [vmem:[#allocation5 + $0x1188] sm:$0xff] }
  0xe5   : > { %v954_v46 = vld [vmem:[#allocation5 + $0x11c0] sm:$0xff] }
  0xe6   : > { %6582 = vmatpush1.bf16.msra.mxu0 %v12498_v53  ;;  %6754 = vmatpush1.bf16.msra.mxu1 %v12500_v54  ;;  %v858_v53 = vld [vmem:[#allocation5 + $0xec0] sm:$0xff]  ;;  %v851_v54 = vld [vmem:[#allocation5 + $0xe88] sm:$0xff] }
  0xe7   : > { %6583 = vmatprep.subr.bf16.mxu0 %v12515_v55  ;;  %6755 = vmatprep.subr.bf16.mxu1 %v12517_v56  ;;  %v859_v55 = vld [vmem:[#allocation5 + $0xec8] sm:$0xff]  ;;  %v12626_v56 = vcombine.low %v834_v44, %v842_v45  ;;  %v12643_v58 = vcombine.high %v850_v52, %v858_v53  ;;  %v946_v45 = vld [vmem:[#allocation5 + $0x1180] sm:$0xff] }
  0xe8   : > { %v12645_v60 = vcombine.high %v851_v54, %v859_v55  ;;  %v12644_v2 = vcombine.low %v851_v54, %v859_v55  ;;  %v970_v54 = vld [vmem:[#allocation5 + $0x1240] sm:$0xff]  ;;  %v963_v55 = vld [vmem:[#allocation5 + $0x1208] sm:$0xff] }
  0xea   : > { %6584 = vmatpush1.bf16.msra.mxu0 %v12514_v62  ;;  %6756 = vmatpush1.bf16.msra.mxu1 %v12516_v63  ;;  %v874_v62 = vld [vmem:[#allocation5 + $0xf40] sm:$0xff]  ;;  %v867_v63 = vld [vmem:[#allocation5 + $0xf08] sm:$0xff] }
  0xeb   : > { %6585 = vmatprep.subr.bf16.mxu0 %v12531_v0  ;;  %6757 = vmatprep.subr.bf16.mxu1 %v12533_v1  ;;  %v875_v0 = vld [vmem:[#allocation5 + $0xf48] sm:$0xff]  ;;  %v12642_v1 = vcombine.low %v850_v52, %v858_v53  ;;  %v12659_v3 = vcombine.high %v866_v61, %v874_v62  ;;  %v962_v53 = vld [vmem:[#allocation5 + $0x1200] sm:$0xff] }
  0xec   : > { %v12661_v4 = vcombine.high %v867_v63, %v875_v0  ;;  %v12660_v10 = vcombine.low %v867_v63, %v875_v0  ;;  %v986_v63 = vld [vmem:[#allocation5 + $0x12c0] sm:$0xff]  ;;  %v979_v0 = vld [vmem:[#allocation5 + $0x1288] sm:$0xff] }
  0xee   : > { %6586 = vmatpush1.bf16.msra.mxu0 %v12530_v6  ;;  %6758 = vmatpush1.bf16.msra.mxu1 %v12532_v7  ;;  %v890_v6 = vld [vmem:[#allocation5 + $0xfc0] sm:$0xff]  ;;  %v883_v7 = vld [vmem:[#allocation5 + $0xf88] sm:$0xff] }
  0xef   : > { %6587 = vmatprep.subr.bf16.mxu0 %v12547_v8  ;;  %6759 = vmatprep.subr.bf16.mxu1 %v12549_v9  ;;  %v891_v8 = vld [vmem:[#allocation5 + $0xfc8] sm:$0xff]  ;;  %v12658_v9 = vcombine.low %v866_v61, %v874_v62  ;;  %v12675_v11 = vcombine.high %v882_v5, %v890_v6  ;;  %v978_v62 = vld [vmem:[#allocation5 + $0x1280] sm:$0xff] }
  0xf0   : > { %v12677_v12 = vcombine.high %v883_v7, %v891_v8  ;;  %v12676_v21 = vcombine.low %v883_v7, %v891_v8  ;;  %v1002_v7 = vld [vmem:[#allocation5 + $0x1340] sm:$0xff]  ;;  %v995_v8 = vld [vmem:[#allocation5 + $0x1308] sm:$0xff] }
  0xf2   : > { %6588 = vmatpush1.bf16.msra.mxu0 %v12546_v14  ;;  %6760 = vmatpush1.bf16.msra.mxu1 %v12548_v15  ;;  %v906_v14 = vld [vmem:[#allocation5 + $0x1040] sm:$0xff]  ;;  %v899_v15 = vld [vmem:[#allocation5 + $0x1008] sm:$0xff] }
  0xf3   : > { %6589 = vmatprep.subr.bf16.mxu0 %v12563_v17  ;;  %6761 = vmatprep.subr.bf16.mxu1 %v12565_v18  ;;  %v907_v17 = vld [vmem:[#allocation5 + $0x1048] sm:$0xff]  ;;  %v12674_v18 = vcombine.low %v882_v5, %v890_v6  ;;  %v12691_v22 = vcombine.high %v898_v13, %v906_v14  ;;  %v994_v6 = vld [vmem:[#allocation5 + $0x1300] sm:$0xff] }
  0xf4   : > { %v12786_v19 = vcombine.low %v994_v6, %v1002_v7 }
  0xf6   : > { %6590 = vmatpush1.bf16.msra.mxu0 %v12562_v23  ;;  %6762 = vmatpush1.bf16.msra.mxu1 %v12564_v24  ;;  %v12693_v23 = vcombine.high %v899_v15, %v907_v17  ;;  %v914_v24 = vld [vmem:[#allocation5 + $0x1080] sm:$0xff] }
  0xf7   : > { %6591 = vmatprep.subr.bf16.mxu0 %v12579_v25  ;;  %6763 = vmatprep.subr.bf16.mxu1 %v12581_v27  ;;  %v922_v25 = vld [vmem:[#allocation5 + $0x10c0] sm:$0xff]  ;;  %v915_v27 = vld [vmem:[#allocation5 + $0x1088] sm:$0xff] }
  0xfa   : > { %6592 = vmatpush1.bf16.msra.mxu0 %v12578_v32  ;;  %6764 = vmatpush1.bf16.msra.mxu1 %v12580_v33  ;;  %v12690_v32 = vcombine.low %v898_v13, %v906_v14  ;;  %v12692_v33 = vcombine.low %v899_v15, %v907_v17  ;;  %v1010_v14 = vld [vmem:[#allocation5 + $0x1380] sm:$0xff]  ;;  %v1011_v17 = vld [vmem:[#allocation5 + $0x1388] sm:$0xff] }
  0xfb   : > { %6593 = vmatprep.subr.bf16.mxu0 %v12595_v34  ;;  %6765 = vmatprep.subr.bf16.mxu1 %v12597_v35  ;;  %v12707_v34 = vcombine.high %v914_v24, %v922_v25  ;;  %v12709_v35 = vcombine.high %v915_v27, %v923_v29  ;;  %v1018_v15 = vld [vmem:[#allocation5 + $0x13c0] sm:$0xff] }
  0xfe   : > { %6594 = vmatpush1.bf16.msra.mxu0 %v12594_v40  ;;  %6766 = vmatpush1.bf16.msra.mxu1 %v12596_v41  ;;  %v939_v40 = vld [vmem:[#allocation5 + $0x1148] sm:$0xff]  ;;  %v12706_v41 = vcombine.low %v914_v24, %v922_v25  ;;  %v1034_v24 = vld [vmem:[#allocation5 + $0x1440] sm:$0xff] }
  0xff   : > { %6595 = vmatprep.subr.bf16.mxu0 %v12611_v42  ;;  %6767 = vmatprep.subr.bf16.mxu1 %v12613_v43  ;;  %v12708_v42 = vcombine.low %v915_v27, %v923_v29  ;;  %v12723_v43 = vcombine.high %v930_v36, %v938_v37  ;;  %v12725_v44 = vcombine.high %v931_v39, %v939_v40  ;;  %v1027_v25 = vld [vmem:[#allocation5 + $0x1408] sm:$0xff] }
 0x100   : > { %v1035_v27 = vld [vmem:[#allocation5 + $0x1448] sm:$0xff]  ;;  %v12802_v29 = vcombine.low %v1010_v14, %v1018_v15 }
 0x102   : > { %6596 = vmatpush1.bf16.msra.mxu0 %v12610_v48  ;;  %6768 = vmatpush1.bf16.msra.mxu1 %v12612_v49  ;;  %v955_v48 = vld [vmem:[#allocation5 + $0x11c8] sm:$0xff]  ;;  %v12722_v49 = vcombine.low %v930_v36, %v938_v37 }
 0x103   : > { %6597 = vmatprep.subr.bf16.mxu0 %v12627_v50  ;;  %6769 = vmatprep.subr.bf16.mxu1 %v12629_v51  ;;  %v12724_v50 = vcombine.low %v931_v39, %v939_v40  ;;  %v12739_v51 = vcombine.high %v946_v45, %v954_v46  ;;  %v12741_v52 = vcombine.high %v947_v47, %v955_v48  ;;  %v1051_v36 = vld [vmem:[#allocation5 + $0x14c8] sm:$0xff] }
 0x104   : > { %v12820_v39 = vcombine.low %v1027_v25, %v1035_v27 }
 0x106   : > { %6598 = vmatpush1.bf16.msra.mxu0 %v12626_v56  ;;  %6770 = vmatpush1.bf16.msra.mxu1 %v12628_v57  ;;  %v971_v56 = vld [vmem:[#allocation5 + $0x1248] sm:$0xff]  ;;  %v12738_v57 = vcombine.low %v946_v45, %v954_v46 }
 0x107   : > { %6599 = vmatprep.subr.bf16.mxu0 %v12643_v58  ;;  %6771 = vmatprep.subr.bf16.mxu1 %v12645_v60  ;;  %v12740_v58 = vcombine.low %v947_v47, %v955_v48  ;;  %v12755_v60 = vcombine.high %v962_v53, %v970_v54  ;;  %v12757_v61 = vcombine.high %v963_v55, %v971_v56  ;;  %v1067_v45 = vld [vmem:[#allocation5 + $0x1548] sm:$0xff] }
 0x10a   : > { %6600 = vmatpush1.bf16.msra.mxu0 %v12642_v1  ;;  %6772 = vmatpush1.bf16.msra.mxu1 %v12644_v2  ;;  %v987_v1 = vld [vmem:[#allocation5 + $0x12c8] sm:$0xff]  ;;  %v12754_v2 = vcombine.low %v962_v53, %v970_v54 }
 0x10b   : > { %6601 = vmatprep.subr.bf16.mxu0 %v12659_v3  ;;  %6773 = vmatprep.subr.bf16.mxu1 %v12661_v4  ;;  %v12756_v3 = vcombine.low %v963_v55, %v971_v56  ;;  %v12771_v4 = vcombine.high %v978_v62, %v986_v63  ;;  %v12773_v5 = vcombine.high %v979_v0, %v987_v1  ;;  %v1083_v53 = vld [vmem:[#allocation5 + $0x15c8] sm:$0xff] }
 0x10e   : > { %6602 = vmatpush1.bf16.msra.mxu0 %v12658_v9  ;;  %6774 = vmatpush1.bf16.msra.mxu1 %v12660_v10  ;;  %v1003_v9 = vld [vmem:[#allocation5 + $0x1348] sm:$0xff]  ;;  %v12770_v10 = vcombine.low %v978_v62, %v986_v63 }
 0x10f   : > { %6603 = vmatprep.subr.bf16.mxu0 %v12675_v11  ;;  %6775 = vmatprep.subr.bf16.mxu1 %v12677_v12  ;;  %v12772_v11 = vcombine.low %v979_v0, %v987_v1  ;;  %v12787_v12 = vcombine.high %v994_v6, %v1002_v7  ;;  %v12789_v13 = vcombine.high %v995_v8, %v1003_v9  ;;  %v1099_v62 = vld [vmem:[#allocation5 + $0x1648] sm:$0xff] }
 0x110   : > { %v12788_v20 = vcombine.low %v995_v8, %v1003_v9  ;;  %v1115_v6 = vld [vmem:[#allocation5 + $0x16c8] sm:$0xff] }
 0x112   : > { %6604 = vmatpush1.bf16.msra.mxu0 %v12674_v18  ;;  %6776 = vmatpush1.bf16.msra.mxu1 %v12676_v21  ;;  %v1019_v18 = vld [vmem:[#allocation5 + $0x13c8] sm:$0xff]  ;;  %v12803_v21 = vcombine.high %v1010_v14, %v1018_v15 }
 0x113   : > { %6616 = vmatprep.subr.bf16.mxu0 %v12691_v22  ;;  %6788 = vmatprep.subr.bf16.mxu1 %v12693_v23  ;;  %v12805_v22 = vcombine.high %v1011_v17, %v1019_v18  ;;  %v1026_v23 = vld [vmem:[#allocation5 + $0x1400] sm:$0xff]  ;;  %v12804_v30 = vcombine.low %v1011_v17, %v1019_v18  ;;  %v1131_v14 = vld [vmem:[#allocation5 + $0x1748] sm:$0xff] }
 0x114   : > { %v12819_v31 = vcombine.high %v1026_v23, %v1034_v24  ;;  %v12818_v37 = vcombine.low %v1026_v23, %v1034_v24  ;;  %v1147_v23 = vld [vmem:[#allocation5 + $0x17c8] sm:$0xff] }
 0x115   : > { %6606 = vmatmul.mubr.bf16.vlgmr.msra.gmra.mrb[0].mxu0 %v14641_v28  ;;  %6778 = vmatmul.mubr.bf16.vlgmr.msra.gmra.mrb[0].mxu1 %v14641_v28 }
 0x116   : > { %6617 = vmatpush1.bf16.msra.mxu0 %v12690_v32  ;;  %6789 = vmatpush1.bf16.msra.mxu1 %v12692_v33  ;;  %v12821_v32 = vcombine.high %v1027_v25, %v1035_v27  ;;  %v1042_v33 = vld [vmem:[#allocation5 + $0x1480] sm:$0xff] }
 0x117   : > { %6618 = vmatprep.subr.bf16.mxu0 %v12707_v34  ;;  %6790 = vmatprep.subr.bf16.mxu1 %v12709_v35  ;;  %v1050_v34 = vld [vmem:[#allocation5 + $0x14c0] sm:$0xff]  ;;  %v1043_v35 = vld [vmem:[#allocation5 + $0x1488] sm:$0xff] }
 0x118   : > { %6648 = vmatprep.mubr.bf16.mxu0 %v14643_v38  ;;  %6820 = vmatprep.mubr.bf16.mxu1 %v14643_v38  ;;  %v12835_v40 = vcombine.high %v1042_v33, %v1050_v34  ;;  %v12834_v46 = vcombine.low %v1042_v33, %v1050_v34  ;;  %v12836_v47 = vcombine.low %v1043_v35, %v1051_v36  ;;  %v1163_v33 = vld [vmem:[#allocation5 + $0x1848] sm:$0xff] }
 0x11a   : > { %6619 = vmatpush1.bf16.msra.mxu0 %v12706_v41  ;;  %6791 = vmatpush1.bf16.msra.mxu1 %v12708_v42  ;;  %v12837_v41 = vcombine.high %v1043_v35, %v1051_v36  ;;  %v1058_v42 = vld [vmem:[#allocation5 + $0x1500] sm:$0xff]  ;;  %v294_v35 = vld [vmem:[#allocation10 + $0x20] sm:$0xff] }
 0x11b   : > { %6620 = vmatprep.subr.bf16.mxu0 %v12723_v43  ;;  %6792 = vmatprep.subr.bf16.mxu1 %v12725_v44  ;;  %v1066_v43 = vld [vmem:[#allocation5 + $0x1540] sm:$0xff]  ;;  %v1059_v44 = vld [vmem:[#allocation5 + $0x1508] sm:$0xff] }
 0x11c   : > { %v12851_v48 = vcombine.high %v1058_v42, %v1066_v43  ;;  %v12850_v54 = vcombine.low %v1058_v42, %v1066_v43  ;;  %v12852_v55 = vcombine.low %v1059_v44, %v1067_v45  ;;  %v302_v36 = vld [vmem:[#allocation10 + $0x60] sm:$0xff]  ;;  %v1178_v42 = vld [vmem:[#allocation5 + $0x18c0] sm:$0xff] }
 0x11d   : > { %v1171_v43 = vld [vmem:[#allocation5 + $0x1888] sm:$0xff] }
 0x11e   : > { %6621 = vmatpush1.bf16.msra.mxu0 %v12722_v49  ;;  %6793 = vmatpush1.bf16.msra.mxu1 %v12724_v50  ;;  %v12853_v49 = vcombine.high %v1059_v44, %v1067_v45  ;;  %v1074_v50 = vld [vmem:[#allocation5 + $0x1580] sm:$0xff]  ;;  %v14649_v44 = vpack.c.bf16 %v302_v36, %v294_v35  ;;  %v1179_v45 = vld [vmem:[#allocation5 + $0x18c8] sm:$0xff] }
 0x11f   : > { %6622 = vmatprep.subr.bf16.mxu0 %v12739_v51  ;;  %6794 = vmatprep.subr.bf16.mxu1 %v12741_v52  ;;  %v1082_v51 = vld [vmem:[#allocation5 + $0x15c0] sm:$0xff]  ;;  %v1075_v52 = vld [vmem:[#allocation5 + $0x1588] sm:$0xff] }
 0x120   : > { %v12867_v56 = vcombine.high %v1074_v50, %v1082_v51  ;;  %v12866_v63 = vcombine.low %v1074_v50, %v1082_v51  ;;  %v12868_v0 = vcombine.low %v1075_v52, %v1083_v53  ;;  %v12965_v51 = vcombine.high %v1171_v43, %v1179_v45  ;;  %v1267_v35 = vld [vmem:[#allocation5 + $0x1b88] sm:$0xff] }
 0x121   : > { %v1275_v36 = vld [vmem:[#allocation5 + $0x1bc8] sm:$0xff] }
 0x122   : > { %6623 = vmatpush1.bf16.msra.mxu0 %v12738_v57  ;;  %6795 = vmatpush1.bf16.msra.mxu1 %v12740_v58  ;;  %v12869_v57 = vcombine.high %v1075_v52, %v1083_v53  ;;  %v1090_v58 = vld [vmem:[#allocation5 + $0x1600] sm:$0xff] }
 0x123   : > { %6624 = vmatprep.subr.bf16.mxu0 %v12755_v60  ;;  %6796 = vmatprep.subr.bf16.mxu1 %v12757_v61  ;;  %v1098_v60 = vld [vmem:[#allocation5 + $0x1640] sm:$0xff]  ;;  %v1091_v61 = vld [vmem:[#allocation5 + $0x1608] sm:$0xff] }
 0x124   : > { %v12883_v1 = vcombine.high %v1090_v58, %v1098_v60  ;;  %v12882_v7 = vcombine.low %v1090_v58, %v1098_v60  ;;  %v12884_v8 = vcombine.low %v1091_v61, %v1099_v62  ;;  %v1186_v52 = vld [vmem:[#allocation5 + $0x1900] sm:$0xff]  ;;  %v12964_v58 = vcombine.low %v1171_v43, %v1179_v45  ;;  %v1283_v45 = vld [vmem:[#allocation5 + $0x1c08] sm:$0xff] }
 0x125   : > { %v1194_v53 = vld [vmem:[#allocation5 + $0x1940] sm:$0xff] }
 0x126   : > { %6625 = vmatpush1.bf16.msra.mxu0 %v12754_v2  ;;  %6797 = vmatpush1.bf16.msra.mxu1 %v12756_v3  ;;  %v12885_v2 = vcombine.high %v1091_v61, %v1099_v62  ;;  %v1106_v3 = vld [vmem:[#allocation5 + $0x1680] sm:$0xff]  ;;  %v12979_v60 = vcombine.high %v1186_v52, %v1194_v53 }
 0x127   : > { %6626 = vmatprep.subr.bf16.mxu0 %v12771_v4  ;;  %6798 = vmatprep.subr.bf16.mxu1 %v12773_v5  ;;  %v1114_v4 = vld [vmem:[#allocation5 + $0x16c0] sm:$0xff]  ;;  %v1107_v5 = vld [vmem:[#allocation5 + $0x1688] sm:$0xff] }
 0x128   : > { %v12899_v9 = vcombine.high %v1106_v3, %v1114_v4  ;;  %v12898_v15 = vcombine.low %v1106_v3, %v1114_v4  ;;  %v12900_v17 = vcombine.low %v1107_v5, %v1115_v6  ;;  %v1202_v62 = vld [vmem:[#allocation5 + $0x1980] sm:$0xff] }
 0x129   : > { %v1290_v43 = vld [vmem:[#allocation5 + $0x1c40] sm:$0xff] }
 0x12a   : > { %6627 = vmatpush1.bf16.msra.mxu0 %v12770_v10  ;;  %6799 = vmatpush1.bf16.msra.mxu1 %v12772_v11  ;;  %v12901_v10 = vcombine.high %v1107_v5, %v1115_v6  ;;  %v1122_v11 = vld [vmem:[#allocation5 + $0x1700] sm:$0xff] }
 0x12b   : > { %6628 = vmatprep.subr.bf16.mxu0 %v12787_v12  ;;  %6800 = vmatprep.subr.bf16.mxu1 %v12789_v13  ;;  %v1130_v12 = vld [vmem:[#allocation5 + $0x1740] sm:$0xff]  ;;  %v1123_v13 = vld [vmem:[#allocation5 + $0x1708] sm:$0xff] }
 0x12c   : > { %v12915_v18 = vcombine.high %v1122_v11, %v1130_v12  ;;  %v12914_v24 = vcombine.low %v1122_v11, %v1130_v12  ;;  %v12916_v25 = vcombine.low %v1123_v13, %v1131_v14  ;;  %v1218_v6 = vld [vmem:[#allocation5 + $0x1a00] sm:$0xff] }
 0x12e   : > { %6629 = vmatpush1.bf16.msra.mxu0 %v12786_v19  ;;  %6801 = vmatpush1.bf16.msra.mxu1 %v12788_v20  ;;  %v12917_v19 = vcombine.high %v1123_v13, %v1131_v14  ;;  %v1138_v20 = vld [vmem:[#allocation5 + $0x1780] sm:$0xff] }
 0x12f   : > { %6630 = vmatprep.subr.bf16.mxu0 %v12803_v21  ;;  %6802 = vmatprep.subr.bf16.mxu1 %v12805_v22  ;;  %v1146_v21 = vld [vmem:[#allocation5 + $0x17c0] sm:$0xff]  ;;  %v1139_v22 = vld [vmem:[#allocation5 + $0x1788] sm:$0xff] }
 0x130   : > { %v12931_v27 = vcombine.high %v1138_v20, %v1146_v21  ;;  %v12930_v34 = vcombine.low %v1138_v20, %v1146_v21  ;;  %v1234_v14 = vld [vmem:[#allocation5 + $0x1a80] sm:$0xff] }
 0x132   : > { %6631 = vmatpush1.bf16.msra.mxu0 %v12802_v29  ;;  %6803 = vmatpush1.bf16.msra.mxu1 %v12804_v30  ;;  %v12933_v29 = vcombine.high %v1139_v22, %v1147_v23  ;;  %v1154_v30 = vld [vmem:[#allocation5 + $0x1800] sm:$0xff] }
 0x133   : > { %6632 = vmatprep.subr.bf16.mxu0 %v12819_v31  ;;  %6804 = vmatprep.subr.bf16.mxu1 %v12821_v32  ;;  %v1162_v31 = vld [vmem:[#allocation5 + $0x1840] sm:$0xff]  ;;  %v1155_v32 = vld [vmem:[#allocation5 + $0x1808] sm:$0xff] }
 0x136   : > { %6633 = vmatpush1.bf16.msra.mxu0 %v12818_v37  ;;  %6805 = vmatpush1.bf16.msra.mxu1 %v12820_v39  ;;  %v12932_v37 = vcombine.low %v1139_v22, %v1147_v23  ;;  %v12947_v39 = vcombine.high %v1154_v30, %v1162_v31  ;;  %v1250_v23 = vld [vmem:[#allocation5 + $0x1b00] sm:$0xff] }
 0x137   : > { %6634 = vmatprep.subr.bf16.mxu0 %v12835_v40  ;;  %6806 = vmatprep.subr.bf16.mxu1 %v12837_v41  ;;  %v12949_v40 = vcombine.high %v1155_v32, %v1163_v33  ;;  %v1170_v41 = vld [vmem:[#allocation5 + $0x1880] sm:$0xff] }
 0x138   : > { %v12963_v50 = vcombine.high %v1170_v41, %v1178_v42 }
 0x13a   : > { %6635 = vmatpush1.bf16.msra.mxu0 %v12834_v46  ;;  %6807 = vmatpush1.bf16.msra.mxu1 %v12836_v47  ;;  %v297_v46 = vld [vmem:[#allocation10 + $0x38] sm:$0xff] }
 0x13b   : > { %6636 = vmatprep.subr.bf16.mxu0 %v12851_v48  ;;  %6808 = vmatprep.subr.bf16.mxu1 %v12853_v49  ;;  %v305_v47 = vld [vmem:[#allocation10 + $0x78] sm:$0xff]  ;;  %v12946_v48 = vcombine.low %v1154_v30, %v1162_v31  ;;  %v12948_v49 = vcombine.low %v1155_v32, %v1163_v33 }
 0x13c   : > { %v1266_v33 = vld [vmem:[#allocation5 + $0x1b80] sm:$0xff] }
 0x13e   : > { %6637 = vmatpush1.bf16.msra.mxu0 %v12850_v54  ;;  %6809 = vmatpush1.bf16.msra.mxu1 %v12852_v55  ;;  %v14651_v54 = vpack.c.bf16 %v305_v47, %v297_v46  ;;  %v1187_v55 = vld [vmem:[#allocation5 + $0x1908] sm:$0xff] }
 0x13f   : > { %6638 = vmatprep.subr.bf16.mxu0 %v12867_v56  ;;  %6810 = vmatprep.subr.bf16.mxu1 %v12869_v57  ;;  %v1195_v56 = vld [vmem:[#allocation5 + $0x1948] sm:$0xff]  ;;  %v12962_v57 = vcombine.low %v1170_v41, %v1178_v42  ;;  %v13061_v41 = vcombine.high %v1267_v35, %v1275_v36  ;;  %v1282_v42 = vld [vmem:[#allocation5 + $0x1c00] sm:$0xff] }
 0x140   : > { %v12981_v61 = vcombine.high %v1187_v55, %v1195_v56  ;;  %v12980_v3 = vcombine.low %v1187_v55, %v1195_v56  ;;  %v1291_v46 = vld [vmem:[#allocation5 + $0x1c48] sm:$0xff]  ;;  %v13074_v56 = vcombine.low %v1282_v42, %v1290_v43 }
 0x141   : > { %v1307_v55 = vld [vmem:[#allocation5 + $0x1cc8] sm:$0xff] }
 0x142   : > { %6639 = vmatpush1.bf16.msra.mxu0 %v12866_v63  ;;  %6811 = vmatpush1.bf16.msra.mxu1 %v12868_v0  ;;  %v1210_v63 = vld [vmem:[#allocation5 + $0x19c0] sm:$0xff]  ;;  %v1203_v0 = vld [vmem:[#allocation5 + $0x1988] sm:$0xff] }
 0x143   : > { %6640 = vmatprep.subr.bf16.mxu0 %v12883_v1  ;;  %6812 = vmatprep.subr.bf16.mxu1 %v12885_v2  ;;  %v1211_v1 = vld [vmem:[#allocation5 + $0x19c8] sm:$0xff]  ;;  %v12978_v2 = vcombine.low %v1186_v52, %v1194_v53  ;;  %v12995_v4 = vcombine.high %v1202_v62, %v1210_v63  ;;  %v1306_v52 = vld [vmem:[#allocation5 + $0x1cc0] sm:$0xff] }
 0x144   : > { %v12997_v5 = vcombine.high %v1203_v0, %v1211_v1  ;;  %v12996_v11 = vcombine.low %v1203_v0, %v1211_v1  ;;  %v1299_v53 = vld [vmem:[#allocation5 + $0x1c88] sm:$0xff] }
 0x145   : > { %v1323_v0 = vld [vmem:[#allocation5 + $0x1d48] sm:$0xff] }
 0x146   : > { %6641 = vmatpush1.bf16.msra.mxu0 %v12882_v7  ;;  %6813 = vmatpush1.bf16.msra.mxu1 %v12884_v8  ;;  %v1226_v7 = vld [vmem:[#allocation5 + $0x1a40] sm:$0xff]  ;;  %v1219_v8 = vld [vmem:[#allocation5 + $0x1a08] sm:$0xff] }
 0x147   : > { %6642 = vmatprep.subr.bf16.mxu0 %v12899_v9  ;;  %6814 = vmatprep.subr.bf16.mxu1 %v12901_v10  ;;  %v1227_v9 = vld [vmem:[#allocation5 + $0x1a48] sm:$0xff]  ;;  %v12994_v10 = vcombine.low %v1202_v62, %v1210_v63  ;;  %v13011_v12 = vcombine.high %v1218_v6, %v1226_v7  ;;  %v1322_v62 = vld [vmem:[#allocation5 + $0x1d40] sm:$0xff] }
 0x148   : > { %v13013_v13 = vcombine.high %v1219_v8, %v1227_v9  ;;  %v13012_v20 = vcombine.low %v1219_v8, %v1227_v9  ;;  %v1315_v63 = vld [vmem:[#allocation5 + $0x1d08] sm:$0xff] }
 0x149   : > { %v1339_v8 = vld [vmem:[#allocation5 + $0x1dc8] sm:$0xff] }
 0x14a   : > { %6643 = vmatpush1.bf16.msra.mxu0 %v12898_v15  ;;  %6815 = vmatpush1.bf16.msra.mxu1 %v12900_v17  ;;  %v1242_v15 = vld [vmem:[#allocation5 + $0x1ac0] sm:$0xff]  ;;  %v1235_v17 = vld [vmem:[#allocation5 + $0x1a88] sm:$0xff] }
 0x14b   : > { %6644 = vmatprep.subr.bf16.mxu0 %v12915_v18  ;;  %6816 = vmatprep.subr.bf16.mxu1 %v12917_v19  ;;  %v1243_v18 = vld [vmem:[#allocation5 + $0x1ac8] sm:$0xff]  ;;  %v13010_v19 = vcombine.low %v1218_v6, %v1226_v7  ;;  %v13027_v21 = vcombine.high %v1234_v14, %v1242_v15  ;;  %v1338_v6 = vld [vmem:[#allocation5 + $0x1dc0] sm:$0xff] }
 0x14c   : > { %v13029_v22 = vcombine.high %v1235_v17, %v1243_v18  ;;  %v13028_v30 = vcombine.low %v1235_v17, %v1243_v18  ;;  %v1331_v7 = vld [vmem:[#allocation5 + $0x1d88] sm:$0xff] }
 0x14d   : > { %v1355_v17 = vld [vmem:[#allocation5 + $0x1e48] sm:$0xff] }
 0x14e   : > { %6645 = vmatpush1.bf16.msra.mxu0 %v12914_v24  ;;  %6817 = vmatpush1.bf16.msra.mxu1 %v12916_v25  ;;  %v1258_v24 = vld [vmem:[#allocation5 + $0x1b40] sm:$0xff]  ;;  %v1251_v25 = vld [vmem:[#allocation5 + $0x1b08] sm:$0xff] }
 0x14f   : > { %6646 = vmatprep.subr.bf16.mxu0 %v12931_v27  ;;  %6818 = vmatprep.subr.bf16.mxu1 %v12933_v29  ;;  %v1259_v27 = vld [vmem:[#allocation5 + $0x1b48] sm:$0xff]  ;;  %v13026_v29 = vcombine.low %v1234_v14, %v1242_v15  ;;  %v13043_v31 = vcombine.high %v1250_v23, %v1258_v24  ;;  %v1354_v14 = vld [vmem:[#allocation5 + $0x1e40] sm:$0xff] }
 0x150   : > { %v13045_v32 = vcombine.high %v1251_v25, %v1259_v27  ;;  %v1347_v15 = vld [vmem:[#allocation5 + $0x1e08] sm:$0xff] }
 0x152   : > { %6647 = vmatpush1.bf16.msra.mxu0 %v12930_v34  ;;  %6819 = vmatpush1.bf16.msra.mxu1 %v12932_v37  ;;  %v1274_v34 = vld [vmem:[#allocation5 + $0x1bc0] sm:$0xff]  ;;  %v13042_v37 = vcombine.low %v1250_v23, %v1258_v24  ;;  %v1363_v24 = vld [vmem:[#allocation5 + $0x1e88] sm:$0xff] }
 0x153   : > { %6659 = vmatprep.subr.bf16.mxu0 %v12947_v39  ;;  %6831 = vmatprep.subr.bf16.mxu1 %v12949_v40  ;;  %v13044_v39 = vcombine.low %v1251_v25, %v1259_v27  ;;  %v13059_v40 = vcombine.high %v1266_v33, %v1274_v34  ;;  %v13058_v47 = vcombine.low %v1266_v33, %v1274_v34  ;;  %v1370_v23 = vld [vmem:[#allocation5 + $0x1ec0] sm:$0xff]  ;;  %v1371_v25 = vld [vmem:[#allocation5 + $0x1ec8] sm:$0xff] }
 0x154   : > { %v1386_v33 = vld [vmem:[#allocation5 + $0x1f40] sm:$0xff]  ;;  %v1379_v34 = vld [vmem:[#allocation5 + $0x1f08] sm:$0xff] }
 0x155   : > { %6649 = vmatmul.mubr.bf16.vlgmr.msra.gmra.mrb[0].mxu0 %v14649_v44  ;;  %6821 = vmatmul.mubr.bf16.vlgmr.msra.gmra.mrb[0].mxu1 %v14649_v44 }
 0x156   : > { %6660 = vmatpush1.bf16.msra.mxu0 %v12946_v48  ;;  %6832 = vmatpush1.bf16.msra.mxu1 %v12948_v49  ;;  %v13060_v48 = vcombine.low %v1267_v35, %v1275_v36  ;;  %v13075_v49 = vcombine.high %v1282_v42, %v1290_v43  ;;  %v1387_v35 = vld [vmem:[#allocation5 + $0x1f48] sm:$0xff]  ;;  %v1402_v42 = vld [vmem:[#allocation5 + $0x1fc0] sm:$0xff] }
 0x157   : > { %6661 = vmatprep.subr.bf16.mxu0 %v12963_v50  ;;  %6833 = vmatprep.subr.bf16.mxu1 %v12965_v51  ;;  %v13077_v50 = vcombine.high %v1283_v45, %v1291_v46  ;;  %v1298_v51 = vld [vmem:[#allocation5 + $0x1c80] sm:$0xff]  ;;  %v1395_v43 = vld [vmem:[#allocation5 + $0x1f88] sm:$0xff] }
 0x158   : > { %6691 = vmatprep.mubr.bf16.mxu0 %v14651_v54  ;;  %6863 = vmatprep.mubr.bf16.mxu1 %v14651_v54  ;;  %v13090_v1 = vcombine.low %v1298_v51, %v1306_v52 }
 0x15a   : > { %6662 = vmatpush1.bf16.msra.mxu0 %v12962_v57  ;;  %6834 = vmatpush1.bf16.msra.mxu1 %v12964_v58  ;;  %v13076_v57 = vcombine.low %v1283_v45, %v1291_v46  ;;  %v13091_v58 = vcombine.high %v1298_v51, %v1306_v52  ;;  %v1403_v45 = vld [vmem:[#allocation5 + $0x1fc8] sm:$0xff]  ;;  %v396_v51 = vld [vmem:[#allocation5 + $0x50] sm:$0xff]  ;;  %v389_v52 = vld [vmem:[#allocation5 + $0x18] sm:$0xff] }
 0x15b   : > { %6663 = vmatprep.subr.bf16.mxu0 %v12979_v60  ;;  %6835 = vmatprep.subr.bf16.mxu1 %v12981_v61  ;;  %v13093_v60 = vcombine.high %v1299_v53, %v1307_v55  ;;  %v1314_v61 = vld [vmem:[#allocation5 + $0x1d00] sm:$0xff] }
 0x15c   : > { %v13106_v9 = vcombine.low %v1314_v61, %v1322_v62 }
 0x15e   : > { %6664 = vmatpush1.bf16.msra.mxu0 %v12978_v2  ;;  %6836 = vmatpush1.bf16.msra.mxu1 %v12980_v3  ;;  %v13092_v2 = vcombine.low %v1299_v53, %v1307_v55  ;;  %v13107_v3 = vcombine.high %v1314_v61, %v1322_v62  ;;  %v397_v53 = vld [vmem:[#allocation5 + $0x58] sm:$0xff]  ;;  %v404_v62 = vld [vmem:[#allocation5 + $0x90] sm:$0xff] }
 0x15f   : > { %6665 = vmatprep.subr.bf16.mxu0 %v12995_v4  ;;  %6837 = vmatprep.subr.bf16.mxu1 %v12997_v5  ;;  %v13109_v4 = vcombine.high %v1315_v63, %v1323_v0  ;;  %v1330_v5 = vld [vmem:[#allocation5 + $0x1d80] sm:$0xff]  ;;  %v12185_v61 = vcombine.high %v389_v52, %v397_v53 }
 0x160   : > { %v13122_v18 = vcombine.low %v1330_v5, %v1338_v6 }
 0x162   : > { %6666 = vmatpush1.bf16.msra.mxu0 %v12994_v10  ;;  %6838 = vmatpush1.bf16.msra.mxu1 %v12996_v11  ;;  %v13108_v10 = vcombine.low %v1315_v63, %v1323_v0  ;;  %v13123_v11 = vcombine.high %v1330_v5, %v1338_v6  ;;  %v412_v63 = vld [vmem:[#allocation5 + $0xd0] sm:$0xff] }
 0x163   : > { %6667 = vmatprep.subr.bf16.mxu0 %v13011_v12  ;;  %6839 = vmatprep.subr.bf16.mxu1 %v13013_v13  ;;  %v13125_v12 = vcombine.high %v1331_v7, %v1339_v8  ;;  %v1346_v13 = vld [vmem:[#allocation5 + $0x1e00] sm:$0xff]  ;;  %v12199_v5 = vcombine.high %v404_v62, %v412_v63 }
 0x164   : > { %v13138_v27 = vcombine.low %v1346_v13, %v1354_v14 }
 0x166   : > { %6668 = vmatpush1.bf16.msra.mxu0 %v13010_v19  ;;  %6840 = vmatpush1.bf16.msra.mxu1 %v13012_v20  ;;  %v13124_v19 = vcombine.low %v1331_v7, %v1339_v8  ;;  %v13139_v20 = vcombine.high %v1346_v13, %v1354_v14  ;;  %v420_v7 = vld [vmem:[#allocation5 + $0x110] sm:$0xff] }
 0x167   : > { %6669 = vmatprep.subr.bf16.mxu0 %v13027_v21  ;;  %6841 = vmatprep.subr.bf16.mxu1 %v13029_v22  ;;  %v13141_v21 = vcombine.high %v1347_v15, %v1355_v17  ;;  %v1362_v22 = vld [vmem:[#allocation5 + $0x1e80] sm:$0xff]  ;;  %v428_v8 = vld [vmem:[#allocation5 + $0x150] sm:$0xff] }
 0x168   : > { %v13154_v36 = vcombine.low %v1362_v22, %v1370_v23  ;;  %v12215_v13 = vcombine.high %v420_v7, %v428_v8 }
 0x16a   : > { %6670 = vmatpush1.bf16.msra.mxu0 %v13026_v29  ;;  %6842 = vmatpush1.bf16.msra.mxu1 %v13028_v30  ;;  %v13140_v29 = vcombine.low %v1347_v15, %v1355_v17  ;;  %v13155_v30 = vcombine.high %v1362_v22, %v1370_v23  ;;  %v436_v15 = vld [vmem:[#allocation5 + $0x190] sm:$0xff] }
 0x16b   : > { %6671 = vmatprep.subr.bf16.mxu0 %v13043_v31  ;;  %6843 = vmatprep.subr.bf16.mxu1 %v13045_v32  ;;  %v13157_v31 = vcombine.high %v1363_v24, %v1371_v25  ;;  %v1378_v32 = vld [vmem:[#allocation5 + $0x1f00] sm:$0xff]  ;;  %v444_v17 = vld [vmem:[#allocation5 + $0x1d0] sm:$0xff] }
 0x16c   : > { %v13170_v46 = vcombine.low %v1378_v32, %v1386_v33  ;;  %v12231_v22 = vcombine.high %v436_v15, %v444_v17 }
 0x16e   : > { %6672 = vmatpush1.bf16.msra.mxu0 %v13042_v37  ;;  %6844 = vmatpush1.bf16.msra.mxu1 %v13044_v39  ;;  %v13156_v37 = vcombine.low %v1363_v24, %v1371_v25  ;;  %v13171_v39 = vcombine.high %v1378_v32, %v1386_v33  ;;  %v452_v24 = vld [vmem:[#allocation5 + $0x210] sm:$0xff] }
 0x16f   : > { %6673 = vmatprep.subr.bf16.mxu0 %v13059_v40  ;;  %6845 = vmatprep.subr.bf16.mxu1 %v13061_v41  ;;  %v13173_v40 = vcombine.high %v1379_v34, %v1387_v35  ;;  %v1394_v41 = vld [vmem:[#allocation5 + $0x1f80] sm:$0xff]  ;;  %v460_v25 = vld [vmem:[#allocation5 + $0x250] sm:$0xff] }
 0x170   : > { %v13186_v55 = vcombine.low %v1394_v41, %v1402_v42  ;;  %v12247_v32 = vcombine.high %v452_v24, %v460_v25 }
 0x172   : > { %6674 = vmatpush1.bf16.msra.mxu0 %v13058_v47  ;;  %6846 = vmatpush1.bf16.msra.mxu1 %v13060_v48  ;;  %v13172_v47 = vcombine.low %v1379_v34, %v1387_v35  ;;  %v13187_v48 = vcombine.high %v1394_v41, %v1402_v42  ;;  %v468_v34 = vld [vmem:[#allocation5 + $0x290] sm:$0xff] }
 0x173   : > { %6675 = vmatprep.subr.bf16.mxu0 %v13075_v49  ;;  %6847 = vmatprep.subr.bf16.mxu1 %v13077_v50  ;;  %v13189_v49 = vcombine.high %v1395_v43, %v1403_v45  ;;  %v388_v50 = vld [vmem:[#allocation5 + $0x10] sm:$0xff] }
 0x174   : > { %v476_v35 = vld [vmem:[#allocation5 + $0x2d0] sm:$0xff] }
 0x175   : > { %v12263_v41 = vcombine.high %v468_v34, %v476_v35 }
 0x176   : > { %6676 = vmatpush1.bf16.msra.mxu0 %v13074_v56  ;;  %6848 = vmatpush1.bf16.msra.mxu1 %v13076_v57  ;;  %v296_v56 = vld [vmem:[#allocation10 + $0x30] sm:$0xff] }
 0x177   : > { %6677 = vmatprep.subr.bf16.mxu0 %v13091_v58  ;;  %6849 = vmatprep.subr.bf16.mxu1 %v13093_v60  ;;  %v304_v57 = vld [vmem:[#allocation10 + $0x70] sm:$0xff]  ;;  %v13188_v58 = vcombine.low %v1395_v43, %v1403_v45  ;;  %v12183_v60 = vcombine.high %v388_v50, %v396_v51  ;;  %v484_v43 = vld [vmem:[#allocation5 + $0x310] sm:$0xff] }
 0x178   : > { %v14657_v0 = vpack.c.bf16 %v304_v57, %v296_v56  ;;  %v492_v45 = vld [vmem:[#allocation5 + $0x350] sm:$0xff]  ;;  %v509_v56 = vld [vmem:[#allocation5 + $0x3d8] sm:$0xff] }
 0x179   : > { %v12278_v57 = vcombine.low %v484_v43, %v492_v45 }
 0x17a   : > { %6678 = vmatpush1.bf16.msra.mxu0 %v13090_v1  ;;  %6850 = vmatpush1.bf16.msra.mxu1 %v13092_v2  ;;  %v405_v1 = vld [vmem:[#allocation5 + $0x98] sm:$0xff] }
 0x17b   : > { %6679 = vmatprep.subr.bf16.mxu0 %v13107_v3  ;;  %6851 = vmatprep.subr.bf16.mxu1 %v13109_v4  ;;  %v413_v2 = vld [vmem:[#allocation5 + $0xd8] sm:$0xff]  ;;  %v12182_v3 = vcombine.low %v388_v50, %v396_v51  ;;  %v12184_v4 = vcombine.low %v389_v52, %v397_v53  ;;  %v12279_v50 = vcombine.high %v484_v43, %v492_v45  ;;  %v500_v52 = vld [vmem:[#allocation5 + $0x390] sm:$0xff] }
 0x17c   : > { %v12201_v6 = vcombine.high %v405_v1, %v413_v2  ;;  %v508_v53 = vld [vmem:[#allocation5 + $0x3d0] sm:$0xff] }
 0x17d   : > { %v596_v43 = vld [vmem:[#allocation5 + $0x690] sm:$0xff] }
 0x17e   : > { %6680 = vmatpush1.bf16.msra.mxu0 %v13106_v9  ;;  %6852 = vmatpush1.bf16.msra.mxu1 %v13108_v10  ;;  %v421_v9 = vld [vmem:[#allocation5 + $0x118] sm:$0xff]  ;;  %v604_v45 = vld [vmem:[#allocation5 + $0x6d0] sm:$0xff] }
 0x17f   : > { %6681 = vmatprep.subr.bf16.mxu0 %v13123_v11  ;;  %6853 = vmatprep.subr.bf16.mxu1 %v13125_v12  ;;  %v429_v10 = vld [vmem:[#allocation5 + $0x158] sm:$0xff]  ;;  %v12198_v11 = vcombine.low %v404_v62, %v412_v63  ;;  %v12200_v12 = vcombine.low %v405_v1, %v413_v2  ;;  %v516_v62 = vld [vmem:[#allocation5 + $0x410] sm:$0xff] }
 0x180   : > { %v12217_v14 = vcombine.high %v421_v9, %v429_v10  ;;  %v524_v63 = vld [vmem:[#allocation5 + $0x450] sm:$0xff]  ;;  %v517_v1 = vld [vmem:[#allocation5 + $0x418] sm:$0xff] }
 0x181   : > { %v525_v2 = vld [vmem:[#allocation5 + $0x458] sm:$0xff] }
 0x182   : > { %6682 = vmatpush1.bf16.msra.mxu0 %v13122_v18  ;;  %6854 = vmatpush1.bf16.msra.mxu1 %v13124_v19  ;;  %v437_v18 = vld [vmem:[#allocation5 + $0x198] sm:$0xff] }
 0x183   : > { %6683 = vmatprep.subr.bf16.mxu0 %v13139_v20  ;;  %6855 = vmatprep.subr.bf16.mxu1 %v13141_v21  ;;  %v445_v19 = vld [vmem:[#allocation5 + $0x1d8] sm:$0xff]  ;;  %v12214_v20 = vcombine.low %v420_v7, %v428_v8  ;;  %v12216_v21 = vcombine.low %v421_v9, %v429_v10  ;;  %v532_v7 = vld [vmem:[#allocation5 + $0x490] sm:$0xff] }
 0x184   : > { %v12233_v23 = vcombine.high %v437_v18, %v445_v19  ;;  %v540_v8 = vld [vmem:[#allocation5 + $0x4d0] sm:$0xff]  ;;  %v533_v9 = vld [vmem:[#allocation5 + $0x498] sm:$0xff] }
 0x185   : > { %v541_v10 = vld [vmem:[#allocation5 + $0x4d8] sm:$0xff] }
 0x186   : > { %6684 = vmatpush1.bf16.msra.mxu0 %v13138_v27  ;;  %6856 = vmatpush1.bf16.msra.mxu1 %v13140_v29  ;;  %v453_v27 = vld [vmem:[#allocation5 + $0x218] sm:$0xff] }
 0x187   : > { %6685 = vmatprep.subr.bf16.mxu0 %v13155_v30  ;;  %6857 = vmatprep.subr.bf16.mxu1 %v13157_v31  ;;  %v461_v29 = vld [vmem:[#allocation5 + $0x258] sm:$0xff]  ;;  %v12230_v30 = vcombine.low %v436_v15, %v444_v17  ;;  %v12232_v31 = vcombine.low %v437_v18, %v445_v19  ;;  %v548_v15 = vld [vmem:[#allocation5 + $0x510] sm:$0xff] }
 0x188   : > { %v12249_v33 = vcombine.high %v453_v27, %v461_v29  ;;  %v556_v17 = vld [vmem:[#allocation5 + $0x550] sm:$0xff]  ;;  %v549_v18 = vld [vmem:[#allocation5 + $0x518] sm:$0xff] }
 0x189   : > { %v557_v19 = vld [vmem:[#allocation5 + $0x558] sm:$0xff] }
 0x18a   : > { %6686 = vmatpush1.bf16.msra.mxu0 %v13154_v36  ;;  %6858 = vmatpush1.bf16.msra.mxu1 %v13156_v37  ;;  %v469_v36 = vld [vmem:[#allocation5 + $0x298] sm:$0xff] }
 0x18b   : > { %6687 = vmatprep.subr.bf16.mxu0 %v13171_v39  ;;  %6859 = vmatprep.subr.bf16.mxu1 %v13173_v40  ;;  %v477_v37 = vld [vmem:[#allocation5 + $0x2d8] sm:$0xff]  ;;  %v12246_v39 = vcombine.low %v452_v24, %v460_v25  ;;  %v12248_v40 = vcombine.low %v453_v27, %v461_v29  ;;  %v564_v24 = vld [vmem:[#allocation5 + $0x590] sm:$0xff] }
 0x18c   : > { %v12265_v42 = vcombine.high %v469_v36, %v477_v37  ;;  %v572_v25 = vld [vmem:[#allocation5 + $0x5d0] sm:$0xff]  ;;  %v565_v27 = vld [vmem:[#allocation5 + $0x598] sm:$0xff] }
 0x18d   : > { %v573_v29 = vld [vmem:[#allocation5 + $0x5d8] sm:$0xff] }
 0x18e   : > { %6688 = vmatpush1.bf16.msra.mxu0 %v13170_v46  ;;  %6860 = vmatpush1.bf16.msra.mxu1 %v13172_v47  ;;  %v485_v46 = vld [vmem:[#allocation5 + $0x318] sm:$0xff] }
 0x18f   : > { %6689 = vmatprep.subr.bf16.mxu0 %v13187_v48  ;;  %6861 = vmatprep.subr.bf16.mxu1 %v13189_v49  ;;  %v493_v47 = vld [vmem:[#allocation5 + $0x358] sm:$0xff]  ;;  %v12262_v48 = vcombine.low %v468_v34, %v476_v35  ;;  %v12264_v49 = vcombine.low %v469_v36, %v477_v37  ;;  %v580_v34 = vld [vmem:[#allocation5 + $0x610] sm:$0xff] }
 0x190   : > { %v12281_v51 = vcombine.high %v485_v46, %v493_v47  ;;  %v588_v35 = vld [vmem:[#allocation5 + $0x650] sm:$0xff]  ;;  %v581_v36 = vld [vmem:[#allocation5 + $0x618] sm:$0xff] }
 0x191   : > { %v589_v37 = vld [vmem:[#allocation5 + $0x658] sm:$0xff] }
 0x192   : > { %6690 = vmatpush1.bf16.msra.mxu0 %v13186_v55  ;;  %6862 = vmatpush1.bf16.msra.mxu1 %v13188_v58  ;;  %v501_v55 = vld [vmem:[#allocation5 + $0x398] sm:$0xff]  ;;  %v12280_v58 = vcombine.low %v485_v46, %v493_v47 }
 0x193   : > { %6874 = vmatprep.subr.bf16.mxu0 %v12183_v60  ;;  %7046 = vmatprep.subr.bf16.mxu1 %v12185_v61  ;;  %v12295_v60 = vcombine.high %v500_v52, %v508_v53  ;;  %v12297_v61 = vcombine.high %v501_v55, %v509_v56  ;;  %v597_v46 = vld [vmem:[#allocation5 + $0x698] sm:$0xff] }
 0x194   : > { %v605_v47 = vld [vmem:[#allocation5 + $0x6d8] sm:$0xff] }
 0x195   : > { %6692 = vmatmul.mubr.bf16.vlgmr.msra.gmra.mrb[0].mxu0 %v14657_v0  ;;  %6864 = vmatmul.mubr.bf16.vlgmr.msra.gmra.mrb[0].mxu1 %v14657_v0 }
 0x196   : > { %6875 = vmatpush1.bf16.msra.mxu0 %v12182_v3  ;;  %7047 = vmatpush1.bf16.msra.mxu1 %v12184_v4  ;;  %v12294_v3 = vcombine.low %v500_v52, %v508_v53  ;;  %v12296_v4 = vcombine.low %v501_v55, %v509_v56  ;;  %v612_v52 = vld [vmem:[#allocation5 + $0x710] sm:$0xff]  ;;  %v613_v55 = vld [vmem:[#allocation5 + $0x718] sm:$0xff] }
 0x197   : > { %6876 = vmatprep.subr.bf16.mxu0 %v12199_v5  ;;  %7048 = vmatprep.subr.bf16.mxu1 %v12201_v6  ;;  %v12311_v5 = vcombine.high %v516_v62, %v524_v63  ;;  %v12313_v6 = vcombine.high %v517_v1, %v525_v2  ;;  %v620_v53 = vld [vmem:[#allocation5 + $0x750] sm:$0xff]  ;;  %v621_v56 = vld [vmem:[#allocation5 + $0x758] sm:$0xff] }
 0x198   : > { %6906 = vmatprep.mubr.bf16.mxu0 %v14629_v59  ;;  %7078 = vmatprep.mubr.bf16.mxu1 %v14629_v59 }
 0x19a   : > { %6877 = vmatpush1.bf16.msra.mxu0 %v12198_v11  ;;  %7049 = vmatpush1.bf16.msra.mxu1 %v12200_v12  ;;  %v12310_v11 = vcombine.low %v516_v62, %v524_v63  ;;  %v12312_v12 = vcombine.low %v517_v1, %v525_v2  ;;  %v628_v62 = vld [vmem:[#allocation5 + $0x790] sm:$0xff]  ;;  %v629_v1 = vld [vmem:[#allocation5 + $0x798] sm:$0xff] }
 0x19b   : > { %6878 = vmatprep.subr.bf16.mxu0 %v12215_v13  ;;  %7050 = vmatprep.subr.bf16.mxu1 %v12217_v14  ;;  %v12327_v13 = vcombine.high %v532_v7, %v540_v8  ;;  %v12329_v14 = vcombine.high %v533_v9, %v541_v10  ;;  %v636_v63 = vld [vmem:[#allocation5 + $0x7d0] sm:$0xff]  ;;  %v637_v2 = vld [vmem:[#allocation5 + $0x7d8] sm:$0xff] }
 0x19e   : > { %6879 = vmatpush1.bf16.msra.mxu0 %v12214_v20  ;;  %7051 = vmatpush1.bf16.msra.mxu1 %v12216_v21  ;;  %v12326_v20 = vcombine.low %v532_v7, %v540_v8  ;;  %v12328_v21 = vcombine.low %v533_v9, %v541_v10  ;;  %v644_v7 = vld [vmem:[#allocation5 + $0x810] sm:$0xff]  ;;  %v645_v9 = vld [vmem:[#allocation5 + $0x818] sm:$0xff] }
 0x19f   : > { %6880 = vmatprep.subr.bf16.mxu0 %v12231_v22  ;;  %7052 = vmatprep.subr.bf16.mxu1 %v12233_v23  ;;  %v12343_v22 = vcombine.high %v548_v15, %v556_v17  ;;  %v12345_v23 = vcombine.high %v549_v18, %v557_v19  ;;  %v652_v8 = vld [vmem:[#allocation5 + $0x850] sm:$0xff]  ;;  %v653_v10 = vld [vmem:[#allocation5 + $0x858] sm:$0xff] }
 0x1a2   : > { %6881 = vmatpush1.bf16.msra.mxu0 %v12230_v30  ;;  %7053 = vmatpush1.bf16.msra.mxu1 %v12232_v31  ;;  %v12342_v30 = vcombine.low %v548_v15, %v556_v17  ;;  %v12344_v31 = vcombine.low %v549_v18, %v557_v19  ;;  %v660_v15 = vld [vmem:[#allocation5 + $0x890] sm:$0xff]  ;;  %v661_v18 = vld [vmem:[#allocation5 + $0x898] sm:$0xff] }
 0x1a3   : > { %6882 = vmatprep.subr.bf16.mxu0 %v12247_v32  ;;  %7054 = vmatprep.subr.bf16.mxu1 %v12249_v33  ;;  %v12359_v32 = vcombine.high %v564_v24, %v572_v25  ;;  %v12361_v33 = vcombine.high %v565_v27, %v573_v29  ;;  %v668_v17 = vld [vmem:[#allocation5 + $0x8d0] sm:$0xff]  ;;  %v669_v19 = vld [vmem:[#allocation5 + $0x8d8] sm:$0xff] }
 0x1a6   : > { %6883 = vmatpush1.bf16.msra.mxu0 %v12246_v39  ;;  %7055 = vmatpush1.bf16.msra.mxu1 %v12248_v40  ;;  %v12358_v39 = vcombine.low %v564_v24, %v572_v25  ;;  %v12360_v40 = vcombine.low %v565_v27, %v573_v29  ;;  %v676_v24 = vld [vmem:[#allocation5 + $0x910] sm:$0xff]  ;;  %v677_v27 = vld [vmem:[#allocation5 + $0x918] sm:$0xff] }
 0x1a7   : > { %6884 = vmatprep.subr.bf16.mxu0 %v12263_v41  ;;  %7056 = vmatprep.subr.bf16.mxu1 %v12265_v42  ;;  %v12375_v41 = vcombine.high %v580_v34, %v588_v35  ;;  %v12377_v42 = vcombine.high %v581_v36, %v589_v37  ;;  %v684_v25 = vld [vmem:[#allocation5 + $0x950] sm:$0xff]  ;;  %v685_v29 = vld [vmem:[#allocation5 + $0x958] sm:$0xff] }
 0x1aa   : > { %6885 = vmatpush1.bf16.msra.mxu0 %v12262_v48  ;;  %7057 = vmatpush1.bf16.msra.mxu1 %v12264_v49  ;;  %v12374_v48 = vcombine.low %v580_v34, %v588_v35  ;;  %v12376_v49 = vcombine.low %v581_v36, %v589_v37  ;;  %v692_v34 = vld [vmem:[#allocation5 + $0x990] sm:$0xff]  ;;  %v693_v36 = vld [vmem:[#allocation5 + $0x998] sm:$0xff] }
 0x1ab   : > { %6886 = vmatprep.subr.bf16.mxu0 %v12279_v50  ;;  %7058 = vmatprep.subr.bf16.mxu1 %v12281_v51  ;;  %v12391_v50 = vcombine.high %v596_v43, %v604_v45  ;;  %v12393_v51 = vcombine.high %v597_v46, %v605_v47  ;;  %v700_v35 = vld [vmem:[#allocation5 + $0x9d0] sm:$0xff]  ;;  %v701_v37 = vld [vmem:[#allocation5 + $0x9d8] sm:$0xff] }
 0x1ae   : > { %6887 = vmatpush1.bf16.msra.mxu0 %v12278_v57  ;;  %7059 = vmatpush1.bf16.msra.mxu1 %v12280_v58  ;;  %v12390_v57 = vcombine.low %v596_v43, %v604_v45  ;;  %v12392_v58 = vcombine.low %v597_v46, %v605_v47  ;;  %v708_v43 = vld [vmem:[#allocation5 + $0xa10] sm:$0xff]  ;;  %v709_v46 = vld [vmem:[#allocation5 + $0xa18] sm:$0xff] }
 0x1af   : > { %6888 = vmatprep.subr.bf16.mxu0 %v12295_v60  ;;  %7060 = vmatprep.subr.bf16.mxu1 %v12297_v61  ;;  %v12407_v60 = vcombine.high %v612_v52, %v620_v53  ;;  %v12409_v61 = vcombine.high %v613_v55, %v621_v56  ;;  %v716_v45 = vld [vmem:[#allocation5 + $0xa50] sm:$0xff]  ;;  %v717_v47 = vld [vmem:[#allocation5 + $0xa58] sm:$0xff] }
 0x1b2   : > { %6889 = vmatpush1.bf16.msra.mxu0 %v12294_v3  ;;  %7061 = vmatpush1.bf16.msra.mxu1 %v12296_v4  ;;  %v12406_v3 = vcombine.low %v612_v52, %v620_v53  ;;  %v12408_v4 = vcombine.low %v613_v55, %v621_v56  ;;  %v724_v52 = vld [vmem:[#allocation5 + $0xa90] sm:$0xff]  ;;  %v725_v55 = vld [vmem:[#allocation5 + $0xa98] sm:$0xff] }
 0x1b3   : > { %6890 = vmatprep.subr.bf16.mxu0 %v12311_v5  ;;  %7062 = vmatprep.subr.bf16.mxu1 %v12313_v6  ;;  %v12423_v5 = vcombine.high %v628_v62, %v636_v63  ;;  %v12425_v6 = vcombine.high %v629_v1, %v637_v2  ;;  %v732_v53 = vld [vmem:[#allocation5 + $0xad0] sm:$0xff]  ;;  %v733_v56 = vld [vmem:[#allocation5 + $0xad8] sm:$0xff] }
 0x1b6   : > { %6891 = vmatpush1.bf16.msra.mxu0 %v12310_v11  ;;  %7063 = vmatpush1.bf16.msra.mxu1 %v12312_v12  ;;  %v12422_v11 = vcombine.low %v628_v62, %v636_v63  ;;  %v12424_v12 = vcombine.low %v629_v1, %v637_v2  ;;  %v740_v62 = vld [vmem:[#allocation5 + $0xb10] sm:$0xff]  ;;  %v741_v1 = vld [vmem:[#allocation5 + $0xb18] sm:$0xff] }
 0x1b7   : > { %6892 = vmatprep.subr.bf16.mxu0 %v12327_v13  ;;  %7064 = vmatprep.subr.bf16.mxu1 %v12329_v14  ;;  %v12439_v13 = vcombine.high %v644_v7, %v652_v8  ;;  %v12441_v14 = vcombine.high %v645_v9, %v653_v10  ;;  %v748_v63 = vld [vmem:[#allocation5 + $0xb50] sm:$0xff]  ;;  %v749_v2 = vld [vmem:[#allocation5 + $0xb58] sm:$0xff] }
 0x1ba   : > { %6893 = vmatpush1.bf16.msra.mxu0 %v12326_v20  ;;  %7065 = vmatpush1.bf16.msra.mxu1 %v12328_v21  ;;  %v12438_v20 = vcombine.low %v644_v7, %v652_v8  ;;  %v12440_v21 = vcombine.low %v645_v9, %v653_v10  ;;  %v756_v7 = vld [vmem:[#allocation5 + $0xb90] sm:$0xff]  ;;  %v757_v9 = vld [vmem:[#allocation5 + $0xb98] sm:$0xff] }
 0x1bb   : > { %6894 = vmatprep.subr.bf16.mxu0 %v12343_v22  ;;  %7066 = vmatprep.subr.bf16.mxu1 %v12345_v23  ;;  %v12455_v22 = vcombine.high %v660_v15, %v668_v17  ;;  %v12457_v23 = vcombine.high %v661_v18, %v669_v19  ;;  %v764_v8 = vld [vmem:[#allocation5 + $0xbd0] sm:$0xff]  ;;  %v765_v10 = vld [vmem:[#allocation5 + $0xbd8] sm:$0xff] }
 0x1be   : > { %6895 = vmatpush1.bf16.msra.mxu0 %v12342_v30  ;;  %7067 = vmatpush1.bf16.msra.mxu1 %v12344_v31  ;;  %v12454_v30 = vcombine.low %v660_v15, %v668_v17  ;;  %v12456_v31 = vcombine.low %v661_v18, %v669_v19  ;;  %v772_v15 = vld [vmem:[#allocation5 + $0xc10] sm:$0xff]  ;;  %v773_v18 = vld [vmem:[#allocation5 + $0xc18] sm:$0xff] }
 0x1bf   : > { %6896 = vmatprep.subr.bf16.mxu0 %v12359_v32  ;;  %7068 = vmatprep.subr.bf16.mxu1 %v12361_v33  ;;  %v12471_v32 = vcombine.high %v676_v24, %v684_v25  ;;  %v12473_v33 = vcombine.high %v677_v27, %v685_v29  ;;  %v780_v17 = vld [vmem:[#allocation5 + $0xc50] sm:$0xff]  ;;  %v781_v19 = vld [vmem:[#allocation5 + $0xc58] sm:$0xff] }
 0x1c2   : > { %6897 = vmatpush1.bf16.msra.mxu0 %v12358_v39  ;;  %7069 = vmatpush1.bf16.msra.mxu1 %v12360_v40  ;;  %v12470_v39 = vcombine.low %v676_v24, %v684_v25  ;;  %v12472_v40 = vcombine.low %v677_v27, %v685_v29  ;;  %v788_v24 = vld [vmem:[#allocation5 + $0xc90] sm:$0xff]  ;;  %v789_v27 = vld [vmem:[#allocation5 + $0xc98] sm:$0xff] }
 0x1c3   : > { %6898 = vmatprep.subr.bf16.mxu0 %v12375_v41  ;;  %7070 = vmatprep.subr.bf16.mxu1 %v12377_v42  ;;  %v12487_v41 = vcombine.high %v692_v34, %v700_v35  ;;  %v12489_v42 = vcombine.high %v693_v36, %v701_v37  ;;  %v796_v25 = vld [vmem:[#allocation5 + $0xcd0] sm:$0xff]  ;;  %v797_v29 = vld [vmem:[#allocation5 + $0xcd8] sm:$0xff] }
 0x1c6   : > { %6899 = vmatpush1.bf16.msra.mxu0 %v12374_v48  ;;  %7071 = vmatpush1.bf16.msra.mxu1 %v12376_v49  ;;  %v12486_v48 = vcombine.low %v692_v34, %v700_v35  ;;  %v12488_v49 = vcombine.low %v693_v36, %v701_v37  ;;  %v804_v34 = vld [vmem:[#allocation5 + $0xd10] sm:$0xff]  ;;  %v805_v36 = vld [vmem:[#allocation5 + $0xd18] sm:$0xff] }
 0x1c7   : > { %6900 = vmatprep.subr.bf16.mxu0 %v12391_v50  ;;  %7072 = vmatprep.subr.bf16.mxu1 %v12393_v51  ;;  %v12503_v50 = vcombine.high %v708_v43, %v716_v45  ;;  %v12505_v51 = vcombine.high %v709_v46, %v717_v47  ;;  %v812_v35 = vld [vmem:[#allocation5 + $0xd50] sm:$0xff]  ;;  %v813_v37 = vld [vmem:[#allocation5 + $0xd58] sm:$0xff] }
 0x1ca   : > { %6901 = vmatpush1.bf16.msra.mxu0 %v12390_v57  ;;  %7073 = vmatpush1.bf16.msra.mxu1 %v12392_v58  ;;  %v12502_v57 = vcombine.low %v708_v43, %v716_v45  ;;  %v12504_v58 = vcombine.low %v709_v46, %v717_v47  ;;  %v820_v43 = vld [vmem:[#allocation5 + $0xd90] sm:$0xff]  ;;  %v821_v46 = vld [vmem:[#allocation5 + $0xd98] sm:$0xff] }
 0x1cb   : > { %6902 = vmatprep.subr.bf16.mxu0 %v12407_v60  ;;  %7074 = vmatprep.subr.bf16.mxu1 %v12409_v61  ;;  %v12519_v60 = vcombine.high %v724_v52, %v732_v53  ;;  %v12521_v61 = vcombine.high %v725_v55, %v733_v56  ;;  %v828_v45 = vld [vmem:[#allocation5 + $0xdd0] sm:$0xff]  ;;  %v829_v47 = vld [vmem:[#allocation5 + $0xdd8] sm:$0xff] }
 0x1ce   : > { %6903 = vmatpush1.bf16.msra.mxu0 %v12406_v3  ;;  %7075 = vmatpush1.bf16.msra.mxu1 %v12408_v4  ;;  %v12518_v3 = vcombine.low %v724_v52, %v732_v53  ;;  %v12520_v4 = vcombine.low %v725_v55, %v733_v56  ;;  %v836_v52 = vld [vmem:[#allocation5 + $0xe10] sm:$0xff]  ;;  %v837_v55 = vld [vmem:[#allocation5 + $0xe18] sm:$0xff] }
 0x1cf   : > { %6904 = vmatprep.subr.bf16.mxu0 %v12423_v5  ;;  %7076 = vmatprep.subr.bf16.mxu1 %v12425_v6  ;;  %v12535_v5 = vcombine.high %v740_v62, %v748_v63  ;;  %v12537_v6 = vcombine.high %v741_v1, %v749_v2  ;;  %v844_v53 = vld [vmem:[#allocation5 + $0xe50] sm:$0xff]  ;;  %v845_v56 = vld [vmem:[#allocation5 + $0xe58] sm:$0xff] }
 0x1d2   : > { %6905 = vmatpush1.bf16.msra.mxu0 %v12422_v11  ;;  %7077 = vmatpush1.bf16.msra.mxu1 %v12424_v12  ;;  %v12534_v11 = vcombine.low %v740_v62, %v748_v63  ;;  %v12536_v12 = vcombine.low %v741_v1, %v749_v2  ;;  %v852_v62 = vld [vmem:[#allocation5 + $0xe90] sm:$0xff]  ;;  %v853_v1 = vld [vmem:[#allocation5 + $0xe98] sm:$0xff] }
 0x1d3   : > { %6917 = vmatprep.subr.bf16.mxu0 %v12439_v13  ;;  %7089 = vmatprep.subr.bf16.mxu1 %v12441_v14  ;;  %v12551_v13 = vcombine.high %v756_v7, %v764_v8  ;;  %v12553_v14 = vcombine.high %v757_v9, %v765_v10  ;;  %v860_v63 = vld [vmem:[#allocation5 + $0xed0] sm:$0xff]  ;;  %v861_v2 = vld [vmem:[#allocation5 + $0xed8] sm:$0xff] }
 0x1d5   : > { %6907 = vmatmul.mubr.bf16.vlgmr.msra.gmra.mrb[4].mxu0 %v14633_v16  ;;  %7079 = vmatmul.mubr.bf16.vlgmr.msra.gmra.mrb[4].mxu1 %v14633_v16 }
 0x1d6   : > { %6918 = vmatpush1.bf16.msra.mxu0 %v12438_v20  ;;  %7090 = vmatpush1.bf16.msra.mxu1 %v12440_v21  ;;  %v12550_v20 = vcombine.low %v756_v7, %v764_v8  ;;  %v12552_v21 = vcombine.low %v757_v9, %v765_v10  ;;  %v868_v7 = vld [vmem:[#allocation5 + $0xf10] sm:$0xff]  ;;  %v869_v9 = vld [vmem:[#allocation5 + $0xf18] sm:$0xff] }
 0x1d7   : > { %6919 = vmatprep.subr.bf16.mxu0 %v12455_v22  ;;  %7091 = vmatprep.subr.bf16.mxu1 %v12457_v23  ;;  %v12567_v22 = vcombine.high %v772_v15, %v780_v17  ;;  %v12569_v23 = vcombine.high %v773_v18, %v781_v19  ;;  %v876_v8 = vld [vmem:[#allocation5 + $0xf50] sm:$0xff]  ;;  %v877_v10 = vld [vmem:[#allocation5 + $0xf58] sm:$0xff] }
 0x1d8   : > { %6949 = vmatprep.mubr.bf16.mxu0 %v14635_v26  ;;  %7121 = vmatprep.mubr.bf16.mxu1 %v14635_v26 }
 0x1da   : > { %6920 = vmatpush1.bf16.msra.mxu0 %v12454_v30  ;;  %7092 = vmatpush1.bf16.msra.mxu1 %v12456_v31  ;;  %v12566_v30 = vcombine.low %v772_v15, %v780_v17  ;;  %v12568_v31 = vcombine.low %v773_v18, %v781_v19  ;;  %v884_v15 = vld [vmem:[#allocation5 + $0xf90] sm:$0xff]  ;;  %v885_v18 = vld [vmem:[#allocation5 + $0xf98] sm:$0xff] }
 0x1db   : > { %6921 = vmatprep.subr.bf16.mxu0 %v12471_v32  ;;  %7093 = vmatprep.subr.bf16.mxu1 %v12473_v33  ;;  %v12583_v32 = vcombine.high %v788_v24, %v796_v25  ;;  %v12585_v33 = vcombine.high %v789_v27, %v797_v29  ;;  %v892_v17 = vld [vmem:[#allocation5 + $0xfd0] sm:$0xff]  ;;  %v893_v19 = vld [vmem:[#allocation5 + $0xfd8] sm:$0xff] }
 0x1de   : > { %6922 = vmatpush1.bf16.msra.mxu0 %v12470_v39  ;;  %7094 = vmatpush1.bf16.msra.mxu1 %v12472_v40  ;;  %v12582_v39 = vcombine.low %v788_v24, %v796_v25  ;;  %v12584_v40 = vcombine.low %v789_v27, %v797_v29  ;;  %v900_v24 = vld [vmem:[#allocation5 + $0x1010] sm:$0xff]  ;;  %v901_v27 = vld [vmem:[#allocation5 + $0x1018] sm:$0xff] }
 0x1df   : > { %6923 = vmatprep.subr.bf16.mxu0 %v12487_v41  ;;  %7095 = vmatprep.subr.bf16.mxu1 %v12489_v42  ;;  %v12599_v41 = vcombine.high %v804_v34, %v812_v35  ;;  %v12601_v42 = vcombine.high %v805_v36, %v813_v37  ;;  %v908_v25 = vld [vmem:[#allocation5 + $0x1050] sm:$0xff]  ;;  %v909_v29 = vld [vmem:[#allocation5 + $0x1058] sm:$0xff] }
 0x1e2   : > { %6924 = vmatpush1.bf16.msra.mxu0 %v12486_v48  ;;  %7096 = vmatpush1.bf16.msra.mxu1 %v12488_v49  ;;  %v12598_v48 = vcombine.low %v804_v34, %v812_v35  ;;  %v12600_v49 = vcombine.low %v805_v36, %v813_v37  ;;  %v916_v34 = vld [vmem:[#allocation5 + $0x1090] sm:$0xff]  ;;  %v917_v36 = vld [vmem:[#allocation5 + $0x1098] sm:$0xff] }
 0x1e3   : > { %6925 = vmatprep.subr.bf16.mxu0 %v12503_v50  ;;  %7097 = vmatprep.subr.bf16.mxu1 %v12505_v51  ;;  %v12615_v50 = vcombine.high %v820_v43, %v828_v45  ;;  %v12617_v51 = vcombine.high %v821_v46, %v829_v47  ;;  %v924_v35 = vld [vmem:[#allocation5 + $0x10d0] sm:$0xff]  ;;  %v925_v37 = vld [vmem:[#allocation5 + $0x10d8] sm:$0xff] }
 0x1e6   : > { %6926 = vmatpush1.bf16.msra.mxu0 %v12502_v57  ;;  %7098 = vmatpush1.bf16.msra.mxu1 %v12504_v58  ;;  %v12614_v57 = vcombine.low %v820_v43, %v828_v45  ;;  %v12616_v58 = vcombine.low %v821_v46, %v829_v47  ;;  %v932_v43 = vld [vmem:[#allocation5 + $0x1110] sm:$0xff]  ;;  %v933_v46 = vld [vmem:[#allocation5 + $0x1118] sm:$0xff] }
 0x1e7   : > { %6927 = vmatprep.subr.bf16.mxu0 %v12519_v60  ;;  %7099 = vmatprep.subr.bf16.mxu1 %v12521_v61  ;;  %v12631_v60 = vcombine.high %v836_v52, %v844_v53  ;;  %v12633_v61 = vcombine.high %v837_v55, %v845_v56  ;;  %v940_v45 = vld [vmem:[#allocation5 + $0x1150] sm:$0xff]  ;;  %v941_v47 = vld [vmem:[#allocation5 + $0x1158] sm:$0xff] }
 0x1ea   : > { %6928 = vmatpush1.bf16.msra.mxu0 %v12518_v3  ;;  %7100 = vmatpush1.bf16.msra.mxu1 %v12520_v4  ;;  %v12630_v3 = vcombine.low %v836_v52, %v844_v53  ;;  %v12632_v4 = vcombine.low %v837_v55, %v845_v56  ;;  %v948_v52 = vld [vmem:[#allocation5 + $0x1190] sm:$0xff]  ;;  %v949_v55 = vld [vmem:[#allocation5 + $0x1198] sm:$0xff] }
 0x1eb   : > { %6929 = vmatprep.subr.bf16.mxu0 %v12535_v5  ;;  %7101 = vmatprep.subr.bf16.mxu1 %v12537_v6  ;;  %v12647_v5 = vcombine.high %v852_v62, %v860_v63  ;;  %v12649_v6 = vcombine.high %v853_v1, %v861_v2  ;;  %v956_v53 = vld [vmem:[#allocation5 + $0x11d0] sm:$0xff]  ;;  %v957_v56 = vld [vmem:[#allocation5 + $0x11d8] sm:$0xff] }
 0x1ee   : > { %6930 = vmatpush1.bf16.msra.mxu0 %v12534_v11  ;;  %7102 = vmatpush1.bf16.msra.mxu1 %v12536_v12  ;;  %v12646_v11 = vcombine.low %v852_v62, %v860_v63  ;;  %v12648_v12 = vcombine.low %v853_v1, %v861_v2  ;;  %v964_v62 = vld [vmem:[#allocation5 + $0x1210] sm:$0xff]  ;;  %v965_v1 = vld [vmem:[#allocation5 + $0x1218] sm:$0xff] }
 0x1ef   : > { %6931 = vmatprep.subr.bf16.mxu0 %v12551_v13  ;;  %7103 = vmatprep.subr.bf16.mxu1 %v12553_v14  ;;  %v12663_v13 = vcombine.high %v868_v7, %v876_v8  ;;  %v12665_v14 = vcombine.high %v869_v9, %v877_v10  ;;  %v972_v63 = vld [vmem:[#allocation5 + $0x1250] sm:$0xff]  ;;  %v973_v2 = vld [vmem:[#allocation5 + $0x1258] sm:$0xff] }
 0x1f2   : > { %6932 = vmatpush1.bf16.msra.mxu0 %v12550_v20  ;;  %7104 = vmatpush1.bf16.msra.mxu1 %v12552_v21  ;;  %v12662_v20 = vcombine.low %v868_v7, %v876_v8  ;;  %v12664_v21 = vcombine.low %v869_v9, %v877_v10  ;;  %v980_v7 = vld [vmem:[#allocation5 + $0x1290] sm:$0xff]  ;;  %v981_v9 = vld [vmem:[#allocation5 + $0x1298] sm:$0xff] }
 0x1f3   : > { %6933 = vmatprep.subr.bf16.mxu0 %v12567_v22  ;;  %7105 = vmatprep.subr.bf16.mxu1 %v12569_v23  ;;  %v12679_v22 = vcombine.high %v884_v15, %v892_v17  ;;  %v12681_v23 = vcombine.high %v885_v18, %v893_v19  ;;  %v988_v8 = vld [vmem:[#allocation5 + $0x12d0] sm:$0xff]  ;;  %v989_v10 = vld [vmem:[#allocation5 + $0x12d8] sm:$0xff] }
 0x1f6   : > { %6934 = vmatpush1.bf16.msra.mxu0 %v12566_v30  ;;  %7106 = vmatpush1.bf16.msra.mxu1 %v12568_v31  ;;  %v12678_v30 = vcombine.low %v884_v15, %v892_v17  ;;  %v12680_v31 = vcombine.low %v885_v18, %v893_v19  ;;  %v996_v15 = vld [vmem:[#allocation5 + $0x1310] sm:$0xff]  ;;  %v997_v18 = vld [vmem:[#allocation5 + $0x1318] sm:$0xff] }
 0x1f7   : > { %6935 = vmatprep.subr.bf16.mxu0 %v12583_v32  ;;  %7107 = vmatprep.subr.bf16.mxu1 %v12585_v33  ;;  %v12695_v32 = vcombine.high %v900_v24, %v908_v25  ;;  %v12697_v33 = vcombine.high %v901_v27, %v909_v29  ;;  %v1004_v17 = vld [vmem:[#allocation5 + $0x1350] sm:$0xff]  ;;  %v1005_v19 = vld [vmem:[#allocation5 + $0x1358] sm:$0xff] }
 0x1fa   : > { %6936 = vmatpush1.bf16.msra.mxu0 %v12582_v39  ;;  %7108 = vmatpush1.bf16.msra.mxu1 %v12584_v40  ;;  %v12694_v39 = vcombine.low %v900_v24, %v908_v25  ;;  %v12696_v40 = vcombine.low %v901_v27, %v909_v29  ;;  %v1012_v24 = vld [vmem:[#allocation5 + $0x1390] sm:$0xff]  ;;  %v1013_v27 = vld [vmem:[#allocation5 + $0x1398] sm:$0xff] }
 0x1fb   : > { %6937 = vmatprep.subr.bf16.mxu0 %v12599_v41  ;;  %7109 = vmatprep.subr.bf16.mxu1 %v12601_v42  ;;  %v12711_v41 = vcombine.high %v916_v34, %v924_v35  ;;  %v12713_v42 = vcombine.high %v917_v36, %v925_v37  ;;  %v1020_v25 = vld [vmem:[#allocation5 + $0x13d0] sm:$0xff]  ;;  %v1021_v29 = vld [vmem:[#allocation5 + $0x13d8] sm:$0xff] }
 0x1fe   : > { %6938 = vmatpush1.bf16.msra.mxu0 %v12598_v48  ;;  %7110 = vmatpush1.bf16.msra.mxu1 %v12600_v49  ;;  %v12710_v48 = vcombine.low %v916_v34, %v924_v35  ;;  %v12712_v49 = vcombine.low %v917_v36, %v925_v37  ;;  %v1028_v34 = vld [vmem:[#allocation5 + $0x1410] sm:$0xff]  ;;  %v1029_v36 = vld [vmem:[#allocation5 + $0x1418] sm:$0xff] }
 0x1ff   : > { %6939 = vmatprep.subr.bf16.mxu0 %v12615_v50  ;;  %7111 = vmatprep.subr.bf16.mxu1 %v12617_v51  ;;  %v12727_v50 = vcombine.high %v932_v43, %v940_v45  ;;  %v12729_v51 = vcombine.high %v933_v46, %v941_v47  ;;  %v1036_v35 = vld [vmem:[#allocation5 + $0x1450] sm:$0xff]  ;;  %v1037_v37 = vld [vmem:[#allocation5 + $0x1458] sm:$0xff] }
 0x202   : > { %6940 = vmatpush1.bf16.msra.mxu0 %v12614_v57  ;;  %7112 = vmatpush1.bf16.msra.mxu1 %v12616_v58  ;;  %v12726_v57 = vcombine.low %v932_v43, %v940_v45  ;;  %v12728_v58 = vcombine.low %v933_v46, %v941_v47  ;;  %v1044_v43 = vld [vmem:[#allocation5 + $0x1490] sm:$0xff]  ;;  %v1045_v46 = vld [vmem:[#allocation5 + $0x1498] sm:$0xff] }
 0x203   : > { %6941 = vmatprep.subr.bf16.mxu0 %v12631_v60  ;;  %7113 = vmatprep.subr.bf16.mxu1 %v12633_v61  ;;  %v12743_v60 = vcombine.high %v948_v52, %v956_v53  ;;  %v12745_v61 = vcombine.high %v949_v55, %v957_v56  ;;  %v1052_v45 = vld [vmem:[#allocation5 + $0x14d0] sm:$0xff]  ;;  %v1053_v47 = vld [vmem:[#allocation5 + $0x14d8] sm:$0xff] }
 0x206   : > { %6942 = vmatpush1.bf16.msra.mxu0 %v12630_v3  ;;  %7114 = vmatpush1.bf16.msra.mxu1 %v12632_v4  ;;  %v12742_v3 = vcombine.low %v948_v52, %v956_v53  ;;  %v12744_v4 = vcombine.low %v949_v55, %v957_v56  ;;  %v1060_v52 = vld [vmem:[#allocation5 + $0x1510] sm:$0xff]  ;;  %v1061_v55 = vld [vmem:[#allocation5 + $0x1518] sm:$0xff] }
 0x207   : > { %6943 = vmatprep.subr.bf16.mxu0 %v12647_v5  ;;  %7115 = vmatprep.subr.bf16.mxu1 %v12649_v6  ;;  %v12759_v5 = vcombine.high %v964_v62, %v972_v63  ;;  %v12761_v6 = vcombine.high %v965_v1, %v973_v2  ;;  %v1068_v53 = vld [vmem:[#allocation5 + $0x1550] sm:$0xff]  ;;  %v1069_v56 = vld [vmem:[#allocation5 + $0x1558] sm:$0xff] }
 0x20a   : > { %6944 = vmatpush1.bf16.msra.mxu0 %v12646_v11  ;;  %7116 = vmatpush1.bf16.msra.mxu1 %v12648_v12  ;;  %v12758_v11 = vcombine.low %v964_v62, %v972_v63  ;;  %v12760_v12 = vcombine.low %v965_v1, %v973_v2  ;;  %v1076_v62 = vld [vmem:[#allocation5 + $0x1590] sm:$0xff]  ;;  %v1077_v1 = vld [vmem:[#allocation5 + $0x1598] sm:$0xff] }
 0x20b   : > { %6945 = vmatprep.subr.bf16.mxu0 %v12663_v13  ;;  %7117 = vmatprep.subr.bf16.mxu1 %v12665_v14  ;;  %v12775_v13 = vcombine.high %v980_v7, %v988_v8  ;;  %v12777_v14 = vcombine.high %v981_v9, %v989_v10  ;;  %v1084_v63 = vld [vmem:[#allocation5 + $0x15d0] sm:$0xff]  ;;  %v1085_v2 = vld [vmem:[#allocation5 + $0x15d8] sm:$0xff] }
 0x20e   : > { %6946 = vmatpush1.bf16.msra.mxu0 %v12662_v20  ;;  %7118 = vmatpush1.bf16.msra.mxu1 %v12664_v21  ;;  %v12774_v20 = vcombine.low %v980_v7, %v988_v8  ;;  %v12776_v21 = vcombine.low %v981_v9, %v989_v10  ;;  %v1092_v7 = vld [vmem:[#allocation5 + $0x1610] sm:$0xff]  ;;  %v1093_v9 = vld [vmem:[#allocation5 + $0x1618] sm:$0xff] }
 0x20f   : > { %6947 = vmatprep.subr.bf16.mxu0 %v12679_v22  ;;  %7119 = vmatprep.subr.bf16.mxu1 %v12681_v23  ;;  %v12791_v22 = vcombine.high %v996_v15, %v1004_v17  ;;  %v12793_v23 = vcombine.high %v997_v18, %v1005_v19  ;;  %v1100_v8 = vld [vmem:[#allocation5 + $0x1650] sm:$0xff]  ;;  %v1101_v10 = vld [vmem:[#allocation5 + $0x1658] sm:$0xff] }
 0x212   : > { %6948 = vmatpush1.bf16.msra.mxu0 %v12678_v30  ;;  %7120 = vmatpush1.bf16.msra.mxu1 %v12680_v31  ;;  %v12790_v30 = vcombine.low %v996_v15, %v1004_v17  ;;  %v12792_v31 = vcombine.low %v997_v18, %v1005_v19  ;;  %v1108_v15 = vld [vmem:[#allocation5 + $0x1690] sm:$0xff]  ;;  %v1109_v18 = vld [vmem:[#allocation5 + $0x1698] sm:$0xff] }
 0x213   : > { %6960 = vmatprep.subr.bf16.mxu0 %v12695_v32  ;;  %7132 = vmatprep.subr.bf16.mxu1 %v12697_v33  ;;  %v12807_v32 = vcombine.high %v1012_v24, %v1020_v25  ;;  %v12809_v33 = vcombine.high %v1013_v27, %v1021_v29  ;;  %v1116_v17 = vld [vmem:[#allocation5 + $0x16d0] sm:$0xff]  ;;  %v1117_v19 = vld [vmem:[#allocation5 + $0x16d8] sm:$0xff] }
 0x215   : > { %6950 = vmatmul.mubr.bf16.vlgmr.msra.gmra.mrb[4].mxu0 %v14641_v28  ;;  %7122 = vmatmul.mubr.bf16.vlgmr.msra.gmra.mrb[4].mxu1 %v14641_v28 }
 0x216   : > { %6961 = vmatpush1.bf16.msra.mxu0 %v12694_v39  ;;  %7133 = vmatpush1.bf16.msra.mxu1 %v12696_v40  ;;  %v12806_v39 = vcombine.low %v1012_v24, %v1020_v25  ;;  %v12808_v40 = vcombine.low %v1013_v27, %v1021_v29  ;;  %v1124_v24 = vld [vmem:[#allocation5 + $0x1710] sm:$0xff]  ;;  %v1125_v27 = vld [vmem:[#allocation5 + $0x1718] sm:$0xff] }
 0x217   : > { %6962 = vmatprep.subr.bf16.mxu0 %v12711_v41  ;;  %7134 = vmatprep.subr.bf16.mxu1 %v12713_v42  ;;  %v12823_v41 = vcombine.high %v1028_v34, %v1036_v35  ;;  %v12825_v42 = vcombine.high %v1029_v36, %v1037_v37  ;;  %v1132_v25 = vld [vmem:[#allocation5 + $0x1750] sm:$0xff]  ;;  %v1133_v29 = vld [vmem:[#allocation5 + $0x1758] sm:$0xff] }
 0x218   : > { %6992 = vmatprep.mubr.bf16.mxu0 %v14643_v38  ;;  %7164 = vmatprep.mubr.bf16.mxu1 %v14643_v38 }
 0x21a   : > { %6963 = vmatpush1.bf16.msra.mxu0 %v12710_v48  ;;  %7135 = vmatpush1.bf16.msra.mxu1 %v12712_v49  ;;  %v12822_v48 = vcombine.low %v1028_v34, %v1036_v35  ;;  %v12824_v49 = vcombine.low %v1029_v36, %v1037_v37  ;;  %v1140_v34 = vld [vmem:[#allocation5 + $0x1790] sm:$0xff]  ;;  %v1141_v36 = vld [vmem:[#allocation5 + $0x1798] sm:$0xff] }
 0x21b   : > { %6964 = vmatprep.subr.bf16.mxu0 %v12727_v50  ;;  %7136 = vmatprep.subr.bf16.mxu1 %v12729_v51  ;;  %v12839_v50 = vcombine.high %v1044_v43, %v1052_v45  ;;  %v12841_v51 = vcombine.high %v1045_v46, %v1053_v47  ;;  %v1148_v35 = vld [vmem:[#allocation5 + $0x17d0] sm:$0xff]  ;;  %v1149_v37 = vld [vmem:[#allocation5 + $0x17d8] sm:$0xff] }
 0x21e   : > { %6965 = vmatpush1.bf16.msra.mxu0 %v12726_v57  ;;  %7137 = vmatpush1.bf16.msra.mxu1 %v12728_v58  ;;  %v12838_v57 = vcombine.low %v1044_v43, %v1052_v45  ;;  %v12840_v58 = vcombine.low %v1045_v46, %v1053_v47  ;;  %v1156_v43 = vld [vmem:[#allocation5 + $0x1810] sm:$0xff]  ;;  %v1157_v46 = vld [vmem:[#allocation5 + $0x1818] sm:$0xff] }
 0x21f   : > { %6966 = vmatprep.subr.bf16.mxu0 %v12743_v60  ;;  %7138 = vmatprep.subr.bf16.mxu1 %v12745_v61  ;;  %v12855_v60 = vcombine.high %v1060_v52, %v1068_v53  ;;  %v12857_v61 = vcombine.high %v1061_v55, %v1069_v56  ;;  %v1164_v45 = vld [vmem:[#allocation5 + $0x1850] sm:$0xff]  ;;  %v1165_v47 = vld [vmem:[#allocation5 + $0x1858] sm:$0xff] }
 0x222   : > { %6967 = vmatpush1.bf16.msra.mxu0 %v12742_v3  ;;  %7139 = vmatpush1.bf16.msra.mxu1 %v12744_v4  ;;  %v12854_v3 = vcombine.low %v1060_v52, %v1068_v53  ;;  %v12856_v4 = vcombine.low %v1061_v55, %v1069_v56  ;;  %v1172_v52 = vld [vmem:[#allocation5 + $0x1890] sm:$0xff]  ;;  %v1173_v55 = vld [vmem:[#allocation5 + $0x1898] sm:$0xff] }
 0x223   : > { %6968 = vmatprep.subr.bf16.mxu0 %v12759_v5  ;;  %7140 = vmatprep.subr.bf16.mxu1 %v12761_v6  ;;  %v12871_v5 = vcombine.high %v1076_v62, %v1084_v63  ;;  %v12873_v6 = vcombine.high %v1077_v1, %v1085_v2  ;;  %v1180_v53 = vld [vmem:[#allocation5 + $0x18d0] sm:$0xff]  ;;  %v1181_v56 = vld [vmem:[#allocation5 + $0x18d8] sm:$0xff] }
 0x226   : > { %6969 = vmatpush1.bf16.msra.mxu0 %v12758_v11  ;;  %7141 = vmatpush1.bf16.msra.mxu1 %v12760_v12  ;;  %v12870_v11 = vcombine.low %v1076_v62, %v1084_v63  ;;  %v12872_v12 = vcombine.low %v1077_v1, %v1085_v2  ;;  %v1188_v62 = vld [vmem:[#allocation5 + $0x1910] sm:$0xff]  ;;  %v1189_v1 = vld [vmem:[#allocation5 + $0x1918] sm:$0xff] }
 0x227   : > { %6970 = vmatprep.subr.bf16.mxu0 %v12775_v13  ;;  %7142 = vmatprep.subr.bf16.mxu1 %v12777_v14  ;;  %v12887_v13 = vcombine.high %v1092_v7, %v1100_v8  ;;  %v12889_v14 = vcombine.high %v1093_v9, %v1101_v10  ;;  %v1196_v63 = vld [vmem:[#allocation5 + $0x1950] sm:$0xff]  ;;  %v1197_v2 = vld [vmem:[#allocation5 + $0x1958] sm:$0xff] }
 0x22a   : > { %6971 = vmatpush1.bf16.msra.mxu0 %v12774_v20  ;;  %7143 = vmatpush1.bf16.msra.mxu1 %v12776_v21  ;;  %v12886_v20 = vcombine.low %v1092_v7, %v1100_v8  ;;  %v12888_v21 = vcombine.low %v1093_v9, %v1101_v10  ;;  %v1204_v7 = vld [vmem:[#allocation5 + $0x1990] sm:$0xff]  ;;  %v1205_v9 = vld [vmem:[#allocation5 + $0x1998] sm:$0xff] }
 0x22b   : > { %6972 = vmatprep.subr.bf16.mxu0 %v12791_v22  ;;  %7144 = vmatprep.subr.bf16.mxu1 %v12793_v23  ;;  %v12903_v22 = vcombine.high %v1108_v15, %v1116_v17  ;;  %v12905_v23 = vcombine.high %v1109_v18, %v1117_v19  ;;  %v1212_v8 = vld [vmem:[#allocation5 + $0x19d0] sm:$0xff]  ;;  %v1213_v10 = vld [vmem:[#allocation5 + $0x19d8] sm:$0xff] }
 0x22e   : > { %6973 = vmatpush1.bf16.msra.mxu0 %v12790_v30  ;;  %7145 = vmatpush1.bf16.msra.mxu1 %v12792_v31  ;;  %v12902_v30 = vcombine.low %v1108_v15, %v1116_v17  ;;  %v12904_v31 = vcombine.low %v1109_v18, %v1117_v19  ;;  %v1220_v15 = vld [vmem:[#allocation5 + $0x1a10] sm:$0xff]  ;;  %v1221_v18 = vld [vmem:[#allocation5 + $0x1a18] sm:$0xff] }
 0x22f   : > { %6974 = vmatprep.subr.bf16.mxu0 %v12807_v32  ;;  %7146 = vmatprep.subr.bf16.mxu1 %v12809_v33  ;;  %v12919_v32 = vcombine.high %v1124_v24, %v1132_v25  ;;  %v12921_v33 = vcombine.high %v1125_v27, %v1133_v29  ;;  %v1228_v17 = vld [vmem:[#allocation5 + $0x1a50] sm:$0xff]  ;;  %v1229_v19 = vld [vmem:[#allocation5 + $0x1a58] sm:$0xff] }
 0x232   : > { %6975 = vmatpush1.bf16.msra.mxu0 %v12806_v39  ;;  %7147 = vmatpush1.bf16.msra.mxu1 %v12808_v40  ;;  %v12918_v39 = vcombine.low %v1124_v24, %v1132_v25  ;;  %v12920_v40 = vcombine.low %v1125_v27, %v1133_v29  ;;  %v1236_v24 = vld [vmem:[#allocation5 + $0x1a90] sm:$0xff]  ;;  %v1237_v27 = vld [vmem:[#allocation5 + $0x1a98] sm:$0xff] }
 0x233   : > { %6976 = vmatprep.subr.bf16.mxu0 %v12823_v41  ;;  %7148 = vmatprep.subr.bf16.mxu1 %v12825_v42  ;;  %v12935_v41 = vcombine.high %v1140_v34, %v1148_v35  ;;  %v12937_v42 = vcombine.high %v1141_v36, %v1149_v37  ;;  %v1244_v25 = vld [vmem:[#allocation5 + $0x1ad0] sm:$0xff]  ;;  %v1245_v29 = vld [vmem:[#allocation5 + $0x1ad8] sm:$0xff] }
 0x236   : > { %6977 = vmatpush1.bf16.msra.mxu0 %v12822_v48  ;;  %7149 = vmatpush1.bf16.msra.mxu1 %v12824_v49  ;;  %v12934_v48 = vcombine.low %v1140_v34, %v1148_v35  ;;  %v12936_v49 = vcombine.low %v1141_v36, %v1149_v37  ;;  %v1252_v34 = vld [vmem:[#allocation5 + $0x1b10] sm:$0xff]  ;;  %v1253_v36 = vld [vmem:[#allocation5 + $0x1b18] sm:$0xff] }
 0x237   : > { %6978 = vmatprep.subr.bf16.mxu0 %v12839_v50  ;;  %7150 = vmatprep.subr.bf16.mxu1 %v12841_v51  ;;  %v12951_v50 = vcombine.high %v1156_v43, %v1164_v45  ;;  %v12953_v51 = vcombine.high %v1157_v46, %v1165_v47  ;;  %v1260_v35 = vld [vmem:[#allocation5 + $0x1b50] sm:$0xff]  ;;  %v1261_v37 = vld [vmem:[#allocation5 + $0x1b58] sm:$0xff] }
 0x23a   : > { %6979 = vmatpush1.bf16.msra.mxu0 %v12838_v57  ;;  %7151 = vmatpush1.bf16.msra.mxu1 %v12840_v58  ;;  %v12950_v57 = vcombine.low %v1156_v43, %v1164_v45  ;;  %v12952_v58 = vcombine.low %v1157_v46, %v1165_v47  ;;  %v13049_v43 = vcombine.high %v1253_v36, %v1261_v37  ;;  %v1268_v45 = vld [vmem:[#allocation5 + $0x1b90] sm:$0xff] }
 0x23b   : > { %6980 = vmatprep.subr.bf16.mxu0 %v12855_v60  ;;  %7152 = vmatprep.subr.bf16.mxu1 %v12857_v61  ;;  %v12967_v60 = vcombine.high %v1172_v52, %v1180_v53  ;;  %v12969_v61 = vcombine.high %v1173_v55, %v1181_v56  ;;  %v1276_v46 = vld [vmem:[#allocation5 + $0x1bd0] sm:$0xff] }
 0x23e   : > { %6981 = vmatpush1.bf16.msra.mxu0 %v12854_v3  ;;  %7153 = vmatpush1.bf16.msra.mxu1 %v12856_v4  ;;  %v12966_v3 = vcombine.low %v1172_v52, %v1180_v53  ;;  %v12968_v4 = vcombine.low %v1173_v55, %v1181_v56  ;;  %v13046_v53 = vcombine.low %v1252_v34, %v1260_v35 }
 0x23f   : > { %6982 = vmatprep.subr.bf16.mxu0 %v12871_v5  ;;  %7154 = vmatprep.subr.bf16.mxu1 %v12873_v6  ;;  %v12983_v5 = vcombine.high %v1188_v62, %v1196_v63  ;;  %v12985_v6 = vcombine.high %v1189_v1, %v1197_v2 }
 0x242   : > { %6983 = vmatpush1.bf16.msra.mxu0 %v12870_v11  ;;  %7155 = vmatpush1.bf16.msra.mxu1 %v12872_v12  ;;  %v12982_v11 = vcombine.low %v1188_v62, %v1196_v63  ;;  %v12984_v12 = vcombine.low %v1189_v1, %v1197_v2  ;;  %v1284_v62 = vld [vmem:[#allocation5 + $0x1c10] sm:$0xff]  ;;  %v1285_v1 = vld [vmem:[#allocation5 + $0x1c18] sm:$0xff] }
 0x243   : > { %6984 = vmatprep.subr.bf16.mxu0 %v12887_v13  ;;  %7156 = vmatprep.subr.bf16.mxu1 %v12889_v14  ;;  %v12999_v13 = vcombine.high %v1204_v7, %v1212_v8  ;;  %v13001_v14 = vcombine.high %v1205_v9, %v1213_v10  ;;  %v1292_v63 = vld [vmem:[#allocation5 + $0x1c50] sm:$0xff]  ;;  %v1293_v2 = vld [vmem:[#allocation5 + $0x1c58] sm:$0xff] }
 0x246   : > { %6985 = vmatpush1.bf16.msra.mxu0 %v12886_v20  ;;  %7157 = vmatpush1.bf16.msra.mxu1 %v12888_v21  ;;  %v12998_v20 = vcombine.low %v1204_v7, %v1212_v8  ;;  %v13000_v21 = vcombine.low %v1205_v9, %v1213_v10  ;;  %v1300_v7 = vld [vmem:[#allocation5 + $0x1c90] sm:$0xff]  ;;  %v1301_v9 = vld [vmem:[#allocation5 + $0x1c98] sm:$0xff] }
 0x247   : > { %6986 = vmatprep.subr.bf16.mxu0 %v12903_v22  ;;  %7158 = vmatprep.subr.bf16.mxu1 %v12905_v23  ;;  %v13015_v22 = vcombine.high %v1220_v15, %v1228_v17  ;;  %v13017_v23 = vcombine.high %v1221_v18, %v1229_v19  ;;  %v1308_v8 = vld [vmem:[#allocation5 + $0x1cd0] sm:$0xff]  ;;  %v1309_v10 = vld [vmem:[#allocation5 + $0x1cd8] sm:$0xff] }
 0x24a   : > { %6987 = vmatpush1.bf16.msra.mxu0 %v12902_v30  ;;  %7159 = vmatpush1.bf16.msra.mxu1 %v12904_v31  ;;  %v13014_v30 = vcombine.low %v1220_v15, %v1228_v17  ;;  %v13016_v31 = vcombine.low %v1221_v18, %v1229_v19  ;;  %v1316_v15 = vld [vmem:[#allocation5 + $0x1d10] sm:$0xff]  ;;  %v1317_v18 = vld [vmem:[#allocation5 + $0x1d18] sm:$0xff] }
 0x24b   : > { %6988 = vmatprep.subr.bf16.mxu0 %v12919_v32  ;;  %7160 = vmatprep.subr.bf16.mxu1 %v12921_v33  ;;  %v13031_v32 = vcombine.high %v1236_v24, %v1244_v25  ;;  %v13033_v33 = vcombine.high %v1237_v27, %v1245_v29  ;;  %v1324_v17 = vld [vmem:[#allocation5 + $0x1d50] sm:$0xff]  ;;  %v1325_v19 = vld [vmem:[#allocation5 + $0x1d58] sm:$0xff] }
 0x24e   : > { %6989 = vmatpush1.bf16.msra.mxu0 %v12918_v39  ;;  %7161 = vmatpush1.bf16.msra.mxu1 %v12920_v40  ;;  %v13030_v39 = vcombine.low %v1236_v24, %v1244_v25  ;;  %v13032_v40 = vcombine.low %v1237_v27, %v1245_v29  ;;  %v1332_v24 = vld [vmem:[#allocation5 + $0x1d90] sm:$0xff]  ;;  %v1333_v27 = vld [vmem:[#allocation5 + $0x1d98] sm:$0xff] }
 0x24f   : > { %6990 = vmatprep.subr.bf16.mxu0 %v12935_v41  ;;  %7162 = vmatprep.subr.bf16.mxu1 %v12937_v42  ;;  %v13047_v41 = vcombine.high %v1252_v34, %v1260_v35  ;;  %v1340_v25 = vld [vmem:[#allocation5 + $0x1dd0] sm:$0xff]  ;;  %v1341_v29 = vld [vmem:[#allocation5 + $0x1dd8] sm:$0xff] }
 0x250   : > { %v1348_v34 = vld [vmem:[#allocation5 + $0x1e10] sm:$0xff] }
 0x251   : > { %v1356_v35 = vld [vmem:[#allocation5 + $0x1e50] sm:$0xff] }
 0x252   : > { %6991 = vmatpush1.bf16.msra.mxu0 %v12934_v48  ;;  %7163 = vmatpush1.bf16.msra.mxu1 %v12936_v49  ;;  %v1269_v49 = vld [vmem:[#allocation5 + $0x1b98] sm:$0xff] }
 0x253   : > { %7003 = vmatprep.subr.bf16.mxu0 %v12951_v50  ;;  %7175 = vmatprep.subr.bf16.mxu1 %v12953_v51  ;;  %v1277_v50 = vld [vmem:[#allocation5 + $0x1bd8] sm:$0xff] }
 0x255   : > { %6993 = vmatmul.mubr.bf16.vlgmr.msra.gmra.mrb[4].mxu0 %v14649_v44  ;;  %7165 = vmatmul.mubr.bf16.vlgmr.msra.gmra.mrb[4].mxu1 %v14649_v44 }
 0x256   : > { %7004 = vmatpush1.bf16.msra.mxu0 %v12950_v57  ;;  %7176 = vmatpush1.bf16.msra.mxu1 %v12952_v58  ;;  %v13048_v57 = vcombine.low %v1253_v36, %v1261_v37  ;;  %v13063_v58 = vcombine.high %v1268_v45, %v1276_v46  ;;  %v1349_v36 = vld [vmem:[#allocation5 + $0x1e18] sm:$0xff] }
 0x257   : > { %7005 = vmatprep.subr.bf16.mxu0 %v12967_v60  ;;  %7177 = vmatprep.subr.bf16.mxu1 %v12969_v61  ;;  %v13065_v61 = vcombine.high %v1269_v49, %v1277_v50  ;;  %v1357_v37 = vld [vmem:[#allocation5 + $0x1e58] sm:$0xff] }
 0x258   : > { %7035 = vmatprep.mubr.bf16.mxu0 %v14651_v54  ;;  %7207 = vmatprep.mubr.bf16.mxu1 %v14651_v54 }
 0x25a   : > { %7006 = vmatpush1.bf16.msra.mxu0 %v12966_v3  ;;  %7178 = vmatpush1.bf16.msra.mxu1 %v12968_v4  ;;  %v13062_v3 = vcombine.low %v1268_v45, %v1276_v46  ;;  %v13064_v4 = vcombine.low %v1269_v49, %v1277_v50  ;;  %v1364_v45 = vld [vmem:[#allocation5 + $0x1e90] sm:$0xff]  ;;  %v1365_v49 = vld [vmem:[#allocation5 + $0x1e98] sm:$0xff] }
 0x25b   : > { %7007 = vmatprep.subr.bf16.mxu0 %v12983_v5  ;;  %7179 = vmatprep.subr.bf16.mxu1 %v12985_v6  ;;  %v13079_v5 = vcombine.high %v1284_v62, %v1292_v63  ;;  %v13081_v6 = vcombine.high %v1285_v1, %v1293_v2  ;;  %v1372_v46 = vld [vmem:[#allocation5 + $0x1ed0] sm:$0xff]  ;;  %v1373_v50 = vld [vmem:[#allocation5 + $0x1ed8] sm:$0xff] }
 0x25e   : > { %7008 = vmatpush1.bf16.msra.mxu0 %v12982_v11  ;;  %7180 = vmatpush1.bf16.msra.mxu1 %v12984_v12  ;;  %v13078_v11 = vcombine.low %v1284_v62, %v1292_v63  ;;  %v13080_v12 = vcombine.low %v1285_v1, %v1293_v2  ;;  %v1380_v62 = vld [vmem:[#allocation5 + $0x1f10] sm:$0xff]  ;;  %v1381_v1 = vld [vmem:[#allocation5 + $0x1f18] sm:$0xff] }
 0x25f   : > { %7009 = vmatprep.subr.bf16.mxu0 %v12999_v13  ;;  %7181 = vmatprep.subr.bf16.mxu1 %v13001_v14  ;;  %v13095_v13 = vcombine.high %v1300_v7, %v1308_v8  ;;  %v13097_v14 = vcombine.high %v1301_v9, %v1309_v10  ;;  %v1388_v63 = vld [vmem:[#allocation5 + $0x1f50] sm:$0xff]  ;;  %v1389_v2 = vld [vmem:[#allocation5 + $0x1f58] sm:$0xff] }
 0x262   : > { %7010 = vmatpush1.bf16.msra.mxu0 %v12998_v20  ;;  %7182 = vmatpush1.bf16.msra.mxu1 %v13000_v21  ;;  %v13094_v20 = vcombine.low %v1300_v7, %v1308_v8  ;;  %v13096_v21 = vcombine.low %v1301_v9, %v1309_v10  ;;  %v1396_v7 = vld [vmem:[#allocation5 + $0x1f90] sm:$0xff]  ;;  %v1397_v9 = vld [vmem:[#allocation5 + $0x1f98] sm:$0xff] }
 0x263   : > { %7011 = vmatprep.subr.bf16.mxu0 %v13015_v22  ;;  %7183 = vmatprep.subr.bf16.mxu1 %v13017_v23  ;;  %v13111_v22 = vcombine.high %v1316_v15, %v1324_v17  ;;  %v13113_v23 = vcombine.high %v1317_v18, %v1325_v19  ;;  %v1404_v8 = vld [vmem:[#allocation5 + $0x1fd0] sm:$0xff]  ;;  %v1405_v10 = vld [vmem:[#allocation5 + $0x1fd8] sm:$0xff] }
 0x266   : > { %7012 = vmatpush1.bf16.msra.mxu0 %v13014_v30  ;;  %7184 = vmatpush1.bf16.msra.mxu1 %v13016_v31  ;;  %v13110_v30 = vcombine.low %v1316_v15, %v1324_v17  ;;  %v13112_v31 = vcombine.low %v1317_v18, %v1325_v19  ;;  %v390_v15 = vld [vmem:[#allocation5 + $0x20] sm:$0xff]  ;;  %v391_v18 = vld [vmem:[#allocation5 + $0x28] sm:$0xff] }
 0x267   : > { %7013 = vmatprep.subr.bf16.mxu0 %v13031_v32  ;;  %7185 = vmatprep.subr.bf16.mxu1 %v13033_v33  ;;  %v13127_v32 = vcombine.high %v1332_v24, %v1340_v25  ;;  %v13129_v33 = vcombine.high %v1333_v27, %v1341_v29  ;;  %v398_v17 = vld [vmem:[#allocation5 + $0x60] sm:$0xff]  ;;  %v399_v19 = vld [vmem:[#allocation5 + $0x68] sm:$0xff] }
 0x268   : > { %v14675_v42 = vpop.f32.mrb[0].mxu0  ;;  %v14677_v47 = vpop.f32.mrb[0].mxu1 }
 0x269   : > { %v14679_v48 = vpop.f32.mrb[1].mxu0  ;;  %v14681_v51 = vpop.f32.mrb[1].mxu1 }
 0x26a   : > { %v14683_v52 = vpop.f32.mrb[2].mxu0  ;;  %7014 = vmatpush1.bf16.msra.mxu0 %v13030_v39  ;;  %v14685_v55 = vpop.f32.mrb[2].mxu1  ;;  %7186 = vmatpush1.bf16.msra.mxu1 %v13032_v40  ;;  %v13126_v39 = vcombine.low %v1332_v24, %v1340_v25  ;;  %v13128_v40 = vcombine.low %v1333_v27, %v1341_v29  ;;  %v406_v24 = vld [vmem:[#allocation5 + $0xa0] sm:$0xff]  ;;  %v407_v27 = vld [vmem:[#allocation5 + $0xa8] sm:$0xff] }
 0x26b   : > { %v14687_v56 = vpop.f32.mrb[3].mxu0  ;;  %7015 = vmatprep.subr.bf16.mxu0 %v13047_v41  ;;  %v14689_v60 = vpop.f32.mrb[3].mxu1  ;;  %7187 = vmatprep.subr.bf16.mxu1 %v13049_v43  ;;  %v13143_v41 = vcombine.high %v1348_v34, %v1356_v35  ;;  %v13145_v43 = vcombine.high %v1349_v36, %v1357_v37  ;;  %v414_v25 = vld [vmem:[#allocation5 + $0xe0] sm:$0xff]  ;;  %v415_v29 = vld [vmem:[#allocation5 + $0xe8] sm:$0xff] }
 0x26e   : > { %7016 = vmatpush1.bf16.msra.mxu0 %v13046_v53  ;;  %7188 = vmatpush1.bf16.msra.mxu1 %v13048_v57  ;;  %v13142_v53 = vcombine.low %v1348_v34, %v1356_v35  ;;  %v13144_v57 = vcombine.low %v1349_v36, %v1357_v37  ;;  %v422_v34 = vld [vmem:[#allocation5 + $0x120] sm:$0xff]  ;;  %v423_v36 = vld [vmem:[#allocation5 + $0x128] sm:$0xff] }
 0x26f   : > { %7017 = vmatprep.subr.bf16.mxu0 %v13063_v58  ;;  %7189 = vmatprep.subr.bf16.mxu1 %v13065_v61  ;;  %v13159_v58 = vcombine.high %v1364_v45, %v1372_v46  ;;  %v13161_v61 = vcombine.high %v1365_v49, %v1373_v50  ;;  %v430_v35 = vld [vmem:[#allocation5 + $0x160] sm:$0xff]  ;;  %v431_v37 = vld [vmem:[#allocation5 + $0x168] sm:$0xff] }
 0x272   : > { %7018 = vmatpush1.bf16.msra.mxu0 %v13062_v3  ;;  %7190 = vmatpush1.bf16.msra.mxu1 %v13064_v4  ;;  %v13158_v3 = vcombine.low %v1364_v45, %v1372_v46  ;;  %v13160_v4 = vcombine.low %v1365_v49, %v1373_v50  ;;  %v438_v45 = vld [vmem:[#allocation5 + $0x1a0] sm:$0xff]  ;;  %v439_v49 = vld [vmem:[#allocation5 + $0x1a8] sm:$0xff] }
 0x273   : > { %7019 = vmatprep.subr.bf16.mxu0 %v13079_v5  ;;  %7191 = vmatprep.subr.bf16.mxu1 %v13081_v6  ;;  %v13175_v5 = vcombine.high %v1380_v62, %v1388_v63  ;;  %v13177_v6 = vcombine.high %v1381_v1, %v1389_v2  ;;  %v446_v46 = vld [vmem:[#allocation5 + $0x1e0] sm:$0xff]  ;;  %v447_v50 = vld [vmem:[#allocation5 + $0x1e8] sm:$0xff] }
 0x276   : > { %7020 = vmatpush1.bf16.msra.mxu0 %v13078_v11  ;;  %7192 = vmatpush1.bf16.msra.mxu1 %v13080_v12  ;;  %v13174_v11 = vcombine.low %v1380_v62, %v1388_v63  ;;  %v13176_v12 = vcombine.low %v1381_v1, %v1389_v2  ;;  %v454_v62 = vld [vmem:[#allocation5 + $0x220] sm:$0xff]  ;;  %v455_v1 = vld [vmem:[#allocation5 + $0x228] sm:$0xff] }
 0x277   : > { %7021 = vmatprep.subr.bf16.mxu0 %v13095_v13  ;;  %7193 = vmatprep.subr.bf16.mxu1 %v13097_v14  ;;  %v13191_v13 = vcombine.high %v1396_v7, %v1404_v8  ;;  %v13193_v14 = vcombine.high %v1397_v9, %v1405_v10  ;;  %v462_v63 = vld [vmem:[#allocation5 + $0x260] sm:$0xff]  ;;  %v463_v2 = vld [vmem:[#allocation5 + $0x268] sm:$0xff] }
 0x27a   : > { %7022 = vmatpush1.bf16.msra.mxu0 %v13094_v20  ;;  %7194 = vmatpush1.bf16.msra.mxu1 %v13096_v21  ;;  %v13190_v20 = vcombine.low %v1396_v7, %v1404_v8  ;;  %v13192_v21 = vcombine.low %v1397_v9, %v1405_v10  ;;  %v470_v7 = vld [vmem:[#allocation5 + $0x2a0] sm:$0xff]  ;;  %v471_v9 = vld [vmem:[#allocation5 + $0x2a8] sm:$0xff] }
 0x27b   : > { %7023 = vmatprep.subr.bf16.mxu0 %v13111_v22  ;;  %7195 = vmatprep.subr.bf16.mxu1 %v13113_v23  ;;  %v12187_v22 = vcombine.high %v390_v15, %v398_v17  ;;  %v12189_v23 = vcombine.high %v391_v18, %v399_v19  ;;  %v478_v8 = vld [vmem:[#allocation5 + $0x2e0] sm:$0xff]  ;;  %v479_v10 = vld [vmem:[#allocation5 + $0x2e8] sm:$0xff] }
 0x27e   : > { %7024 = vmatpush1.bf16.msra.mxu0 %v13110_v30  ;;  %7196 = vmatpush1.bf16.msra.mxu1 %v13112_v31  ;;  %v12186_v30 = vcombine.low %v390_v15, %v398_v17  ;;  %v12188_v31 = vcombine.low %v391_v18, %v399_v19  ;;  %v486_v15 = vld [vmem:[#allocation5 + $0x320] sm:$0xff]  ;;  %v487_v18 = vld [vmem:[#allocation5 + $0x328] sm:$0xff] }
 0x27f   : > { %7025 = vmatprep.subr.bf16.mxu0 %v13127_v32  ;;  %7197 = vmatprep.subr.bf16.mxu1 %v13129_v33  ;;  %v12203_v32 = vcombine.high %v406_v24, %v414_v25  ;;  %v12205_v33 = vcombine.high %v407_v27, %v415_v29  ;;  %v494_v17 = vld [vmem:[#allocation5 + $0x360] sm:$0xff]  ;;  %v495_v19 = vld [vmem:[#allocation5 + $0x368] sm:$0xff] }
 0x282   : > { %7026 = vmatpush1.bf16.msra.mxu0 %v13126_v39  ;;  %7198 = vmatpush1.bf16.msra.mxu1 %v13128_v40  ;;  %v12202_v39 = vcombine.low %v406_v24, %v414_v25  ;;  %v12204_v40 = vcombine.low %v407_v27, %v415_v29  ;;  %v502_v24 = vld [vmem:[#allocation5 + $0x3a0] sm:$0xff]  ;;  %v503_v27 = vld [vmem:[#allocation5 + $0x3a8] sm:$0xff] }
 0x283   : > { %7027 = vmatprep.subr.bf16.mxu0 %v13143_v41  ;;  %7199 = vmatprep.subr.bf16.mxu1 %v13145_v43  ;;  %v12219_v41 = vcombine.high %v422_v34, %v430_v35  ;;  %v12221_v43 = vcombine.high %v423_v36, %v431_v37  ;;  %v510_v25 = vld [vmem:[#allocation5 + $0x3e0] sm:$0xff]  ;;  %v511_v29 = vld [vmem:[#allocation5 + $0x3e8] sm:$0xff] }
 0x286   : > { %7028 = vmatpush1.bf16.msra.mxu0 %v13142_v53  ;;  %7200 = vmatpush1.bf16.msra.mxu1 %v13144_v57  ;;  %v12218_v53 = vcombine.low %v422_v34, %v430_v35  ;;  %v12220_v57 = vcombine.low %v423_v36, %v431_v37  ;;  %v518_v34 = vld [vmem:[#allocation5 + $0x420] sm:$0xff]  ;;  %v519_v36 = vld [vmem:[#allocation5 + $0x428] sm:$0xff] }
 0x287   : > { %7029 = vmatprep.subr.bf16.mxu0 %v13159_v58  ;;  %7201 = vmatprep.subr.bf16.mxu1 %v13161_v61  ;;  %v12235_v58 = vcombine.high %v438_v45, %v446_v46  ;;  %v12237_v61 = vcombine.high %v439_v49, %v447_v50  ;;  %v526_v35 = vld [vmem:[#allocation5 + $0x460] sm:$0xff]  ;;  %v527_v37 = vld [vmem:[#allocation5 + $0x468] sm:$0xff] }
 0x28a   : > { %7030 = vmatpush1.bf16.msra.mxu0 %v13158_v3  ;;  %7202 = vmatpush1.bf16.msra.mxu1 %v13160_v4  ;;  %v12234_v3 = vcombine.low %v438_v45, %v446_v46  ;;  %v12236_v4 = vcombine.low %v439_v49, %v447_v50  ;;  %v534_v45 = vld [vmem:[#allocation5 + $0x4a0] sm:$0xff]  ;;  %v535_v49 = vld [vmem:[#allocation5 + $0x4a8] sm:$0xff] }
 0x28b   : > { %7031 = vmatprep.subr.bf16.mxu0 %v13175_v5  ;;  %7203 = vmatprep.subr.bf16.mxu1 %v13177_v6  ;;  %v12251_v5 = vcombine.high %v454_v62, %v462_v63  ;;  %v12253_v6 = vcombine.high %v455_v1, %v463_v2  ;;  %v542_v46 = vld [vmem:[#allocation5 + $0x4e0] sm:$0xff]  ;;  %v543_v50 = vld [vmem:[#allocation5 + $0x4e8] sm:$0xff] }
 0x28e   : > { %7032 = vmatpush1.bf16.msra.mxu0 %v13174_v11  ;;  %7204 = vmatpush1.bf16.msra.mxu1 %v13176_v12  ;;  %v12250_v11 = vcombine.low %v454_v62, %v462_v63  ;;  %v12252_v12 = vcombine.low %v455_v1, %v463_v2  ;;  %v550_v62 = vld [vmem:[#allocation5 + $0x520] sm:$0xff]  ;;  %v551_v1 = vld [vmem:[#allocation5 + $0x528] sm:$0xff] }
 0x28f   : > { %7033 = vmatprep.subr.bf16.mxu0 %v13191_v13  ;;  %7205 = vmatprep.subr.bf16.mxu1 %v13193_v14  ;;  %v12267_v13 = vcombine.high %v470_v7, %v478_v8  ;;  %v12269_v14 = vcombine.high %v471_v9, %v479_v10  ;;  %v558_v63 = vld [vmem:[#allocation5 + $0x560] sm:$0xff]  ;;  %v559_v2 = vld [vmem:[#allocation5 + $0x568] sm:$0xff] }
 0x292   : > { %7034 = vmatpush1.bf16.msra.mxu0 %v13190_v20  ;;  %7206 = vmatpush1.bf16.msra.mxu1 %v13192_v21  ;;  %v12266_v20 = vcombine.low %v470_v7, %v478_v8  ;;  %v12268_v21 = vcombine.low %v471_v9, %v479_v10  ;;  %v566_v7 = vld [vmem:[#allocation5 + $0x5a0] sm:$0xff]  ;;  %v567_v9 = vld [vmem:[#allocation5 + $0x5a8] sm:$0xff] }
 0x293   : > { %7218 = vmatprep.subr.bf16.mxu0 %v12187_v22  ;;  %7390 = vmatprep.subr.bf16.mxu1 %v12189_v23  ;;  %v12283_v22 = vcombine.high %v486_v15, %v494_v17  ;;  %v12285_v23 = vcombine.high %v487_v18, %v495_v19  ;;  %v574_v8 = vld [vmem:[#allocation5 + $0x5e0] sm:$0xff]  ;;  %v575_v10 = vld [vmem:[#allocation5 + $0x5e8] sm:$0xff] }
 0x295   : > { %7036 = vmatmul.mubr.bf16.vlgmr.msra.gmra.mrb[4].mxu0 %v14657_v0  ;;  %7208 = vmatmul.mubr.bf16.vlgmr.msra.gmra.mrb[4].mxu1 %v14657_v0 }
 0x296   : > { %7219 = vmatpush1.bf16.msra.mxu0 %v12186_v30  ;;  %7391 = vmatpush1.bf16.msra.mxu1 %v12188_v31  ;;  %v12282_v30 = vcombine.low %v486_v15, %v494_v17  ;;  %v12284_v31 = vcombine.low %v487_v18, %v495_v19  ;;  %v582_v15 = vld [vmem:[#allocation5 + $0x620] sm:$0xff]  ;;  %v583_v18 = vld [vmem:[#allocation5 + $0x628] sm:$0xff] }
 0x297   : > { %7220 = vmatprep.subr.bf16.mxu0 %v12203_v32  ;;  %7392 = vmatprep.subr.bf16.mxu1 %v12205_v33  ;;  %v12299_v32 = vcombine.high %v502_v24, %v510_v25  ;;  %v12301_v33 = vcombine.high %v503_v27, %v511_v29  ;;  %v590_v17 = vld [vmem:[#allocation5 + $0x660] sm:$0xff]  ;;  %v591_v19 = vld [vmem:[#allocation5 + $0x668] sm:$0xff] }
 0x298   : > { %7250 = vmatprep.mubr.bf16.mxu0 %v14629_v59  ;;  %7422 = vmatprep.mubr.bf16.mxu1 %v14629_v59 }
 0x29a   : > { %7221 = vmatpush1.bf16.msra.mxu0 %v12202_v39  ;;  %7393 = vmatpush1.bf16.msra.mxu1 %v12204_v40  ;;  %v12298_v39 = vcombine.low %v502_v24, %v510_v25  ;;  %v12300_v40 = vcombine.low %v503_v27, %v511_v29  ;;  %v598_v24 = vld [vmem:[#allocation5 + $0x6a0] sm:$0xff]  ;;  %v599_v27 = vld [vmem:[#allocation5 + $0x6a8] sm:$0xff] }
 0x29b   : > { %7222 = vmatprep.subr.bf16.mxu0 %v12219_v41  ;;  %7394 = vmatprep.subr.bf16.mxu1 %v12221_v43  ;;  %v12315_v41 = vcombine.high %v518_v34, %v526_v35  ;;  %v12317_v43 = vcombine.high %v519_v36, %v527_v37  ;;  %v606_v25 = vld [vmem:[#allocation5 + $0x6e0] sm:$0xff]  ;;  %v607_v29 = vld [vmem:[#allocation5 + $0x6e8] sm:$0xff] }
 0x29e   : > { %7223 = vmatpush1.bf16.msra.mxu0 %v12218_v53  ;;  %7395 = vmatpush1.bf16.msra.mxu1 %v12220_v57  ;;  %v12314_v53 = vcombine.low %v518_v34, %v526_v35  ;;  %v12316_v57 = vcombine.low %v519_v36, %v527_v37  ;;  %v614_v34 = vld [vmem:[#allocation5 + $0x720] sm:$0xff]  ;;  %v615_v36 = vld [vmem:[#allocation5 + $0x728] sm:$0xff] }
 0x29f   : > { %7224 = vmatprep.subr.bf16.mxu0 %v12235_v58  ;;  %7396 = vmatprep.subr.bf16.mxu1 %v12237_v61  ;;  %v12331_v58 = vcombine.high %v534_v45, %v542_v46  ;;  %v12333_v61 = vcombine.high %v535_v49, %v543_v50  ;;  %v622_v35 = vld [vmem:[#allocation5 + $0x760] sm:$0xff]  ;;  %v623_v37 = vld [vmem:[#allocation5 + $0x768] sm:$0xff] }
 0x2a2   : > { %7225 = vmatpush1.bf16.msra.mxu0 %v12234_v3  ;;  %7397 = vmatpush1.bf16.msra.mxu1 %v12236_v4  ;;  %v12330_v3 = vcombine.low %v534_v45, %v542_v46  ;;  %v12332_v4 = vcombine.low %v535_v49, %v543_v50  ;;  %v630_v45 = vld [vmem:[#allocation5 + $0x7a0] sm:$0xff]  ;;  %v631_v49 = vld [vmem:[#allocation5 + $0x7a8] sm:$0xff] }
 0x2a3   : > { %7226 = vmatprep.subr.bf16.mxu0 %v12251_v5  ;;  %7398 = vmatprep.subr.bf16.mxu1 %v12253_v6  ;;  %v12347_v5 = vcombine.high %v550_v62, %v558_v63  ;;  %v12349_v6 = vcombine.high %v551_v1, %v559_v2  ;;  %v638_v46 = vld [vmem:[#allocation5 + $0x7e0] sm:$0xff]  ;;  %v639_v50 = vld [vmem:[#allocation5 + $0x7e8] sm:$0xff] }
 0x2a6   : > { %7227 = vmatpush1.bf16.msra.mxu0 %v12250_v11  ;;  %7399 = vmatpush1.bf16.msra.mxu1 %v12252_v12  ;;  %v12346_v11 = vcombine.low %v550_v62, %v558_v63  ;;  %v12348_v12 = vcombine.low %v551_v1, %v559_v2  ;;  %v646_v62 = vld [vmem:[#allocation5 + $0x820] sm:$0xff]  ;;  %v647_v1 = vld [vmem:[#allocation5 + $0x828] sm:$0xff] }
 0x2a7   : > { %7228 = vmatprep.subr.bf16.mxu0 %v12267_v13  ;;  %7400 = vmatprep.subr.bf16.mxu1 %v12269_v14  ;;  %v12363_v13 = vcombine.high %v566_v7, %v574_v8  ;;  %v12365_v14 = vcombine.high %v567_v9, %v575_v10  ;;  %v654_v63 = vld [vmem:[#allocation5 + $0x860] sm:$0xff]  ;;  %v655_v2 = vld [vmem:[#allocation5 + $0x868] sm:$0xff] }
 0x2aa   : > { %7229 = vmatpush1.bf16.msra.mxu0 %v12266_v20  ;;  %7401 = vmatpush1.bf16.msra.mxu1 %v12268_v21  ;;  %v12362_v20 = vcombine.low %v566_v7, %v574_v8  ;;  %v12364_v21 = vcombine.low %v567_v9, %v575_v10  ;;  %v662_v7 = vld [vmem:[#allocation5 + $0x8a0] sm:$0xff]  ;;  %v663_v9 = vld [vmem:[#allocation5 + $0x8a8] sm:$0xff] }
 0x2ab   : > { %7230 = vmatprep.subr.bf16.mxu0 %v12283_v22  ;;  %7402 = vmatprep.subr.bf16.mxu1 %v12285_v23  ;;  %v12379_v22 = vcombine.high %v582_v15, %v590_v17  ;;  %v12381_v23 = vcombine.high %v583_v18, %v591_v19  ;;  %v670_v8 = vld [vmem:[#allocation5 + $0x8e0] sm:$0xff]  ;;  %v671_v10 = vld [vmem:[#allocation5 + $0x8e8] sm:$0xff] }
 0x2ae   : > { %7231 = vmatpush1.bf16.msra.mxu0 %v12282_v30  ;;  %7403 = vmatpush1.bf16.msra.mxu1 %v12284_v31  ;;  %v12378_v30 = vcombine.low %v582_v15, %v590_v17  ;;  %v12380_v31 = vcombine.low %v583_v18, %v591_v19  ;;  %v678_v15 = vld [vmem:[#allocation5 + $0x920] sm:$0xff]  ;;  %v679_v18 = vld [vmem:[#allocation5 + $0x928] sm:$0xff] }
 0x2af   : > { %7232 = vmatprep.subr.bf16.mxu0 %v12299_v32  ;;  %7404 = vmatprep.subr.bf16.mxu1 %v12301_v33  ;;  %v12395_v32 = vcombine.high %v598_v24, %v606_v25  ;;  %v12397_v33 = vcombine.high %v599_v27, %v607_v29  ;;  %v686_v17 = vld [vmem:[#allocation5 + $0x960] sm:$0xff]  ;;  %v687_v19 = vld [vmem:[#allocation5 + $0x968] sm:$0xff] }
 0x2b2   : > { %7233 = vmatpush1.bf16.msra.mxu0 %v12298_v39  ;;  %7405 = vmatpush1.bf16.msra.mxu1 %v12300_v40  ;;  %v12394_v39 = vcombine.low %v598_v24, %v606_v25  ;;  %v12396_v40 = vcombine.low %v599_v27, %v607_v29  ;;  %v694_v24 = vld [vmem:[#allocation5 + $0x9a0] sm:$0xff]  ;;  %v695_v27 = vld [vmem:[#allocation5 + $0x9a8] sm:$0xff] }
 0x2b3   : > { %7234 = vmatprep.subr.bf16.mxu0 %v12315_v41  ;;  %7406 = vmatprep.subr.bf16.mxu1 %v12317_v43  ;;  %v12411_v41 = vcombine.high %v614_v34, %v622_v35  ;;  %v12413_v43 = vcombine.high %v615_v36, %v623_v37  ;;  %v702_v25 = vld [vmem:[#allocation5 + $0x9e0] sm:$0xff]  ;;  %v703_v29 = vld [vmem:[#allocation5 + $0x9e8] sm:$0xff] }
 0x2b6   : > { %7235 = vmatpush1.bf16.msra.mxu0 %v12314_v53  ;;  %7407 = vmatpush1.bf16.msra.mxu1 %v12316_v57  ;;  %v12410_v53 = vcombine.low %v614_v34, %v622_v35  ;;  %v12412_v57 = vcombine.low %v615_v36, %v623_v37  ;;  %v710_v34 = vld [vmem:[#allocation5 + $0xa20] sm:$0xff]  ;;  %v711_v36 = vld [vmem:[#allocation5 + $0xa28] sm:$0xff] }
 0x2b7   : > { %7236 = vmatprep.subr.bf16.mxu0 %v12331_v58  ;;  %7408 = vmatprep.subr.bf16.mxu1 %v12333_v61  ;;  %v12427_v58 = vcombine.high %v630_v45, %v638_v46  ;;  %v12429_v61 = vcombine.high %v631_v49, %v639_v50  ;;  %v718_v35 = vld [vmem:[#allocation5 + $0xa60] sm:$0xff]  ;;  %v719_v37 = vld [vmem:[#allocation5 + $0xa68] sm:$0xff] }
 0x2ba   : > { %7237 = vmatpush1.bf16.msra.mxu0 %v12330_v3  ;;  %7409 = vmatpush1.bf16.msra.mxu1 %v12332_v4  ;;  %v12426_v3 = vcombine.low %v630_v45, %v638_v46  ;;  %v12428_v4 = vcombine.low %v631_v49, %v639_v50  ;;  %v726_v45 = vld [vmem:[#allocation5 + $0xaa0] sm:$0xff]  ;;  %v727_v49 = vld [vmem:[#allocation5 + $0xaa8] sm:$0xff] }
 0x2bb   : > { %7238 = vmatprep.subr.bf16.mxu0 %v12347_v5  ;;  %7410 = vmatprep.subr.bf16.mxu1 %v12349_v6  ;;  %v12443_v5 = vcombine.high %v646_v62, %v654_v63  ;;  %v12445_v6 = vcombine.high %v647_v1, %v655_v2  ;;  %v734_v46 = vld [vmem:[#allocation5 + $0xae0] sm:$0xff]  ;;  %v735_v50 = vld [vmem:[#allocation5 + $0xae8] sm:$0xff] }
 0x2be   : > { %7239 = vmatpush1.bf16.msra.mxu0 %v12346_v11  ;;  %7411 = vmatpush1.bf16.msra.mxu1 %v12348_v12  ;;  %v12442_v11 = vcombine.low %v646_v62, %v654_v63  ;;  %v12444_v12 = vcombine.low %v647_v1, %v655_v2  ;;  %v742_v62 = vld [vmem:[#allocation5 + $0xb20] sm:$0xff]  ;;  %v743_v1 = vld [vmem:[#allocation5 + $0xb28] sm:$0xff] }
 0x2bf   : > { %7240 = vmatprep.subr.bf16.mxu0 %v12363_v13  ;;  %7412 = vmatprep.subr.bf16.mxu1 %v12365_v14  ;;  %v12459_v13 = vcombine.high %v662_v7, %v670_v8  ;;  %v12461_v14 = vcombine.high %v663_v9, %v671_v10  ;;  %v750_v63 = vld [vmem:[#allocation5 + $0xb60] sm:$0xff]  ;;  %v751_v2 = vld [vmem:[#allocation5 + $0xb68] sm:$0xff] }
 0x2c2   : > { %7241 = vmatpush1.bf16.msra.mxu0 %v12362_v20  ;;  %7413 = vmatpush1.bf16.msra.mxu1 %v12364_v21  ;;  %v12458_v20 = vcombine.low %v662_v7, %v670_v8  ;;  %v12460_v21 = vcombine.low %v663_v9, %v671_v10  ;;  %v758_v7 = vld [vmem:[#allocation5 + $0xba0] sm:$0xff]  ;;  %v759_v9 = vld [vmem:[#allocation5 + $0xba8] sm:$0xff] }
 0x2c3   : > { %7242 = vmatprep.subr.bf16.mxu0 %v12379_v22  ;;  %7414 = vmatprep.subr.bf16.mxu1 %v12381_v23  ;;  %v12475_v22 = vcombine.high %v678_v15, %v686_v17  ;;  %v12477_v23 = vcombine.high %v679_v18, %v687_v19  ;;  %v766_v8 = vld [vmem:[#allocation5 + $0xbe0] sm:$0xff]  ;;  %v767_v10 = vld [vmem:[#allocation5 + $0xbe8] sm:$0xff] }
 0x2c6   : > { %7243 = vmatpush1.bf16.msra.mxu0 %v12378_v30  ;;  %7415 = vmatpush1.bf16.msra.mxu1 %v12380_v31  ;;  %v12474_v30 = vcombine.low %v678_v15, %v686_v17  ;;  %v12476_v31 = vcombine.low %v679_v18, %v687_v19  ;;  %v774_v15 = vld [vmem:[#allocation5 + $0xc20] sm:$0xff]  ;;  %v775_v18 = vld [vmem:[#allocation5 + $0xc28] sm:$0xff] }
 0x2c7   : > { %7244 = vmatprep.subr.bf16.mxu0 %v12395_v32  ;;  %7416 = vmatprep.subr.bf16.mxu1 %v12397_v33  ;;  %v12491_v32 = vcombine.high %v694_v24, %v702_v25  ;;  %v12493_v33 = vcombine.high %v695_v27, %v703_v29  ;;  %v782_v17 = vld [vmem:[#allocation5 + $0xc60] sm:$0xff]  ;;  %v783_v19 = vld [vmem:[#allocation5 + $0xc68] sm:$0xff] }
 0x2ca   : > { %7245 = vmatpush1.bf16.msra.mxu0 %v12394_v39  ;;  %7417 = vmatpush1.bf16.msra.mxu1 %v12396_v40  ;;  %v12490_v39 = vcombine.low %v694_v24, %v702_v25  ;;  %v12492_v40 = vcombine.low %v695_v27, %v703_v29  ;;  %v790_v24 = vld [vmem:[#allocation5 + $0xca0] sm:$0xff]  ;;  %v791_v27 = vld [vmem:[#allocation5 + $0xca8] sm:$0xff] }
 0x2cb   : > { %7246 = vmatprep.subr.bf16.mxu0 %v12411_v41  ;;  %7418 = vmatprep.subr.bf16.mxu1 %v12413_v43  ;;  %v12507_v41 = vcombine.high %v710_v34, %v718_v35  ;;  %v12509_v43 = vcombine.high %v711_v36, %v719_v37  ;;  %v798_v25 = vld [vmem:[#allocation5 + $0xce0] sm:$0xff]  ;;  %v799_v29 = vld [vmem:[#allocation5 + $0xce8] sm:$0xff] }
 0x2ce   : > { %7247 = vmatpush1.bf16.msra.mxu0 %v12410_v53  ;;  %7419 = vmatpush1.bf16.msra.mxu1 %v12412_v57  ;;  %v12506_v53 = vcombine.low %v710_v34, %v718_v35  ;;  %v12508_v57 = vcombine.low %v711_v36, %v719_v37  ;;  %v806_v34 = vld [vmem:[#allocation5 + $0xd20] sm:$0xff]  ;;  %v807_v36 = vld [vmem:[#allocation5 + $0xd28] sm:$0xff] }
 0x2cf   : > { %7248 = vmatprep.subr.bf16.mxu0 %v12427_v58  ;;  %7420 = vmatprep.subr.bf16.mxu1 %v12429_v61  ;;  %v12523_v58 = vcombine.high %v726_v45, %v734_v46  ;;  %v12525_v61 = vcombine.high %v727_v49, %v735_v50  ;;  %v814_v35 = vld [vmem:[#allocation5 + $0xd60] sm:$0xff]  ;;  %v815_v37 = vld [vmem:[#allocation5 + $0xd68] sm:$0xff] }
 0x2d2   : > { %7249 = vmatpush1.bf16.msra.mxu0 %v12426_v3  ;;  %7421 = vmatpush1.bf16.msra.mxu1 %v12428_v4  ;;  %v12522_v3 = vcombine.low %v726_v45, %v734_v46  ;;  %v12524_v4 = vcombine.low %v727_v49, %v735_v50  ;;  %v822_v45 = vld [vmem:[#allocation5 + $0xda0] sm:$0xff]  ;;  %v823_v49 = vld [vmem:[#allocation5 + $0xda8] sm:$0xff] }
 0x2d3   : > { %7261 = vmatprep.subr.bf16.mxu0 %v12443_v5  ;;  %7433 = vmatprep.subr.bf16.mxu1 %v12445_v6  ;;  %v12539_v5 = vcombine.high %v742_v62, %v750_v63  ;;  %v12541_v6 = vcombine.high %v743_v1, %v751_v2  ;;  %v830_v46 = vld [vmem:[#allocation5 + $0xde0] sm:$0xff]  ;;  %v831_v50 = vld [vmem:[#allocation5 + $0xde8] sm:$0xff] }
 0x2d5   : > { %7251 = vmatmul.mubr.bf16.vlgmr.msra.gmra.mrb[8].mxu0 %v14633_v16  ;;  %7423 = vmatmul.mubr.bf16.vlgmr.msra.gmra.mrb[8].mxu1 %v14633_v16 }
 0x2d6   : > { %7262 = vmatpush1.bf16.msra.mxu0 %v12442_v11  ;;  %7434 = vmatpush1.bf16.msra.mxu1 %v12444_v12  ;;  %v12538_v11 = vcombine.low %v742_v62, %v750_v63  ;;  %v12540_v12 = vcombine.low %v743_v1, %v751_v2  ;;  %v838_v62 = vld [vmem:[#allocation5 + $0xe20] sm:$0xff]  ;;  %v839_v1 = vld [vmem:[#allocation5 + $0xe28] sm:$0xff] }
 0x2d7   : > { %7263 = vmatprep.subr.bf16.mxu0 %v12459_v13  ;;  %7435 = vmatprep.subr.bf16.mxu1 %v12461_v14  ;;  %v12555_v13 = vcombine.high %v758_v7, %v766_v8  ;;  %v12557_v14 = vcombine.high %v759_v9, %v767_v10  ;;  %v846_v63 = vld [vmem:[#allocation5 + $0xe60] sm:$0xff]  ;;  %v847_v2 = vld [vmem:[#allocation5 + $0xe68] sm:$0xff] }
 0x2d8   : > { %7293 = vmatprep.mubr.bf16.mxu0 %v14635_v26  ;;  %7465 = vmatprep.mubr.bf16.mxu1 %v14635_v26 }
 0x2da   : > { %7264 = vmatpush1.bf16.msra.mxu0 %v12458_v20  ;;  %7436 = vmatpush1.bf16.msra.mxu1 %v12460_v21  ;;  %v12554_v20 = vcombine.low %v758_v7, %v766_v8  ;;  %v12556_v21 = vcombine.low %v759_v9, %v767_v10  ;;  %v854_v7 = vld [vmem:[#allocation5 + $0xea0] sm:$0xff]  ;;  %v855_v9 = vld [vmem:[#allocation5 + $0xea8] sm:$0xff] }
 0x2db   : > { %7265 = vmatprep.subr.bf16.mxu0 %v12475_v22  ;;  %7437 = vmatprep.subr.bf16.mxu1 %v12477_v23  ;;  %v12571_v22 = vcombine.high %v774_v15, %v782_v17  ;;  %v12573_v23 = vcombine.high %v775_v18, %v783_v19  ;;  %v862_v8 = vld [vmem:[#allocation5 + $0xee0] sm:$0xff]  ;;  %v863_v10 = vld [vmem:[#allocation5 + $0xee8] sm:$0xff] }
 0x2de   : > { %7266 = vmatpush1.bf16.msra.mxu0 %v12474_v30  ;;  %7438 = vmatpush1.bf16.msra.mxu1 %v12476_v31  ;;  %v12570_v30 = vcombine.low %v774_v15, %v782_v17  ;;  %v12572_v31 = vcombine.low %v775_v18, %v783_v19  ;;  %v870_v15 = vld [vmem:[#allocation5 + $0xf20] sm:$0xff]  ;;  %v871_v18 = vld [vmem:[#allocation5 + $0xf28] sm:$0xff] }
 0x2df   : > { %7267 = vmatprep.subr.bf16.mxu0 %v12491_v32  ;;  %7439 = vmatprep.subr.bf16.mxu1 %v12493_v33  ;;  %v12587_v32 = vcombine.high %v790_v24, %v798_v25  ;;  %v12589_v33 = vcombine.high %v791_v27, %v799_v29  ;;  %v878_v17 = vld [vmem:[#allocation5 + $0xf60] sm:$0xff]  ;;  %v879_v19 = vld [vmem:[#allocation5 + $0xf68] sm:$0xff] }
 0x2e2   : > { %7268 = vmatpush1.bf16.msra.mxu0 %v12490_v39  ;;  %7440 = vmatpush1.bf16.msra.mxu1 %v12492_v40  ;;  %v12586_v39 = vcombine.low %v790_v24, %v798_v25  ;;  %v12588_v40 = vcombine.low %v791_v27, %v799_v29  ;;  %v886_v24 = vld [vmem:[#allocation5 + $0xfa0] sm:$0xff]  ;;  %v887_v27 = vld [vmem:[#allocation5 + $0xfa8] sm:$0xff] }
 0x2e3   : > { %7269 = vmatprep.subr.bf16.mxu0 %v12507_v41  ;;  %7441 = vmatprep.subr.bf16.mxu1 %v12509_v43  ;;  %v12603_v41 = vcombine.high %v806_v34, %v814_v35  ;;  %v12605_v43 = vcombine.high %v807_v36, %v815_v37  ;;  %v894_v25 = vld [vmem:[#allocation5 + $0xfe0] sm:$0xff]  ;;  %v895_v29 = vld [vmem:[#allocation5 + $0xfe8] sm:$0xff] }
 0x2e6   : > { %7270 = vmatpush1.bf16.msra.mxu0 %v12506_v53  ;;  %7442 = vmatpush1.bf16.msra.mxu1 %v12508_v57  ;;  %v12602_v53 = vcombine.low %v806_v34, %v814_v35  ;;  %v12604_v57 = vcombine.low %v807_v36, %v815_v37  ;;  %v902_v34 = vld [vmem:[#allocation5 + $0x1020] sm:$0xff]  ;;  %v903_v36 = vld [vmem:[#allocation5 + $0x1028] sm:$0xff] }
 0x2e7   : > { %7271 = vmatprep.subr.bf16.mxu0 %v12523_v58  ;;  %7443 = vmatprep.subr.bf16.mxu1 %v12525_v61  ;;  %v12619_v58 = vcombine.high %v822_v45, %v830_v46  ;;  %v12621_v61 = vcombine.high %v823_v49, %v831_v50  ;;  %v910_v35 = vld [vmem:[#allocation5 + $0x1060] sm:$0xff]  ;;  %v911_v37 = vld [vmem:[#allocation5 + $0x1068] sm:$0xff] }
 0x2ea   : > { %7272 = vmatpush1.bf16.msra.mxu0 %v12522_v3  ;;  %7444 = vmatpush1.bf16.msra.mxu1 %v12524_v4  ;;  %v12618_v3 = vcombine.low %v822_v45, %v830_v46  ;;  %v12620_v4 = vcombine.low %v823_v49, %v831_v50  ;;  %v918_v45 = vld [vmem:[#allocation5 + $0x10a0] sm:$0xff]  ;;  %v919_v49 = vld [vmem:[#allocation5 + $0x10a8] sm:$0xff] }
 0x2eb   : > { %7273 = vmatprep.subr.bf16.mxu0 %v12539_v5  ;;  %7445 = vmatprep.subr.bf16.mxu1 %v12541_v6  ;;  %v12635_v5 = vcombine.high %v838_v62, %v846_v63  ;;  %v12637_v6 = vcombine.high %v839_v1, %v847_v2  ;;  %v926_v46 = vld [vmem:[#allocation5 + $0x10e0] sm:$0xff]  ;;  %v927_v50 = vld [vmem:[#allocation5 + $0x10e8] sm:$0xff] }
 0x2ee   : > { %7274 = vmatpush1.bf16.msra.mxu0 %v12538_v11  ;;  %7446 = vmatpush1.bf16.msra.mxu1 %v12540_v12  ;;  %v12634_v11 = vcombine.low %v838_v62, %v846_v63  ;;  %v12636_v12 = vcombine.low %v839_v1, %v847_v2  ;;  %v934_v62 = vld [vmem:[#allocation5 + $0x1120] sm:$0xff]  ;;  %v935_v1 = vld [vmem:[#allocation5 + $0x1128] sm:$0xff] }
 0x2ef   : > { %7275 = vmatprep.subr.bf16.mxu0 %v12555_v13  ;;  %7447 = vmatprep.subr.bf16.mxu1 %v12557_v14  ;;  %v12651_v13 = vcombine.high %v854_v7, %v862_v8  ;;  %v12653_v14 = vcombine.high %v855_v9, %v863_v10  ;;  %v942_v63 = vld [vmem:[#allocation5 + $0x1160] sm:$0xff]  ;;  %v943_v2 = vld [vmem:[#allocation5 + $0x1168] sm:$0xff] }
 0x2f2   : > { %7276 = vmatpush1.bf16.msra.mxu0 %v12554_v20  ;;  %7448 = vmatpush1.bf16.msra.mxu1 %v12556_v21  ;;  %v12650_v20 = vcombine.low %v854_v7, %v862_v8  ;;  %v12652_v21 = vcombine.low %v855_v9, %v863_v10  ;;  %v950_v7 = vld [vmem:[#allocation5 + $0x11a0] sm:$0xff]  ;;  %v951_v9 = vld [vmem:[#allocation5 + $0x11a8] sm:$0xff] }
 0x2f3   : > { %7277 = vmatprep.subr.bf16.mxu0 %v12571_v22  ;;  %7449 = vmatprep.subr.bf16.mxu1 %v12573_v23  ;;  %v12667_v22 = vcombine.high %v870_v15, %v878_v17  ;;  %v12669_v23 = vcombine.high %v871_v18, %v879_v19  ;;  %v958_v8 = vld [vmem:[#allocation5 + $0x11e0] sm:$0xff]  ;;  %v959_v10 = vld [vmem:[#allocation5 + $0x11e8] sm:$0xff] }
 0x2f6   : > { %7278 = vmatpush1.bf16.msra.mxu0 %v12570_v30  ;;  %7450 = vmatpush1.bf16.msra.mxu1 %v12572_v31  ;;  %v12666_v30 = vcombine.low %v870_v15, %v878_v17  ;;  %v12668_v31 = vcombine.low %v871_v18, %v879_v19  ;;  %v966_v15 = vld [vmem:[#allocation5 + $0x1220] sm:$0xff]  ;;  %v967_v18 = vld [vmem:[#allocation5 + $0x1228] sm:$0xff] }
 0x2f7   : > { %7279 = vmatprep.subr.bf16.mxu0 %v12587_v32  ;;  %7451 = vmatprep.subr.bf16.mxu1 %v12589_v33  ;;  %v12683_v32 = vcombine.high %v886_v24, %v894_v25  ;;  %v12685_v33 = vcombine.high %v887_v27, %v895_v29  ;;  %v974_v17 = vld [vmem:[#allocation5 + $0x1260] sm:$0xff]  ;;  %v975_v19 = vld [vmem:[#allocation5 + $0x1268] sm:$0xff] }
 0x2fa   : > { %7280 = vmatpush1.bf16.msra.mxu0 %v12586_v39  ;;  %7452 = vmatpush1.bf16.msra.mxu1 %v12588_v40  ;;  %v12682_v39 = vcombine.low %v886_v24, %v894_v25  ;;  %v12684_v40 = vcombine.low %v887_v27, %v895_v29  ;;  %v982_v24 = vld [vmem:[#allocation5 + $0x12a0] sm:$0xff]  ;;  %v983_v27 = vld [vmem:[#allocation5 + $0x12a8] sm:$0xff] }
 0x2fb   : > { %7281 = vmatprep.subr.bf16.mxu0 %v12603_v41  ;;  %7453 = vmatprep.subr.bf16.mxu1 %v12605_v43  ;;  %v12699_v41 = vcombine.high %v902_v34, %v910_v35  ;;  %v12701_v43 = vcombine.high %v903_v36, %v911_v37  ;;  %v990_v25 = vld [vmem:[#allocation5 + $0x12e0] sm:$0xff]  ;;  %v991_v29 = vld [vmem:[#allocation5 + $0x12e8] sm:$0xff] }
 0x2fe   : > { %7282 = vmatpush1.bf16.msra.mxu0 %v12602_v53  ;;  %7454 = vmatpush1.bf16.msra.mxu1 %v12604_v57  ;;  %v12698_v53 = vcombine.low %v902_v34, %v910_v35  ;;  %v12700_v57 = vcombine.low %v903_v36, %v911_v37  ;;  %v998_v34 = vld [vmem:[#allocation5 + $0x1320] sm:$0xff]  ;;  %v999_v36 = vld [vmem:[#allocation5 + $0x1328] sm:$0xff] }
 0x2ff   : > { %7283 = vmatprep.subr.bf16.mxu0 %v12619_v58  ;;  %7455 = vmatprep.subr.bf16.mxu1 %v12621_v61  ;;  %v12715_v58 = vcombine.high %v918_v45, %v926_v46  ;;  %v12717_v61 = vcombine.high %v919_v49, %v927_v50  ;;  %v1006_v35 = vld [vmem:[#allocation5 + $0x1360] sm:$0xff]  ;;  %v1007_v37 = vld [vmem:[#allocation5 + $0x1368] sm:$0xff] }
 0x302   : > { %7284 = vmatpush1.bf16.msra.mxu0 %v12618_v3  ;;  %7456 = vmatpush1.bf16.msra.mxu1 %v12620_v4  ;;  %v12714_v3 = vcombine.low %v918_v45, %v926_v46  ;;  %v12716_v4 = vcombine.low %v919_v49, %v927_v50  ;;  %v1014_v45 = vld [vmem:[#allocation5 + $0x13a0] sm:$0xff]  ;;  %v1015_v49 = vld [vmem:[#allocation5 + $0x13a8] sm:$0xff] }
 0x303   : > { %7285 = vmatprep.subr.bf16.mxu0 %v12635_v5  ;;  %7457 = vmatprep.subr.bf16.mxu1 %v12637_v6  ;;  %v12731_v5 = vcombine.high %v934_v62, %v942_v63  ;;  %v12733_v6 = vcombine.high %v935_v1, %v943_v2  ;;  %v1022_v46 = vld [vmem:[#allocation5 + $0x13e0] sm:$0xff]  ;;  %v1023_v50 = vld [vmem:[#allocation5 + $0x13e8] sm:$0xff] }
 0x306   : > { %7286 = vmatpush1.bf16.msra.mxu0 %v12634_v11  ;;  %7458 = vmatpush1.bf16.msra.mxu1 %v12636_v12  ;;  %v12730_v11 = vcombine.low %v934_v62, %v942_v63  ;;  %v12732_v12 = vcombine.low %v935_v1, %v943_v2  ;;  %v1030_v62 = vld [vmem:[#allocation5 + $0x1420] sm:$0xff]  ;;  %v1031_v1 = vld [vmem:[#allocation5 + $0x1428] sm:$0xff] }
 0x307   : > { %7287 = vmatprep.subr.bf16.mxu0 %v12651_v13  ;;  %7459 = vmatprep.subr.bf16.mxu1 %v12653_v14  ;;  %v12747_v13 = vcombine.high %v950_v7, %v958_v8  ;;  %v12749_v14 = vcombine.high %v951_v9, %v959_v10  ;;  %v1038_v63 = vld [vmem:[#allocation5 + $0x1460] sm:$0xff]  ;;  %v1039_v2 = vld [vmem:[#allocation5 + $0x1468] sm:$0xff] }
 0x30a   : > { %7288 = vmatpush1.bf16.msra.mxu0 %v12650_v20  ;;  %7460 = vmatpush1.bf16.msra.mxu1 %v12652_v21  ;;  %v12746_v20 = vcombine.low %v950_v7, %v958_v8  ;;  %v12748_v21 = vcombine.low %v951_v9, %v959_v10  ;;  %v1046_v7 = vld [vmem:[#allocation5 + $0x14a0] sm:$0xff]  ;;  %v1047_v9 = vld [vmem:[#allocation5 + $0x14a8] sm:$0xff] }
 0x30b   : > { %7289 = vmatprep.subr.bf16.mxu0 %v12667_v22  ;;  %7461 = vmatprep.subr.bf16.mxu1 %v12669_v23  ;;  %v12763_v22 = vcombine.high %v966_v15, %v974_v17  ;;  %v12765_v23 = vcombine.high %v967_v18, %v975_v19  ;;  %v1054_v8 = vld [vmem:[#allocation5 + $0x14e0] sm:$0xff]  ;;  %v1055_v10 = vld [vmem:[#allocation5 + $0x14e8] sm:$0xff] }
 0x30e   : > { %7290 = vmatpush1.bf16.msra.mxu0 %v12666_v30  ;;  %7462 = vmatpush1.bf16.msra.mxu1 %v12668_v31  ;;  %v12762_v30 = vcombine.low %v966_v15, %v974_v17  ;;  %v12764_v31 = vcombine.low %v967_v18, %v975_v19  ;;  %v1062_v15 = vld [vmem:[#allocation5 + $0x1520] sm:$0xff]  ;;  %v1063_v18 = vld [vmem:[#allocation5 + $0x1528] sm:$0xff] }
 0x30f   : > { %7291 = vmatprep.subr.bf16.mxu0 %v12683_v32  ;;  %7463 = vmatprep.subr.bf16.mxu1 %v12685_v33  ;;  %v12779_v32 = vcombine.high %v982_v24, %v990_v25  ;;  %v12781_v33 = vcombine.high %v983_v27, %v991_v29  ;;  %v1070_v17 = vld [vmem:[#allocation5 + $0x1560] sm:$0xff]  ;;  %v1071_v19 = vld [vmem:[#allocation5 + $0x1568] sm:$0xff] }
 0x312   : > { %7292 = vmatpush1.bf16.msra.mxu0 %v12682_v39  ;;  %7464 = vmatpush1.bf16.msra.mxu1 %v12684_v40  ;;  %v12778_v39 = vcombine.low %v982_v24, %v990_v25  ;;  %v12780_v40 = vcombine.low %v983_v27, %v991_v29  ;;  %v1078_v24 = vld [vmem:[#allocation5 + $0x15a0] sm:$0xff]  ;;  %v1079_v27 = vld [vmem:[#allocation5 + $0x15a8] sm:$0xff] }
 0x313   : > { %7304 = vmatprep.subr.bf16.mxu0 %v12699_v41  ;;  %7476 = vmatprep.subr.bf16.mxu1 %v12701_v43  ;;  %v12795_v41 = vcombine.high %v998_v34, %v1006_v35  ;;  %v12797_v43 = vcombine.high %v999_v36, %v1007_v37  ;;  %v1086_v25 = vld [vmem:[#allocation5 + $0x15e0] sm:$0xff]  ;;  %v1087_v29 = vld [vmem:[#allocation5 + $0x15e8] sm:$0xff] }
 0x315   : > { %7294 = vmatmul.mubr.bf16.vlgmr.msra.gmra.mrb[8].mxu0 %v14641_v28  ;;  %7466 = vmatmul.mubr.bf16.vlgmr.msra.gmra.mrb[8].mxu1 %v14641_v28 }
 0x316   : > { %7305 = vmatpush1.bf16.msra.mxu0 %v12698_v53  ;;  %7477 = vmatpush1.bf16.msra.mxu1 %v12700_v57  ;;  %v12794_v53 = vcombine.low %v998_v34, %v1006_v35  ;;  %v12796_v57 = vcombine.low %v999_v36, %v1007_v37  ;;  %v1094_v34 = vld [vmem:[#allocation5 + $0x1620] sm:$0xff]  ;;  %v1095_v36 = vld [vmem:[#allocation5 + $0x1628] sm:$0xff] }
 0x317   : > { %7306 = vmatprep.subr.bf16.mxu0 %v12715_v58  ;;  %7478 = vmatprep.subr.bf16.mxu1 %v12717_v61  ;;  %v12811_v58 = vcombine.high %v1014_v45, %v1022_v46  ;;  %v12813_v61 = vcombine.high %v1015_v49, %v1023_v50  ;;  %v1102_v35 = vld [vmem:[#allocation5 + $0x1660] sm:$0xff]  ;;  %v1103_v37 = vld [vmem:[#allocation5 + $0x1668] sm:$0xff] }
 0x318   : > { %7336 = vmatprep.mubr.bf16.mxu0 %v14643_v38  ;;  %7508 = vmatprep.mubr.bf16.mxu1 %v14643_v38 }
 0x31a   : > { %7307 = vmatpush1.bf16.msra.mxu0 %v12714_v3  ;;  %7479 = vmatpush1.bf16.msra.mxu1 %v12716_v4  ;;  %v12810_v3 = vcombine.low %v1014_v45, %v1022_v46  ;;  %v12812_v4 = vcombine.low %v1015_v49, %v1023_v50  ;;  %v1110_v45 = vld [vmem:[#allocation5 + $0x16a0] sm:$0xff]  ;;  %v1111_v49 = vld [vmem:[#allocation5 + $0x16a8] sm:$0xff] }
 0x31b   : > { %7308 = vmatprep.subr.bf16.mxu0 %v12731_v5  ;;  %7480 = vmatprep.subr.bf16.mxu1 %v12733_v6  ;;  %v12827_v5 = vcombine.high %v1030_v62, %v1038_v63  ;;  %v12829_v6 = vcombine.high %v1031_v1, %v1039_v2  ;;  %v1118_v46 = vld [vmem:[#allocation5 + $0x16e0] sm:$0xff]  ;;  %v1119_v50 = vld [vmem:[#allocation5 + $0x16e8] sm:$0xff] }
 0x31e   : > { %7309 = vmatpush1.bf16.msra.mxu0 %v12730_v11  ;;  %7481 = vmatpush1.bf16.msra.mxu1 %v12732_v12  ;;  %v12826_v11 = vcombine.low %v1030_v62, %v1038_v63  ;;  %v12828_v12 = vcombine.low %v1031_v1, %v1039_v2  ;;  %v1126_v62 = vld [vmem:[#allocation5 + $0x1720] sm:$0xff]  ;;  %v1127_v1 = vld [vmem:[#allocation5 + $0x1728] sm:$0xff] }
 0x31f   : > { %7310 = vmatprep.subr.bf16.mxu0 %v12747_v13  ;;  %7482 = vmatprep.subr.bf16.mxu1 %v12749_v14  ;;  %v12843_v13 = vcombine.high %v1046_v7, %v1054_v8  ;;  %v12845_v14 = vcombine.high %v1047_v9, %v1055_v10  ;;  %v1134_v63 = vld [vmem:[#allocation5 + $0x1760] sm:$0xff]  ;;  %v1135_v2 = vld [vmem:[#allocation5 + $0x1768] sm:$0xff] }
 0x322   : > { %7311 = vmatpush1.bf16.msra.mxu0 %v12746_v20  ;;  %7483 = vmatpush1.bf16.msra.mxu1 %v12748_v21  ;;  %v12842_v20 = vcombine.low %v1046_v7, %v1054_v8  ;;  %v12844_v21 = vcombine.low %v1047_v9, %v1055_v10  ;;  %v1142_v7 = vld [vmem:[#allocation5 + $0x17a0] sm:$0xff]  ;;  %v1143_v9 = vld [vmem:[#allocation5 + $0x17a8] sm:$0xff] }
 0x323   : > { %7312 = vmatprep.subr.bf16.mxu0 %v12763_v22  ;;  %7484 = vmatprep.subr.bf16.mxu1 %v12765_v23  ;;  %v12859_v22 = vcombine.high %v1062_v15, %v1070_v17  ;;  %v12861_v23 = vcombine.high %v1063_v18, %v1071_v19  ;;  %v1150_v8 = vld [vmem:[#allocation5 + $0x17e0] sm:$0xff]  ;;  %v1151_v10 = vld [vmem:[#allocation5 + $0x17e8] sm:$0xff] }
 0x326   : > { %7313 = vmatpush1.bf16.msra.mxu0 %v12762_v30  ;;  %7485 = vmatpush1.bf16.msra.mxu1 %v12764_v31  ;;  %v12858_v30 = vcombine.low %v1062_v15, %v1070_v17  ;;  %v12860_v31 = vcombine.low %v1063_v18, %v1071_v19  ;;  %v1158_v15 = vld [vmem:[#allocation5 + $0x1820] sm:$0xff]  ;;  %v1159_v18 = vld [vmem:[#allocation5 + $0x1828] sm:$0xff] }
 0x327   : > { %7314 = vmatprep.subr.bf16.mxu0 %v12779_v32  ;;  %7486 = vmatprep.subr.bf16.mxu1 %v12781_v33  ;;  %v12875_v32 = vcombine.high %v1078_v24, %v1086_v25  ;;  %v12877_v33 = vcombine.high %v1079_v27, %v1087_v29  ;;  %v1166_v17 = vld [vmem:[#allocation5 + $0x1860] sm:$0xff]  ;;  %v1167_v19 = vld [vmem:[#allocation5 + $0x1868] sm:$0xff] }
 0x32a   : > { %7315 = vmatpush1.bf16.msra.mxu0 %v12778_v39  ;;  %7487 = vmatpush1.bf16.msra.mxu1 %v12780_v40  ;;  %v12874_v39 = vcombine.low %v1078_v24, %v1086_v25  ;;  %v12876_v40 = vcombine.low %v1079_v27, %v1087_v29  ;;  %v1174_v24 = vld [vmem:[#allocation5 + $0x18a0] sm:$0xff]  ;;  %v1175_v27 = vld [vmem:[#allocation5 + $0x18a8] sm:$0xff] }
 0x32b   : > { %7316 = vmatprep.subr.bf16.mxu0 %v12795_v41  ;;  %7488 = vmatprep.subr.bf16.mxu1 %v12797_v43  ;;  %v12891_v41 = vcombine.high %v1094_v34, %v1102_v35  ;;  %v12893_v43 = vcombine.high %v1095_v36, %v1103_v37  ;;  %v1182_v25 = vld [vmem:[#allocation5 + $0x18e0] sm:$0xff]  ;;  %v1183_v29 = vld [vmem:[#allocation5 + $0x18e8] sm:$0xff] }
 0x32e   : > { %7317 = vmatpush1.bf16.msra.mxu0 %v12794_v53  ;;  %7489 = vmatpush1.bf16.msra.mxu1 %v12796_v57  ;;  %v12890_v53 = vcombine.low %v1094_v34, %v1102_v35  ;;  %v12892_v57 = vcombine.low %v1095_v36, %v1103_v37  ;;  %v1190_v34 = vld [vmem:[#allocation5 + $0x1920] sm:$0xff]  ;;  %v1191_v36 = vld [vmem:[#allocation5 + $0x1928] sm:$0xff] }
 0x32f   : > { %7318 = vmatprep.subr.bf16.mxu0 %v12811_v58  ;;  %7490 = vmatprep.subr.bf16.mxu1 %v12813_v61  ;;  %v12907_v58 = vcombine.high %v1110_v45, %v1118_v46  ;;  %v12909_v61 = vcombine.high %v1111_v49, %v1119_v50  ;;  %v1198_v35 = vld [vmem:[#allocation5 + $0x1960] sm:$0xff]  ;;  %v1199_v37 = vld [vmem:[#allocation5 + $0x1968] sm:$0xff] }
 0x332   : > { %7319 = vmatpush1.bf16.msra.mxu0 %v12810_v3  ;;  %7491 = vmatpush1.bf16.msra.mxu1 %v12812_v4  ;;  %v12906_v3 = vcombine.low %v1110_v45, %v1118_v46  ;;  %v12908_v4 = vcombine.low %v1111_v49, %v1119_v50  ;;  %v1206_v45 = vld [vmem:[#allocation5 + $0x19a0] sm:$0xff]  ;;  %v1207_v49 = vld [vmem:[#allocation5 + $0x19a8] sm:$0xff] }
 0x333   : > { %7320 = vmatprep.subr.bf16.mxu0 %v12827_v5  ;;  %7492 = vmatprep.subr.bf16.mxu1 %v12829_v6  ;;  %v12923_v5 = vcombine.high %v1126_v62, %v1134_v63  ;;  %v12925_v6 = vcombine.high %v1127_v1, %v1135_v2  ;;  %v1214_v46 = vld [vmem:[#allocation5 + $0x19e0] sm:$0xff]  ;;  %v1215_v50 = vld [vmem:[#allocation5 + $0x19e8] sm:$0xff] }
 0x336   : > { %7321 = vmatpush1.bf16.msra.mxu0 %v12826_v11  ;;  %7493 = vmatpush1.bf16.msra.mxu1 %v12828_v12  ;;  %v12922_v11 = vcombine.low %v1126_v62, %v1134_v63  ;;  %v12924_v12 = vcombine.low %v1127_v1, %v1135_v2  ;;  %v1222_v62 = vld [vmem:[#allocation5 + $0x1a20] sm:$0xff]  ;;  %v1223_v1 = vld [vmem:[#allocation5 + $0x1a28] sm:$0xff] }
 0x337   : > { %7322 = vmatprep.subr.bf16.mxu0 %v12843_v13  ;;  %7494 = vmatprep.subr.bf16.mxu1 %v12845_v14  ;;  %v12939_v13 = vcombine.high %v1142_v7, %v1150_v8  ;;  %v12941_v14 = vcombine.high %v1143_v9, %v1151_v10  ;;  %v1230_v63 = vld [vmem:[#allocation5 + $0x1a60] sm:$0xff]  ;;  %v1231_v2 = vld [vmem:[#allocation5 + $0x1a68] sm:$0xff] }
 0x33a   : > { %7323 = vmatpush1.bf16.msra.mxu0 %v12842_v20  ;;  %7495 = vmatpush1.bf16.msra.mxu1 %v12844_v21  ;;  %v12938_v20 = vcombine.low %v1142_v7, %v1150_v8  ;;  %v12940_v21 = vcombine.low %v1143_v9, %v1151_v10  ;;  %v1238_v7 = vld [vmem:[#allocation5 + $0x1aa0] sm:$0xff]  ;;  %v1239_v9 = vld [vmem:[#allocation5 + $0x1aa8] sm:$0xff] }
 0x33b   : > { %7324 = vmatprep.subr.bf16.mxu0 %v12859_v22  ;;  %7496 = vmatprep.subr.bf16.mxu1 %v12861_v23  ;;  %v12955_v22 = vcombine.high %v1158_v15, %v1166_v17  ;;  %v12957_v23 = vcombine.high %v1159_v18, %v1167_v19  ;;  %v1246_v8 = vld [vmem:[#allocation5 + $0x1ae0] sm:$0xff]  ;;  %v1247_v10 = vld [vmem:[#allocation5 + $0x1ae8] sm:$0xff] }
 0x33e   : > { %7325 = vmatpush1.bf16.msra.mxu0 %v12858_v30  ;;  %7497 = vmatpush1.bf16.msra.mxu1 %v12860_v31  ;;  %v12954_v30 = vcombine.low %v1158_v15, %v1166_v17  ;;  %v12956_v31 = vcombine.low %v1159_v18, %v1167_v19  ;;  %v1254_v15 = vld [vmem:[#allocation5 + $0x1b20] sm:$0xff]  ;;  %v1255_v18 = vld [vmem:[#allocation5 + $0x1b28] sm:$0xff] }
 0x33f   : > { %7326 = vmatprep.subr.bf16.mxu0 %v12875_v32  ;;  %7498 = vmatprep.subr.bf16.mxu1 %v12877_v33  ;;  %v12971_v32 = vcombine.high %v1174_v24, %v1182_v25  ;;  %v12973_v33 = vcombine.high %v1175_v27, %v1183_v29  ;;  %v1262_v17 = vld [vmem:[#allocation5 + $0x1b60] sm:$0xff]  ;;  %v1263_v19 = vld [vmem:[#allocation5 + $0x1b68] sm:$0xff] }
 0x342   : > { %7327 = vmatpush1.bf16.msra.mxu0 %v12874_v39  ;;  %7499 = vmatpush1.bf16.msra.mxu1 %v12876_v40  ;;  %v12970_v39 = vcombine.low %v1174_v24, %v1182_v25  ;;  %v12972_v40 = vcombine.low %v1175_v27, %v1183_v29  ;;  %v13053_v24 = vcombine.high %v1255_v18, %v1263_v19  ;;  %v1270_v25 = vld [vmem:[#allocation5 + $0x1ba0] sm:$0xff] }
 0x343   : > { %7328 = vmatprep.subr.bf16.mxu0 %v12891_v41  ;;  %7500 = vmatprep.subr.bf16.mxu1 %v12893_v43  ;;  %v12987_v41 = vcombine.high %v1190_v34, %v1198_v35  ;;  %v12989_v43 = vcombine.high %v1191_v36, %v1199_v37  ;;  %v1278_v27 = vld [vmem:[#allocation5 + $0x1be0] sm:$0xff] }
 0x346   : > { %7329 = vmatpush1.bf16.msra.mxu0 %v12890_v53  ;;  %7501 = vmatpush1.bf16.msra.mxu1 %v12892_v57  ;;  %v12986_v53 = vcombine.low %v1190_v34, %v1198_v35  ;;  %v12988_v57 = vcombine.low %v1191_v36, %v1199_v37  ;;  %v13050_v35 = vcombine.low %v1254_v15, %v1262_v17 }
 0x347   : > { %7330 = vmatprep.subr.bf16.mxu0 %v12907_v58  ;;  %7502 = vmatprep.subr.bf16.mxu1 %v12909_v61  ;;  %v13003_v58 = vcombine.high %v1206_v45, %v1214_v46  ;;  %v13005_v61 = vcombine.high %v1207_v49, %v1215_v50 }
 0x34a   : > { %7331 = vmatpush1.bf16.msra.mxu0 %v12906_v3  ;;  %7503 = vmatpush1.bf16.msra.mxu1 %v12908_v4  ;;  %v13002_v3 = vcombine.low %v1206_v45, %v1214_v46  ;;  %v13004_v4 = vcombine.low %v1207_v49, %v1215_v50  ;;  %v1286_v45 = vld [vmem:[#allocation5 + $0x1c20] sm:$0xff]  ;;  %v1287_v49 = vld [vmem:[#allocation5 + $0x1c28] sm:$0xff] }
 0x34b   : > { %7332 = vmatprep.subr.bf16.mxu0 %v12923_v5  ;;  %7504 = vmatprep.subr.bf16.mxu1 %v12925_v6  ;;  %v13019_v5 = vcombine.high %v1222_v62, %v1230_v63  ;;  %v13021_v6 = vcombine.high %v1223_v1, %v1231_v2  ;;  %v1294_v46 = vld [vmem:[#allocation5 + $0x1c60] sm:$0xff]  ;;  %v1295_v50 = vld [vmem:[#allocation5 + $0x1c68] sm:$0xff] }
 0x34e   : > { %7333 = vmatpush1.bf16.msra.mxu0 %v12922_v11  ;;  %7505 = vmatpush1.bf16.msra.mxu1 %v12924_v12  ;;  %v13018_v11 = vcombine.low %v1222_v62, %v1230_v63  ;;  %v13020_v12 = vcombine.low %v1223_v1, %v1231_v2  ;;  %v1302_v62 = vld [vmem:[#allocation5 + $0x1ca0] sm:$0xff]  ;;  %v1303_v1 = vld [vmem:[#allocation5 + $0x1ca8] sm:$0xff] }
 0x34f   : > { %7334 = vmatprep.subr.bf16.mxu0 %v12939_v13  ;;  %7506 = vmatprep.subr.bf16.mxu1 %v12941_v14  ;;  %v13035_v13 = vcombine.high %v1238_v7, %v1246_v8  ;;  %v13037_v14 = vcombine.high %v1239_v9, %v1247_v10  ;;  %v1310_v63 = vld [vmem:[#allocation5 + $0x1ce0] sm:$0xff]  ;;  %v1311_v2 = vld [vmem:[#allocation5 + $0x1ce8] sm:$0xff] }
 0x352   : > { %7335 = vmatpush1.bf16.msra.mxu0 %v12938_v20  ;;  %7507 = vmatpush1.bf16.msra.mxu1 %v12940_v21  ;;  %v13034_v20 = vcombine.low %v1238_v7, %v1246_v8  ;;  %v13036_v21 = vcombine.low %v1239_v9, %v1247_v10  ;;  %v1318_v7 = vld [vmem:[#allocation5 + $0x1d20] sm:$0xff]  ;;  %v1319_v9 = vld [vmem:[#allocation5 + $0x1d28] sm:$0xff] }
 0x353   : > { %7347 = vmatprep.subr.bf16.mxu0 %v12955_v22  ;;  %7519 = vmatprep.subr.bf16.mxu1 %v12957_v23  ;;  %v13051_v22 = vcombine.high %v1254_v15, %v1262_v17  ;;  %v1326_v8 = vld [vmem:[#allocation5 + $0x1d60] sm:$0xff]  ;;  %v1327_v10 = vld [vmem:[#allocation5 + $0x1d68] sm:$0xff] }
 0x354   : > { %v1334_v15 = vld [vmem:[#allocation5 + $0x1da0] sm:$0xff] }
 0x355   : > { %7337 = vmatmul.mubr.bf16.vlgmr.msra.gmra.mrb[8].mxu0 %v14649_v44  ;;  %7509 = vmatmul.mubr.bf16.vlgmr.msra.gmra.mrb[8].mxu1 %v14649_v44  ;;  %v1342_v17 = vld [vmem:[#allocation5 + $0x1de0] sm:$0xff] }
 0x356   : > { %7348 = vmatpush1.bf16.msra.mxu0 %v12954_v30  ;;  %7520 = vmatpush1.bf16.msra.mxu1 %v12956_v31  ;;  %v1271_v31 = vld [vmem:[#allocation5 + $0x1ba8] sm:$0xff] }
 0x357   : > { %7349 = vmatprep.subr.bf16.mxu0 %v12971_v32  ;;  %7521 = vmatprep.subr.bf16.mxu1 %v12973_v33  ;;  %v1279_v32 = vld [vmem:[#allocation5 + $0x1be8] sm:$0xff] }
 0x358   : > { %7379 = vmatprep.mubr.bf16.mxu0 %v14651_v54  ;;  %7551 = vmatprep.mubr.bf16.mxu1 %v14651_v54 }
 0x35a   : > { %7350 = vmatpush1.bf16.msra.mxu0 %v12970_v39  ;;  %7522 = vmatpush1.bf16.msra.mxu1 %v12972_v40  ;;  %v13052_v39 = vcombine.low %v1255_v18, %v1263_v19  ;;  %v13067_v40 = vcombine.high %v1270_v25, %v1278_v27  ;;  %v1335_v18 = vld [vmem:[#allocation5 + $0x1da8] sm:$0xff] }
 0x35b   : > { %7351 = vmatprep.subr.bf16.mxu0 %v12987_v41  ;;  %7523 = vmatprep.subr.bf16.mxu1 %v12989_v43  ;;  %v13069_v43 = vcombine.high %v1271_v31, %v1279_v32  ;;  %v1343_v19 = vld [vmem:[#allocation5 + $0x1de8] sm:$0xff] }
 0x35e   : > { %7352 = vmatpush1.bf16.msra.mxu0 %v12986_v53  ;;  %7524 = vmatpush1.bf16.msra.mxu1 %v12988_v57  ;;  %v13066_v53 = vcombine.low %v1270_v25, %v1278_v27  ;;  %v13068_v57 = vcombine.low %v1271_v31, %v1279_v32  ;;  %v1350_v25 = vld [vmem:[#allocation5 + $0x1e20] sm:$0xff]  ;;  %v1351_v31 = vld [vmem:[#allocation5 + $0x1e28] sm:$0xff] }
 0x35f   : > { %7353 = vmatprep.subr.bf16.mxu0 %v13003_v58  ;;  %7525 = vmatprep.subr.bf16.mxu1 %v13005_v61  ;;  %v13083_v58 = vcombine.high %v1286_v45, %v1294_v46  ;;  %v13085_v61 = vcombine.high %v1287_v49, %v1295_v50  ;;  %v1358_v27 = vld [vmem:[#allocation5 + $0x1e60] sm:$0xff]  ;;  %v1359_v32 = vld [vmem:[#allocation5 + $0x1e68] sm:$0xff] }
 0x362   : > { %7354 = vmatpush1.bf16.msra.mxu0 %v13002_v3  ;;  %7526 = vmatpush1.bf16.msra.mxu1 %v13004_v4  ;;  %v13082_v3 = vcombine.low %v1286_v45, %v1294_v46  ;;  %v13084_v4 = vcombine.low %v1287_v49, %v1295_v50  ;;  %v1366_v45 = vld [vmem:[#allocation5 + $0x1ea0] sm:$0xff]  ;;  %v1367_v49 = vld [vmem:[#allocation5 + $0x1ea8] sm:$0xff] }
 0x363   : > { %7355 = vmatprep.subr.bf16.mxu0 %v13019_v5  ;;  %7527 = vmatprep.subr.bf16.mxu1 %v13021_v6  ;;  %v13099_v5 = vcombine.high %v1302_v62, %v1310_v63  ;;  %v13101_v6 = vcombine.high %v1303_v1, %v1311_v2  ;;  %v1374_v46 = vld [vmem:[#allocation5 + $0x1ee0] sm:$0xff]  ;;  %v1375_v50 = vld [vmem:[#allocation5 + $0x1ee8] sm:$0xff] }
 0x366   : > { %7356 = vmatpush1.bf16.msra.mxu0 %v13018_v11  ;;  %7528 = vmatpush1.bf16.msra.mxu1 %v13020_v12  ;;  %v13098_v11 = vcombine.low %v1302_v62, %v1310_v63  ;;  %v13100_v12 = vcombine.low %v1303_v1, %v1311_v2  ;;  %v1382_v62 = vld [vmem:[#allocation5 + $0x1f20] sm:$0xff]  ;;  %v1383_v1 = vld [vmem:[#allocation5 + $0x1f28] sm:$0xff] }
 0x367   : > { %7357 = vmatprep.subr.bf16.mxu0 %v13035_v13  ;;  %7529 = vmatprep.subr.bf16.mxu1 %v13037_v14  ;;  %v13115_v13 = vcombine.high %v1318_v7, %v1326_v8  ;;  %v13117_v14 = vcombine.high %v1319_v9, %v1327_v10  ;;  %v1390_v63 = vld [vmem:[#allocation5 + $0x1f60] sm:$0xff]  ;;  %v1391_v2 = vld [vmem:[#allocation5 + $0x1f68] sm:$0xff] }
 0x368   : > { %v14707_v23 = vpop.f32.mrb[4].mxu0  ;;  %v14709_v29 = vpop.f32.mrb[4].mxu1 }
 0x369   : > { %v14711_v30 = vpop.f32.mrb[5].mxu0  ;;  %v14713_v33 = vpop.f32.mrb[5].mxu1 }
 0x36a   : > { %v14715_v34 = vpop.f32.mrb[6].mxu0  ;;  %7358 = vmatpush1.bf16.msra.mxu0 %v13034_v20  ;;  %v14717_v36 = vpop.f32.mrb[6].mxu1  ;;  %7530 = vmatpush1.bf16.msra.mxu1 %v13036_v21  ;;  %v13114_v20 = vcombine.low %v1318_v7, %v1326_v8  ;;  %v13116_v21 = vcombine.low %v1319_v9, %v1327_v10  ;;  %v1398_v7 = vld [vmem:[#allocation5 + $0x1fa0] sm:$0xff]  ;;  %v1399_v9 = vld [vmem:[#allocation5 + $0x1fa8] sm:$0xff] }
 0x36b   : > { %v14719_v37 = vpop.f32.mrb[7].mxu0  ;;  %7359 = vmatprep.subr.bf16.mxu0 %v13051_v22  ;;  %v14721_v41 = vpop.f32.mrb[7].mxu1  ;;  %7531 = vmatprep.subr.bf16.mxu1 %v13053_v24  ;;  %v13131_v22 = vcombine.high %v1334_v15, %v1342_v17  ;;  %v13133_v24 = vcombine.high %v1335_v18, %v1343_v19  ;;  %v1406_v8 = vld [vmem:[#allocation5 + $0x1fe0] sm:$0xff]  ;;  %v1407_v10 = vld [vmem:[#allocation5 + $0x1fe8] sm:$0xff] }
 0x36e   : > { %7360 = vmatpush1.bf16.msra.mxu0 %v13050_v35  ;;  %7532 = vmatpush1.bf16.msra.mxu1 %v13052_v39  ;;  %v13130_v35 = vcombine.low %v1334_v15, %v1342_v17  ;;  %v13132_v39 = vcombine.low %v1335_v18, %v1343_v19  ;;  %v392_v15 = vld [vmem:[#allocation5 + $0x30] sm:$0xff]  ;;  %v393_v18 = vld [vmem:[#allocation5 + $0x38] sm:$0xff] }
 0x36f   : > { %7361 = vmatprep.subr.bf16.mxu0 %v13067_v40  ;;  %7533 = vmatprep.subr.bf16.mxu1 %v13069_v43  ;;  %v13147_v40 = vcombine.high %v1350_v25, %v1358_v27  ;;  %v13149_v43 = vcombine.high %v1351_v31, %v1359_v32  ;;  %v400_v17 = vld [vmem:[#allocation5 + $0x70] sm:$0xff]  ;;  %v401_v19 = vld [vmem:[#allocation5 + $0x78] sm:$0xff] }
 0x372   : > { %7362 = vmatpush1.bf16.msra.mxu0 %v13066_v53  ;;  %7534 = vmatpush1.bf16.msra.mxu1 %v13068_v57  ;;  %v13146_v53 = vcombine.low %v1350_v25, %v1358_v27  ;;  %v13148_v57 = vcombine.low %v1351_v31, %v1359_v32  ;;  %v408_v25 = vld [vmem:[#allocation5 + $0xb0] sm:$0xff]  ;;  %v409_v31 = vld [vmem:[#allocation5 + $0xb8] sm:$0xff] }
 0x373   : > { %7363 = vmatprep.subr.bf16.mxu0 %v13083_v58  ;;  %7535 = vmatprep.subr.bf16.mxu1 %v13085_v61  ;;  %v13163_v58 = vcombine.high %v1366_v45, %v1374_v46  ;;  %v13165_v61 = vcombine.high %v1367_v49, %v1375_v50  ;;  %v416_v27 = vld [vmem:[#allocation5 + $0xf0] sm:$0xff]  ;;  %v417_v32 = vld [vmem:[#allocation5 + $0xf8] sm:$0xff] }
 0x376   : > { %7364 = vmatpush1.bf16.msra.mxu0 %v13082_v3  ;;  %7536 = vmatpush1.bf16.msra.mxu1 %v13084_v4  ;;  %v13162_v3 = vcombine.low %v1366_v45, %v1374_v46  ;;  %v13164_v4 = vcombine.low %v1367_v49, %v1375_v50  ;;  %v424_v45 = vld [vmem:[#allocation5 + $0x130] sm:$0xff]  ;;  %v425_v49 = vld [vmem:[#allocation5 + $0x138] sm:$0xff] }
 0x377   : > { %7365 = vmatprep.subr.bf16.mxu0 %v13099_v5  ;;  %7537 = vmatprep.subr.bf16.mxu1 %v13101_v6  ;;  %v13179_v5 = vcombine.high %v1382_v62, %v1390_v63  ;;  %v13181_v6 = vcombine.high %v1383_v1, %v1391_v2  ;;  %v432_v46 = vld [vmem:[#allocation5 + $0x170] sm:$0xff]  ;;  %v433_v50 = vld [vmem:[#allocation5 + $0x178] sm:$0xff] }
 0x37a   : > { %7366 = vmatpush1.bf16.msra.mxu0 %v13098_v11  ;;  %7538 = vmatpush1.bf16.msra.mxu1 %v13100_v12  ;;  %v13178_v11 = vcombine.low %v1382_v62, %v1390_v63  ;;  %v13180_v12 = vcombine.low %v1383_v1, %v1391_v2  ;;  %v440_v62 = vld [vmem:[#allocation5 + $0x1b0] sm:$0xff]  ;;  %v441_v1 = vld [vmem:[#allocation5 + $0x1b8] sm:$0xff] }
 0x37b   : > { %7367 = vmatprep.subr.bf16.mxu0 %v13115_v13  ;;  %7539 = vmatprep.subr.bf16.mxu1 %v13117_v14  ;;  %v13195_v13 = vcombine.high %v1398_v7, %v1406_v8  ;;  %v13197_v14 = vcombine.high %v1399_v9, %v1407_v10  ;;  %v448_v63 = vld [vmem:[#allocation5 + $0x1f0] sm:$0xff]  ;;  %v449_v2 = vld [vmem:[#allocation5 + $0x1f8] sm:$0xff] }
 0x37e   : > { %7368 = vmatpush1.bf16.msra.mxu0 %v13114_v20  ;;  %7540 = vmatpush1.bf16.msra.mxu1 %v13116_v21  ;;  %v13194_v20 = vcombine.low %v1398_v7, %v1406_v8  ;;  %v13196_v21 = vcombine.low %v1399_v9, %v1407_v10  ;;  %v456_v7 = vld [vmem:[#allocation5 + $0x230] sm:$0xff]  ;;  %v457_v9 = vld [vmem:[#allocation5 + $0x238] sm:$0xff] }
 0x37f   : > { %7369 = vmatprep.subr.bf16.mxu0 %v13131_v22  ;;  %7541 = vmatprep.subr.bf16.mxu1 %v13133_v24  ;;  %v12191_v22 = vcombine.high %v392_v15, %v400_v17  ;;  %v12193_v24 = vcombine.high %v393_v18, %v401_v19  ;;  %v464_v8 = vld [vmem:[#allocation5 + $0x270] sm:$0xff]  ;;  %v465_v10 = vld [vmem:[#allocation5 + $0x278] sm:$0xff] }
 0x382   : > { %7370 = vmatpush1.bf16.msra.mxu0 %v13130_v35  ;;  %7542 = vmatpush1.bf16.msra.mxu1 %v13132_v39  ;;  %v12190_v35 = vcombine.low %v392_v15, %v400_v17  ;;  %v12192_v39 = vcombine.low %v393_v18, %v401_v19  ;;  %v472_v15 = vld [vmem:[#allocation5 + $0x2b0] sm:$0xff]  ;;  %v473_v18 = vld [vmem:[#allocation5 + $0x2b8] sm:$0xff] }
 0x383   : > { %7371 = vmatprep.subr.bf16.mxu0 %v13147_v40  ;;  %7543 = vmatprep.subr.bf16.mxu1 %v13149_v43  ;;  %v12207_v40 = vcombine.high %v408_v25, %v416_v27  ;;  %v12209_v43 = vcombine.high %v409_v31, %v417_v32  ;;  %v480_v17 = vld [vmem:[#allocation5 + $0x2f0] sm:$0xff]  ;;  %v481_v19 = vld [vmem:[#allocation5 + $0x2f8] sm:$0xff] }
 0x386   : > { %7372 = vmatpush1.bf16.msra.mxu0 %v13146_v53  ;;  %7544 = vmatpush1.bf16.msra.mxu1 %v13148_v57  ;;  %v12206_v53 = vcombine.low %v408_v25, %v416_v27  ;;  %v12208_v57 = vcombine.low %v409_v31, %v417_v32  ;;  %v488_v25 = vld [vmem:[#allocation5 + $0x330] sm:$0xff]  ;;  %v489_v31 = vld [vmem:[#allocation5 + $0x338] sm:$0xff] }
 0x387   : > { %7373 = vmatprep.subr.bf16.mxu0 %v13163_v58  ;;  %7545 = vmatprep.subr.bf16.mxu1 %v13165_v61  ;;  %v12223_v58 = vcombine.high %v424_v45, %v432_v46  ;;  %v12225_v61 = vcombine.high %v425_v49, %v433_v50  ;;  %v496_v27 = vld [vmem:[#allocation5 + $0x370] sm:$0xff]  ;;  %v497_v32 = vld [vmem:[#allocation5 + $0x378] sm:$0xff] }
 0x38a   : > { %7374 = vmatpush1.bf16.msra.mxu0 %v13162_v3  ;;  %7546 = vmatpush1.bf16.msra.mxu1 %v13164_v4  ;;  %v12222_v3 = vcombine.low %v424_v45, %v432_v46  ;;  %v12224_v4 = vcombine.low %v425_v49, %v433_v50  ;;  %v504_v45 = vld [vmem:[#allocation5 + $0x3b0] sm:$0xff]  ;;  %v505_v49 = vld [vmem:[#allocation5 + $0x3b8] sm:$0xff] }
 0x38b   : > { %7375 = vmatprep.subr.bf16.mxu0 %v13179_v5  ;;  %7547 = vmatprep.subr.bf16.mxu1 %v13181_v6  ;;  %v12239_v5 = vcombine.high %v440_v62, %v448_v63  ;;  %v12241_v6 = vcombine.high %v441_v1, %v449_v2  ;;  %v512_v46 = vld [vmem:[#allocation5 + $0x3f0] sm:$0xff]  ;;  %v513_v50 = vld [vmem:[#allocation5 + $0x3f8] sm:$0xff] }
 0x38e   : > { %7376 = vmatpush1.bf16.msra.mxu0 %v13178_v11  ;;  %7548 = vmatpush1.bf16.msra.mxu1 %v13180_v12  ;;  %v12238_v11 = vcombine.low %v440_v62, %v448_v63  ;;  %v12240_v12 = vcombine.low %v441_v1, %v449_v2  ;;  %v520_v62 = vld [vmem:[#allocation5 + $0x430] sm:$0xff]  ;;  %v521_v1 = vld [vmem:[#allocation5 + $0x438] sm:$0xff] }
 0x38f   : > { %7377 = vmatprep.subr.bf16.mxu0 %v13195_v13  ;;  %7549 = vmatprep.subr.bf16.mxu1 %v13197_v14  ;;  %v12255_v13 = vcombine.high %v456_v7, %v464_v8  ;;  %v12257_v14 = vcombine.high %v457_v9, %v465_v10  ;;  %v528_v63 = vld [vmem:[#allocation5 + $0x470] sm:$0xff]  ;;  %v529_v2 = vld [vmem:[#allocation5 + $0x478] sm:$0xff] }
 0x392   : > { %7378 = vmatpush1.bf16.msra.mxu0 %v13194_v20  ;;  %7550 = vmatpush1.bf16.msra.mxu1 %v13196_v21  ;;  %v12254_v20 = vcombine.low %v456_v7, %v464_v8  ;;  %v12256_v21 = vcombine.low %v457_v9, %v465_v10  ;;  %v536_v7 = vld [vmem:[#allocation5 + $0x4b0] sm:$0xff]  ;;  %v537_v9 = vld [vmem:[#allocation5 + $0x4b8] sm:$0xff] }
 0x393   : > { %7562 = vmatprep.subr.bf16.mxu0 %v12191_v22  ;;  %7734 = vmatprep.subr.bf16.mxu1 %v12193_v24  ;;  %v12271_v22 = vcombine.high %v472_v15, %v480_v17  ;;  %v12273_v24 = vcombine.high %v473_v18, %v481_v19  ;;  %v544_v8 = vld [vmem:[#allocation5 + $0x4f0] sm:$0xff]  ;;  %v545_v10 = vld [vmem:[#allocation5 + $0x4f8] sm:$0xff] }
 0x395   : > { %7380 = vmatmul.mubr.bf16.vlgmr.msra.gmra.mrb[8].mxu0 %v14657_v0  ;;  %7552 = vmatmul.mubr.bf16.vlgmr.msra.gmra.mrb[8].mxu1 %v14657_v0 }
 0x396   : > { %7563 = vmatpush1.bf16.msra.mxu0 %v12190_v35  ;;  %7735 = vmatpush1.bf16.msra.mxu1 %v12192_v39  ;;  %v12270_v35 = vcombine.low %v472_v15, %v480_v17  ;;  %v12272_v39 = vcombine.low %v473_v18, %v481_v19  ;;  %v552_v15 = vld [vmem:[#allocation5 + $0x530] sm:$0xff]  ;;  %v553_v18 = vld [vmem:[#allocation5 + $0x538] sm:$0xff] }
 0x397   : > { %7564 = vmatprep.subr.bf16.mxu0 %v12207_v40  ;;  %7736 = vmatprep.subr.bf16.mxu1 %v12209_v43  ;;  %v12287_v40 = vcombine.high %v488_v25, %v496_v27  ;;  %v12289_v43 = vcombine.high %v489_v31, %v497_v32  ;;  %v560_v17 = vld [vmem:[#allocation5 + $0x570] sm:$0xff]  ;;  %v561_v19 = vld [vmem:[#allocation5 + $0x578] sm:$0xff] }
 0x398   : > { %7594 = vmatprep.mubr.bf16.mxu0 %v14629_v59  ;;  %7766 = vmatprep.mubr.bf16.mxu1 %v14629_v59 }
 0x39a   : > { %7565 = vmatpush1.bf16.msra.mxu0 %v12206_v53  ;;  %7737 = vmatpush1.bf16.msra.mxu1 %v12208_v57  ;;  %v12286_v53 = vcombine.low %v488_v25, %v496_v27  ;;  %v12288_v57 = vcombine.low %v489_v31, %v497_v32  ;;  %v568_v25 = vld [vmem:[#allocation5 + $0x5b0] sm:$0xff]  ;;  %v569_v31 = vld [vmem:[#allocation5 + $0x5b8] sm:$0xff] }
 0x39b   : > { %7566 = vmatprep.subr.bf16.mxu0 %v12223_v58  ;;  %7738 = vmatprep.subr.bf16.mxu1 %v12225_v61  ;;  %v12303_v58 = vcombine.high %v504_v45, %v512_v46  ;;  %v12305_v61 = vcombine.high %v505_v49, %v513_v50  ;;  %v576_v27 = vld [vmem:[#allocation5 + $0x5f0] sm:$0xff]  ;;  %v577_v32 = vld [vmem:[#allocation5 + $0x5f8] sm:$0xff] }
 0x39e   : > { %7567 = vmatpush1.bf16.msra.mxu0 %v12222_v3  ;;  %7739 = vmatpush1.bf16.msra.mxu1 %v12224_v4  ;;  %v12302_v3 = vcombine.low %v504_v45, %v512_v46  ;;  %v12304_v4 = vcombine.low %v505_v49, %v513_v50  ;;  %v584_v45 = vld [vmem:[#allocation5 + $0x630] sm:$0xff]  ;;  %v585_v49 = vld [vmem:[#allocation5 + $0x638] sm:$0xff] }
 0x39f   : > { %7568 = vmatprep.subr.bf16.mxu0 %v12239_v5  ;;  %7740 = vmatprep.subr.bf16.mxu1 %v12241_v6  ;;  %v12319_v5 = vcombine.high %v520_v62, %v528_v63  ;;  %v12321_v6 = vcombine.high %v521_v1, %v529_v2  ;;  %v592_v46 = vld [vmem:[#allocation5 + $0x670] sm:$0xff]  ;;  %v593_v50 = vld [vmem:[#allocation5 + $0x678] sm:$0xff] }
 0x3a2   : > { %7569 = vmatpush1.bf16.msra.mxu0 %v12238_v11  ;;  %7741 = vmatpush1.bf16.msra.mxu1 %v12240_v12  ;;  %v12318_v11 = vcombine.low %v520_v62, %v528_v63  ;;  %v12320_v12 = vcombine.low %v521_v1, %v529_v2  ;;  %v600_v62 = vld [vmem:[#allocation5 + $0x6b0] sm:$0xff]  ;;  %v601_v1 = vld [vmem:[#allocation5 + $0x6b8] sm:$0xff] }
 0x3a3   : > { %7570 = vmatprep.subr.bf16.mxu0 %v12255_v13  ;;  %7742 = vmatprep.subr.bf16.mxu1 %v12257_v14  ;;  %v12335_v13 = vcombine.high %v536_v7, %v544_v8  ;;  %v12337_v14 = vcombine.high %v537_v9, %v545_v10  ;;  %v608_v63 = vld [vmem:[#allocation5 + $0x6f0] sm:$0xff]  ;;  %v609_v2 = vld [vmem:[#allocation5 + $0x6f8] sm:$0xff] }
 0x3a6   : > { %7571 = vmatpush1.bf16.msra.mxu0 %v12254_v20  ;;  %7743 = vmatpush1.bf16.msra.mxu1 %v12256_v21  ;;  %v12334_v20 = vcombine.low %v536_v7, %v544_v8  ;;  %v12336_v21 = vcombine.low %v537_v9, %v545_v10  ;;  %v616_v7 = vld [vmem:[#allocation5 + $0x730] sm:$0xff]  ;;  %v617_v9 = vld [vmem:[#allocation5 + $0x738] sm:$0xff] }
 0x3a7   : > { %7572 = vmatprep.subr.bf16.mxu0 %v12271_v22  ;;  %7744 = vmatprep.subr.bf16.mxu1 %v12273_v24  ;;  %v12351_v22 = vcombine.high %v552_v15, %v560_v17  ;;  %v12353_v24 = vcombine.high %v553_v18, %v561_v19  ;;  %v624_v8 = vld [vmem:[#allocation5 + $0x770] sm:$0xff]  ;;  %v625_v10 = vld [vmem:[#allocation5 + $0x778] sm:$0xff] }
 0x3aa   : > { %7573 = vmatpush1.bf16.msra.mxu0 %v12270_v35  ;;  %7745 = vmatpush1.bf16.msra.mxu1 %v12272_v39  ;;  %v12350_v35 = vcombine.low %v552_v15, %v560_v17  ;;  %v12352_v39 = vcombine.low %v553_v18, %v561_v19  ;;  %v632_v15 = vld [vmem:[#allocation5 + $0x7b0] sm:$0xff]  ;;  %v633_v18 = vld [vmem:[#allocation5 + $0x7b8] sm:$0xff] }
 0x3ab   : > { %7574 = vmatprep.subr.bf16.mxu0 %v12287_v40  ;;  %7746 = vmatprep.subr.bf16.mxu1 %v12289_v43  ;;  %v12367_v40 = vcombine.high %v568_v25, %v576_v27  ;;  %v12369_v43 = vcombine.high %v569_v31, %v577_v32  ;;  %v640_v17 = vld [vmem:[#allocation5 + $0x7f0] sm:$0xff]  ;;  %v641_v19 = vld [vmem:[#allocation5 + $0x7f8] sm:$0xff] }
 0x3ae   : > { %7575 = vmatpush1.bf16.msra.mxu0 %v12286_v53  ;;  %7747 = vmatpush1.bf16.msra.mxu1 %v12288_v57  ;;  %v12366_v53 = vcombine.low %v568_v25, %v576_v27  ;;  %v12368_v57 = vcombine.low %v569_v31, %v577_v32  ;;  %v648_v25 = vld [vmem:[#allocation5 + $0x830] sm:$0xff]  ;;  %v649_v31 = vld [vmem:[#allocation5 + $0x838] sm:$0xff] }
 0x3af   : > { %7576 = vmatprep.subr.bf16.mxu0 %v12303_v58  ;;  %7748 = vmatprep.subr.bf16.mxu1 %v12305_v61  ;;  %v12383_v58 = vcombine.high %v584_v45, %v592_v46  ;;  %v12385_v61 = vcombine.high %v585_v49, %v593_v50  ;;  %v656_v27 = vld [vmem:[#allocation5 + $0x870] sm:$0xff]  ;;  %v657_v32 = vld [vmem:[#allocation5 + $0x878] sm:$0xff] }
 0x3b2   : > { %7577 = vmatpush1.bf16.msra.mxu0 %v12302_v3  ;;  %7749 = vmatpush1.bf16.msra.mxu1 %v12304_v4  ;;  %v12382_v3 = vcombine.low %v584_v45, %v592_v46  ;;  %v12384_v4 = vcombine.low %v585_v49, %v593_v50  ;;  %v664_v45 = vld [vmem:[#allocation5 + $0x8b0] sm:$0xff]  ;;  %v665_v49 = vld [vmem:[#allocation5 + $0x8b8] sm:$0xff] }
 0x3b3   : > { %7578 = vmatprep.subr.bf16.mxu0 %v12319_v5  ;;  %7750 = vmatprep.subr.bf16.mxu1 %v12321_v6  ;;  %v12399_v5 = vcombine.high %v600_v62, %v608_v63  ;;  %v12401_v6 = vcombine.high %v601_v1, %v609_v2  ;;  %v672_v46 = vld [vmem:[#allocation5 + $0x8f0] sm:$0xff]  ;;  %v673_v50 = vld [vmem:[#allocation5 + $0x8f8] sm:$0xff] }
 0x3b6   : > { %7579 = vmatpush1.bf16.msra.mxu0 %v12318_v11  ;;  %7751 = vmatpush1.bf16.msra.mxu1 %v12320_v12  ;;  %v12398_v11 = vcombine.low %v600_v62, %v608_v63  ;;  %v12400_v12 = vcombine.low %v601_v1, %v609_v2  ;;  %v680_v62 = vld [vmem:[#allocation5 + $0x930] sm:$0xff]  ;;  %v681_v1 = vld [vmem:[#allocation5 + $0x938] sm:$0xff] }
 0x3b7   : > { %7580 = vmatprep.subr.bf16.mxu0 %v12335_v13  ;;  %7752 = vmatprep.subr.bf16.mxu1 %v12337_v14  ;;  %v12415_v13 = vcombine.high %v616_v7, %v624_v8  ;;  %v12417_v14 = vcombine.high %v617_v9, %v625_v10  ;;  %v688_v63 = vld [vmem:[#allocation5 + $0x970] sm:$0xff]  ;;  %v689_v2 = vld [vmem:[#allocation5 + $0x978] sm:$0xff] }
 0x3ba   : > { %7581 = vmatpush1.bf16.msra.mxu0 %v12334_v20  ;;  %7753 = vmatpush1.bf16.msra.mxu1 %v12336_v21  ;;  %v12414_v20 = vcombine.low %v616_v7, %v624_v8  ;;  %v12416_v21 = vcombine.low %v617_v9, %v625_v10  ;;  %v696_v7 = vld [vmem:[#allocation5 + $0x9b0] sm:$0xff]  ;;  %v697_v9 = vld [vmem:[#allocation5 + $0x9b8] sm:$0xff] }
 0x3bb   : > { %7582 = vmatprep.subr.bf16.mxu0 %v12351_v22  ;;  %7754 = vmatprep.subr.bf16.mxu1 %v12353_v24  ;;  %v12431_v22 = vcombine.high %v632_v15, %v640_v17  ;;  %v12433_v24 = vcombine.high %v633_v18, %v641_v19  ;;  %v704_v8 = vld [vmem:[#allocation5 + $0x9f0] sm:$0xff]  ;;  %v705_v10 = vld [vmem:[#allocation5 + $0x9f8] sm:$0xff] }
 0x3be   : > { %7583 = vmatpush1.bf16.msra.mxu0 %v12350_v35  ;;  %7755 = vmatpush1.bf16.msra.mxu1 %v12352_v39  ;;  %v12430_v35 = vcombine.low %v632_v15, %v640_v17  ;;  %v12432_v39 = vcombine.low %v633_v18, %v641_v19  ;;  %v712_v15 = vld [vmem:[#allocation5 + $0xa30] sm:$0xff]  ;;  %v713_v18 = vld [vmem:[#allocation5 + $0xa38] sm:$0xff] }
 0x3bf   : > { %7584 = vmatprep.subr.bf16.mxu0 %v12367_v40  ;;  %7756 = vmatprep.subr.bf16.mxu1 %v12369_v43  ;;  %v12447_v40 = vcombine.high %v648_v25, %v656_v27  ;;  %v12449_v43 = vcombine.high %v649_v31, %v657_v32  ;;  %v720_v17 = vld [vmem:[#allocation5 + $0xa70] sm:$0xff]  ;;  %v721_v19 = vld [vmem:[#allocation5 + $0xa78] sm:$0xff] }
 0x3c2   : > { %7585 = vmatpush1.bf16.msra.mxu0 %v12366_v53  ;;  %7757 = vmatpush1.bf16.msra.mxu1 %v12368_v57  ;;  %v12446_v53 = vcombine.low %v648_v25, %v656_v27  ;;  %v12448_v57 = vcombine.low %v649_v31, %v657_v32  ;;  %v728_v25 = vld [vmem:[#allocation5 + $0xab0] sm:$0xff]  ;;  %v729_v31 = vld [vmem:[#allocation5 + $0xab8] sm:$0xff] }
 0x3c3   : > { %7586 = vmatprep.subr.bf16.mxu0 %v12383_v58  ;;  %7758 = vmatprep.subr.bf16.mxu1 %v12385_v61  ;;  %v12463_v58 = vcombine.high %v664_v45, %v672_v46  ;;  %v12465_v61 = vcombine.high %v665_v49, %v673_v50  ;;  %v736_v27 = vld [vmem:[#allocation5 + $0xaf0] sm:$0xff]  ;;  %v737_v32 = vld [vmem:[#allocation5 + $0xaf8] sm:$0xff] }
 0x3c6   : > { %7587 = vmatpush1.bf16.msra.mxu0 %v12382_v3  ;;  %7759 = vmatpush1.bf16.msra.mxu1 %v12384_v4  ;;  %v12462_v3 = vcombine.low %v664_v45, %v672_v46  ;;  %v12464_v4 = vcombine.low %v665_v49, %v673_v50  ;;  %v744_v45 = vld [vmem:[#allocation5 + $0xb30] sm:$0xff]  ;;  %v745_v49 = vld [vmem:[#allocation5 + $0xb38] sm:$0xff] }
 0x3c7   : > { %7588 = vmatprep.subr.bf16.mxu0 %v12399_v5  ;;  %7760 = vmatprep.subr.bf16.mxu1 %v12401_v6  ;;  %v12479_v5 = vcombine.high %v680_v62, %v688_v63  ;;  %v12481_v6 = vcombine.high %v681_v1, %v689_v2  ;;  %v752_v46 = vld [vmem:[#allocation5 + $0xb70] sm:$0xff]  ;;  %v753_v50 = vld [vmem:[#allocation5 + $0xb78] sm:$0xff] }
 0x3ca   : > { %7589 = vmatpush1.bf16.msra.mxu0 %v12398_v11  ;;  %7761 = vmatpush1.bf16.msra.mxu1 %v12400_v12  ;;  %v12478_v11 = vcombine.low %v680_v62, %v688_v63  ;;  %v12480_v12 = vcombine.low %v681_v1, %v689_v2  ;;  %v760_v62 = vld [vmem:[#allocation5 + $0xbb0] sm:$0xff]  ;;  %v761_v1 = vld [vmem:[#allocation5 + $0xbb8] sm:$0xff] }
 0x3cb   : > { %7590 = vmatprep.subr.bf16.mxu0 %v12415_v13  ;;  %7762 = vmatprep.subr.bf16.mxu1 %v12417_v14  ;;  %v12495_v13 = vcombine.high %v696_v7, %v704_v8  ;;  %v12497_v14 = vcombine.high %v697_v9, %v705_v10  ;;  %v768_v63 = vld [vmem:[#allocation5 + $0xbf0] sm:$0xff]  ;;  %v769_v2 = vld [vmem:[#allocation5 + $0xbf8] sm:$0xff] }
 0x3ce   : > { %7591 = vmatpush1.bf16.msra.mxu0 %v12414_v20  ;;  %7763 = vmatpush1.bf16.msra.mxu1 %v12416_v21  ;;  %v12494_v20 = vcombine.low %v696_v7, %v704_v8  ;;  %v12496_v21 = vcombine.low %v697_v9, %v705_v10  ;;  %v776_v7 = vld [vmem:[#allocation5 + $0xc30] sm:$0xff]  ;;  %v777_v9 = vld [vmem:[#allocation5 + $0xc38] sm:$0xff] }
 0x3cf   : > { %7592 = vmatprep.subr.bf16.mxu0 %v12431_v22  ;;  %7764 = vmatprep.subr.bf16.mxu1 %v12433_v24  ;;  %v12511_v22 = vcombine.high %v712_v15, %v720_v17  ;;  %v12513_v24 = vcombine.high %v713_v18, %v721_v19  ;;  %v784_v8 = vld [vmem:[#allocation5 + $0xc70] sm:$0xff]  ;;  %v785_v10 = vld [vmem:[#allocation5 + $0xc78] sm:$0xff] }
 0x3d2   : > { %7593 = vmatpush1.bf16.msra.mxu0 %v12430_v35  ;;  %7765 = vmatpush1.bf16.msra.mxu1 %v12432_v39  ;;  %v12510_v35 = vcombine.low %v712_v15, %v720_v17  ;;  %v12512_v39 = vcombine.low %v713_v18, %v721_v19  ;;  %v792_v15 = vld [vmem:[#allocation5 + $0xcb0] sm:$0xff]  ;;  %v793_v18 = vld [vmem:[#allocation5 + $0xcb8] sm:$0xff] }
 0x3d3   : > { %7605 = vmatprep.subr.bf16.mxu0 %v12447_v40  ;;  %7777 = vmatprep.subr.bf16.mxu1 %v12449_v43  ;;  %v12527_v40 = vcombine.high %v728_v25, %v736_v27  ;;  %v12529_v43 = vcombine.high %v729_v31, %v737_v32  ;;  %v800_v17 = vld [vmem:[#allocation5 + $0xcf0] sm:$0xff]  ;;  %v801_v19 = vld [vmem:[#allocation5 + $0xcf8] sm:$0xff] }
 0x3d5   : > { %7595 = vmatmul.mubr.bf16.vlgmr.msra.gmra.mrb[12].mxu0 %v14633_v16  ;;  %7767 = vmatmul.mubr.bf16.vlgmr.msra.gmra.mrb[12].mxu1 %v14633_v16 }
 0x3d6   : > { %7606 = vmatpush1.bf16.msra.mxu0 %v12446_v53  ;;  %7778 = vmatpush1.bf16.msra.mxu1 %v12448_v57  ;;  %v12526_v53 = vcombine.low %v728_v25, %v736_v27  ;;  %v12528_v57 = vcombine.low %v729_v31, %v737_v32  ;;  %v808_v25 = vld [vmem:[#allocation5 + $0xd30] sm:$0xff]  ;;  %v809_v31 = vld [vmem:[#allocation5 + $0xd38] sm:$0xff] }
 0x3d7   : > { %7607 = vmatprep.subr.bf16.mxu0 %v12463_v58  ;;  %7779 = vmatprep.subr.bf16.mxu1 %v12465_v61  ;;  %v12543_v58 = vcombine.high %v744_v45, %v752_v46  ;;  %v12545_v61 = vcombine.high %v745_v49, %v753_v50  ;;  %v816_v27 = vld [vmem:[#allocation5 + $0xd70] sm:$0xff]  ;;  %v817_v32 = vld [vmem:[#allocation5 + $0xd78] sm:$0xff] }
 0x3d8   : > { %7637 = vmatprep.mubr.bf16.mxu0 %v14635_v26  ;;  %7809 = vmatprep.mubr.bf16.mxu1 %v14635_v26 }
 0x3da   : > { %7608 = vmatpush1.bf16.msra.mxu0 %v12462_v3  ;;  %7780 = vmatpush1.bf16.msra.mxu1 %v12464_v4  ;;  %v12542_v3 = vcombine.low %v744_v45, %v752_v46  ;;  %v12544_v4 = vcombine.low %v745_v49, %v753_v50  ;;  %v824_v45 = vld [vmem:[#allocation5 + $0xdb0] sm:$0xff]  ;;  %v825_v49 = vld [vmem:[#allocation5 + $0xdb8] sm:$0xff] }
 0x3db   : > { %7609 = vmatprep.subr.bf16.mxu0 %v12479_v5  ;;  %7781 = vmatprep.subr.bf16.mxu1 %v12481_v6  ;;  %v12559_v5 = vcombine.high %v760_v62, %v768_v63  ;;  %v12561_v6 = vcombine.high %v761_v1, %v769_v2  ;;  %v832_v46 = vld [vmem:[#allocation5 + $0xdf0] sm:$0xff]  ;;  %v833_v50 = vld [vmem:[#allocation5 + $0xdf8] sm:$0xff] }
 0x3de   : > { %7610 = vmatpush1.bf16.msra.mxu0 %v12478_v11  ;;  %7782 = vmatpush1.bf16.msra.mxu1 %v12480_v12  ;;  %v12558_v11 = vcombine.low %v760_v62, %v768_v63  ;;  %v12560_v12 = vcombine.low %v761_v1, %v769_v2  ;;  %v840_v62 = vld [vmem:[#allocation5 + $0xe30] sm:$0xff]  ;;  %v841_v1 = vld [vmem:[#allocation5 + $0xe38] sm:$0xff] }
 0x3df   : > { %7611 = vmatprep.subr.bf16.mxu0 %v12495_v13  ;;  %7783 = vmatprep.subr.bf16.mxu1 %v12497_v14  ;;  %v12575_v13 = vcombine.high %v776_v7, %v784_v8  ;;  %v12577_v14 = vcombine.high %v777_v9, %v785_v10  ;;  %v848_v63 = vld [vmem:[#allocation5 + $0xe70] sm:$0xff]  ;;  %v849_v2 = vld [vmem:[#allocation5 + $0xe78] sm:$0xff] }
 0x3e2   : > { %7612 = vmatpush1.bf16.msra.mxu0 %v12494_v20  ;;  %7784 = vmatpush1.bf16.msra.mxu1 %v12496_v21  ;;  %v12574_v20 = vcombine.low %v776_v7, %v784_v8  ;;  %v12576_v21 = vcombine.low %v777_v9, %v785_v10  ;;  %v856_v7 = vld [vmem:[#allocation5 + $0xeb0] sm:$0xff]  ;;  %v857_v9 = vld [vmem:[#allocation5 + $0xeb8] sm:$0xff] }
 0x3e3   : > { %7613 = vmatprep.subr.bf16.mxu0 %v12511_v22  ;;  %7785 = vmatprep.subr.bf16.mxu1 %v12513_v24  ;;  %v12591_v22 = vcombine.high %v792_v15, %v800_v17  ;;  %v12593_v24 = vcombine.high %v793_v18, %v801_v19  ;;  %v864_v8 = vld [vmem:[#allocation5 + $0xef0] sm:$0xff]  ;;  %v865_v10 = vld [vmem:[#allocation5 + $0xef8] sm:$0xff] }
 0x3e6   : > { %7614 = vmatpush1.bf16.msra.mxu0 %v12510_v35  ;;  %7786 = vmatpush1.bf16.msra.mxu1 %v12512_v39  ;;  %v12590_v35 = vcombine.low %v792_v15, %v800_v17  ;;  %v12592_v39 = vcombine.low %v793_v18, %v801_v19  ;;  %v872_v15 = vld [vmem:[#allocation5 + $0xf30] sm:$0xff]  ;;  %v873_v18 = vld [vmem:[#allocation5 + $0xf38] sm:$0xff] }
 0x3e7   : > { %7615 = vmatprep.subr.bf16.mxu0 %v12527_v40  ;;  %7787 = vmatprep.subr.bf16.mxu1 %v12529_v43  ;;  %v12607_v40 = vcombine.high %v808_v25, %v816_v27  ;;  %v12609_v43 = vcombine.high %v809_v31, %v817_v32  ;;  %v880_v17 = vld [vmem:[#allocation5 + $0xf70] sm:$0xff]  ;;  %v881_v19 = vld [vmem:[#allocation5 + $0xf78] sm:$0xff] }
 0x3ea   : > { %7616 = vmatpush1.bf16.msra.mxu0 %v12526_v53  ;;  %7788 = vmatpush1.bf16.msra.mxu1 %v12528_v57  ;;  %v12606_v53 = vcombine.low %v808_v25, %v816_v27  ;;  %v12608_v57 = vcombine.low %v809_v31, %v817_v32  ;;  %v888_v25 = vld [vmem:[#allocation5 + $0xfb0] sm:$0xff]  ;;  %v889_v31 = vld [vmem:[#allocation5 + $0xfb8] sm:$0xff] }
 0x3eb   : > { %7617 = vmatprep.subr.bf16.mxu0 %v12543_v58  ;;  %7789 = vmatprep.subr.bf16.mxu1 %v12545_v61  ;;  %v12623_v58 = vcombine.high %v824_v45, %v832_v46  ;;  %v12625_v61 = vcombine.high %v825_v49, %v833_v50  ;;  %v896_v27 = vld [vmem:[#allocation5 + $0xff0] sm:$0xff]  ;;  %v897_v32 = vld [vmem:[#allocation5 + $0xff8] sm:$0xff] }
 0x3ee   : > { %7618 = vmatpush1.bf16.msra.mxu0 %v12542_v3  ;;  %7790 = vmatpush1.bf16.msra.mxu1 %v12544_v4  ;;  %v12622_v3 = vcombine.low %v824_v45, %v832_v46  ;;  %v12624_v4 = vcombine.low %v825_v49, %v833_v50  ;;  %v904_v45 = vld [vmem:[#allocation5 + $0x1030] sm:$0xff]  ;;  %v905_v49 = vld [vmem:[#allocation5 + $0x1038] sm:$0xff] }
 0x3ef   : > { %7619 = vmatprep.subr.bf16.mxu0 %v12559_v5  ;;  %7791 = vmatprep.subr.bf16.mxu1 %v12561_v6  ;;  %v12639_v5 = vcombine.high %v840_v62, %v848_v63  ;;  %v12641_v6 = vcombine.high %v841_v1, %v849_v2  ;;  %v912_v46 = vld [vmem:[#allocation5 + $0x1070] sm:$0xff]  ;;  %v913_v50 = vld [vmem:[#allocation5 + $0x1078] sm:$0xff] }
 0x3f2   : > { %7620 = vmatpush1.bf16.msra.mxu0 %v12558_v11  ;;  %7792 = vmatpush1.bf16.msra.mxu1 %v12560_v12  ;;  %v12638_v11 = vcombine.low %v840_v62, %v848_v63  ;;  %v12640_v12 = vcombine.low %v841_v1, %v849_v2  ;;  %v920_v62 = vld [vmem:[#allocation5 + $0x10b0] sm:$0xff]  ;;  %v921_v1 = vld [vmem:[#allocation5 + $0x10b8] sm:$0xff] }
 0x3f3   : > { %7621 = vmatprep.subr.bf16.mxu0 %v12575_v13  ;;  %7793 = vmatprep.subr.bf16.mxu1 %v12577_v14  ;;  %v12655_v13 = vcombine.high %v856_v7, %v864_v8  ;;  %v12657_v14 = vcombine.high %v857_v9, %v865_v10  ;;  %v928_v63 = vld [vmem:[#allocation5 + $0x10f0] sm:$0xff]  ;;  %v929_v2 = vld [vmem:[#allocation5 + $0x10f8] sm:$0xff] }
 0x3f6   : > { %7622 = vmatpush1.bf16.msra.mxu0 %v12574_v20  ;;  %7794 = vmatpush1.bf16.msra.mxu1 %v12576_v21  ;;  %v12654_v20 = vcombine.low %v856_v7, %v864_v8  ;;  %v12656_v21 = vcombine.low %v857_v9, %v865_v10  ;;  %v936_v7 = vld [vmem:[#allocation5 + $0x1130] sm:$0xff]  ;;  %v937_v9 = vld [vmem:[#allocation5 + $0x1138] sm:$0xff] }
 0x3f7   : > { %7623 = vmatprep.subr.bf16.mxu0 %v12591_v22  ;;  %7795 = vmatprep.subr.bf16.mxu1 %v12593_v24  ;;  %v12671_v22 = vcombine.high %v872_v15, %v880_v17  ;;  %v12673_v24 = vcombine.high %v873_v18, %v881_v19  ;;  %v944_v8 = vld [vmem:[#allocation5 + $0x1170] sm:$0xff]  ;;  %v945_v10 = vld [vmem:[#allocation5 + $0x1178] sm:$0xff] }
 0x3fa   : > { %7624 = vmatpush1.bf16.msra.mxu0 %v12590_v35  ;;  %7796 = vmatpush1.bf16.msra.mxu1 %v12592_v39  ;;  %v12670_v35 = vcombine.low %v872_v15, %v880_v17  ;;  %v12672_v39 = vcombine.low %v873_v18, %v881_v19  ;;  %v952_v15 = vld [vmem:[#allocation5 + $0x11b0] sm:$0xff]  ;;  %v953_v18 = vld [vmem:[#allocation5 + $0x11b8] sm:$0xff] }
 0x3fb   : > { %7625 = vmatprep.subr.bf16.mxu0 %v12607_v40  ;;  %7797 = vmatprep.subr.bf16.mxu1 %v12609_v43  ;;  %v12687_v40 = vcombine.high %v888_v25, %v896_v27  ;;  %v12689_v43 = vcombine.high %v889_v31, %v897_v32  ;;  %v960_v17 = vld [vmem:[#allocation5 + $0x11f0] sm:$0xff]  ;;  %v961_v19 = vld [vmem:[#allocation5 + $0x11f8] sm:$0xff] }
 0x3fe   : > { %7626 = vmatpush1.bf16.msra.mxu0 %v12606_v53  ;;  %7798 = vmatpush1.bf16.msra.mxu1 %v12608_v57  ;;  %v12686_v53 = vcombine.low %v888_v25, %v896_v27  ;;  %v12688_v57 = vcombine.low %v889_v31, %v897_v32  ;;  %v968_v25 = vld [vmem:[#allocation5 + $0x1230] sm:$0xff]  ;;  %v969_v31 = vld [vmem:[#allocation5 + $0x1238] sm:$0xff] }
 0x3ff   : > { %7627 = vmatprep.subr.bf16.mxu0 %v12623_v58  ;;  %7799 = vmatprep.subr.bf16.mxu1 %v12625_v61  ;;  %v12703_v58 = vcombine.high %v904_v45, %v912_v46  ;;  %v12705_v61 = vcombine.high %v905_v49, %v913_v50  ;;  %v976_v27 = vld [vmem:[#allocation5 + $0x1270] sm:$0xff]  ;;  %v977_v32 = vld [vmem:[#allocation5 + $0x1278] sm:$0xff] }
 0x402   : > { %7628 = vmatpush1.bf16.msra.mxu0 %v12622_v3  ;;  %7800 = vmatpush1.bf16.msra.mxu1 %v12624_v4  ;;  %v12702_v3 = vcombine.low %v904_v45, %v912_v46  ;;  %v12704_v4 = vcombine.low %v905_v49, %v913_v50  ;;  %v984_v45 = vld [vmem:[#allocation5 + $0x12b0] sm:$0xff]  ;;  %v985_v49 = vld [vmem:[#allocation5 + $0x12b8] sm:$0xff] }
 0x403   : > { %7629 = vmatprep.subr.bf16.mxu0 %v12639_v5  ;;  %7801 = vmatprep.subr.bf16.mxu1 %v12641_v6  ;;  %v12719_v5 = vcombine.high %v920_v62, %v928_v63  ;;  %v12721_v6 = vcombine.high %v921_v1, %v929_v2  ;;  %v992_v46 = vld [vmem:[#allocation5 + $0x12f0] sm:$0xff]  ;;  %v993_v50 = vld [vmem:[#allocation5 + $0x12f8] sm:$0xff] }
 0x406   : > { %7630 = vmatpush1.bf16.msra.mxu0 %v12638_v11  ;;  %7802 = vmatpush1.bf16.msra.mxu1 %v12640_v12  ;;  %v12718_v11 = vcombine.low %v920_v62, %v928_v63  ;;  %v12720_v12 = vcombine.low %v921_v1, %v929_v2  ;;  %v1000_v62 = vld [vmem:[#allocation5 + $0x1330] sm:$0xff]  ;;  %v1001_v1 = vld [vmem:[#allocation5 + $0x1338] sm:$0xff] }
 0x407   : > { %7631 = vmatprep.subr.bf16.mxu0 %v12655_v13  ;;  %7803 = vmatprep.subr.bf16.mxu1 %v12657_v14  ;;  %v12735_v13 = vcombine.high %v936_v7, %v944_v8  ;;  %v12737_v14 = vcombine.high %v937_v9, %v945_v10  ;;  %v1008_v63 = vld [vmem:[#allocation5 + $0x1370] sm:$0xff]  ;;  %v1009_v2 = vld [vmem:[#allocation5 + $0x1378] sm:$0xff] }
 0x40a   : > { %7632 = vmatpush1.bf16.msra.mxu0 %v12654_v20  ;;  %7804 = vmatpush1.bf16.msra.mxu1 %v12656_v21  ;;  %v12734_v20 = vcombine.low %v936_v7, %v944_v8  ;;  %v12736_v21 = vcombine.low %v937_v9, %v945_v10  ;;  %v1016_v7 = vld [vmem:[#allocation5 + $0x13b0] sm:$0xff]  ;;  %v1017_v9 = vld [vmem:[#allocation5 + $0x13b8] sm:$0xff] }
 0x40b   : > { %7633 = vmatprep.subr.bf16.mxu0 %v12671_v22  ;;  %7805 = vmatprep.subr.bf16.mxu1 %v12673_v24  ;;  %v12751_v22 = vcombine.high %v952_v15, %v960_v17  ;;  %v12753_v24 = vcombine.high %v953_v18, %v961_v19  ;;  %v1024_v8 = vld [vmem:[#allocation5 + $0x13f0] sm:$0xff]  ;;  %v1025_v10 = vld [vmem:[#allocation5 + $0x13f8] sm:$0xff] }
 0x40e   : > { %7634 = vmatpush1.bf16.msra.mxu0 %v12670_v35  ;;  %7806 = vmatpush1.bf16.msra.mxu1 %v12672_v39  ;;  %v12750_v35 = vcombine.low %v952_v15, %v960_v17  ;;  %v12752_v39 = vcombine.low %v953_v18, %v961_v19  ;;  %v1032_v15 = vld [vmem:[#allocation5 + $0x1430] sm:$0xff]  ;;  %v1033_v18 = vld [vmem:[#allocation5 + $0x1438] sm:$0xff] }
 0x40f   : > { %7635 = vmatprep.subr.bf16.mxu0 %v12687_v40  ;;  %7807 = vmatprep.subr.bf16.mxu1 %v12689_v43  ;;  %v12767_v40 = vcombine.high %v968_v25, %v976_v27  ;;  %v12769_v43 = vcombine.high %v969_v31, %v977_v32  ;;  %v1040_v17 = vld [vmem:[#allocation5 + $0x1470] sm:$0xff]  ;;  %v1041_v19 = vld [vmem:[#allocation5 + $0x1478] sm:$0xff] }
 0x412   : > { %7636 = vmatpush1.bf16.msra.mxu0 %v12686_v53  ;;  %7808 = vmatpush1.bf16.msra.mxu1 %v12688_v57  ;;  %v12766_v53 = vcombine.low %v968_v25, %v976_v27  ;;  %v12768_v57 = vcombine.low %v969_v31, %v977_v32  ;;  %v1048_v25 = vld [vmem:[#allocation5 + $0x14b0] sm:$0xff]  ;;  %v1049_v31 = vld [vmem:[#allocation5 + $0x14b8] sm:$0xff] }
 0x413   : > { %7648 = vmatprep.subr.bf16.mxu0 %v12703_v58  ;;  %7820 = vmatprep.subr.bf16.mxu1 %v12705_v61  ;;  %v12783_v58 = vcombine.high %v984_v45, %v992_v46  ;;  %v12785_v61 = vcombine.high %v985_v49, %v993_v50  ;;  %v1056_v27 = vld [vmem:[#allocation5 + $0x14f0] sm:$0xff]  ;;  %v1057_v32 = vld [vmem:[#allocation5 + $0x14f8] sm:$0xff] }
 0x415   : > { %7638 = vmatmul.mubr.bf16.vlgmr.msra.gmra.mrb[12].mxu0 %v14641_v28  ;;  %7810 = vmatmul.mubr.bf16.vlgmr.msra.gmra.mrb[12].mxu1 %v14641_v28 }
 0x416   : > { %7649 = vmatpush1.bf16.msra.mxu0 %v12702_v3  ;;  %7821 = vmatpush1.bf16.msra.mxu1 %v12704_v4  ;;  %v12782_v3 = vcombine.low %v984_v45, %v992_v46  ;;  %v12784_v4 = vcombine.low %v985_v49, %v993_v50  ;;  %v1064_v45 = vld [vmem:[#allocation5 + $0x1530] sm:$0xff]  ;;  %v1065_v49 = vld [vmem:[#allocation5 + $0x1538] sm:$0xff] }
 0x417   : > { %7650 = vmatprep.subr.bf16.mxu0 %v12719_v5  ;;  %7822 = vmatprep.subr.bf16.mxu1 %v12721_v6  ;;  %v12799_v5 = vcombine.high %v1000_v62, %v1008_v63  ;;  %v12801_v6 = vcombine.high %v1001_v1, %v1009_v2  ;;  %v1072_v46 = vld [vmem:[#allocation5 + $0x1570] sm:$0xff]  ;;  %v1073_v50 = vld [vmem:[#allocation5 + $0x1578] sm:$0xff] }
 0x418   : > { %7680 = vmatprep.mubr.bf16.mxu0 %v14643_v38  ;;  %7852 = vmatprep.mubr.bf16.mxu1 %v14643_v38 }
 0x41a   : > { %7651 = vmatpush1.bf16.msra.mxu0 %v12718_v11  ;;  %7823 = vmatpush1.bf16.msra.mxu1 %v12720_v12  ;;  %v12798_v11 = vcombine.low %v1000_v62, %v1008_v63  ;;  %v12800_v12 = vcombine.low %v1001_v1, %v1009_v2  ;;  %v1080_v62 = vld [vmem:[#allocation5 + $0x15b0] sm:$0xff]  ;;  %v1081_v1 = vld [vmem:[#allocation5 + $0x15b8] sm:$0xff] }
 0x41b   : > { %7652 = vmatprep.subr.bf16.mxu0 %v12735_v13  ;;  %7824 = vmatprep.subr.bf16.mxu1 %v12737_v14  ;;  %v12815_v13 = vcombine.high %v1016_v7, %v1024_v8  ;;  %v12817_v14 = vcombine.high %v1017_v9, %v1025_v10  ;;  %v1088_v63 = vld [vmem:[#allocation5 + $0x15f0] sm:$0xff]  ;;  %v1089_v2 = vld [vmem:[#allocation5 + $0x15f8] sm:$0xff] }
 0x41e   : > { %7653 = vmatpush1.bf16.msra.mxu0 %v12734_v20  ;;  %7825 = vmatpush1.bf16.msra.mxu1 %v12736_v21  ;;  %v12814_v20 = vcombine.low %v1016_v7, %v1024_v8  ;;  %v12816_v21 = vcombine.low %v1017_v9, %v1025_v10  ;;  %v1096_v7 = vld [vmem:[#allocation5 + $0x1630] sm:$0xff]  ;;  %v1097_v9 = vld [vmem:[#allocation5 + $0x1638] sm:$0xff] }
 0x41f   : > { %7654 = vmatprep.subr.bf16.mxu0 %v12751_v22  ;;  %7826 = vmatprep.subr.bf16.mxu1 %v12753_v24  ;;  %v12831_v22 = vcombine.high %v1032_v15, %v1040_v17  ;;  %v12833_v24 = vcombine.high %v1033_v18, %v1041_v19  ;;  %v1104_v8 = vld [vmem:[#allocation5 + $0x1670] sm:$0xff]  ;;  %v1105_v10 = vld [vmem:[#allocation5 + $0x1678] sm:$0xff] }
 0x422   : > { %7655 = vmatpush1.bf16.msra.mxu0 %v12750_v35  ;;  %7827 = vmatpush1.bf16.msra.mxu1 %v12752_v39  ;;  %v12830_v35 = vcombine.low %v1032_v15, %v1040_v17  ;;  %v12832_v39 = vcombine.low %v1033_v18, %v1041_v19  ;;  %v1112_v15 = vld [vmem:[#allocation5 + $0x16b0] sm:$0xff]  ;;  %v1113_v18 = vld [vmem:[#allocation5 + $0x16b8] sm:$0xff] }
 0x423   : > { %7656 = vmatprep.subr.bf16.mxu0 %v12767_v40  ;;  %7828 = vmatprep.subr.bf16.mxu1 %v12769_v43  ;;  %v12847_v40 = vcombine.high %v1048_v25, %v1056_v27  ;;  %v12849_v43 = vcombine.high %v1049_v31, %v1057_v32  ;;  %v1120_v17 = vld [vmem:[#allocation5 + $0x16f0] sm:$0xff]  ;;  %v1121_v19 = vld [vmem:[#allocation5 + $0x16f8] sm:$0xff] }
 0x426   : > { %7657 = vmatpush1.bf16.msra.mxu0 %v12766_v53  ;;  %7829 = vmatpush1.bf16.msra.mxu1 %v12768_v57  ;;  %v12846_v53 = vcombine.low %v1048_v25, %v1056_v27  ;;  %v12848_v57 = vcombine.low %v1049_v31, %v1057_v32  ;;  %v1128_v25 = vld [vmem:[#allocation5 + $0x1730] sm:$0xff]  ;;  %v1129_v31 = vld [vmem:[#allocation5 + $0x1738] sm:$0xff] }
 0x427   : > { %7658 = vmatprep.subr.bf16.mxu0 %v12783_v58  ;;  %7830 = vmatprep.subr.bf16.mxu1 %v12785_v61  ;;  %v12863_v58 = vcombine.high %v1064_v45, %v1072_v46  ;;  %v12865_v61 = vcombine.high %v1065_v49, %v1073_v50  ;;  %v1136_v27 = vld [vmem:[#allocation5 + $0x1770] sm:$0xff]  ;;  %v1137_v32 = vld [vmem:[#allocation5 + $0x1778] sm:$0xff] }
 0x42a   : > { %7659 = vmatpush1.bf16.msra.mxu0 %v12782_v3  ;;  %7831 = vmatpush1.bf16.msra.mxu1 %v12784_v4  ;;  %v12862_v3 = vcombine.low %v1064_v45, %v1072_v46  ;;  %v12864_v4 = vcombine.low %v1065_v49, %v1073_v50  ;;  %v1144_v45 = vld [vmem:[#allocation5 + $0x17b0] sm:$0xff]  ;;  %v1145_v49 = vld [vmem:[#allocation5 + $0x17b8] sm:$0xff] }
 0x42b   : > { %7660 = vmatprep.subr.bf16.mxu0 %v12799_v5  ;;  %7832 = vmatprep.subr.bf16.mxu1 %v12801_v6  ;;  %v12879_v5 = vcombine.high %v1080_v62, %v1088_v63  ;;  %v12881_v6 = vcombine.high %v1081_v1, %v1089_v2  ;;  %v1152_v46 = vld [vmem:[#allocation5 + $0x17f0] sm:$0xff]  ;;  %v1153_v50 = vld [vmem:[#allocation5 + $0x17f8] sm:$0xff] }
 0x42e   : > { %7661 = vmatpush1.bf16.msra.mxu0 %v12798_v11  ;;  %7833 = vmatpush1.bf16.msra.mxu1 %v12800_v12  ;;  %v12878_v11 = vcombine.low %v1080_v62, %v1088_v63  ;;  %v12880_v12 = vcombine.low %v1081_v1, %v1089_v2  ;;  %v1160_v62 = vld [vmem:[#allocation5 + $0x1830] sm:$0xff]  ;;  %v1161_v1 = vld [vmem:[#allocation5 + $0x1838] sm:$0xff] }
 0x42f   : > { %7662 = vmatprep.subr.bf16.mxu0 %v12815_v13  ;;  %7834 = vmatprep.subr.bf16.mxu1 %v12817_v14  ;;  %v12895_v13 = vcombine.high %v1096_v7, %v1104_v8  ;;  %v12897_v14 = vcombine.high %v1097_v9, %v1105_v10  ;;  %v1168_v63 = vld [vmem:[#allocation5 + $0x1870] sm:$0xff]  ;;  %v1169_v2 = vld [vmem:[#allocation5 + $0x1878] sm:$0xff] }
 0x432   : > { %7663 = vmatpush1.bf16.msra.mxu0 %v12814_v20  ;;  %7835 = vmatpush1.bf16.msra.mxu1 %v12816_v21  ;;  %v12894_v20 = vcombine.low %v1096_v7, %v1104_v8  ;;  %v12896_v21 = vcombine.low %v1097_v9, %v1105_v10  ;;  %v1176_v7 = vld [vmem:[#allocation5 + $0x18b0] sm:$0xff]  ;;  %v1177_v9 = vld [vmem:[#allocation5 + $0x18b8] sm:$0xff] }
 0x433   : > { %7664 = vmatprep.subr.bf16.mxu0 %v12831_v22  ;;  %7836 = vmatprep.subr.bf16.mxu1 %v12833_v24  ;;  %v12911_v22 = vcombine.high %v1112_v15, %v1120_v17  ;;  %v12913_v24 = vcombine.high %v1113_v18, %v1121_v19  ;;  %v1184_v8 = vld [vmem:[#allocation5 + $0x18f0] sm:$0xff]  ;;  %v1185_v10 = vld [vmem:[#allocation5 + $0x18f8] sm:$0xff] }
 0x436   : > { %7665 = vmatpush1.bf16.msra.mxu0 %v12830_v35  ;;  %7837 = vmatpush1.bf16.msra.mxu1 %v12832_v39  ;;  %v12910_v35 = vcombine.low %v1112_v15, %v1120_v17  ;;  %v12912_v39 = vcombine.low %v1113_v18, %v1121_v19  ;;  %v1192_v15 = vld [vmem:[#allocation5 + $0x1930] sm:$0xff]  ;;  %v1193_v18 = vld [vmem:[#allocation5 + $0x1938] sm:$0xff] }
 0x437   : > { %7666 = vmatprep.subr.bf16.mxu0 %v12847_v40  ;;  %7838 = vmatprep.subr.bf16.mxu1 %v12849_v43  ;;  %v12927_v40 = vcombine.high %v1128_v25, %v1136_v27  ;;  %v12929_v43 = vcombine.high %v1129_v31, %v1137_v32  ;;  %v1200_v17 = vld [vmem:[#allocation5 + $0x1970] sm:$0xff]  ;;  %v1201_v19 = vld [vmem:[#allocation5 + $0x1978] sm:$0xff] }
 0x43a   : > { %7667 = vmatpush1.bf16.msra.mxu0 %v12846_v53  ;;  %7839 = vmatpush1.bf16.msra.mxu1 %v12848_v57  ;;  %v12926_v53 = vcombine.low %v1128_v25, %v1136_v27  ;;  %v12928_v57 = vcombine.low %v1129_v31, %v1137_v32  ;;  %v1208_v25 = vld [vmem:[#allocation5 + $0x19b0] sm:$0xff]  ;;  %v1209_v31 = vld [vmem:[#allocation5 + $0x19b8] sm:$0xff] }
 0x43b   : > { %7668 = vmatprep.subr.bf16.mxu0 %v12863_v58  ;;  %7840 = vmatprep.subr.bf16.mxu1 %v12865_v61  ;;  %v12943_v58 = vcombine.high %v1144_v45, %v1152_v46  ;;  %v12945_v61 = vcombine.high %v1145_v49, %v1153_v50  ;;  %v1216_v27 = vld [vmem:[#allocation5 + $0x19f0] sm:$0xff]  ;;  %v1217_v32 = vld [vmem:[#allocation5 + $0x19f8] sm:$0xff] }
 0x43e   : > { %7669 = vmatpush1.bf16.msra.mxu0 %v12862_v3  ;;  %7841 = vmatpush1.bf16.msra.mxu1 %v12864_v4  ;;  %v12942_v3 = vcombine.low %v1144_v45, %v1152_v46  ;;  %v12944_v4 = vcombine.low %v1145_v49, %v1153_v50  ;;  %v1224_v45 = vld [vmem:[#allocation5 + $0x1a30] sm:$0xff]  ;;  %v1225_v49 = vld [vmem:[#allocation5 + $0x1a38] sm:$0xff] }
 0x43f   : > { %7670 = vmatprep.subr.bf16.mxu0 %v12879_v5  ;;  %7842 = vmatprep.subr.bf16.mxu1 %v12881_v6  ;;  %v12959_v5 = vcombine.high %v1160_v62, %v1168_v63  ;;  %v12961_v6 = vcombine.high %v1161_v1, %v1169_v2  ;;  %v1232_v46 = vld [vmem:[#allocation5 + $0x1a70] sm:$0xff]  ;;  %v1233_v50 = vld [vmem:[#allocation5 + $0x1a78] sm:$0xff] }
 0x442   : > { %7671 = vmatpush1.bf16.msra.mxu0 %v12878_v11  ;;  %7843 = vmatpush1.bf16.msra.mxu1 %v12880_v12  ;;  %v12958_v11 = vcombine.low %v1160_v62, %v1168_v63  ;;  %v12960_v12 = vcombine.low %v1161_v1, %v1169_v2  ;;  %v1240_v62 = vld [vmem:[#allocation5 + $0x1ab0] sm:$0xff]  ;;  %v1241_v1 = vld [vmem:[#allocation5 + $0x1ab8] sm:$0xff] }
 0x443   : > { %7672 = vmatprep.subr.bf16.mxu0 %v12895_v13  ;;  %7844 = vmatprep.subr.bf16.mxu1 %v12897_v14  ;;  %v12975_v13 = vcombine.high %v1176_v7, %v1184_v8  ;;  %v12977_v14 = vcombine.high %v1177_v9, %v1185_v10  ;;  %v1248_v63 = vld [vmem:[#allocation5 + $0x1af0] sm:$0xff]  ;;  %v1249_v2 = vld [vmem:[#allocation5 + $0x1af8] sm:$0xff] }
 0x446   : > { %7673 = vmatpush1.bf16.msra.mxu0 %v12894_v20  ;;  %7845 = vmatpush1.bf16.msra.mxu1 %v12896_v21  ;;  %v12974_v20 = vcombine.low %v1176_v7, %v1184_v8  ;;  %v12976_v21 = vcombine.low %v1177_v9, %v1185_v10  ;;  %v1256_v7 = vld [vmem:[#allocation5 + $0x1b30] sm:$0xff]  ;;  %v1257_v9 = vld [vmem:[#allocation5 + $0x1b38] sm:$0xff] }
 0x447   : > { %7674 = vmatprep.subr.bf16.mxu0 %v12911_v22  ;;  %7846 = vmatprep.subr.bf16.mxu1 %v12913_v24  ;;  %v12991_v22 = vcombine.high %v1192_v15, %v1200_v17  ;;  %v12993_v24 = vcombine.high %v1193_v18, %v1201_v19  ;;  %v1264_v8 = vld [vmem:[#allocation5 + $0x1b70] sm:$0xff]  ;;  %v1265_v10 = vld [vmem:[#allocation5 + $0x1b78] sm:$0xff] }
 0x44a   : > { %7675 = vmatpush1.bf16.msra.mxu0 %v12910_v35  ;;  %7847 = vmatpush1.bf16.msra.mxu1 %v12912_v39  ;;  %v12990_v35 = vcombine.low %v1192_v15, %v1200_v17  ;;  %v12992_v39 = vcombine.low %v1193_v18, %v1201_v19  ;;  %v13057_v15 = vcombine.high %v1257_v9, %v1265_v10  ;;  %v1272_v17 = vld [vmem:[#allocation5 + $0x1bb0] sm:$0xff] }
 0x44b   : > { %7676 = vmatprep.subr.bf16.mxu0 %v12927_v40  ;;  %7848 = vmatprep.subr.bf16.mxu1 %v12929_v43  ;;  %v13007_v40 = vcombine.high %v1208_v25, %v1216_v27  ;;  %v13009_v43 = vcombine.high %v1209_v31, %v1217_v32  ;;  %v1280_v18 = vld [vmem:[#allocation5 + $0x1bf0] sm:$0xff] }
 0x44e   : > { %7677 = vmatpush1.bf16.msra.mxu0 %v12926_v53  ;;  %7849 = vmatpush1.bf16.msra.mxu1 %v12928_v57  ;;  %v13006_v53 = vcombine.low %v1208_v25, %v1216_v27  ;;  %v13008_v57 = vcombine.low %v1209_v31, %v1217_v32  ;;  %v13054_v27 = vcombine.low %v1256_v7, %v1264_v8 }
 0x44f   : > { %7678 = vmatprep.subr.bf16.mxu0 %v12943_v58  ;;  %7850 = vmatprep.subr.bf16.mxu1 %v12945_v61  ;;  %v13023_v58 = vcombine.high %v1224_v45, %v1232_v46  ;;  %v13025_v61 = vcombine.high %v1225_v49, %v1233_v50 }
 0x452   : > { %7679 = vmatpush1.bf16.msra.mxu0 %v12942_v3  ;;  %7851 = vmatpush1.bf16.msra.mxu1 %v12944_v4  ;;  %v13022_v3 = vcombine.low %v1224_v45, %v1232_v46  ;;  %v13024_v4 = vcombine.low %v1225_v49, %v1233_v50  ;;  %v1288_v45 = vld [vmem:[#allocation5 + $0x1c30] sm:$0xff]  ;;  %v1289_v49 = vld [vmem:[#allocation5 + $0x1c38] sm:$0xff] }
 0x453   : > { %7691 = vmatprep.subr.bf16.mxu0 %v12959_v5  ;;  %7863 = vmatprep.subr.bf16.mxu1 %v12961_v6  ;;  %v13039_v5 = vcombine.high %v1240_v62, %v1248_v63  ;;  %v13041_v6 = vcombine.high %v1241_v1, %v1249_v2  ;;  %v1296_v46 = vld [vmem:[#allocation5 + $0x1c70] sm:$0xff]  ;;  %v1297_v50 = vld [vmem:[#allocation5 + $0x1c78] sm:$0xff] }
 0x455   : > { %7681 = vmatmul.mubr.bf16.vlgmr.msra.gmra.mrb[12].mxu0 %v14649_v44  ;;  %7853 = vmatmul.mubr.bf16.vlgmr.msra.gmra.mrb[12].mxu1 %v14649_v44 }
 0x456   : > { %7692 = vmatpush1.bf16.msra.mxu0 %v12958_v11  ;;  %7864 = vmatpush1.bf16.msra.mxu1 %v12960_v12  ;;  %v13038_v11 = vcombine.low %v1240_v62, %v1248_v63  ;;  %v13040_v12 = vcombine.low %v1241_v1, %v1249_v2  ;;  %v1304_v62 = vld [vmem:[#allocation5 + $0x1cb0] sm:$0xff]  ;;  %v1305_v1 = vld [vmem:[#allocation5 + $0x1cb8] sm:$0xff] }
 0x457   : > { %7693 = vmatprep.subr.bf16.mxu0 %v12975_v13  ;;  %7865 = vmatprep.subr.bf16.mxu1 %v12977_v14  ;;  %v13055_v13 = vcombine.high %v1256_v7, %v1264_v8  ;;  %v1312_v63 = vld [vmem:[#allocation5 + $0x1cf0] sm:$0xff]  ;;  %v1313_v2 = vld [vmem:[#allocation5 + $0x1cf8] sm:$0xff] }
 0x458   : > { %7723 = vmatprep.mubr.bf16.mxu0 %v14651_v54  ;;  %7895 = vmatprep.mubr.bf16.mxu1 %v14651_v54  ;;  %v1320_v7 = vld [vmem:[#allocation5 + $0x1d30] sm:$0xff] }
 0x459   : > { %v1328_v8 = vld [vmem:[#allocation5 + $0x1d70] sm:$0xff] }
 0x45a   : > { %7694 = vmatpush1.bf16.msra.mxu0 %v12974_v20  ;;  %7866 = vmatpush1.bf16.msra.mxu1 %v12976_v21  ;;  %v1273_v21 = vld [vmem:[#allocation5 + $0x1bb8] sm:$0xff] }
 0x45b   : > { %7695 = vmatprep.subr.bf16.mxu0 %v12991_v22  ;;  %7867 = vmatprep.subr.bf16.mxu1 %v12993_v24  ;;  %v1281_v22 = vld [vmem:[#allocation5 + $0x1bf8] sm:$0xff] }
 0x45e   : > { %7696 = vmatpush1.bf16.msra.mxu0 %v12990_v35  ;;  %7868 = vmatpush1.bf16.msra.mxu1 %v12992_v39  ;;  %v13056_v35 = vcombine.low %v1257_v9, %v1265_v10  ;;  %v13071_v39 = vcombine.high %v1272_v17, %v1280_v18  ;;  %v1321_v9 = vld [vmem:[#allocation5 + $0x1d38] sm:$0xff] }
 0x45f   : > { %7697 = vmatprep.subr.bf16.mxu0 %v13007_v40  ;;  %7869 = vmatprep.subr.bf16.mxu1 %v13009_v43  ;;  %v13073_v43 = vcombine.high %v1273_v21, %v1281_v22  ;;  %v1329_v10 = vld [vmem:[#allocation5 + $0x1d78] sm:$0xff] }
 0x462   : > { %7698 = vmatpush1.bf16.msra.mxu0 %v13006_v53  ;;  %7870 = vmatpush1.bf16.msra.mxu1 %v13008_v57  ;;  %v13070_v53 = vcombine.low %v1272_v17, %v1280_v18  ;;  %v13072_v57 = vcombine.low %v1273_v21, %v1281_v22  ;;  %v1336_v17 = vld [vmem:[#allocation5 + $0x1db0] sm:$0xff]  ;;  %v1337_v21 = vld [vmem:[#allocation5 + $0x1db8] sm:$0xff] }
 0x463   : > { %7699 = vmatprep.subr.bf16.mxu0 %v13023_v58  ;;  %7871 = vmatprep.subr.bf16.mxu1 %v13025_v61  ;;  %v13087_v58 = vcombine.high %v1288_v45, %v1296_v46  ;;  %v13089_v61 = vcombine.high %v1289_v49, %v1297_v50  ;;  %v1344_v18 = vld [vmem:[#allocation5 + $0x1df0] sm:$0xff]  ;;  %v1345_v22 = vld [vmem:[#allocation5 + $0x1df8] sm:$0xff] }
 0x466   : > { %7700 = vmatpush1.bf16.msra.mxu0 %v13022_v3  ;;  %7872 = vmatpush1.bf16.msra.mxu1 %v13024_v4  ;;  %v13086_v3 = vcombine.low %v1288_v45, %v1296_v46  ;;  %v13088_v4 = vcombine.low %v1289_v49, %v1297_v50  ;;  %v1352_v45 = vld [vmem:[#allocation5 + $0x1e30] sm:$0xff]  ;;  %v1353_v49 = vld [vmem:[#allocation5 + $0x1e38] sm:$0xff] }
 0x467   : > { %7701 = vmatprep.subr.bf16.mxu0 %v13039_v5  ;;  %7873 = vmatprep.subr.bf16.mxu1 %v13041_v6  ;;  %v13103_v5 = vcombine.high %v1304_v62, %v1312_v63  ;;  %v13105_v6 = vcombine.high %v1305_v1, %v1313_v2  ;;  %v1360_v46 = vld [vmem:[#allocation5 + $0x1e70] sm:$0xff]  ;;  %v1361_v50 = vld [vmem:[#allocation5 + $0x1e78] sm:$0xff] }
 0x468   : > { %v14739_v14 = vpop.f32.mrb[8].mxu0  ;;  %v14741_v19 = vpop.f32.mrb[8].mxu1 }
 0x469   : > { %v14743_v20 = vpop.f32.mrb[9].mxu0  ;;  %v14745_v24 = vpop.f32.mrb[9].mxu1 }
 0x46a   : > { %v14747_v25 = vpop.f32.mrb[10].mxu0  ;;  %7702 = vmatpush1.bf16.msra.mxu0 %v13038_v11  ;;  %v14749_v31 = vpop.f32.mrb[10].mxu1  ;;  %7874 = vmatpush1.bf16.msra.mxu1 %v13040_v12  ;;  %v13102_v11 = vcombine.low %v1304_v62, %v1312_v63  ;;  %v13104_v12 = vcombine.low %v1305_v1, %v1313_v2  ;;  %v1368_v62 = vld [vmem:[#allocation5 + $0x1eb0] sm:$0xff]  ;;  %v1369_v1 = vld [vmem:[#allocation5 + $0x1eb8] sm:$0xff] }
 0x46b   : > { %v14751_v32 = vpop.f32.mrb[11].mxu0  ;;  %7703 = vmatprep.subr.bf16.mxu0 %v13055_v13  ;;  %v14753_v40 = vpop.f32.mrb[11].mxu1  ;;  %7875 = vmatprep.subr.bf16.mxu1 %v13057_v15  ;;  %v13119_v13 = vcombine.high %v1320_v7, %v1328_v8  ;;  %v13121_v15 = vcombine.high %v1321_v9, %v1329_v10  ;;  %v1376_v63 = vld [vmem:[#allocation5 + $0x1ef0] sm:$0xff]  ;;  %v1377_v2 = vld [vmem:[#allocation5 + $0x1ef8] sm:$0xff] }
 0x46e   : > { %7704 = vmatpush1.bf16.msra.mxu0 %v13054_v27  ;;  %7876 = vmatpush1.bf16.msra.mxu1 %v13056_v35  ;;  %v13118_v27 = vcombine.low %v1320_v7, %v1328_v8  ;;  %v13120_v35 = vcombine.low %v1321_v9, %v1329_v10  ;;  %v1384_v7 = vld [vmem:[#allocation5 + $0x1f30] sm:$0xff]  ;;  %v1385_v9 = vld [vmem:[#allocation5 + $0x1f38] sm:$0xff] }
 0x46f   : > { %7705 = vmatprep.subr.bf16.mxu0 %v13071_v39  ;;  %7877 = vmatprep.subr.bf16.mxu1 %v13073_v43  ;;  %v13135_v39 = vcombine.high %v1336_v17, %v1344_v18  ;;  %v13137_v43 = vcombine.high %v1337_v21, %v1345_v22  ;;  %v1392_v8 = vld [vmem:[#allocation5 + $0x1f70] sm:$0xff]  ;;  %v1393_v10 = vld [vmem:[#allocation5 + $0x1f78] sm:$0xff] }
 0x472   : > { %7706 = vmatpush1.bf16.msra.mxu0 %v13070_v53  ;;  %7878 = vmatpush1.bf16.msra.mxu1 %v13072_v57  ;;  %v13134_v53 = vcombine.low %v1336_v17, %v1344_v18  ;;  %v13136_v57 = vcombine.low %v1337_v21, %v1345_v22  ;;  %v1400_v17 = vld [vmem:[#allocation5 + $0x1fb0] sm:$0xff]  ;;  %v1401_v21 = vld [vmem:[#allocation5 + $0x1fb8] sm:$0xff] }
 0x473   : > { %7707 = vmatprep.subr.bf16.mxu0 %v13087_v58  ;;  %7879 = vmatprep.subr.bf16.mxu1 %v13089_v61  ;;  %v13151_v58 = vcombine.high %v1352_v45, %v1360_v46  ;;  %v13153_v61 = vcombine.high %v1353_v49, %v1361_v50  ;;  %v1408_v18 = vld [vmem:[#allocation5 + $0x1ff0] sm:$0xff]  ;;  %v1409_v22 = vld [vmem:[#allocation5 + $0x1ff8] sm:$0xff] }
 0x476   : > { %7708 = vmatpush1.bf16.msra.mxu0 %v13086_v3  ;;  %7880 = vmatpush1.bf16.msra.mxu1 %v13088_v4  ;;  %v13150_v3 = vcombine.low %v1352_v45, %v1360_v46  ;;  %v13152_v4 = vcombine.low %v1353_v49, %v1361_v50  ;;  %v7906_v45 = vld [vmem:[#allocation7] sm:$0xff]  ;;  %v7907_v49 = vld [vmem:[#allocation7 + $0x8] sm:$0xff] }
 0x477   : > { %7709 = vmatprep.subr.bf16.mxu0 %v13103_v5  ;;  %7881 = vmatprep.subr.bf16.mxu1 %v13105_v6  ;;  %v13167_v5 = vcombine.high %v1368_v62, %v1376_v63  ;;  %v13169_v6 = vcombine.high %v1369_v1, %v1377_v2  ;;  %v7910_v46 = vld [vmem:[#allocation7 + $0x20] sm:$0xff]  ;;  %v7911_v50 = vld [vmem:[#allocation7 + $0x28] sm:$0xff] }
 0x47a   : > { %7710 = vmatpush1.bf16.msra.mxu0 %v13102_v11  ;;  %7882 = vmatpush1.bf16.msra.mxu1 %v13104_v12  ;;  %v13166_v11 = vcombine.low %v1368_v62, %v1376_v63  ;;  %v13168_v12 = vcombine.low %v1369_v1, %v1377_v2  ;;  %v7914_v62 = vld [vmem:[#allocation7 + $0x40] sm:$0xff]  ;;  %v7915_v1 = vld [vmem:[#allocation7 + $0x48] sm:$0xff] }
 0x47b   : > { %7711 = vmatprep.subr.bf16.mxu0 %v13119_v13  ;;  %7883 = vmatprep.subr.bf16.mxu1 %v13121_v15  ;;  %v13183_v13 = vcombine.high %v1384_v7, %v1392_v8  ;;  %v13185_v15 = vcombine.high %v1385_v9, %v1393_v10  ;;  %v7918_v63 = vld [vmem:[#allocation7 + $0x60] sm:$0xff]  ;;  %v7919_v2 = vld [vmem:[#allocation7 + $0x68] sm:$0xff] }
 0x47e   : > { %7712 = vmatpush1.bf16.msra.mxu0 %v13118_v27  ;;  %7884 = vmatpush1.bf16.msra.mxu1 %v13120_v35  ;;  %v13182_v27 = vcombine.low %v1384_v7, %v1392_v8  ;;  %v13184_v35 = vcombine.low %v1385_v9, %v1393_v10  ;;  %v7922_v7 = vld [vmem:[#allocation7 + $0x80] sm:$0xff]  ;;  %v7923_v9 = vld [vmem:[#allocation7 + $0x88] sm:$0xff] }
 0x47f   : > { %7713 = vmatprep.subr.bf16.mxu0 %v13135_v39  ;;  %7885 = vmatprep.subr.bf16.mxu1 %v13137_v43  ;;  %v13199_v39 = vcombine.high %v1400_v17, %v1408_v18  ;;  %v13201_v43 = vcombine.high %v1401_v21, %v1409_v22  ;;  %v7926_v8 = vld [vmem:[#allocation7 + $0xa0] sm:$0xff]  ;;  %v7927_v10 = vld [vmem:[#allocation7 + $0xa8] sm:$0xff] }
 0x482   : > { %7714 = vmatpush1.bf16.msra.mxu0 %v13134_v53  ;;  %7886 = vmatpush1.bf16.msra.mxu1 %v13136_v57  ;;  %v13198_v53 = vcombine.low %v1400_v17, %v1408_v18  ;;  %v13200_v57 = vcombine.low %v1401_v21, %v1409_v22  ;;  %v7930_v17 = vld [vmem:[#allocation7 + $0xc0] sm:$0xff]  ;;  %v7931_v21 = vld [vmem:[#allocation7 + $0xc8] sm:$0xff] }
 0x483   : > { %7715 = vmatprep.subr.bf16.mxu0 %v13151_v58  ;;  %7887 = vmatprep.subr.bf16.mxu1 %v13153_v61  ;;  %v13235_v58 = vcombine.high %v7906_v45, %v7910_v46  ;;  %v13237_v61 = vcombine.high %v7907_v49, %v7911_v50  ;;  %v7934_v18 = vld [vmem:[#allocation7 + $0xe0] sm:$0xff]  ;;  %v7935_v22 = vld [vmem:[#allocation7 + $0xe8] sm:$0xff] }
 0x486   : > { %7716 = vmatpush1.bf16.msra.mxu0 %v13150_v3  ;;  %7888 = vmatpush1.bf16.msra.mxu1 %v13152_v4  ;;  %v13234_v3 = vcombine.low %v7906_v45, %v7910_v46  ;;  %v13236_v4 = vcombine.low %v7907_v49, %v7911_v50  ;;  %v7938_v45 = vld [vmem:[#allocation7 + $0x100] sm:$0xff]  ;;  %v7939_v49 = vld [vmem:[#allocation7 + $0x108] sm:$0xff] }
 0x487   : > { %7717 = vmatprep.subr.bf16.mxu0 %v13167_v5  ;;  %7889 = vmatprep.subr.bf16.mxu1 %v13169_v6  ;;  %v13243_v5 = vcombine.high %v7914_v62, %v7918_v63  ;;  %v13245_v6 = vcombine.high %v7915_v1, %v7919_v2  ;;  %v7942_v46 = vld [vmem:[#allocation7 + $0x120] sm:$0xff]  ;;  %v7943_v50 = vld [vmem:[#allocation7 + $0x128] sm:$0xff] }
 0x48a   : > { %7718 = vmatpush1.bf16.msra.mxu0 %v13166_v11  ;;  %7890 = vmatpush1.bf16.msra.mxu1 %v13168_v12  ;;  %v13242_v11 = vcombine.low %v7914_v62, %v7918_v63  ;;  %v13244_v12 = vcombine.low %v7915_v1, %v7919_v2  ;;  %v7946_v62 = vld [vmem:[#allocation7 + $0x140] sm:$0xff]  ;;  %v7947_v1 = vld [vmem:[#allocation7 + $0x148] sm:$0xff] }
 0x48b   : > { %7719 = vmatprep.subr.bf16.mxu0 %v13183_v13  ;;  %7891 = vmatprep.subr.bf16.mxu1 %v13185_v15  ;;  %v13251_v13 = vcombine.high %v7922_v7, %v7926_v8  ;;  %v13253_v15 = vcombine.high %v7923_v9, %v7927_v10  ;;  %v7950_v63 = vld [vmem:[#allocation7 + $0x160] sm:$0xff]  ;;  %v7951_v2 = vld [vmem:[#allocation7 + $0x168] sm:$0xff] }
 0x48e   : > { %7720 = vmatpush1.bf16.msra.mxu0 %v13182_v27  ;;  %7892 = vmatpush1.bf16.msra.mxu1 %v13184_v35  ;;  %v13250_v27 = vcombine.low %v7922_v7, %v7926_v8  ;;  %v13252_v35 = vcombine.low %v7923_v9, %v7927_v10  ;;  %v7954_v7 = vld [vmem:[#allocation7 + $0x180] sm:$0xff]  ;;  %v7955_v9 = vld [vmem:[#allocation7 + $0x188] sm:$0xff] }
 0x48f   : > { %7721 = vmatprep.subr.bf16.mxu0 %v13199_v39  ;;  %7893 = vmatprep.subr.bf16.mxu1 %v13201_v43  ;;  %v13259_v39 = vcombine.high %v7930_v17, %v7934_v18  ;;  %v13261_v43 = vcombine.high %v7931_v21, %v7935_v22  ;;  %v7958_v8 = vld [vmem:[#allocation7 + $0x1a0] sm:$0xff]  ;;  %v7959_v10 = vld [vmem:[#allocation7 + $0x1a8] sm:$0xff] }
 0x492   : > { %7722 = vmatpush1.bf16.msra.mxu0 %v13198_v53  ;;  %7894 = vmatpush1.bf16.msra.mxu1 %v13200_v57  ;;  %v13258_v53 = vcombine.low %v7930_v17, %v7934_v18  ;;  %v13260_v57 = vcombine.low %v7931_v21, %v7935_v22  ;;  %v7962_v17 = vld [vmem:[#allocation7 + $0x1c0] sm:$0xff]  ;;  %v7963_v21 = vld [vmem:[#allocation7 + $0x1c8] sm:$0xff] }
 0x493   : > { %11244 = vmatprep.subr.bf16.mxu0 %v13235_v58  ;;  %11416 = vmatprep.subr.bf16.mxu1 %v13237_v61  ;;  %v13267_v58 = vcombine.high %v7938_v45, %v7942_v46  ;;  %v13269_v61 = vcombine.high %v7939_v49, %v7943_v50  ;;  %v7966_v18 = vld [vmem:[#allocation7 + $0x1e0] sm:$0xff]  ;;  %v7967_v22 = vld [vmem:[#allocation7 + $0x1e8] sm:$0xff] }
 0x495   : > { %7724 = vmatmul.mubr.bf16.vlgmr.msra.gmra.mrb[12].mxu0 %v14657_v0  ;;  %7896 = vmatmul.mubr.bf16.vlgmr.msra.gmra.mrb[12].mxu1 %v14657_v0 }
 0x496   : > { %11245 = vmatpush1.bf16.msra.mxu0 %v13234_v3  ;;  %11417 = vmatpush1.bf16.msra.mxu1 %v13236_v4  ;;  %v13266_v3 = vcombine.low %v7938_v45, %v7942_v46  ;;  %v13268_v4 = vcombine.low %v7939_v49, %v7943_v50  ;;  %v7970_v45 = vld [vmem:[#allocation7 + $0x200] sm:$0xff]  ;;  %v7971_v49 = vld [vmem:[#allocation7 + $0x208] sm:$0xff] }
 0x497   : > { %11246 = vmatprep.subr.bf16.mxu0 %v13243_v5  ;;  %11418 = vmatprep.subr.bf16.mxu1 %v13245_v6  ;;  %v13275_v5 = vcombine.high %v7946_v62, %v7950_v63  ;;  %v13277_v6 = vcombine.high %v7947_v1, %v7951_v2  ;;  %v7974_v46 = vld [vmem:[#allocation7 + $0x220] sm:$0xff]  ;;  %v7975_v50 = vld [vmem:[#allocation7 + $0x228] sm:$0xff] }
 0x498   : > { %11276 = vmatprep.mubr.bf16.mxu0 %v14629_v59  ;;  %11448 = vmatprep.mubr.bf16.mxu1 %v14629_v59 }
 0x49a   : > { %11247 = vmatpush1.bf16.msra.mxu0 %v13242_v11  ;;  %11419 = vmatpush1.bf16.msra.mxu1 %v13244_v12  ;;  %v13274_v11 = vcombine.low %v7946_v62, %v7950_v63  ;;  %v13276_v12 = vcombine.low %v7947_v1, %v7951_v2  ;;  %v7978_v62 = vld [vmem:[#allocation7 + $0x240] sm:$0xff]  ;;  %v7979_v1 = vld [vmem:[#allocation7 + $0x248] sm:$0xff] }
 0x49b   : > { %11248 = vmatprep.subr.bf16.mxu0 %v13251_v13  ;;  %11420 = vmatprep.subr.bf16.mxu1 %v13253_v15  ;;  %v13283_v13 = vcombine.high %v7954_v7, %v7958_v8  ;;  %v13285_v15 = vcombine.high %v7955_v9, %v7959_v10  ;;  %v7982_v63 = vld [vmem:[#allocation7 + $0x260] sm:$0xff]  ;;  %v7983_v2 = vld [vmem:[#allocation7 + $0x268] sm:$0xff] }
 0x49e   : > { %11249 = vmatpush1.bf16.msra.mxu0 %v13250_v27  ;;  %11421 = vmatpush1.bf16.msra.mxu1 %v13252_v35  ;;  %v13282_v27 = vcombine.low %v7954_v7, %v7958_v8  ;;  %v13284_v35 = vcombine.low %v7955_v9, %v7959_v10  ;;  %v7986_v7 = vld [vmem:[#allocation7 + $0x280] sm:$0xff]  ;;  %v7987_v9 = vld [vmem:[#allocation7 + $0x288] sm:$0xff] }
 0x49f   : > { %11250 = vmatprep.subr.bf16.mxu0 %v13259_v39  ;;  %11422 = vmatprep.subr.bf16.mxu1 %v13261_v43  ;;  %v13291_v39 = vcombine.high %v7962_v17, %v7966_v18  ;;  %v13293_v43 = vcombine.high %v7963_v21, %v7967_v22  ;;  %v7990_v8 = vld [vmem:[#allocation7 + $0x2a0] sm:$0xff]  ;;  %v7991_v10 = vld [vmem:[#allocation7 + $0x2a8] sm:$0xff] }
 0x4a2   : > { %11251 = vmatpush1.bf16.msra.mxu0 %v13258_v53  ;;  %11423 = vmatpush1.bf16.msra.mxu1 %v13260_v57  ;;  %v13290_v53 = vcombine.low %v7962_v17, %v7966_v18  ;;  %v13292_v57 = vcombine.low %v7963_v21, %v7967_v22  ;;  %v7994_v17 = vld [vmem:[#allocation7 + $0x2c0] sm:$0xff]  ;;  %v7995_v21 = vld [vmem:[#allocation7 + $0x2c8] sm:$0xff] }
 0x4a3   : > { %11252 = vmatprep.subr.bf16.mxu0 %v13267_v58  ;;  %11424 = vmatprep.subr.bf16.mxu1 %v13269_v61  ;;  %v13299_v58 = vcombine.high %v7970_v45, %v7974_v46  ;;  %v13301_v61 = vcombine.high %v7971_v49, %v7975_v50  ;;  %v7998_v18 = vld [vmem:[#allocation7 + $0x2e0] sm:$0xff]  ;;  %v7999_v22 = vld [vmem:[#allocation7 + $0x2e8] sm:$0xff] }
 0x4a6   : > { %11253 = vmatpush1.bf16.msra.mxu0 %v13266_v3  ;;  %11425 = vmatpush1.bf16.msra.mxu1 %v13268_v4  ;;  %v13298_v3 = vcombine.low %v7970_v45, %v7974_v46  ;;  %v13300_v4 = vcombine.low %v7971_v49, %v7975_v50  ;;  %v8002_v45 = vld [vmem:[#allocation7 + $0x300] sm:$0xff]  ;;  %v8003_v49 = vld [vmem:[#allocation7 + $0x308] sm:$0xff] }
 0x4a7   : > { %11254 = vmatprep.subr.bf16.mxu0 %v13275_v5  ;;  %11426 = vmatprep.subr.bf16.mxu1 %v13277_v6  ;;  %v13307_v5 = vcombine.high %v7978_v62, %v7982_v63  ;;  %v13309_v6 = vcombine.high %v7979_v1, %v7983_v2  ;;  %v8006_v46 = vld [vmem:[#allocation7 + $0x320] sm:$0xff]  ;;  %v8007_v50 = vld [vmem:[#allocation7 + $0x328] sm:$0xff] }
 0x4aa   : > { %11255 = vmatpush1.bf16.msra.mxu0 %v13274_v11  ;;  %11427 = vmatpush1.bf16.msra.mxu1 %v13276_v12  ;;  %v13306_v11 = vcombine.low %v7978_v62, %v7982_v63  ;;  %v13308_v12 = vcombine.low %v7979_v1, %v7983_v2  ;;  %v8010_v62 = vld [vmem:[#allocation7 + $0x340] sm:$0xff]  ;;  %v8011_v1 = vld [vmem:[#allocation7 + $0x348] sm:$0xff] }
 0x4ab   : > { %11256 = vmatprep.subr.bf16.mxu0 %v13283_v13  ;;  %11428 = vmatprep.subr.bf16.mxu1 %v13285_v15  ;;  %v13315_v13 = vcombine.high %v7986_v7, %v7990_v8  ;;  %v13317_v15 = vcombine.high %v7987_v9, %v7991_v10  ;;  %v8014_v63 = vld [vmem:[#allocation7 + $0x360] sm:$0xff]  ;;  %v8015_v2 = vld [vmem:[#allocation7 + $0x368] sm:$0xff] }
 0x4ae   : > { %11257 = vmatpush1.bf16.msra.mxu0 %v13282_v27  ;;  %11429 = vmatpush1.bf16.msra.mxu1 %v13284_v35  ;;  %v13314_v27 = vcombine.low %v7986_v7, %v7990_v8  ;;  %v13316_v35 = vcombine.low %v7987_v9, %v7991_v10  ;;  %v8018_v7 = vld [vmem:[#allocation7 + $0x380] sm:$0xff]  ;;  %v8019_v9 = vld [vmem:[#allocation7 + $0x388] sm:$0xff] }
 0x4af   : > { %11258 = vmatprep.subr.bf16.mxu0 %v13291_v39  ;;  %11430 = vmatprep.subr.bf16.mxu1 %v13293_v43  ;;  %v13323_v39 = vcombine.high %v7994_v17, %v7998_v18  ;;  %v13325_v43 = vcombine.high %v7995_v21, %v7999_v22  ;;  %v8022_v8 = vld [vmem:[#allocation7 + $0x3a0] sm:$0xff]  ;;  %v8023_v10 = vld [vmem:[#allocation7 + $0x3a8] sm:$0xff] }
 0x4b2   : > { %11259 = vmatpush1.bf16.msra.mxu0 %v13290_v53  ;;  %11431 = vmatpush1.bf16.msra.mxu1 %v13292_v57  ;;  %v13322_v53 = vcombine.low %v7994_v17, %v7998_v18  ;;  %v13324_v57 = vcombine.low %v7995_v21, %v7999_v22  ;;  %v8026_v17 = vld [vmem:[#allocation7 + $0x3c0] sm:$0xff]  ;;  %v8027_v21 = vld [vmem:[#allocation7 + $0x3c8] sm:$0xff] }
 0x4b3   : > { %11260 = vmatprep.subr.bf16.mxu0 %v13299_v58  ;;  %11432 = vmatprep.subr.bf16.mxu1 %v13301_v61  ;;  %v13331_v58 = vcombine.high %v8002_v45, %v8006_v46  ;;  %v13333_v61 = vcombine.high %v8003_v49, %v8007_v50  ;;  %v8030_v18 = vld [vmem:[#allocation7 + $0x3e0] sm:$0xff]  ;;  %v8031_v22 = vld [vmem:[#allocation7 + $0x3e8] sm:$0xff] }
 0x4b6   : > { %11261 = vmatpush1.bf16.msra.mxu0 %v13298_v3  ;;  %11433 = vmatpush1.bf16.msra.mxu1 %v13300_v4  ;;  %v13330_v3 = vcombine.low %v8002_v45, %v8006_v46  ;;  %v13332_v4 = vcombine.low %v8003_v49, %v8007_v50  ;;  %v8034_v45 = vld [vmem:[#allocation7 + $0x400] sm:$0xff]  ;;  %v8035_v49 = vld [vmem:[#allocation7 + $0x408] sm:$0xff] }
 0x4b7   : > { %11262 = vmatprep.subr.bf16.mxu0 %v13307_v5  ;;  %11434 = vmatprep.subr.bf16.mxu1 %v13309_v6  ;;  %v13339_v5 = vcombine.high %v8010_v62, %v8014_v63  ;;  %v13341_v6 = vcombine.high %v8011_v1, %v8015_v2  ;;  %v8038_v46 = vld [vmem:[#allocation7 + $0x420] sm:$0xff]  ;;  %v8039_v50 = vld [vmem:[#allocation7 + $0x428] sm:$0xff] }
 0x4ba   : > { %11263 = vmatpush1.bf16.msra.mxu0 %v13306_v11  ;;  %11435 = vmatpush1.bf16.msra.mxu1 %v13308_v12  ;;  %v13338_v11 = vcombine.low %v8010_v62, %v8014_v63  ;;  %v13340_v12 = vcombine.low %v8011_v1, %v8015_v2  ;;  %v8042_v62 = vld [vmem:[#allocation7 + $0x440] sm:$0xff]  ;;  %v8043_v1 = vld [vmem:[#allocation7 + $0x448] sm:$0xff] }
 0x4bb   : > { %11264 = vmatprep.subr.bf16.mxu0 %v13315_v13  ;;  %11436 = vmatprep.subr.bf16.mxu1 %v13317_v15  ;;  %v13347_v13 = vcombine.high %v8018_v7, %v8022_v8  ;;  %v13349_v15 = vcombine.high %v8019_v9, %v8023_v10  ;;  %v8046_v63 = vld [vmem:[#allocation7 + $0x460] sm:$0xff]  ;;  %v8047_v2 = vld [vmem:[#allocation7 + $0x468] sm:$0xff] }
 0x4be   : > { %11265 = vmatpush1.bf16.msra.mxu0 %v13314_v27  ;;  %11437 = vmatpush1.bf16.msra.mxu1 %v13316_v35  ;;  %v13346_v27 = vcombine.low %v8018_v7, %v8022_v8  ;;  %v13348_v35 = vcombine.low %v8019_v9, %v8023_v10  ;;  %v8050_v7 = vld [vmem:[#allocation7 + $0x480] sm:$0xff]  ;;  %v8051_v9 = vld [vmem:[#allocation7 + $0x488] sm:$0xff] }
 0x4bf   : > { %11266 = vmatprep.subr.bf16.mxu0 %v13323_v39  ;;  %11438 = vmatprep.subr.bf16.mxu1 %v13325_v43  ;;  %v13355_v39 = vcombine.high %v8026_v17, %v8030_v18  ;;  %v13357_v43 = vcombine.high %v8027_v21, %v8031_v22  ;;  %v8054_v8 = vld [vmem:[#allocation7 + $0x4a0] sm:$0xff]  ;;  %v8055_v10 = vld [vmem:[#allocation7 + $0x4a8] sm:$0xff] }
 0x4c2   : > { %11267 = vmatpush1.bf16.msra.mxu0 %v13322_v53  ;;  %11439 = vmatpush1.bf16.msra.mxu1 %v13324_v57  ;;  %v13354_v53 = vcombine.low %v8026_v17, %v8030_v18  ;;  %v13356_v57 = vcombine.low %v8027_v21, %v8031_v22  ;;  %v8058_v17 = vld [vmem:[#allocation7 + $0x4c0] sm:$0xff]  ;;  %v8059_v21 = vld [vmem:[#allocation7 + $0x4c8] sm:$0xff] }
 0x4c3   : > { %11268 = vmatprep.subr.bf16.mxu0 %v13331_v58  ;;  %11440 = vmatprep.subr.bf16.mxu1 %v13333_v61  ;;  %v13363_v58 = vcombine.high %v8034_v45, %v8038_v46  ;;  %v13365_v61 = vcombine.high %v8035_v49, %v8039_v50  ;;  %v8062_v18 = vld [vmem:[#allocation7 + $0x4e0] sm:$0xff]  ;;  %v8063_v22 = vld [vmem:[#allocation7 + $0x4e8] sm:$0xff] }
 0x4c6   : > { %11269 = vmatpush1.bf16.msra.mxu0 %v13330_v3  ;;  %11441 = vmatpush1.bf16.msra.mxu1 %v13332_v4  ;;  %v13362_v3 = vcombine.low %v8034_v45, %v8038_v46  ;;  %v13364_v4 = vcombine.low %v8035_v49, %v8039_v50  ;;  %v8066_v45 = vld [vmem:[#allocation7 + $0x500] sm:$0xff]  ;;  %v8067_v49 = vld [vmem:[#allocation7 + $0x508] sm:$0xff] }
 0x4c7   : > { %11270 = vmatprep.subr.bf16.mxu0 %v13339_v5  ;;  %11442 = vmatprep.subr.bf16.mxu1 %v13341_v6  ;;  %v13371_v5 = vcombine.high %v8042_v62, %v8046_v63  ;;  %v13373_v6 = vcombine.high %v8043_v1, %v8047_v2  ;;  %v8070_v46 = vld [vmem:[#allocation7 + $0x520] sm:$0xff]  ;;  %v8071_v50 = vld [vmem:[#allocation7 + $0x528] sm:$0xff] }
 0x4ca   : > { %11271 = vmatpush1.bf16.msra.mxu0 %v13338_v11  ;;  %11443 = vmatpush1.bf16.msra.mxu1 %v13340_v12  ;;  %v13370_v11 = vcombine.low %v8042_v62, %v8046_v63  ;;  %v13372_v12 = vcombine.low %v8043_v1, %v8047_v2  ;;  %v8074_v62 = vld [vmem:[#allocation7 + $0x540] sm:$0xff]  ;;  %v8075_v1 = vld [vmem:[#allocation7 + $0x548] sm:$0xff] }
 0x4cb   : > { %11272 = vmatprep.subr.bf16.mxu0 %v13347_v13  ;;  %11444 = vmatprep.subr.bf16.mxu1 %v13349_v15  ;;  %v13379_v13 = vcombine.high %v8050_v7, %v8054_v8  ;;  %v13381_v15 = vcombine.high %v8051_v9, %v8055_v10  ;;  %v8078_v63 = vld [vmem:[#allocation7 + $0x560] sm:$0xff]  ;;  %v8079_v2 = vld [vmem:[#allocation7 + $0x568] sm:$0xff] }
 0x4ce   : > { %11273 = vmatpush1.bf16.msra.mxu0 %v13346_v27  ;;  %11445 = vmatpush1.bf16.msra.mxu1 %v13348_v35  ;;  %v13378_v27 = vcombine.low %v8050_v7, %v8054_v8  ;;  %v13380_v35 = vcombine.low %v8051_v9, %v8055_v10  ;;  %v8082_v7 = vld [vmem:[#allocation7 + $0x580] sm:$0xff]  ;;  %v8083_v9 = vld [vmem:[#allocation7 + $0x588] sm:$0xff] }
 0x4cf   : > { %11274 = vmatprep.subr.bf16.mxu0 %v13355_v39  ;;  %11446 = vmatprep.subr.bf16.mxu1 %v13357_v43  ;;  %v13387_v39 = vcombine.high %v8058_v17, %v8062_v18  ;;  %v13389_v43 = vcombine.high %v8059_v21, %v8063_v22  ;;  %v8086_v8 = vld [vmem:[#allocation7 + $0x5a0] sm:$0xff]  ;;  %v8087_v10 = vld [vmem:[#allocation7 + $0x5a8] sm:$0xff] }
 0x4d2   : > { %11275 = vmatpush1.bf16.msra.mxu0 %v13354_v53  ;;  %11447 = vmatpush1.bf16.msra.mxu1 %v13356_v57  ;;  %v13386_v53 = vcombine.low %v8058_v17, %v8062_v18  ;;  %v13388_v57 = vcombine.low %v8059_v21, %v8063_v22  ;;  %v8090_v17 = vld [vmem:[#allocation7 + $0x5c0] sm:$0xff]  ;;  %v8091_v21 = vld [vmem:[#allocation7 + $0x5c8] sm:$0xff] }
 0x4d3   : > { %11287 = vmatprep.subr.bf16.mxu0 %v13363_v58  ;;  %11459 = vmatprep.subr.bf16.mxu1 %v13365_v61  ;;  %v13395_v58 = vcombine.high %v8066_v45, %v8070_v46  ;;  %v13397_v61 = vcombine.high %v8067_v49, %v8071_v50  ;;  %v8094_v18 = vld [vmem:[#allocation7 + $0x5e0] sm:$0xff]  ;;  %v8095_v22 = vld [vmem:[#allocation7 + $0x5e8] sm:$0xff] }
 0x4d5   : > { %11277 = vmatmul.mubr.bf16.vlgmr.msra.gmra.mrb[16].mxu0 %v14633_v16  ;;  %11449 = vmatmul.mubr.bf16.vlgmr.msra.gmra.mrb[16].mxu1 %v14633_v16 }
 0x4d6   : > { %11288 = vmatpush1.bf16.msra.mxu0 %v13362_v3  ;;  %11460 = vmatpush1.bf16.msra.mxu1 %v13364_v4  ;;  %v13394_v3 = vcombine.low %v8066_v45, %v8070_v46  ;;  %v13396_v4 = vcombine.low %v8067_v49, %v8071_v50  ;;  %v8098_v45 = vld [vmem:[#allocation7 + $0x600] sm:$0xff]  ;;  %v8099_v49 = vld [vmem:[#allocation7 + $0x608] sm:$0xff] }
 0x4d7   : > { %11289 = vmatprep.subr.bf16.mxu0 %v13371_v5  ;;  %11461 = vmatprep.subr.bf16.mxu1 %v13373_v6  ;;  %v13403_v5 = vcombine.high %v8074_v62, %v8078_v63  ;;  %v13405_v6 = vcombine.high %v8075_v1, %v8079_v2  ;;  %v8102_v46 = vld [vmem:[#allocation7 + $0x620] sm:$0xff]  ;;  %v8103_v50 = vld [vmem:[#allocation7 + $0x628] sm:$0xff] }
 0x4d8   : > { %11319 = vmatprep.mubr.bf16.mxu0 %v14635_v26  ;;  %11491 = vmatprep.mubr.bf16.mxu1 %v14635_v26 }
 0x4da   : > { %11290 = vmatpush1.bf16.msra.mxu0 %v13370_v11  ;;  %11462 = vmatpush1.bf16.msra.mxu1 %v13372_v12  ;;  %v13402_v11 = vcombine.low %v8074_v62, %v8078_v63  ;;  %v13404_v12 = vcombine.low %v8075_v1, %v8079_v2  ;;  %v8106_v62 = vld [vmem:[#allocation7 + $0x640] sm:$0xff]  ;;  %v8107_v1 = vld [vmem:[#allocation7 + $0x648] sm:$0xff] }
 0x4db   : > { %11291 = vmatprep.subr.bf16.mxu0 %v13379_v13  ;;  %11463 = vmatprep.subr.bf16.mxu1 %v13381_v15  ;;  %v13411_v13 = vcombine.high %v8082_v7, %v8086_v8  ;;  %v13413_v15 = vcombine.high %v8083_v9, %v8087_v10  ;;  %v8110_v63 = vld [vmem:[#allocation7 + $0x660] sm:$0xff]  ;;  %v8111_v2 = vld [vmem:[#allocation7 + $0x668] sm:$0xff] }
 0x4de   : > { %11292 = vmatpush1.bf16.msra.mxu0 %v13378_v27  ;;  %11464 = vmatpush1.bf16.msra.mxu1 %v13380_v35  ;;  %v13410_v27 = vcombine.low %v8082_v7, %v8086_v8  ;;  %v13412_v35 = vcombine.low %v8083_v9, %v8087_v10  ;;  %v8114_v7 = vld [vmem:[#allocation7 + $0x680] sm:$0xff]  ;;  %v8115_v9 = vld [vmem:[#allocation7 + $0x688] sm:$0xff] }
 0x4df   : > { %11293 = vmatprep.subr.bf16.mxu0 %v13387_v39  ;;  %11465 = vmatprep.subr.bf16.mxu1 %v13389_v43  ;;  %v13419_v39 = vcombine.high %v8090_v17, %v8094_v18  ;;  %v13421_v43 = vcombine.high %v8091_v21, %v8095_v22  ;;  %v8118_v8 = vld [vmem:[#allocation7 + $0x6a0] sm:$0xff]  ;;  %v8119_v10 = vld [vmem:[#allocation7 + $0x6a8] sm:$0xff] }
 0x4e2   : > { %11294 = vmatpush1.bf16.msra.mxu0 %v13386_v53  ;;  %11466 = vmatpush1.bf16.msra.mxu1 %v13388_v57  ;;  %v13418_v53 = vcombine.low %v8090_v17, %v8094_v18  ;;  %v13420_v57 = vcombine.low %v8091_v21, %v8095_v22  ;;  %v8122_v17 = vld [vmem:[#allocation7 + $0x6c0] sm:$0xff]  ;;  %v8123_v21 = vld [vmem:[#allocation7 + $0x6c8] sm:$0xff] }
 0x4e3   : > { %11295 = vmatprep.subr.bf16.mxu0 %v13395_v58  ;;  %11467 = vmatprep.subr.bf16.mxu1 %v13397_v61  ;;  %v13427_v58 = vcombine.high %v8098_v45, %v8102_v46  ;;  %v13429_v61 = vcombine.high %v8099_v49, %v8103_v50  ;;  %v8126_v18 = vld [vmem:[#allocation7 + $0x6e0] sm:$0xff]  ;;  %v8127_v22 = vld [vmem:[#allocation7 + $0x6e8] sm:$0xff] }
 0x4e6   : > { %11296 = vmatpush1.bf16.msra.mxu0 %v13394_v3  ;;  %11468 = vmatpush1.bf16.msra.mxu1 %v13396_v4  ;;  %v13426_v3 = vcombine.low %v8098_v45, %v8102_v46  ;;  %v13428_v4 = vcombine.low %v8099_v49, %v8103_v50  ;;  %v8130_v45 = vld [vmem:[#allocation7 + $0x700] sm:$0xff]  ;;  %v8131_v49 = vld [vmem:[#allocation7 + $0x708] sm:$0xff] }
 0x4e7   : > { %11297 = vmatprep.subr.bf16.mxu0 %v13403_v5  ;;  %11469 = vmatprep.subr.bf16.mxu1 %v13405_v6  ;;  %v13435_v5 = vcombine.high %v8106_v62, %v8110_v63  ;;  %v13437_v6 = vcombine.high %v8107_v1, %v8111_v2  ;;  %v8134_v46 = vld [vmem:[#allocation7 + $0x720] sm:$0xff]  ;;  %v8135_v50 = vld [vmem:[#allocation7 + $0x728] sm:$0xff] }
 0x4ea   : > { %11298 = vmatpush1.bf16.msra.mxu0 %v13402_v11  ;;  %11470 = vmatpush1.bf16.msra.mxu1 %v13404_v12  ;;  %v13434_v11 = vcombine.low %v8106_v62, %v8110_v63  ;;  %v13436_v12 = vcombine.low %v8107_v1, %v8111_v2  ;;  %v8138_v62 = vld [vmem:[#allocation7 + $0x740] sm:$0xff]  ;;  %v8139_v1 = vld [vmem:[#allocation7 + $0x748] sm:$0xff] }
 0x4eb   : > { %11299 = vmatprep.subr.bf16.mxu0 %v13411_v13  ;;  %11471 = vmatprep.subr.bf16.mxu1 %v13413_v15  ;;  %v13443_v13 = vcombine.high %v8114_v7, %v8118_v8  ;;  %v13445_v15 = vcombine.high %v8115_v9, %v8119_v10  ;;  %v8142_v63 = vld [vmem:[#allocation7 + $0x760] sm:$0xff]  ;;  %v8143_v2 = vld [vmem:[#allocation7 + $0x768] sm:$0xff] }
 0x4ee   : > { %11300 = vmatpush1.bf16.msra.mxu0 %v13410_v27  ;;  %11472 = vmatpush1.bf16.msra.mxu1 %v13412_v35  ;;  %v13442_v27 = vcombine.low %v8114_v7, %v8118_v8  ;;  %v13444_v35 = vcombine.low %v8115_v9, %v8119_v10  ;;  %v8146_v7 = vld [vmem:[#allocation7 + $0x780] sm:$0xff]  ;;  %v8147_v9 = vld [vmem:[#allocation7 + $0x788] sm:$0xff] }
 0x4ef   : > { %11301 = vmatprep.subr.bf16.mxu0 %v13419_v39  ;;  %11473 = vmatprep.subr.bf16.mxu1 %v13421_v43  ;;  %v13451_v39 = vcombine.high %v8122_v17, %v8126_v18  ;;  %v13453_v43 = vcombine.high %v8123_v21, %v8127_v22  ;;  %v8150_v8 = vld [vmem:[#allocation7 + $0x7a0] sm:$0xff]  ;;  %v8151_v10 = vld [vmem:[#allocation7 + $0x7a8] sm:$0xff] }
 0x4f2   : > { %11302 = vmatpush1.bf16.msra.mxu0 %v13418_v53  ;;  %11474 = vmatpush1.bf16.msra.mxu1 %v13420_v57  ;;  %v13450_v53 = vcombine.low %v8122_v17, %v8126_v18  ;;  %v13452_v57 = vcombine.low %v8123_v21, %v8127_v22  ;;  %v8154_v17 = vld [vmem:[#allocation7 + $0x7c0] sm:$0xff]  ;;  %v8155_v21 = vld [vmem:[#allocation7 + $0x7c8] sm:$0xff] }
 0x4f3   : > { %11303 = vmatprep.subr.bf16.mxu0 %v13427_v58  ;;  %11475 = vmatprep.subr.bf16.mxu1 %v13429_v61  ;;  %v13459_v58 = vcombine.high %v8130_v45, %v8134_v46  ;;  %v13461_v61 = vcombine.high %v8131_v49, %v8135_v50  ;;  %v8158_v18 = vld [vmem:[#allocation7 + $0x7e0] sm:$0xff]  ;;  %v8159_v22 = vld [vmem:[#allocation7 + $0x7e8] sm:$0xff] }
 0x4f6   : > { %11304 = vmatpush1.bf16.msra.mxu0 %v13426_v3  ;;  %11476 = vmatpush1.bf16.msra.mxu1 %v13428_v4  ;;  %v13458_v3 = vcombine.low %v8130_v45, %v8134_v46  ;;  %v13460_v4 = vcombine.low %v8131_v49, %v8135_v50  ;;  %v8162_v45 = vld [vmem:[#allocation7 + $0x800] sm:$0xff]  ;;  %v8163_v49 = vld [vmem:[#allocation7 + $0x808] sm:$0xff] }
 0x4f7   : > { %11305 = vmatprep.subr.bf16.mxu0 %v13435_v5  ;;  %11477 = vmatprep.subr.bf16.mxu1 %v13437_v6  ;;  %v13467_v5 = vcombine.high %v8138_v62, %v8142_v63  ;;  %v13469_v6 = vcombine.high %v8139_v1, %v8143_v2  ;;  %v8166_v46 = vld [vmem:[#allocation7 + $0x820] sm:$0xff]  ;;  %v8167_v50 = vld [vmem:[#allocation7 + $0x828] sm:$0xff] }
 0x4fa   : > { %11306 = vmatpush1.bf16.msra.mxu0 %v13434_v11  ;;  %11478 = vmatpush1.bf16.msra.mxu1 %v13436_v12  ;;  %v13466_v11 = vcombine.low %v8138_v62, %v8142_v63  ;;  %v13468_v12 = vcombine.low %v8139_v1, %v8143_v2  ;;  %v8170_v62 = vld [vmem:[#allocation7 + $0x840] sm:$0xff]  ;;  %v8171_v1 = vld [vmem:[#allocation7 + $0x848] sm:$0xff] }
 0x4fb   : > { %11307 = vmatprep.subr.bf16.mxu0 %v13443_v13  ;;  %11479 = vmatprep.subr.bf16.mxu1 %v13445_v15  ;;  %v13475_v13 = vcombine.high %v8146_v7, %v8150_v8  ;;  %v13477_v15 = vcombine.high %v8147_v9, %v8151_v10  ;;  %v8174_v63 = vld [vmem:[#allocation7 + $0x860] sm:$0xff]  ;;  %v8175_v2 = vld [vmem:[#allocation7 + $0x868] sm:$0xff] }
 0x4fe   : > { %11308 = vmatpush1.bf16.msra.mxu0 %v13442_v27  ;;  %11480 = vmatpush1.bf16.msra.mxu1 %v13444_v35  ;;  %v13474_v27 = vcombine.low %v8146_v7, %v8150_v8  ;;  %v13476_v35 = vcombine.low %v8147_v9, %v8151_v10  ;;  %v8178_v7 = vld [vmem:[#allocation7 + $0x880] sm:$0xff]  ;;  %v8179_v9 = vld [vmem:[#allocation7 + $0x888] sm:$0xff] }
 0x4ff   : > { %11309 = vmatprep.subr.bf16.mxu0 %v13451_v39  ;;  %11481 = vmatprep.subr.bf16.mxu1 %v13453_v43  ;;  %v13483_v39 = vcombine.high %v8154_v17, %v8158_v18  ;;  %v13485_v43 = vcombine.high %v8155_v21, %v8159_v22  ;;  %v8182_v8 = vld [vmem:[#allocation7 + $0x8a0] sm:$0xff]  ;;  %v8183_v10 = vld [vmem:[#allocation7 + $0x8a8] sm:$0xff] }
 0x502   : > { %11310 = vmatpush1.bf16.msra.mxu0 %v13450_v53  ;;  %11482 = vmatpush1.bf16.msra.mxu1 %v13452_v57  ;;  %v13482_v53 = vcombine.low %v8154_v17, %v8158_v18  ;;  %v13484_v57 = vcombine.low %v8155_v21, %v8159_v22  ;;  %v8186_v17 = vld [vmem:[#allocation7 + $0x8c0] sm:$0xff]  ;;  %v8187_v21 = vld [vmem:[#allocation7 + $0x8c8] sm:$0xff] }
 0x503   : > { %11311 = vmatprep.subr.bf16.mxu0 %v13459_v58  ;;  %11483 = vmatprep.subr.bf16.mxu1 %v13461_v61  ;;  %v13491_v58 = vcombine.high %v8162_v45, %v8166_v46  ;;  %v13493_v61 = vcombine.high %v8163_v49, %v8167_v50  ;;  %v8190_v18 = vld [vmem:[#allocation7 + $0x8e0] sm:$0xff]  ;;  %v8191_v22 = vld [vmem:[#allocation7 + $0x8e8] sm:$0xff] }
 0x506   : > { %11312 = vmatpush1.bf16.msra.mxu0 %v13458_v3  ;;  %11484 = vmatpush1.bf16.msra.mxu1 %v13460_v4  ;;  %v13490_v3 = vcombine.low %v8162_v45, %v8166_v46  ;;  %v13492_v4 = vcombine.low %v8163_v49, %v8167_v50  ;;  %v8194_v45 = vld [vmem:[#allocation7 + $0x900] sm:$0xff]  ;;  %v8195_v49 = vld [vmem:[#allocation7 + $0x908] sm:$0xff] }
 0x507   : > { %11313 = vmatprep.subr.bf16.mxu0 %v13467_v5  ;;  %11485 = vmatprep.subr.bf16.mxu1 %v13469_v6  ;;  %v13499_v5 = vcombine.high %v8170_v62, %v8174_v63  ;;  %v13501_v6 = vcombine.high %v8171_v1, %v8175_v2  ;;  %v8198_v46 = vld [vmem:[#allocation7 + $0x920] sm:$0xff]  ;;  %v8199_v50 = vld [vmem:[#allocation7 + $0x928] sm:$0xff] }
 0x50a   : > { %11314 = vmatpush1.bf16.msra.mxu0 %v13466_v11  ;;  %11486 = vmatpush1.bf16.msra.mxu1 %v13468_v12  ;;  %v13498_v11 = vcombine.low %v8170_v62, %v8174_v63  ;;  %v13500_v12 = vcombine.low %v8171_v1, %v8175_v2  ;;  %v8202_v62 = vld [vmem:[#allocation7 + $0x940] sm:$0xff]  ;;  %v8203_v1 = vld [vmem:[#allocation7 + $0x948] sm:$0xff] }
 0x50b   : > { %11315 = vmatprep.subr.bf16.mxu0 %v13475_v13  ;;  %11487 = vmatprep.subr.bf16.mxu1 %v13477_v15  ;;  %v13507_v13 = vcombine.high %v8178_v7, %v8182_v8  ;;  %v13509_v15 = vcombine.high %v8179_v9, %v8183_v10  ;;  %v8206_v63 = vld [vmem:[#allocation7 + $0x960] sm:$0xff]  ;;  %v8207_v2 = vld [vmem:[#allocation7 + $0x968] sm:$0xff] }
 0x50e   : > { %11316 = vmatpush1.bf16.msra.mxu0 %v13474_v27  ;;  %11488 = vmatpush1.bf16.msra.mxu1 %v13476_v35  ;;  %v13506_v27 = vcombine.low %v8178_v7, %v8182_v8  ;;  %v13508_v35 = vcombine.low %v8179_v9, %v8183_v10  ;;  %v8210_v7 = vld [vmem:[#allocation7 + $0x980] sm:$0xff]  ;;  %v8211_v9 = vld [vmem:[#allocation7 + $0x988] sm:$0xff] }
 0x50f   : > { %11317 = vmatprep.subr.bf16.mxu0 %v13483_v39  ;;  %11489 = vmatprep.subr.bf16.mxu1 %v13485_v43  ;;  %v13515_v39 = vcombine.high %v8186_v17, %v8190_v18  ;;  %v13517_v43 = vcombine.high %v8187_v21, %v8191_v22  ;;  %v8214_v8 = vld [vmem:[#allocation7 + $0x9a0] sm:$0xff]  ;;  %v8215_v10 = vld [vmem:[#allocation7 + $0x9a8] sm:$0xff] }
 0x512   : > { %11318 = vmatpush1.bf16.msra.mxu0 %v13482_v53  ;;  %11490 = vmatpush1.bf16.msra.mxu1 %v13484_v57  ;;  %v13514_v53 = vcombine.low %v8186_v17, %v8190_v18  ;;  %v13516_v57 = vcombine.low %v8187_v21, %v8191_v22  ;;  %v8218_v17 = vld [vmem:[#allocation7 + $0x9c0] sm:$0xff]  ;;  %v8219_v21 = vld [vmem:[#allocation7 + $0x9c8] sm:$0xff] }
 0x513   : > { %11330 = vmatprep.subr.bf16.mxu0 %v13491_v58  ;;  %11502 = vmatprep.subr.bf16.mxu1 %v13493_v61  ;;  %v13523_v58 = vcombine.high %v8194_v45, %v8198_v46  ;;  %v13525_v61 = vcombine.high %v8195_v49, %v8199_v50  ;;  %v8222_v18 = vld [vmem:[#allocation7 + $0x9e0] sm:$0xff]  ;;  %v8223_v22 = vld [vmem:[#allocation7 + $0x9e8] sm:$0xff] }
 0x515   : > { %11320 = vmatmul.mubr.bf16.vlgmr.msra.gmra.mrb[16].mxu0 %v14641_v28  ;;  %11492 = vmatmul.mubr.bf16.vlgmr.msra.gmra.mrb[16].mxu1 %v14641_v28 }
 0x516   : > { %11331 = vmatpush1.bf16.msra.mxu0 %v13490_v3  ;;  %11503 = vmatpush1.bf16.msra.mxu1 %v13492_v4  ;;  %v13522_v3 = vcombine.low %v8194_v45, %v8198_v46  ;;  %v13524_v4 = vcombine.low %v8195_v49, %v8199_v50  ;;  %v8226_v45 = vld [vmem:[#allocation7 + $0xa00] sm:$0xff]  ;;  %v8227_v49 = vld [vmem:[#allocation7 + $0xa08] sm:$0xff] }
 0x517   : > { %11332 = vmatprep.subr.bf16.mxu0 %v13499_v5  ;;  %11504 = vmatprep.subr.bf16.mxu1 %v13501_v6  ;;  %v13531_v5 = vcombine.high %v8202_v62, %v8206_v63  ;;  %v13533_v6 = vcombine.high %v8203_v1, %v8207_v2  ;;  %v8230_v46 = vld [vmem:[#allocation7 + $0xa20] sm:$0xff]  ;;  %v8231_v50 = vld [vmem:[#allocation7 + $0xa28] sm:$0xff] }
 0x518   : > { %11362 = vmatprep.mubr.bf16.mxu0 %v14643_v38  ;;  %11534 = vmatprep.mubr.bf16.mxu1 %v14643_v38 }
 0x51a   : > { %11333 = vmatpush1.bf16.msra.mxu0 %v13498_v11  ;;  %11505 = vmatpush1.bf16.msra.mxu1 %v13500_v12  ;;  %v13530_v11 = vcombine.low %v8202_v62, %v8206_v63  ;;  %v13532_v12 = vcombine.low %v8203_v1, %v8207_v2  ;;  %v8234_v62 = vld [vmem:[#allocation7 + $0xa40] sm:$0xff]  ;;  %v8235_v1 = vld [vmem:[#allocation7 + $0xa48] sm:$0xff] }
 0x51b   : > { %11334 = vmatprep.subr.bf16.mxu0 %v13507_v13  ;;  %11506 = vmatprep.subr.bf16.mxu1 %v13509_v15  ;;  %v13539_v13 = vcombine.high %v8210_v7, %v8214_v8  ;;  %v13541_v15 = vcombine.high %v8211_v9, %v8215_v10  ;;  %v8238_v63 = vld [vmem:[#allocation7 + $0xa60] sm:$0xff]  ;;  %v8239_v2 = vld [vmem:[#allocation7 + $0xa68] sm:$0xff] }
 0x51e   : > { %11335 = vmatpush1.bf16.msra.mxu0 %v13506_v27  ;;  %11507 = vmatpush1.bf16.msra.mxu1 %v13508_v35  ;;  %v13538_v27 = vcombine.low %v8210_v7, %v8214_v8  ;;  %v13540_v35 = vcombine.low %v8211_v9, %v8215_v10  ;;  %v8242_v7 = vld [vmem:[#allocation7 + $0xa80] sm:$0xff]  ;;  %v8243_v9 = vld [vmem:[#allocation7 + $0xa88] sm:$0xff] }
 0x51f   : > { %11336 = vmatprep.subr.bf16.mxu0 %v13515_v39  ;;  %11508 = vmatprep.subr.bf16.mxu1 %v13517_v43  ;;  %v13547_v39 = vcombine.high %v8218_v17, %v8222_v18  ;;  %v13549_v43 = vcombine.high %v8219_v21, %v8223_v22  ;;  %v8246_v8 = vld [vmem:[#allocation7 + $0xaa0] sm:$0xff]  ;;  %v8247_v10 = vld [vmem:[#allocation7 + $0xaa8] sm:$0xff] }
 0x522   : > { %11337 = vmatpush1.bf16.msra.mxu0 %v13514_v53  ;;  %11509 = vmatpush1.bf16.msra.mxu1 %v13516_v57  ;;  %v13546_v53 = vcombine.low %v8218_v17, %v8222_v18  ;;  %v13548_v57 = vcombine.low %v8219_v21, %v8223_v22  ;;  %v8250_v17 = vld [vmem:[#allocation7 + $0xac0] sm:$0xff]  ;;  %v8251_v21 = vld [vmem:[#allocation7 + $0xac8] sm:$0xff] }
 0x523   : > { %11338 = vmatprep.subr.bf16.mxu0 %v13523_v58  ;;  %11510 = vmatprep.subr.bf16.mxu1 %v13525_v61  ;;  %v13555_v58 = vcombine.high %v8226_v45, %v8230_v46  ;;  %v13557_v61 = vcombine.high %v8227_v49, %v8231_v50  ;;  %v8254_v18 = vld [vmem:[#allocation7 + $0xae0] sm:$0xff]  ;;  %v8255_v22 = vld [vmem:[#allocation7 + $0xae8] sm:$0xff] }
 0x526   : > { %11339 = vmatpush1.bf16.msra.mxu0 %v13522_v3  ;;  %11511 = vmatpush1.bf16.msra.mxu1 %v13524_v4  ;;  %v13554_v3 = vcombine.low %v8226_v45, %v8230_v46  ;;  %v13556_v4 = vcombine.low %v8227_v49, %v8231_v50  ;;  %v8258_v45 = vld [vmem:[#allocation7 + $0xb00] sm:$0xff]  ;;  %v8259_v49 = vld [vmem:[#allocation7 + $0xb08] sm:$0xff] }
 0x527   : > { %11340 = vmatprep.subr.bf16.mxu0 %v13531_v5  ;;  %11512 = vmatprep.subr.bf16.mxu1 %v13533_v6  ;;  %v13563_v5 = vcombine.high %v8234_v62, %v8238_v63  ;;  %v13565_v6 = vcombine.high %v8235_v1, %v8239_v2  ;;  %v8262_v46 = vld [vmem:[#allocation7 + $0xb20] sm:$0xff]  ;;  %v8263_v50 = vld [vmem:[#allocation7 + $0xb28] sm:$0xff] }
 0x52a   : > { %11341 = vmatpush1.bf16.msra.mxu0 %v13530_v11  ;;  %11513 = vmatpush1.bf16.msra.mxu1 %v13532_v12  ;;  %v13562_v11 = vcombine.low %v8234_v62, %v8238_v63  ;;  %v13564_v12 = vcombine.low %v8235_v1, %v8239_v2  ;;  %v8266_v62 = vld [vmem:[#allocation7 + $0xb40] sm:$0xff]  ;;  %v8267_v1 = vld [vmem:[#allocation7 + $0xb48] sm:$0xff] }
 0x52b   : > { %11342 = vmatprep.subr.bf16.mxu0 %v13539_v13  ;;  %11514 = vmatprep.subr.bf16.mxu1 %v13541_v15  ;;  %v13571_v13 = vcombine.high %v8242_v7, %v8246_v8  ;;  %v13573_v15 = vcombine.high %v8243_v9, %v8247_v10  ;;  %v8270_v63 = vld [vmem:[#allocation7 + $0xb60] sm:$0xff]  ;;  %v8271_v2 = vld [vmem:[#allocation7 + $0xb68] sm:$0xff] }
 0x52e   : > { %11343 = vmatpush1.bf16.msra.mxu0 %v13538_v27  ;;  %11515 = vmatpush1.bf16.msra.mxu1 %v13540_v35  ;;  %v13570_v27 = vcombine.low %v8242_v7, %v8246_v8  ;;  %v13572_v35 = vcombine.low %v8243_v9, %v8247_v10  ;;  %v8274_v7 = vld [vmem:[#allocation7 + $0xb80] sm:$0xff]  ;;  %v8275_v9 = vld [vmem:[#allocation7 + $0xb88] sm:$0xff] }
 0x52f   : > { %11344 = vmatprep.subr.bf16.mxu0 %v13547_v39  ;;  %11516 = vmatprep.subr.bf16.mxu1 %v13549_v43  ;;  %v13579_v39 = vcombine.high %v8250_v17, %v8254_v18  ;;  %v13581_v43 = vcombine.high %v8251_v21, %v8255_v22  ;;  %v8278_v8 = vld [vmem:[#allocation7 + $0xba0] sm:$0xff]  ;;  %v8279_v10 = vld [vmem:[#allocation7 + $0xba8] sm:$0xff] }
 0x532   : > { %11345 = vmatpush1.bf16.msra.mxu0 %v13546_v53  ;;  %11517 = vmatpush1.bf16.msra.mxu1 %v13548_v57  ;;  %v13578_v53 = vcombine.low %v8250_v17, %v8254_v18  ;;  %v13580_v57 = vcombine.low %v8251_v21, %v8255_v22  ;;  %v8282_v17 = vld [vmem:[#allocation7 + $0xbc0] sm:$0xff]  ;;  %v8283_v21 = vld [vmem:[#allocation7 + $0xbc8] sm:$0xff] }
 0x533   : > { %11346 = vmatprep.subr.bf16.mxu0 %v13555_v58  ;;  %11518 = vmatprep.subr.bf16.mxu1 %v13557_v61  ;;  %v13587_v58 = vcombine.high %v8258_v45, %v8262_v46  ;;  %v13589_v61 = vcombine.high %v8259_v49, %v8263_v50  ;;  %v8286_v18 = vld [vmem:[#allocation7 + $0xbe0] sm:$0xff]  ;;  %v8287_v22 = vld [vmem:[#allocation7 + $0xbe8] sm:$0xff] }
 0x536   : > { %11347 = vmatpush1.bf16.msra.mxu0 %v13554_v3  ;;  %11519 = vmatpush1.bf16.msra.mxu1 %v13556_v4  ;;  %v13586_v3 = vcombine.low %v8258_v45, %v8262_v46  ;;  %v13588_v4 = vcombine.low %v8259_v49, %v8263_v50  ;;  %v8290_v45 = vld [vmem:[#allocation7 + $0xc00] sm:$0xff]  ;;  %v8291_v49 = vld [vmem:[#allocation7 + $0xc08] sm:$0xff] }
 0x537   : > { %11348 = vmatprep.subr.bf16.mxu0 %v13563_v5  ;;  %11520 = vmatprep.subr.bf16.mxu1 %v13565_v6  ;;  %v13595_v5 = vcombine.high %v8266_v62, %v8270_v63  ;;  %v13597_v6 = vcombine.high %v8267_v1, %v8271_v2  ;;  %v8294_v46 = vld [vmem:[#allocation7 + $0xc20] sm:$0xff]  ;;  %v8295_v50 = vld [vmem:[#allocation7 + $0xc28] sm:$0xff] }
 0x53a   : > { %11349 = vmatpush1.bf16.msra.mxu0 %v13562_v11  ;;  %11521 = vmatpush1.bf16.msra.mxu1 %v13564_v12  ;;  %v13594_v11 = vcombine.low %v8266_v62, %v8270_v63  ;;  %v13596_v12 = vcombine.low %v8267_v1, %v8271_v2  ;;  %v8298_v62 = vld [vmem:[#allocation7 + $0xc40] sm:$0xff]  ;;  %v8299_v1 = vld [vmem:[#allocation7 + $0xc48] sm:$0xff] }
 0x53b   : > { %11350 = vmatprep.subr.bf16.mxu0 %v13571_v13  ;;  %11522 = vmatprep.subr.bf16.mxu1 %v13573_v15  ;;  %v13603_v13 = vcombine.high %v8274_v7, %v8278_v8  ;;  %v13605_v15 = vcombine.high %v8275_v9, %v8279_v10  ;;  %v8302_v63 = vld [vmem:[#allocation7 + $0xc60] sm:$0xff]  ;;  %v8303_v2 = vld [vmem:[#allocation7 + $0xc68] sm:$0xff] }
 0x53e   : > { %11351 = vmatpush1.bf16.msra.mxu0 %v13570_v27  ;;  %11523 = vmatpush1.bf16.msra.mxu1 %v13572_v35  ;;  %v13602_v27 = vcombine.low %v8274_v7, %v8278_v8  ;;  %v13604_v35 = vcombine.low %v8275_v9, %v8279_v10  ;;  %v8306_v7 = vld [vmem:[#allocation7 + $0xc80] sm:$0xff]  ;;  %v8307_v9 = vld [vmem:[#allocation7 + $0xc88] sm:$0xff] }
 0x53f   : > { %11352 = vmatprep.subr.bf16.mxu0 %v13579_v39  ;;  %11524 = vmatprep.subr.bf16.mxu1 %v13581_v43  ;;  %v13611_v39 = vcombine.high %v8282_v17, %v8286_v18  ;;  %v13613_v43 = vcombine.high %v8283_v21, %v8287_v22  ;;  %v8310_v8 = vld [vmem:[#allocation7 + $0xca0] sm:$0xff]  ;;  %v8311_v10 = vld [vmem:[#allocation7 + $0xca8] sm:$0xff] }
 0x542   : > { %11353 = vmatpush1.bf16.msra.mxu0 %v13578_v53  ;;  %11525 = vmatpush1.bf16.msra.mxu1 %v13580_v57  ;;  %v13610_v53 = vcombine.low %v8282_v17, %v8286_v18  ;;  %v13612_v57 = vcombine.low %v8283_v21, %v8287_v22  ;;  %v8314_v17 = vld [vmem:[#allocation7 + $0xcc0] sm:$0xff]  ;;  %v8315_v21 = vld [vmem:[#allocation7 + $0xcc8] sm:$0xff] }
 0x543   : > { %11354 = vmatprep.subr.bf16.mxu0 %v13587_v58  ;;  %11526 = vmatprep.subr.bf16.mxu1 %v13589_v61  ;;  %v13619_v58 = vcombine.high %v8290_v45, %v8294_v46  ;;  %v13621_v61 = vcombine.high %v8291_v49, %v8295_v50  ;;  %v8318_v18 = vld [vmem:[#allocation7 + $0xce0] sm:$0xff]  ;;  %v8319_v22 = vld [vmem:[#allocation7 + $0xce8] sm:$0xff] }
 0x546   : > { %11355 = vmatpush1.bf16.msra.mxu0 %v13586_v3  ;;  %11527 = vmatpush1.bf16.msra.mxu1 %v13588_v4  ;;  %v13618_v3 = vcombine.low %v8290_v45, %v8294_v46  ;;  %v13620_v4 = vcombine.low %v8291_v49, %v8295_v50  ;;  %v8322_v45 = vld [vmem:[#allocation7 + $0xd00] sm:$0xff]  ;;  %v8323_v49 = vld [vmem:[#allocation7 + $0xd08] sm:$0xff] }
 0x547   : > { %11356 = vmatprep.subr.bf16.mxu0 %v13595_v5  ;;  %11528 = vmatprep.subr.bf16.mxu1 %v13597_v6  ;;  %v13627_v5 = vcombine.high %v8298_v62, %v8302_v63  ;;  %v13629_v6 = vcombine.high %v8299_v1, %v8303_v2  ;;  %v8326_v46 = vld [vmem:[#allocation7 + $0xd20] sm:$0xff]  ;;  %v8327_v50 = vld [vmem:[#allocation7 + $0xd28] sm:$0xff] }
 0x54a   : > { %11357 = vmatpush1.bf16.msra.mxu0 %v13594_v11  ;;  %11529 = vmatpush1.bf16.msra.mxu1 %v13596_v12  ;;  %v13626_v11 = vcombine.low %v8298_v62, %v8302_v63  ;;  %v13628_v12 = vcombine.low %v8299_v1, %v8303_v2  ;;  %v8330_v62 = vld [vmem:[#allocation7 + $0xd40] sm:$0xff]  ;;  %v8331_v1 = vld [vmem:[#allocation7 + $0xd48] sm:$0xff] }
 0x54b   : > { %11358 = vmatprep.subr.bf16.mxu0 %v13603_v13  ;;  %11530 = vmatprep.subr.bf16.mxu1 %v13605_v15  ;;  %v13635_v13 = vcombine.high %v8306_v7, %v8310_v8  ;;  %v13637_v15 = vcombine.high %v8307_v9, %v8311_v10  ;;  %v8334_v63 = vld [vmem:[#allocation7 + $0xd60] sm:$0xff]  ;;  %v8335_v2 = vld [vmem:[#allocation7 + $0xd68] sm:$0xff] }
 0x54e   : > { %11359 = vmatpush1.bf16.msra.mxu0 %v13602_v27  ;;  %11531 = vmatpush1.bf16.msra.mxu1 %v13604_v35  ;;  %v13634_v27 = vcombine.low %v8306_v7, %v8310_v8  ;;  %v13636_v35 = vcombine.low %v8307_v9, %v8311_v10  ;;  %v8338_v7 = vld [vmem:[#allocation7 + $0xd80] sm:$0xff]  ;;  %v8339_v9 = vld [vmem:[#allocation7 + $0xd88] sm:$0xff] }
 0x54f   : > { %11360 = vmatprep.subr.bf16.mxu0 %v13611_v39  ;;  %11532 = vmatprep.subr.bf16.mxu1 %v13613_v43  ;;  %v13643_v39 = vcombine.high %v8314_v17, %v8318_v18  ;;  %v13645_v43 = vcombine.high %v8315_v21, %v8319_v22  ;;  %v8342_v8 = vld [vmem:[#allocation7 + $0xda0] sm:$0xff]  ;;  %v8343_v10 = vld [vmem:[#allocation7 + $0xda8] sm:$0xff] }
 0x552   : > { %11361 = vmatpush1.bf16.msra.mxu0 %v13610_v53  ;;  %11533 = vmatpush1.bf16.msra.mxu1 %v13612_v57  ;;  %v13642_v53 = vcombine.low %v8314_v17, %v8318_v18  ;;  %v13644_v57 = vcombine.low %v8315_v21, %v8319_v22  ;;  %v13669_v17 = vcombine.high %v8339_v9, %v8343_v10  ;;  %v8346_v18 = vld [vmem:[#allocation7 + $0xdc0] sm:$0xff] }
 0x553   : > { %11373 = vmatprep.subr.bf16.mxu0 %v13619_v58  ;;  %11545 = vmatprep.subr.bf16.mxu1 %v13621_v61  ;;  %v13651_v58 = vcombine.high %v8322_v45, %v8326_v46  ;;  %v13653_v61 = vcombine.high %v8323_v49, %v8327_v50  ;;  %v8350_v21 = vld [vmem:[#allocation7 + $0xde0] sm:$0xff] }
 0x555   : > { %11363 = vmatmul.mubr.bf16.vlgmr.msra.gmra.mrb[16].mxu0 %v14649_v44  ;;  %11535 = vmatmul.mubr.bf16.vlgmr.msra.gmra.mrb[16].mxu1 %v14649_v44 }
 0x556   : > { %11374 = vmatpush1.bf16.msra.mxu0 %v13618_v3  ;;  %11546 = vmatpush1.bf16.msra.mxu1 %v13620_v4  ;;  %v13650_v3 = vcombine.low %v8322_v45, %v8326_v46  ;;  %v13652_v4 = vcombine.low %v8323_v49, %v8327_v50  ;;  %v13666_v46 = vcombine.low %v8338_v7, %v8342_v8 }
 0x557   : > { %11375 = vmatprep.subr.bf16.mxu0 %v13627_v5  ;;  %11547 = vmatprep.subr.bf16.mxu1 %v13629_v6  ;;  %v13659_v5 = vcombine.high %v8330_v62, %v8334_v63  ;;  %v13661_v6 = vcombine.high %v8331_v1, %v8335_v2 }
 0x558   : > { %11405 = vmatprep.mubr.bf16.mxu0 %v14651_v54  ;;  %11577 = vmatprep.mubr.bf16.mxu1 %v14651_v54 }
 0x55a   : > { %11376 = vmatpush1.bf16.msra.mxu0 %v13626_v11  ;;  %11548 = vmatpush1.bf16.msra.mxu1 %v13628_v12  ;;  %v13658_v11 = vcombine.low %v8330_v62, %v8334_v63  ;;  %v13660_v12 = vcombine.low %v8331_v1, %v8335_v2  ;;  %v8354_v62 = vld [vmem:[#allocation7 + $0xe00] sm:$0xff]  ;;  %v8355_v1 = vld [vmem:[#allocation7 + $0xe08] sm:$0xff] }
 0x55b   : > { %11377 = vmatprep.subr.bf16.mxu0 %v13635_v13  ;;  %11549 = vmatprep.subr.bf16.mxu1 %v13637_v15  ;;  %v13667_v13 = vcombine.high %v8338_v7, %v8342_v8  ;;  %v8358_v63 = vld [vmem:[#allocation7 + $0xe20] sm:$0xff]  ;;  %v8359_v2 = vld [vmem:[#allocation7 + $0xe28] sm:$0xff] }
 0x55c   : > { %v8362_v7 = vld [vmem:[#allocation7 + $0xe40] sm:$0xff] }
 0x55d   : > { %v8366_v8 = vld [vmem:[#allocation7 + $0xe60] sm:$0xff] }
 0x55e   : > { %11378 = vmatpush1.bf16.msra.mxu0 %v13634_v27  ;;  %11550 = vmatpush1.bf16.msra.mxu1 %v13636_v35  ;;  %v8347_v35 = vld [vmem:[#allocation7 + $0xdc8] sm:$0xff] }
 0x55f   : > { %11379 = vmatprep.subr.bf16.mxu0 %v13643_v39  ;;  %11551 = vmatprep.subr.bf16.mxu1 %v13645_v43  ;;  %v8351_v39 = vld [vmem:[#allocation7 + $0xde8] sm:$0xff] }
 0x562   : > { %11380 = vmatpush1.bf16.msra.mxu0 %v13642_v53  ;;  %11552 = vmatpush1.bf16.msra.mxu1 %v13644_v57  ;;  %v13668_v53 = vcombine.low %v8339_v9, %v8343_v10  ;;  %v13675_v57 = vcombine.high %v8346_v18, %v8350_v21  ;;  %v8363_v9 = vld [vmem:[#allocation7 + $0xe48] sm:$0xff] }
 0x563   : > { %11381 = vmatprep.subr.bf16.mxu0 %v13651_v58  ;;  %11553 = vmatprep.subr.bf16.mxu1 %v13653_v61  ;;  %v13677_v61 = vcombine.high %v8347_v35, %v8351_v39  ;;  %v8367_v10 = vld [vmem:[#allocation7 + $0xe68] sm:$0xff] }
 0x566   : > { %11382 = vmatpush1.bf16.msra.mxu0 %v13650_v3  ;;  %11554 = vmatpush1.bf16.msra.mxu1 %v13652_v4  ;;  %v13674_v3 = vcombine.low %v8346_v18, %v8350_v21  ;;  %v13676_v4 = vcombine.low %v8347_v35, %v8351_v39  ;;  %v8374_v18 = vld [vmem:[#allocation7 + $0xea0] sm:$0xff]  ;;  %v8371_v21 = vld [vmem:[#allocation7 + $0xe88] sm:$0xff]  ;;  %v13690_v35 = vcombine.low %v8362_v7, %v8366_v8 }
 0x567   : > { %11383 = vmatprep.subr.bf16.mxu0 %v13659_v5  ;;  %11555 = vmatprep.subr.bf16.mxu1 %v13661_v6  ;;  %v13683_v5 = vcombine.high %v8354_v62, %v8358_v63  ;;  %v13685_v6 = vcombine.high %v8355_v1, %v8359_v2  ;;  %v13692_v39 = vcombine.low %v8363_v9, %v8367_v10 }
 0x568   : > { %v14771_v15 = vpop.f32.mrb[12].mxu0  ;;  %v14773_v22 = vpop.f32.mrb[12].mxu1 }
 0x569   : > { %15135 = vst [vmem:[#allocation15_spill] sm:$0xff] %v14773_v22  ;;  %v14775_v27 = vpop.f32.mrb[13].mxu0  ;;  %v14777_v43 = vpop.f32.mrb[13].mxu1 }
 0x56a   : > { %15136 = vst [vmem:[#allocation16_spill] sm:$0xff] %v14775_v27  ;;  %15137 = vst [vmem:[#allocation17_spill] sm:$0xff] %v14777_v43  ;;  %v14779_v45 = vpop.f32.mrb[14].mxu0  ;;  %11384 = vmatpush1.bf16.msra.mxu0 %v13658_v11  ;;  %v14781_v49 = vpop.f32.mrb[14].mxu1  ;;  %11556 = vmatpush1.bf16.msra.mxu1 %v13660_v12  ;;  %v13682_v11 = vcombine.low %v8354_v62, %v8358_v63  ;;  %v13684_v12 = vcombine.low %v8355_v1, %v8359_v2  ;;  %v8382_v62 = vld [vmem:[#allocation7 + $0xee0] sm:$0xff]  ;;  %v8379_v63 = vld [vmem:[#allocation7 + $0xec8] sm:$0xff] }
 0x56b   : > { %15138 = vst [vmem:[#allocation18_spill] sm:$0xff] %v14779_v45  ;;  %15139 = vst [vmem:[#allocation19_spill] sm:$0xff] %v14781_v49  ;;  %v14783_v50 = vpop.f32.mrb[15].mxu0  ;;  %11385 = vmatprep.subr.bf16.mxu0 %v13667_v13  ;;  %v14785_v58 = vpop.f32.mrb[15].mxu1  ;;  %11557 = vmatprep.subr.bf16.mxu1 %v13669_v17  ;;  %v13691_v13 = vcombine.high %v8362_v7, %v8366_v8  ;;  %v13693_v17 = vcombine.high %v8363_v9, %v8367_v10  ;;  %v8390_v7 = vld [vmem:[#allocation7 + $0xf20] sm:$0xff]  ;;  %v8387_v8 = vld [vmem:[#allocation7 + $0xf08] sm:$0xff] }
 0x56c   : > { %15140 = vst [vmem:[#allocation20_spill] sm:$0xff] %v14783_v50  ;;  %15141 = vst [vmem:[#allocation21_spill] sm:$0xff] %v14785_v58  ;;  %v8257_v50 = vld [vmem:[#allocation7 + $0xaf8] sm:$0xff] }
 0x56e   : > { %11386 = vmatpush1.bf16.msra.mxu0 %v13666_v46  ;;  %11558 = vmatpush1.bf16.msra.mxu1 %v13668_v53  ;;  %v8370_v46 = vld [vmem:[#allocation7 + $0xe80] sm:$0xff]  ;;  %v8375_v53 = vld [vmem:[#allocation7 + $0xea8] sm:$0xff] }
 0x56f   : > { %11387 = vmatprep.subr.bf16.mxu0 %v13675_v57  ;;  %11559 = vmatprep.subr.bf16.mxu1 %v13677_v61  ;;  %v13699_v57 = vcombine.high %v8370_v46, %v8374_v18  ;;  %v13701_v61 = vcombine.high %v8371_v21, %v8375_v53  ;;  %v13698_v1 = vcombine.low %v8370_v46, %v8374_v18  ;;  %v8398_v46 = vld [vmem:[#allocation7 + $0xf60] sm:$0xff]  ;;  %v8395_v18 = vld [vmem:[#allocation7 + $0xf48] sm:$0xff] }
 0x570   : > { %v13700_v2 = vcombine.low %v8371_v21, %v8375_v53 }
 0x572   : > { %11388 = vmatpush1.bf16.msra.mxu0 %v13674_v3  ;;  %11560 = vmatpush1.bf16.msra.mxu1 %v13676_v4  ;;  %v8378_v3 = vld [vmem:[#allocation7 + $0xec0] sm:$0xff]  ;;  %v8383_v4 = vld [vmem:[#allocation7 + $0xee8] sm:$0xff] }
 0x573   : > { %11389 = vmatprep.subr.bf16.mxu0 %v13683_v5  ;;  %11561 = vmatprep.subr.bf16.mxu1 %v13685_v6  ;;  %v13707_v5 = vcombine.high %v8378_v3, %v8382_v62  ;;  %v13709_v6 = vcombine.high %v8379_v63, %v8383_v4  ;;  %v13706_v9 = vcombine.low %v8378_v3, %v8382_v62  ;;  %v8406_v3 = vld [vmem:[#allocation7 + $0xfa0] sm:$0xff]  ;;  %v8403_v62 = vld [vmem:[#allocation7 + $0xf88] sm:$0xff] }
 0x574   : > { %v13708_v10 = vcombine.low %v8379_v63, %v8383_v4 }
 0x576   : > { %11390 = vmatpush1.bf16.msra.mxu0 %v13682_v11  ;;  %11562 = vmatpush1.bf16.msra.mxu1 %v13684_v12  ;;  %v8386_v11 = vld [vmem:[#allocation7 + $0xf00] sm:$0xff]  ;;  %v8391_v12 = vld [vmem:[#allocation7 + $0xf28] sm:$0xff] }
 0x577   : > { %11391 = vmatprep.subr.bf16.mxu0 %v13691_v13  ;;  %11563 = vmatprep.subr.bf16.mxu1 %v13693_v17  ;;  %v13715_v13 = vcombine.high %v8386_v11, %v8390_v7  ;;  %v13717_v17 = vcombine.high %v8387_v8, %v8391_v12  ;;  %v13714_v21 = vcombine.low %v8386_v11, %v8390_v7  ;;  %v8414_v11 = vld [vmem:[#allocation7 + $0xfe0] sm:$0xff]  ;;  %v8411_v7 = vld [vmem:[#allocation7 + $0xfc8] sm:$0xff] }
 0x578   : > { %v13716_v53 = vcombine.low %v8387_v8, %v8391_v12 }
 0x57a   : > { %11392 = vmatpush1.bf16.msra.mxu0 %v13690_v35  ;;  %11564 = vmatpush1.bf16.msra.mxu1 %v13692_v39  ;;  %v8394_v35 = vld [vmem:[#allocation7 + $0xf40] sm:$0xff]  ;;  %v8399_v39 = vld [vmem:[#allocation7 + $0xf68] sm:$0xff] }
 0x57b   : > { %11393 = vmatprep.subr.bf16.mxu0 %v13699_v57  ;;  %11565 = vmatprep.subr.bf16.mxu1 %v13701_v61  ;;  %v13723_v57 = vcombine.high %v8394_v35, %v8398_v46  ;;  %v13725_v61 = vcombine.high %v8395_v18, %v8399_v39  ;;  %v13722_v63 = vcombine.low %v8394_v35, %v8398_v46  ;;  %v7912_v35 = vld [vmem:[#allocation7 + $0x30] sm:$0xff]  ;;  %v7909_v46 = vld [vmem:[#allocation7 + $0x18] sm:$0xff] }
 0x57c   : > { %v13724_v4 = vcombine.low %v8395_v18, %v8399_v39 }
 0x57e   : > { %11394 = vmatpush1.bf16.msra.mxu0 %v13698_v1  ;;  %11566 = vmatpush1.bf16.msra.mxu1 %v13700_v2  ;;  %v8402_v1 = vld [vmem:[#allocation7 + $0xf80] sm:$0xff]  ;;  %v8407_v2 = vld [vmem:[#allocation7 + $0xfa8] sm:$0xff] }
 0x57f   : > { %11395 = vmatprep.subr.bf16.mxu0 %v13707_v5  ;;  %11567 = vmatprep.subr.bf16.mxu1 %v13709_v6  ;;  %v13731_v5 = vcombine.high %v8402_v1, %v8406_v3  ;;  %v13733_v6 = vcombine.high %v8403_v62, %v8407_v2  ;;  %v13730_v8 = vcombine.low %v8402_v1, %v8406_v3  ;;  %v7920_v1 = vld [vmem:[#allocation7 + $0x70] sm:$0xff]  ;;  %v7917_v3 = vld [vmem:[#allocation7 + $0x58] sm:$0xff] }
 0x580   : > { %v13732_v12 = vcombine.low %v8403_v62, %v8407_v2 }
 0x582   : > { %11396 = vmatpush1.bf16.msra.mxu0 %v13706_v9  ;;  %11568 = vmatpush1.bf16.msra.mxu1 %v13708_v10  ;;  %v8410_v9 = vld [vmem:[#allocation7 + $0xfc0] sm:$0xff]  ;;  %v8415_v10 = vld [vmem:[#allocation7 + $0xfe8] sm:$0xff] }
 0x583   : > { %11397 = vmatprep.subr.bf16.mxu0 %v13715_v13  ;;  %11569 = vmatprep.subr.bf16.mxu1 %v13717_v17  ;;  %v13739_v13 = vcombine.high %v8410_v9, %v8414_v11  ;;  %v13741_v17 = vcombine.high %v8411_v7, %v8415_v10  ;;  %v13738_v18 = vcombine.low %v8410_v9, %v8414_v11  ;;  %v7928_v9 = vld [vmem:[#allocation7 + $0xb0] sm:$0xff]  ;;  %v7925_v11 = vld [vmem:[#allocation7 + $0x98] sm:$0xff] }
 0x584   : > { %v13740_v39 = vcombine.low %v8411_v7, %v8415_v10  ;;  %v7929_v7 = vld [vmem:[#allocation7 + $0xb8] sm:$0xff] }
 0x586   : > { %11398 = vmatpush1.bf16.msra.mxu0 %v13714_v21  ;;  %11570 = vmatpush1.bf16.msra.mxu1 %v13716_v53  ;;  %v7908_v21 = vld [vmem:[#allocation7 + $0x10] sm:$0xff]  ;;  %v7913_v53 = vld [vmem:[#allocation7 + $0x38] sm:$0xff] }
 0x587   : > { %11399 = vmatprep.subr.bf16.mxu0 %v13723_v57  ;;  %11571 = vmatprep.subr.bf16.mxu1 %v13725_v61  ;;  %v13239_v57 = vcombine.high %v7908_v21, %v7912_v35  ;;  %v13241_v61 = vcombine.high %v7909_v46, %v7913_v53  ;;  %v13238_v62 = vcombine.low %v7908_v21, %v7912_v35  ;;  %v7932_v21 = vld [vmem:[#allocation7 + $0xd0] sm:$0xff] }
 0x588   : > { %v13240_v2 = vcombine.low %v7909_v46, %v7913_v53  ;;  %v7936_v35 = vld [vmem:[#allocation7 + $0xf0] sm:$0xff]  ;;  %v7933_v46 = vld [vmem:[#allocation7 + $0xd8] sm:$0xff] }
 0x589   : > { %v7937_v53 = vld [vmem:[#allocation7 + $0xf8] sm:$0xff] }
 0x58a   : > { %11400 = vmatpush1.bf16.msra.mxu0 %v13722_v63  ;;  %11572 = vmatpush1.bf16.msra.mxu1 %v13724_v4  ;;  %v7916_v63 = vld [vmem:[#allocation7 + $0x50] sm:$0xff]  ;;  %v7921_v4 = vld [vmem:[#allocation7 + $0x78] sm:$0xff] }
 0x58b   : > { %11401 = vmatprep.subr.bf16.mxu0 %v13731_v5  ;;  %11573 = vmatprep.subr.bf16.mxu1 %v13733_v6  ;;  %v13247_v5 = vcombine.high %v7916_v63, %v7920_v1  ;;  %v13249_v6 = vcombine.high %v7917_v3, %v7921_v4  ;;  %v13246_v10 = vcombine.low %v7916_v63, %v7920_v1  ;;  %v7940_v63 = vld [vmem:[#allocation7 + $0x110] sm:$0xff] }
 0x58c   : > { %v7944_v1 = vld [vmem:[#allocation7 + $0x130] sm:$0xff] }
 0x58e   : > { %11402 = vmatpush1.bf16.msra.mxu0 %v13730_v8  ;;  %11574 = vmatpush1.bf16.msra.mxu1 %v13732_v12  ;;  %v7924_v8 = vld [vmem:[#allocation7 + $0x90] sm:$0xff]  ;;  %v13248_v12 = vcombine.low %v7917_v3, %v7921_v4  ;;  %v7941_v3 = vld [vmem:[#allocation7 + $0x118] sm:$0xff] }
 0x58f   : > { %11403 = vmatprep.subr.bf16.mxu0 %v13739_v13  ;;  %11575 = vmatprep.subr.bf16.mxu1 %v13741_v17  ;;  %v13255_v13 = vcombine.high %v7924_v8, %v7928_v9  ;;  %v13257_v17 = vcombine.high %v7925_v11, %v7929_v7  ;;  %v7945_v4 = vld [vmem:[#allocation7 + $0x138] sm:$0xff] }
 0x592   : > { %11404 = vmatpush1.bf16.msra.mxu0 %v13738_v18  ;;  %11576 = vmatpush1.bf16.msra.mxu1 %v13740_v39  ;;  %v13254_v18 = vcombine.low %v7924_v8, %v7928_v9  ;;  %v13256_v39 = vcombine.low %v7925_v11, %v7929_v7  ;;  %v7952_v8 = vld [vmem:[#allocation7 + $0x170] sm:$0xff]  ;;  %v7949_v9 = vld [vmem:[#allocation7 + $0x158] sm:$0xff]  ;;  %v13270_v11 = vcombine.low %v7940_v63, %v7944_v1 }
 0x593   : > { %11588 = vmatprep.subr.bf16.mxu0 %v13239_v57  ;;  %11760 = vmatprep.subr.bf16.mxu1 %v13241_v61  ;;  %v13263_v57 = vcombine.high %v7932_v21, %v7936_v35  ;;  %v13265_v61 = vcombine.high %v7933_v46, %v7937_v53  ;;  %v13272_v7 = vcombine.low %v7941_v3, %v7945_v4 }
 0x595   : > { %11406 = vmatmul.mubr.bf16.vlgmr.msra.gmra.mrb[16].mxu0 %v14657_v0  ;;  %11578 = vmatmul.mubr.bf16.vlgmr.msra.gmra.mrb[16].mxu1 %v14657_v0 }
 0x596   : > { %11589 = vmatpush1.bf16.msra.mxu0 %v13238_v62  ;;  %11761 = vmatpush1.bf16.msra.mxu1 %v13240_v2  ;;  %v13262_v62 = vcombine.low %v7932_v21, %v7936_v35  ;;  %v13264_v2 = vcombine.low %v7933_v46, %v7937_v53  ;;  %v7960_v21 = vld [vmem:[#allocation7 + $0x1b0] sm:$0xff]  ;;  %v7957_v35 = vld [vmem:[#allocation7 + $0x198] sm:$0xff] }
 0x597   : > { %11590 = vmatprep.subr.bf16.mxu0 %v13247_v5  ;;  %11762 = vmatprep.subr.bf16.mxu1 %v13249_v6  ;;  %v13271_v5 = vcombine.high %v7940_v63, %v7944_v1  ;;  %v7948_v6 = vld [vmem:[#allocation7 + $0x150] sm:$0xff]  ;;  %v7965_v1 = vld [vmem:[#allocation7 + $0x1d8] sm:$0xff] }
 0x598   : > { %11620 = vmatprep.mubr.bf16.mxu0 %v14629_v59  ;;  %11792 = vmatprep.mubr.bf16.mxu1 %v14629_v59  ;;  %v13273_v59 = vcombine.high %v7941_v3, %v7945_v4  ;;  %v13278_v46 = vcombine.low %v7948_v6, %v7952_v8  ;;  %v7968_v63 = vld [vmem:[#allocation7 + $0x1f0] sm:$0xff] }
 0x59a   : > { %11591 = vmatpush1.bf16.msra.mxu0 %v13246_v10  ;;  %11763 = vmatpush1.bf16.msra.mxu1 %v13248_v12  ;;  %v7953_v10 = vld [vmem:[#allocation7 + $0x178] sm:$0xff]  ;;  %v13279_v12 = vcombine.high %v7948_v6, %v7952_v8  ;;  %v7976_v6 = vld [vmem:[#allocation7 + $0x230] sm:$0xff] }
 0x59b   : > { %11592 = vmatprep.subr.bf16.mxu0 %v13255_v13  ;;  %11764 = vmatprep.subr.bf16.mxu1 %v13257_v17  ;;  %v13281_v13 = vcombine.high %v7949_v9, %v7953_v10  ;;  %v7956_v17 = vld [vmem:[#allocation7 + $0x190] sm:$0xff]  ;;  %v13280_v53 = vcombine.low %v7949_v9, %v7953_v10  ;;  %v7973_v8 = vld [vmem:[#allocation7 + $0x218] sm:$0xff] }
 0x59c   : > { %v13286_v3 = vcombine.low %v7956_v17, %v7960_v21 }
 0x59e   : > { %11593 = vmatpush1.bf16.msra.mxu0 %v13254_v18  ;;  %11765 = vmatpush1.bf16.msra.mxu1 %v13256_v39  ;;  %v7961_v18 = vld [vmem:[#allocation7 + $0x1b8] sm:$0xff]  ;;  %v13287_v39 = vcombine.high %v7956_v17, %v7960_v21  ;;  %v7984_v17 = vld [vmem:[#allocation7 + $0x270] sm:$0xff] }
 0x59f   : > { %11594 = vmatprep.subr.bf16.mxu0 %v13263_v57  ;;  %11766 = vmatprep.subr.bf16.mxu1 %v13265_v61  ;;  %v13289_v57 = vcombine.high %v7957_v35, %v7961_v18  ;;  %v7964_v61 = vld [vmem:[#allocation7 + $0x1d0] sm:$0xff]  ;;  %v13288_v4 = vcombine.low %v7957_v35, %v7961_v18  ;;  %v7981_v21 = vld [vmem:[#allocation7 + $0x258] sm:$0xff] }
 0x5a0   : > { %v13294_v9 = vcombine.low %v7964_v61, %v7968_v63 }
 0x5a2   : > { %11595 = vmatpush1.bf16.msra.mxu0 %v13262_v62  ;;  %11767 = vmatpush1.bf16.msra.mxu1 %v13264_v2  ;;  %v7969_v62 = vld [vmem:[#allocation7 + $0x1f8] sm:$0xff]  ;;  %v13295_v2 = vcombine.high %v7964_v61, %v7968_v63  ;;  %v7992_v61 = vld [vmem:[#allocation7 + $0x2b0] sm:$0xff] }
 0x5a3   : > { %11596 = vmatprep.subr.bf16.mxu0 %v13271_v5  ;;  %11768 = vmatprep.subr.bf16.mxu1 %v13273_v59  ;;  %v13297_v5 = vcombine.high %v7965_v1, %v7969_v62  ;;  %v7972_v59 = vld [vmem:[#allocation7 + $0x210] sm:$0xff]  ;;  %v13296_v10 = vcombine.low %v7965_v1, %v7969_v62  ;;  %v7989_v63 = vld [vmem:[#allocation7 + $0x298] sm:$0xff] }
 0x5a4   : > { %v13302_v35 = vcombine.low %v7972_v59, %v7976_v6 }
 0x5a6   : > { %11597 = vmatpush1.bf16.msra.mxu0 %v13270_v11  ;;  %11769 = vmatpush1.bf16.msra.mxu1 %v13272_v7  ;;  %v7977_v11 = vld [vmem:[#allocation7 + $0x238] sm:$0xff]  ;;  %v13303_v7 = vcombine.high %v7972_v59, %v7976_v6  ;;  %v8000_v59 = vld [vmem:[#allocation7 + $0x2f0] sm:$0xff] }
 0x5a7   : > { %11598 = vmatprep.subr.bf16.mxu0 %v13279_v12  ;;  %11770 = vmatprep.subr.bf16.mxu1 %v13281_v13  ;;  %v13305_v12 = vcombine.high %v7973_v8, %v7977_v11  ;;  %v7980_v13 = vld [vmem:[#allocation7 + $0x250] sm:$0xff]  ;;  %v13304_v18 = vcombine.low %v7973_v8, %v7977_v11  ;;  %v7997_v6 = vld [vmem:[#allocation7 + $0x2d8] sm:$0xff] }
 0x5a8   : > { %v13310_v1 = vcombine.low %v7980_v13, %v7984_v17 }
 0x5aa   : > { %11599 = vmatpush1.bf16.msra.mxu0 %v13278_v46  ;;  %11771 = vmatpush1.bf16.msra.mxu1 %v13280_v53  ;;  %v7985_v46 = vld [vmem:[#allocation7 + $0x278] sm:$0xff]  ;;  %v13311_v53 = vcombine.high %v7980_v13, %v7984_v17  ;;  %v8008_v13 = vld [vmem:[#allocation7 + $0x330] sm:$0xff] }
 0x5ab   : > { %11600 = vmatprep.subr.bf16.mxu0 %v13287_v39  ;;  %11772 = vmatprep.subr.bf16.mxu1 %v13289_v57  ;;  %v13313_v39 = vcombine.high %v7981_v21, %v7985_v46  ;;  %v7988_v57 = vld [vmem:[#allocation7 + $0x290] sm:$0xff]  ;;  %v13312_v62 = vcombine.low %v7981_v21, %v7985_v46  ;;  %v8005_v17 = vld [vmem:[#allocation7 + $0x318] sm:$0xff] }
 0x5ac   : > { %v13318_v8 = vcombine.low %v7988_v57, %v7992_v61 }
 0x5ae   : > { %11601 = vmatpush1.bf16.msra.mxu0 %v13286_v3  ;;  %11773 = vmatpush1.bf16.msra.mxu1 %v13288_v4  ;;  %v7993_v3 = vld [vmem:[#allocation7 + $0x2b8] sm:$0xff]  ;;  %v13319_v4 = vcombine.high %v7988_v57, %v7992_v61  ;;  %v8016_v57 = vld [vmem:[#allocation7 + $0x370] sm:$0xff] }
 0x5af   : > { %11602 = vmatprep.subr.bf16.mxu0 %v13295_v2  ;;  %11774 = vmatprep.subr.bf16.mxu1 %v13297_v5  ;;  %v13321_v2 = vcombine.high %v7989_v63, %v7993_v3  ;;  %v7996_v5 = vld [vmem:[#allocation7 + $0x2d0] sm:$0xff]  ;;  %v13320_v11 = vcombine.low %v7989_v63, %v7993_v3  ;;  %v8013_v61 = vld [vmem:[#allocation7 + $0x358] sm:$0xff] }
 0x5b0   : > { %v13326_v21 = vcombine.low %v7996_v5, %v8000_v59 }
 0x5b2   : > { %11603 = vmatpush1.bf16.msra.mxu0 %v13294_v9  ;;  %11775 = vmatpush1.bf16.msra.mxu1 %v13296_v10  ;;  %v8001_v9 = vld [vmem:[#allocation7 + $0x2f8] sm:$0xff]  ;;  %v13327_v10 = vcombine.high %v7996_v5, %v8000_v59  ;;  %v8024_v5 = vld [vmem:[#allocation7 + $0x3b0] sm:$0xff] }
 0x5b3   : > { %11604 = vmatprep.subr.bf16.mxu0 %v13303_v7  ;;  %11776 = vmatprep.subr.bf16.mxu1 %v13305_v12  ;;  %v13329_v7 = vcombine.high %v7997_v6, %v8001_v9  ;;  %v8004_v12 = vld [vmem:[#allocation7 + $0x310] sm:$0xff]  ;;  %v13328_v46 = vcombine.low %v7997_v6, %v8001_v9  ;;  %v8021_v59 = vld [vmem:[#allocation7 + $0x398] sm:$0xff] }
 0x5b4   : > { %v13334_v63 = vcombine.low %v8004_v12, %v8008_v13 }
 0x5b6   : > { %11605 = vmatpush1.bf16.msra.mxu0 %v13302_v35  ;;  %11777 = vmatpush1.bf16.msra.mxu1 %v13304_v18  ;;  %v8009_v35 = vld [vmem:[#allocation7 + $0x338] sm:$0xff]  ;;  %v13335_v18 = vcombine.high %v8004_v12, %v8008_v13  ;;  %v8032_v12 = vld [vmem:[#allocation7 + $0x3f0] sm:$0xff] }
 0x5b7   : > { %11606 = vmatprep.subr.bf16.mxu0 %v13311_v53  ;;  %11778 = vmatprep.subr.bf16.mxu1 %v13313_v39  ;;  %v13337_v53 = vcombine.high %v8005_v17, %v8009_v35  ;;  %v8012_v39 = vld [vmem:[#allocation7 + $0x350] sm:$0xff]  ;;  %v13336_v3 = vcombine.low %v8005_v17, %v8009_v35  ;;  %v8029_v13 = vld [vmem:[#allocation7 + $0x3d8] sm:$0xff] }
 0x5b8   : > { %v13342_v6 = vcombine.low %v8012_v39, %v8016_v57 }
 0x5ba   : > { %11607 = vmatpush1.bf16.msra.mxu0 %v13310_v1  ;;  %11779 = vmatpush1.bf16.msra.mxu1 %v13312_v62  ;;  %v8017_v1 = vld [vmem:[#allocation7 + $0x378] sm:$0xff]  ;;  %v13343_v62 = vcombine.high %v8012_v39, %v8016_v57  ;;  %v8040_v39 = vld [vmem:[#allocation7 + $0x430] sm:$0xff] }
 0x5bb   : > { %11608 = vmatprep.subr.bf16.mxu0 %v13319_v4  ;;  %11780 = vmatprep.subr.bf16.mxu1 %v13321_v2  ;;  %v13345_v4 = vcombine.high %v8013_v61, %v8017_v1  ;;  %v8020_v2 = vld [vmem:[#allocation7 + $0x390] sm:$0xff]  ;;  %v13344_v9 = vcombine.low %v8013_v61, %v8017_v1  ;;  %v8037_v57 = vld [vmem:[#allocation7 + $0x418] sm:$0xff] }
 0x5bc   : > { %v13350_v17 = vcombine.low %v8020_v2, %v8024_v5 }
 0x5be   : > { %11609 = vmatpush1.bf16.msra.mxu0 %v13318_v8  ;;  %11781 = vmatpush1.bf16.msra.mxu1 %v13320_v11  ;;  %v8025_v8 = vld [vmem:[#allocation7 + $0x3b8] sm:$0xff]  ;;  %v13351_v11 = vcombine.high %v8020_v2, %v8024_v5  ;;  %v8048_v2 = vld [vmem:[#allocation7 + $0x470] sm:$0xff] }
 0x5bf   : > { %11610 = vmatprep.subr.bf16.mxu0 %v13327_v10  ;;  %11782 = vmatprep.subr.bf16.mxu1 %v13329_v7  ;;  %v13353_v10 = vcombine.high %v8021_v59, %v8025_v8  ;;  %v8028_v7 = vld [vmem:[#allocation7 + $0x3d0] sm:$0xff]  ;;  %v13352_v35 = vcombine.low %v8021_v59, %v8025_v8  ;;  %v8045_v5 = vld [vmem:[#allocation7 + $0x458] sm:$0xff] }
 0x5c0   : > { %v13358_v61 = vcombine.low %v8028_v7, %v8032_v12 }
 0x5c2   : > { %11611 = vmatpush1.bf16.msra.mxu0 %v13326_v21  ;;  %11783 = vmatpush1.bf16.msra.mxu1 %v13328_v46  ;;  %v8033_v21 = vld [vmem:[#allocation7 + $0x3f8] sm:$0xff]  ;;  %v13359_v46 = vcombine.high %v8028_v7, %v8032_v12  ;;  %v8056_v7 = vld [vmem:[#allocation7 + $0x4b0] sm:$0xff] }
 0x5c3   : > { %11612 = vmatprep.subr.bf16.mxu0 %v13335_v18  ;;  %11784 = vmatprep.subr.bf16.mxu1 %v13337_v53  ;;  %v13361_v18 = vcombine.high %v8029_v13, %v8033_v21  ;;  %v8036_v53 = vld [vmem:[#allocation7 + $0x410] sm:$0xff]  ;;  %v13360_v1 = vcombine.low %v8029_v13, %v8033_v21  ;;  %v8053_v12 = vld [vmem:[#allocation7 + $0x498] sm:$0xff] }
 0x5c4   : > { %v13366_v59 = vcombine.low %v8036_v53, %v8040_v39  ;;  %v8057_v13 = vld [vmem:[#allocation7 + $0x4b8] sm:$0xff] }
 0x5c6   : > { %11613 = vmatpush1.bf16.msra.mxu0 %v13334_v63  ;;  %11785 = vmatpush1.bf16.msra.mxu1 %v13336_v3  ;;  %v8041_v63 = vld [vmem:[#allocation7 + $0x438] sm:$0xff]  ;;  %v13367_v3 = vcombine.high %v8036_v53, %v8040_v39  ;;  %v8064_v53 = vld [vmem:[#allocation7 + $0x4f0] sm:$0xff] }
 0x5c7   : > { %11614 = vmatprep.subr.bf16.mxu0 %v13343_v62  ;;  %11786 = vmatprep.subr.bf16.mxu1 %v13345_v4  ;;  %v13369_v62 = vcombine.high %v8037_v57, %v8041_v63  ;;  %v8044_v4 = vld [vmem:[#allocation7 + $0x450] sm:$0xff]  ;;  %v13368_v8 = vcombine.low %v8037_v57, %v8041_v63  ;;  %v8061_v39 = vld [vmem:[#allocation7 + $0x4d8] sm:$0xff] }
 0x5c8   : > { %v13374_v21 = vcombine.low %v8044_v4, %v8048_v2  ;;  %v8065_v57 = vld [vmem:[#allocation7 + $0x4f8] sm:$0xff] }
 0x5ca   : > { %11615 = vmatpush1.bf16.msra.mxu0 %v13342_v6  ;;  %11787 = vmatpush1.bf16.msra.mxu1 %v13344_v9  ;;  %v8049_v6 = vld [vmem:[#allocation7 + $0x478] sm:$0xff]  ;;  %v13375_v9 = vcombine.high %v8044_v4, %v8048_v2 }
 0x5cb   : > { %11616 = vmatprep.subr.bf16.mxu0 %v13351_v11  ;;  %11788 = vmatprep.subr.bf16.mxu1 %v13353_v10  ;;  %v13377_v11 = vcombine.high %v8045_v5, %v8049_v6  ;;  %v8052_v10 = vld [vmem:[#allocation7 + $0x490] sm:$0xff]  ;;  %v8069_v4 = vld [vmem:[#allocation7 + $0x518] sm:$0xff] }
 0x5cc   : > { %v13382_v63 = vcombine.low %v8052_v10, %v8056_v7  ;;  %v8073_v2 = vld [vmem:[#allocation7 + $0x538] sm:$0xff] }
 0x5ce   : > { %11617 = vmatpush1.bf16.msra.mxu0 %v13350_v17  ;;  %11789 = vmatpush1.bf16.msra.mxu1 %v13352_v35  ;;  %v13376_v17 = vcombine.low %v8045_v5, %v8049_v6  ;;  %v13383_v35 = vcombine.high %v8052_v10, %v8056_v7  ;;  %v13392_v6 = vcombine.low %v8061_v39, %v8065_v57  ;;  %v8081_v10 = vld [vmem:[#allocation7 + $0x578] sm:$0xff] }
 0x5cf   : > { %11618 = vmatprep.subr.bf16.mxu0 %v13359_v46  ;;  %11790 = vmatprep.subr.bf16.mxu1 %v13361_v18  ;;  %v13385_v46 = vcombine.high %v8053_v12, %v8057_v13  ;;  %v8060_v18 = vld [vmem:[#allocation7 + $0x4d0] sm:$0xff] }
 0x5d0   : > { %v13390_v5 = vcombine.low %v8060_v18, %v8064_v53 }
 0x5d2   : > { %11619 = vmatpush1.bf16.msra.mxu0 %v13358_v61  ;;  %11791 = vmatpush1.bf16.msra.mxu1 %v13360_v1  ;;  %v13391_v61 = vcombine.high %v8060_v18, %v8064_v53  ;;  %v13393_v1 = vcombine.high %v8061_v39, %v8065_v57  ;;  %v8089_v18 = vld [vmem:[#allocation7 + $0x5b8] sm:$0xff] }
 0x5d3   : > { %11631 = vmatprep.subr.bf16.mxu0 %v13367_v3  ;;  %11803 = vmatprep.subr.bf16.mxu1 %v13369_v62  ;;  %v8068_v3 = vld [vmem:[#allocation7 + $0x510] sm:$0xff] }
 0x5d4   : > { %v8072_v62 = vld [vmem:[#allocation7 + $0x530] sm:$0xff] }
 0x5d5   : > { %11621 = vmatmul.mubr.bf16.vlgmr.msra.gmra.mrb[20].mxu0 %v14633_v16  ;;  %11793 = vmatmul.mubr.bf16.vlgmr.msra.gmra.mrb[20].mxu1 %v14633_v16  ;;  %v13384_v16 = vcombine.low %v8053_v12, %v8057_v13  ;;  %v13398_v7 = vcombine.low %v8068_v3, %v8072_v62  ;;  %v13400_v12 = vcombine.low %v8069_v4, %v8073_v2 }
 0x5d6   : > { %11632 = vmatpush1.bf16.msra.mxu0 %v13366_v59  ;;  %11804 = vmatpush1.bf16.msra.mxu1 %v13368_v8  ;;  %v13399_v59 = vcombine.high %v8068_v3, %v8072_v62  ;;  %v8076_v8 = vld [vmem:[#allocation7 + $0x550] sm:$0xff]  ;;  %v8097_v3 = vld [vmem:[#allocation7 + $0x5f8] sm:$0xff] }
 0x5d7   : > { %11633 = vmatprep.subr.bf16.mxu0 %v13375_v9  ;;  %11805 = vmatprep.subr.bf16.mxu1 %v13377_v11  ;;  %v8080_v9 = vld [vmem:[#allocation7 + $0x570] sm:$0xff]  ;;  %v8077_v11 = vld [vmem:[#allocation7 + $0x558] sm:$0xff] }
 0x5d8   : > { %11663 = vmatprep.mubr.bf16.mxu0 %v14635_v26  ;;  %11835 = vmatprep.mubr.bf16.mxu1 %v14635_v26  ;;  %v13401_v26 = vcombine.high %v8069_v4, %v8073_v2  ;;  %v13407_v13 = vcombine.high %v8076_v8, %v8080_v9  ;;  %v13406_v53 = vcombine.low %v8076_v8, %v8080_v9  ;;  %v8105_v8 = vld [vmem:[#allocation7 + $0x638] sm:$0xff] }
 0x5d9   : > { %v13408_v39 = vcombine.low %v8077_v11, %v8081_v10 }
 0x5da   : > { %11634 = vmatpush1.bf16.msra.mxu0 %v13374_v21  ;;  %11806 = vmatpush1.bf16.msra.mxu1 %v13376_v17  ;;  %v13409_v21 = vcombine.high %v8077_v11, %v8081_v10  ;;  %v8084_v17 = vld [vmem:[#allocation7 + $0x590] sm:$0xff] }
 0x5db   : > { %11635 = vmatprep.subr.bf16.mxu0 %v13383_v35  ;;  %11807 = vmatprep.subr.bf16.mxu1 %v13385_v46  ;;  %v8088_v35 = vld [vmem:[#allocation7 + $0x5b0] sm:$0xff]  ;;  %v8085_v46 = vld [vmem:[#allocation7 + $0x598] sm:$0xff] }
 0x5dc   : > { %v13415_v57 = vcombine.high %v8084_v17, %v8088_v35  ;;  %v13414_v62 = vcombine.low %v8084_v17, %v8088_v35  ;;  %v13416_v4 = vcombine.low %v8085_v46, %v8089_v18  ;;  %v8113_v17 = vld [vmem:[#allocation7 + $0x678] sm:$0xff] }
 0x5de   : > { %11636 = vmatpush1.bf16.msra.mxu0 %v13382_v63  ;;  %11808 = vmatpush1.bf16.msra.mxu1 %v13384_v16  ;;  %v13417_v63 = vcombine.high %v8085_v46, %v8089_v18  ;;  %v8092_v16 = vld [vmem:[#allocation7 + $0x5d0] sm:$0xff] }
 0x5df   : > { %11637 = vmatprep.subr.bf16.mxu0 %v13391_v61  ;;  %11809 = vmatprep.subr.bf16.mxu1 %v13393_v1  ;;  %v8096_v61 = vld [vmem:[#allocation7 + $0x5f0] sm:$0xff]  ;;  %v8093_v1 = vld [vmem:[#allocation7 + $0x5d8] sm:$0xff] }
 0x5e0   : > { %v13423_v2 = vcombine.high %v8092_v16, %v8096_v61  ;;  %v13422_v9 = vcombine.low %v8092_v16, %v8096_v61  ;;  %v13424_v11 = vcombine.low %v8093_v1, %v8097_v3  ;;  %v8121_v16 = vld [vmem:[#allocation7 + $0x6b8] sm:$0xff] }
 0x5e2   : > { %11638 = vmatpush1.bf16.msra.mxu0 %v13390_v5  ;;  %11810 = vmatpush1.bf16.msra.mxu1 %v13392_v6  ;;  %v13425_v5 = vcombine.high %v8093_v1, %v8097_v3  ;;  %v8100_v6 = vld [vmem:[#allocation7 + $0x610] sm:$0xff] }
 0x5e3   : > { %11639 = vmatprep.subr.bf16.mxu0 %v13399_v59  ;;  %11811 = vmatprep.subr.bf16.mxu1 %v13401_v26  ;;  %v8104_v59 = vld [vmem:[#allocation7 + $0x630] sm:$0xff]  ;;  %v8101_v26 = vld [vmem:[#allocation7 + $0x618] sm:$0xff] }
 0x5e4   : > { %v13431_v10 = vcombine.high %v8100_v6, %v8104_v59  ;;  %v13430_v35 = vcombine.low %v8100_v6, %v8104_v59  ;;  %v13432_v46 = vcombine.low %v8101_v26, %v8105_v8  ;;  %v8129_v6 = vld [vmem:[#allocation7 + $0x6f8] sm:$0xff] }
 0x5e6   : > { %11640 = vmatpush1.bf16.msra.mxu0 %v13398_v7  ;;  %11812 = vmatpush1.bf16.msra.mxu1 %v13400_v12  ;;  %v13433_v7 = vcombine.high %v8101_v26, %v8105_v8  ;;  %v8108_v12 = vld [vmem:[#allocation7 + $0x650] sm:$0xff] }
 0x5e7   : > { %11641 = vmatprep.subr.bf16.mxu0 %v13407_v13  ;;  %11813 = vmatprep.subr.bf16.mxu1 %v13409_v21  ;;  %v8112_v13 = vld [vmem:[#allocation7 + $0x670] sm:$0xff]  ;;  %v8109_v21 = vld [vmem:[#allocation7 + $0x658] sm:$0xff] }
 0x5e8   : > { %v13439_v18 = vcombine.high %v8108_v12, %v8112_v13  ;;  %v13438_v61 = vcombine.low %v8108_v12, %v8112_v13  ;;  %v13440_v1 = vcombine.low %v8109_v21, %v8113_v17  ;;  %v8137_v12 = vld [vmem:[#allocation7 + $0x738] sm:$0xff] }
 0x5ea   : > { %11642 = vmatpush1.bf16.msra.mxu0 %v13406_v53  ;;  %11814 = vmatpush1.bf16.msra.mxu1 %v13408_v39  ;;  %v13441_v53 = vcombine.high %v8109_v21, %v8113_v17  ;;  %v8116_v39 = vld [vmem:[#allocation7 + $0x690] sm:$0xff] }
 0x5eb   : > { %11643 = vmatprep.subr.bf16.mxu0 %v13415_v57  ;;  %11815 = vmatprep.subr.bf16.mxu1 %v13417_v63  ;;  %v8120_v57 = vld [vmem:[#allocation7 + $0x6b0] sm:$0xff]  ;;  %v8117_v63 = vld [vmem:[#allocation7 + $0x698] sm:$0xff] }
 0x5ec   : > { %v13447_v3 = vcombine.high %v8116_v39, %v8120_v57  ;;  %v13446_v59 = vcombine.low %v8116_v39, %v8120_v57  ;;  %v13448_v26 = vcombine.low %v8117_v63, %v8121_v16  ;;  %v8145_v39 = vld [vmem:[#allocation7 + $0x778] sm:$0xff] }
 0x5ee   : > { %11644 = vmatpush1.bf16.msra.mxu0 %v13414_v62  ;;  %11816 = vmatpush1.bf16.msra.mxu1 %v13416_v4  ;;  %v13449_v62 = vcombine.high %v8117_v63, %v8121_v16  ;;  %v8124_v4 = vld [vmem:[#allocation7 + $0x6d0] sm:$0xff] }
 0x5ef   : > { %11645 = vmatprep.subr.bf16.mxu0 %v13423_v2  ;;  %11817 = vmatprep.subr.bf16.mxu1 %v13425_v5  ;;  %v8128_v2 = vld [vmem:[#allocation7 + $0x6f0] sm:$0xff]  ;;  %v8125_v5 = vld [vmem:[#allocation7 + $0x6d8] sm:$0xff] }
 0x5f0   : > { %v13455_v8 = vcombine.high %v8124_v4, %v8128_v2  ;;  %v13454_v13 = vcombine.low %v8124_v4, %v8128_v2  ;;  %v13456_v21 = vcombine.low %v8125_v5, %v8129_v6  ;;  %v8153_v4 = vld [vmem:[#allocation7 + $0x7b8] sm:$0xff] }
 0x5f2   : > { %11646 = vmatpush1.bf16.msra.mxu0 %v13422_v9  ;;  %11818 = vmatpush1.bf16.msra.mxu1 %v13424_v11  ;;  %v13457_v9 = vcombine.high %v8125_v5, %v8129_v6  ;;  %v8132_v11 = vld [vmem:[#allocation7 + $0x710] sm:$0xff] }
 0x5f3   : > { %11647 = vmatprep.subr.bf16.mxu0 %v13431_v10  ;;  %11819 = vmatprep.subr.bf16.mxu1 %v13433_v7  ;;  %v8136_v10 = vld [vmem:[#allocation7 + $0x730] sm:$0xff]  ;;  %v8133_v7 = vld [vmem:[#allocation7 + $0x718] sm:$0xff] }
 0x5f4   : > { %v13463_v17 = vcombine.high %v8132_v11, %v8136_v10  ;;  %v13462_v57 = vcombine.low %v8132_v11, %v8136_v10  ;;  %v13464_v63 = vcombine.low %v8133_v7, %v8137_v12  ;;  %v8161_v11 = vld [vmem:[#allocation7 + $0x7f8] sm:$0xff] }
 0x5f6   : > { %11648 = vmatpush1.bf16.msra.mxu0 %v13430_v35  ;;  %11820 = vmatpush1.bf16.msra.mxu1 %v13432_v46  ;;  %v13465_v35 = vcombine.high %v8133_v7, %v8137_v12  ;;  %v8140_v46 = vld [vmem:[#allocation7 + $0x750] sm:$0xff] }
 0x5f7   : > { %11649 = vmatprep.subr.bf16.mxu0 %v13439_v18  ;;  %11821 = vmatprep.subr.bf16.mxu1 %v13441_v53  ;;  %v8144_v18 = vld [vmem:[#allocation7 + $0x770] sm:$0xff]  ;;  %v8141_v53 = vld [vmem:[#allocation7 + $0x758] sm:$0xff] }
 0x5f8   : > { %v13471_v16 = vcombine.high %v8140_v46, %v8144_v18  ;;  %v13470_v2 = vcombine.low %v8140_v46, %v8144_v18  ;;  %v13472_v5 = vcombine.low %v8141_v53, %v8145_v39  ;;  %v8169_v46 = vld [vmem:[#allocation7 + $0x838] sm:$0xff] }
 0x5fa   : > { %11650 = vmatpush1.bf16.msra.mxu0 %v13438_v61  ;;  %11822 = vmatpush1.bf16.msra.mxu1 %v13440_v1  ;;  %v13473_v61 = vcombine.high %v8141_v53, %v8145_v39  ;;  %v8148_v1 = vld [vmem:[#allocation7 + $0x790] sm:$0xff] }
 0x5fb   : > { %11651 = vmatprep.subr.bf16.mxu0 %v13447_v3  ;;  %11823 = vmatprep.subr.bf16.mxu1 %v13449_v62  ;;  %v8152_v3 = vld [vmem:[#allocation7 + $0x7b0] sm:$0xff]  ;;  %v8149_v62 = vld [vmem:[#allocation7 + $0x798] sm:$0xff] }
 0x5fc   : > { %v13479_v6 = vcombine.high %v8148_v1, %v8152_v3  ;;  %v13478_v10 = vcombine.low %v8148_v1, %v8152_v3  ;;  %v13480_v7 = vcombine.low %v8149_v62, %v8153_v4  ;;  %v8177_v1 = vld [vmem:[#allocation7 + $0x878] sm:$0xff] }
 0x5fe   : > { %11652 = vmatpush1.bf16.msra.mxu0 %v13446_v59  ;;  %11824 = vmatpush1.bf16.msra.mxu1 %v13448_v26  ;;  %v13481_v59 = vcombine.high %v8149_v62, %v8153_v4  ;;  %v8156_v26 = vld [vmem:[#allocation7 + $0x7d0] sm:$0xff] }
 0x5ff   : > { %11653 = vmatprep.subr.bf16.mxu0 %v13455_v8  ;;  %11825 = vmatprep.subr.bf16.mxu1 %v13457_v9  ;;  %v8160_v8 = vld [vmem:[#allocation7 + $0x7f0] sm:$0xff]  ;;  %v8157_v9 = vld [vmem:[#allocation7 + $0x7d8] sm:$0xff] }
 0x600   : > { %v13487_v12 = vcombine.high %v8156_v26, %v8160_v8  ;;  %v13486_v18 = vcombine.low %v8156_v26, %v8160_v8  ;;  %v13488_v53 = vcombine.low %v8157_v9, %v8161_v11  ;;  %v8185_v26 = vld [vmem:[#allocation7 + $0x8b8] sm:$0xff] }
 0x602   : > { %11654 = vmatpush1.bf16.msra.mxu0 %v13454_v13  ;;  %11826 = vmatpush1.bf16.msra.mxu1 %v13456_v21  ;;  %v13489_v13 = vcombine.high %v8157_v9, %v8161_v11  ;;  %v8164_v21 = vld [vmem:[#allocation7 + $0x810] sm:$0xff] }
 0x603   : > { %11655 = vmatprep.subr.bf16.mxu0 %v13463_v17  ;;  %11827 = vmatprep.subr.bf16.mxu1 %v13465_v35  ;;  %v8168_v17 = vld [vmem:[#allocation7 + $0x830] sm:$0xff]  ;;  %v8165_v35 = vld [vmem:[#allocation7 + $0x818] sm:$0xff] }
 0x604   : > { %v13495_v39 = vcombine.high %v8164_v21, %v8168_v17  ;;  %v13494_v3 = vcombine.low %v8164_v21, %v8168_v17  ;;  %v13496_v62 = vcombine.low %v8165_v35, %v8169_v46  ;;  %v8193_v21 = vld [vmem:[#allocation7 + $0x8f8] sm:$0xff] }
 0x606   : > { %11656 = vmatpush1.bf16.msra.mxu0 %v13462_v57  ;;  %11828 = vmatpush1.bf16.msra.mxu1 %v13464_v63  ;;  %v13497_v57 = vcombine.high %v8165_v35, %v8169_v46  ;;  %v8172_v63 = vld [vmem:[#allocation7 + $0x850] sm:$0xff] }
 0x607   : > { %11657 = vmatprep.subr.bf16.mxu0 %v13471_v16  ;;  %11829 = vmatprep.subr.bf16.mxu1 %v13473_v61  ;;  %v8176_v16 = vld [vmem:[#allocation7 + $0x870] sm:$0xff]  ;;  %v8173_v61 = vld [vmem:[#allocation7 + $0x858] sm:$0xff] }
 0x608   : > { %v13503_v4 = vcombine.high %v8172_v63, %v8176_v16  ;;  %v13502_v8 = vcombine.low %v8172_v63, %v8176_v16  ;;  %v13504_v9 = vcombine.low %v8173_v61, %v8177_v1 }
 0x60a   : > { %11658 = vmatpush1.bf16.msra.mxu0 %v13470_v2  ;;  %11830 = vmatpush1.bf16.msra.mxu1 %v13472_v5  ;;  %v13505_v2 = vcombine.high %v8173_v61, %v8177_v1  ;;  %v8180_v5 = vld [vmem:[#allocation7 + $0x890] sm:$0xff] }
 0x60b   : > { %11659 = vmatprep.subr.bf16.mxu0 %v13479_v6  ;;  %11831 = vmatprep.subr.bf16.mxu1 %v13481_v59  ;;  %v8184_v6 = vld [vmem:[#allocation7 + $0x8b0] sm:$0xff]  ;;  %v8181_v59 = vld [vmem:[#allocation7 + $0x898] sm:$0xff] }
 0x60c   : > { %v13511_v11 = vcombine.high %v8180_v5, %v8184_v6  ;;  %v13510_v17 = vcombine.low %v8180_v5, %v8184_v6  ;;  %v8204_v1 = vld [vmem:[#allocation7 + $0x950] sm:$0xff] }
 0x60e   : > { %11660 = vmatpush1.bf16.msra.mxu0 %v13478_v10  ;;  %11832 = vmatpush1.bf16.msra.mxu1 %v13480_v7  ;;  %v13513_v10 = vcombine.high %v8181_v59, %v8185_v26  ;;  %v8188_v7 = vld [vmem:[#allocation7 + $0x8d0] sm:$0xff] }
 0x60f   : > { %11661 = vmatprep.subr.bf16.mxu0 %v13487_v12  ;;  %11833 = vmatprep.subr.bf16.mxu1 %v13489_v13  ;;  %v8192_v12 = vld [vmem:[#allocation7 + $0x8f0] sm:$0xff]  ;;  %v8189_v13 = vld [vmem:[#allocation7 + $0x8d8] sm:$0xff] }
 0x610   : > { %v13519_v35 = vcombine.high %v8188_v7, %v8192_v12  ;;  %v13521_v46 = vcombine.high %v8189_v13, %v8193_v21  ;;  %v13518_v63 = vcombine.low %v8188_v7, %v8192_v12  ;;  %v13520_v16 = vcombine.low %v8189_v13, %v8193_v21  ;;  %v8220_v21 = vld [vmem:[#allocation7 + $0x9d0] sm:$0xff] }
 0x612   : > { %11662 = vmatpush1.bf16.msra.mxu0 %v13486_v18  ;;  %11834 = vmatpush1.bf16.msra.mxu1 %v13488_v53  ;;  %v8196_v18 = vld [vmem:[#allocation7 + $0x910] sm:$0xff] }
 0x613   : > { %11674 = vmatprep.subr.bf16.mxu0 %v13495_v39  ;;  %11846 = vmatprep.subr.bf16.mxu1 %v13497_v57  ;;  %v8200_v53 = vld [vmem:[#allocation7 + $0x930] sm:$0xff]  ;;  %v8197_v39 = vld [vmem:[#allocation7 + $0x918] sm:$0xff] }
 0x614   : > { %v8201_v57 = vld [vmem:[#allocation7 + $0x938] sm:$0xff]  ;;  %v13527_v61 = vcombine.high %v8196_v18, %v8200_v53 }
 0x615   : > { %11664 = vmatmul.mubr.bf16.vlgmr.msra.gmra.mrb[20].mxu0 %v14641_v28  ;;  %11836 = vmatmul.mubr.bf16.vlgmr.msra.gmra.mrb[20].mxu1 %v14641_v28  ;;  %v13512_v28 = vcombine.low %v8181_v59, %v8185_v26  ;;  %v13528_v5 = vcombine.low %v8197_v39, %v8201_v57  ;;  %v8212_v26 = vld [vmem:[#allocation7 + $0x990] sm:$0xff] }
 0x616   : > { %11675 = vmatpush1.bf16.msra.mxu0 %v13494_v3  ;;  %11847 = vmatpush1.bf16.msra.mxu1 %v13496_v62  ;;  %v8208_v3 = vld [vmem:[#allocation7 + $0x970] sm:$0xff]  ;;  %v8205_v62 = vld [vmem:[#allocation7 + $0x958] sm:$0xff] }
 0x617   : > { %11676 = vmatprep.subr.bf16.mxu0 %v13503_v4  ;;  %11848 = vmatprep.subr.bf16.mxu1 %v13505_v2  ;;  %v8209_v4 = vld [vmem:[#allocation7 + $0x978] sm:$0xff]  ;;  %v13526_v2 = vcombine.low %v8196_v18, %v8200_v53  ;;  %v13535_v6 = vcombine.high %v8204_v1, %v8208_v3 }
 0x618   : > { %11706 = vmatprep.mubr.bf16.mxu0 %v14643_v38  ;;  %11878 = vmatprep.mubr.bf16.mxu1 %v14643_v38  ;;  %v13529_v38 = vcombine.high %v8197_v39, %v8201_v57  ;;  %v13537_v59 = vcombine.high %v8205_v62, %v8209_v4  ;;  %v13536_v7 = vcombine.low %v8205_v62, %v8209_v4  ;;  %v8228_v57 = vld [vmem:[#allocation7 + $0xa10] sm:$0xff] }
 0x619   : > { %v8236_v4 = vld [vmem:[#allocation7 + $0xa50] sm:$0xff] }
 0x61a   : > { %11677 = vmatpush1.bf16.msra.mxu0 %v13502_v8  ;;  %11849 = vmatpush1.bf16.msra.mxu1 %v13504_v9  ;;  %v8216_v8 = vld [vmem:[#allocation7 + $0x9b0] sm:$0xff]  ;;  %v8213_v9 = vld [vmem:[#allocation7 + $0x998] sm:$0xff] }
 0x61b   : > { %11678 = vmatprep.subr.bf16.mxu0 %v13511_v11  ;;  %11850 = vmatprep.subr.bf16.mxu1 %v13513_v10  ;;  %v8217_v11 = vld [vmem:[#allocation7 + $0x9b8] sm:$0xff]  ;;  %v13534_v10 = vcombine.low %v8204_v1, %v8208_v3  ;;  %v13543_v12 = vcombine.high %v8212_v26, %v8216_v8 }
 0x61c   : > { %v13545_v13 = vcombine.high %v8213_v9, %v8217_v11  ;;  %v13544_v18 = vcombine.low %v8213_v9, %v8217_v11 }
 0x61e   : > { %11679 = vmatpush1.bf16.msra.mxu0 %v13510_v17  ;;  %11851 = vmatpush1.bf16.msra.mxu1 %v13512_v28  ;;  %v8224_v17 = vld [vmem:[#allocation7 + $0x9f0] sm:$0xff]  ;;  %v8221_v28 = vld [vmem:[#allocation7 + $0x9d8] sm:$0xff] }
 0x61f   : > { %11680 = vmatprep.subr.bf16.mxu0 %v13519_v35  ;;  %11852 = vmatprep.subr.bf16.mxu1 %v13521_v46  ;;  %v8225_v35 = vld [vmem:[#allocation7 + $0x9f8] sm:$0xff]  ;;  %v13542_v46 = vcombine.low %v8212_v26, %v8216_v8  ;;  %v13551_v53 = vcombine.high %v8220_v21, %v8224_v17  ;;  %v307_v26 = vld [vmem:[%s14614_s27 + $0x8] sm:$0xff] }
 0x620   : > { %v13553_v39 = vcombine.high %v8221_v28, %v8225_v35  ;;  %v13552_v1 = vcombine.low %v8221_v28, %v8225_v35  ;;  %v8245_v28 = vld [vmem:[#allocation7 + $0xa98] sm:$0xff] }
 0x621   : > { %v8249_v35 = vld [vmem:[#allocation7 + $0xab8] sm:$0xff] }
 0x622   : > { %11681 = vmatpush1.bf16.msra.mxu0 %v13518_v63  ;;  %11853 = vmatpush1.bf16.msra.mxu1 %v13520_v16  ;;  %v8232_v63 = vld [vmem:[#allocation7 + $0xa30] sm:$0xff]  ;;  %v8229_v16 = vld [vmem:[#allocation7 + $0xa18] sm:$0xff] }
 0x623   : > { %11682 = vmatprep.subr.bf16.mxu0 %v13527_v61  ;;  %11854 = vmatprep.subr.bf16.mxu1 %v13529_v38  ;;  %v8233_v61 = vld [vmem:[#allocation7 + $0xa38] sm:$0xff]  ;;  %v13550_v38 = vcombine.low %v8220_v21, %v8224_v17  ;;  %v13559_v3 = vcombine.high %v8228_v57, %v8232_v63  ;;  %v13558_v8 = vcombine.low %v8228_v57, %v8232_v63  ;;  %v332_v21 = vunpack.c.l.bf16 %v307_v26  ;;  %v318_v17 = vld [vmem:[%s14614_s27 + $0x60] sm:$0xff] }
 0x624   : > { %v13561_v62 = vcombine.high %v8229_v16, %v8233_v61  ;;  %v13560_v9 = vcombine.low %v8229_v16, %v8233_v61  ;;  %v354_v61 = vunpack.c.l.bf16 %v318_v17 }
 0x626   : > { %11683 = vmatpush1.bf16.msra.mxu0 %v13526_v2  ;;  %11855 = vmatpush1.bf16.msra.mxu1 %v13528_v5  ;;  %v8240_v2 = vld [vmem:[#allocation7 + $0xa70] sm:$0xff]  ;;  %v306_v5 = vld [vmem:[%s14614_s27] sm:$0xff] }
 0x627   : > { %11684 = vmatprep.subr.bf16.mxu0 %v13535_v6  ;;  %11856 = vmatprep.subr.bf16.mxu1 %v13537_v59  ;;  %v8237_v6 = vld [vmem:[#allocation7 + $0xa58] sm:$0xff]  ;;  %v13567_v11 = vcombine.high %v8236_v4, %v8240_v2 }
 0x628   : > { %v8241_v59 = vld [vmem:[#allocation7 + $0xa78] sm:$0xff] }
 0x629   : > { %v13568_v57 = vcombine.low %v8237_v6, %v8241_v59 }
 0x62a   : > { %11685 = vmatpush1.bf16.msra.mxu0 %v13534_v10  ;;  %11857 = vmatpush1.bf16.msra.mxu1 %v13536_v7  ;;  %v330_v10 = vunpack.c.l.bf16 %v306_v5  ;;  %v13569_v7 = vcombine.high %v8237_v6, %v8241_v59  ;;  %v355_v59 = vunpack.c.h.bf16 %v318_v17  ;;  %v8265_v17 = vld [vmem:[#allocation7 + $0xb38] sm:$0xff] }
 0x62b   : > { %11686 = vmatprep.subr.bf16.mxu0 %v13543_v12  ;;  %11858 = vmatprep.subr.bf16.mxu1 %v13545_v13  ;;  %v8244_v12 = vld [vmem:[#allocation7 + $0xa90] sm:$0xff] }
 0x62c   : > { %v8248_v13 = vld [vmem:[#allocation7 + $0xab0] sm:$0xff]  ;;  %v8418_v16 = vadd.f32 %v14675_v42, %v330_v10  ;;  %v13576_v42 = vcombine.low %v8245_v28, %v8249_v35 }
 0x62d   : > { %v13575_v63 = vcombine.high %v8244_v12, %v8248_v13  ;;  %v8260_v10 = vld [vmem:[#allocation7 + $0xb10] sm:$0xff] }
 0x62e   : > { %11687 = vmatpush1.bf16.msra.mxu0 %v13542_v46  ;;  %11859 = vmatpush1.bf16.msra.mxu1 %v13544_v18  ;;  %v331_v46 = vunpack.c.h.bf16 %v306_v5  ;;  %v319_v18 = vld [vmem:[%s14614_s27 + $0x68] sm:$0xff]  ;;  %v8253_v5 = vld [vmem:[#allocation7 + $0xad8] sm:$0xff] }
 0x62f   : > { %11688 = vmatprep.subr.bf16.mxu0 %v13551_v53  ;;  %11860 = vmatprep.subr.bf16.mxu1 %v13553_v39  ;;  %v13566_v53 = vcombine.low %v8236_v4, %v8240_v2  ;;  %v333_v39 = vunpack.c.h.bf16 %v307_v26  ;;  %v356_v58 = vunpack.c.l.bf16 %v319_v18  ;;  %v13574_v2 = vcombine.low %v8244_v12, %v8248_v13  ;;  %v14808_v26 = vld [vmem:[%s14614_s27 + $0x20] sm:$0xff] }
 0x630   : > { %v8419_v4 = vadd.f32 %v14679_v48, %v331_v46  ;;  %v357_v13 = vunpack.c.h.bf16 %v319_v18 }
 0x631   : > { %v8421_v6 = vadd.f32 %v14681_v51, %v333_v39  ;;  %v8428_v12 = vadd.f32 %v14685_v55, %v356_v58  ;;  %v311_v51 = vld [vmem:[%s14614_s27 + $0x28] sm:$0xff]  ;;  %v13584_v39 = vcombine.low %v8253_v5, %v8257_v50  ;;  %v322_v58 = vld [vmem:[%s14614_s27 + $0x80] sm:$0xff] }
 0x632   : > { %11689 = vmatpush1.bf16.msra.mxu0 %v13550_v38  ;;  %11861 = vmatpush1.bf16.msra.mxu1 %v13552_v1  ;;  %v13577_v38 = vcombine.high %v8245_v28, %v8249_v35  ;;  %v8252_v1 = vld [vmem:[#allocation7 + $0xad0] sm:$0xff]  ;;  %v13203_v46 = vmul.f32 -1.442695, %v8419_v4  ;;  %v340_v55 = vunpack.c.l.bf16 %v311_v51  ;;  %v323_v4 = vld [vmem:[%s14614_s27 + $0x88] sm:$0xff] }
 0x633   : > { %11690 = vmatprep.subr.bf16.mxu0 %v13559_v3  ;;  %11862 = vmatprep.subr.bf16.mxu1 %v13561_v62  ;;  %v8256_v3 = vld [vmem:[#allocation7 + $0xaf0] sm:$0xff]  ;;  %v8420_v62 = vadd.f32 %v14677_v47, %v332_v21  ;;  %v8426_v47 = vadd.f32 %v14683_v52, %v354_v61  ;;  %v8261_v21 = vld [vmem:[#allocation7 + $0xb18] sm:$0xff]  ;;  %v13205_v35 = vmul.f32 -1.442695, %v8421_v6  ;;  %v8427_v52 = vadd.f32 %v14687_v56, %v355_v59 }
 0x634   : > { %v13582_v28 = vcombine.low %v8252_v1, %v8256_v3  ;;  %v13593_v18 = vcombine.high %v8261_v21, %v8265_v17  ;;  %v8272_v61 = vld [vmem:[#allocation7 + $0xb70] sm:$0xff]  ;;  %v8269_v56 = vld [vmem:[#allocation7 + $0xb58] sm:$0xff]  ;;  %v362_v6 = vunpack.c.l.bf16 %v322_v58  ;;  %v13592_v59 = vcombine.low %v8261_v21, %v8265_v17 }
 0x635   : > { %v13204_v48 = vmul.f32 -1.442695, %v8420_v62  ;;  %v8273_v62 = vld [vmem:[#allocation7 + $0xb78] sm:$0xff] }
 0x636   : > { %11691 = vmatpush1.bf16.msra.mxu0 %v13558_v8  ;;  %11863 = vmatpush1.bf16.msra.mxu1 %v13560_v9  ;;  %v13583_v8 = vcombine.high %v8252_v1, %v8256_v3  ;;  %v13202_v9 = vmul.f32 -1.442695, %v8418_v16  ;;  %v8268_v16 = vld [vmem:[#allocation7 + $0xb50] sm:$0xff]  ;;  %v8429_v1 = vadd.f32 %v14689_v60, %v357_v13  ;;  %v339_v3 = vunpack.c.h.bf16 %v14808_v26 }
 0x637   : > { %11692 = vmatprep.subr.bf16.mxu0 %v13567_v11  ;;  %11864 = vmatprep.subr.bf16.mxu1 %v13569_v7  ;;  %v13585_v11 = vcombine.high %v8253_v5, %v8257_v50  ;;  %v8264_v7 = vld [vmem:[#allocation7 + $0xb30] sm:$0xff]  ;;  %v341_v5 = vunpack.c.h.bf16 %v311_v51  ;;  %v8532_v60 = vadd.f32 %v14741_v19, %v340_v55  ;;  %v363_v51 = vunpack.c.h.bf16 %v322_v58 }
 0x638   : > { %14015 = vpow2.f32 %v13202_v9  ;;  %v8276_v9 = vld [vmem:[#allocation7 + $0xb90] sm:$0xff]  ;;  %v13598_v21 = vcombine.low %v8268_v16, %v8272_v61  ;;  %v8538_v17 = vadd.f32 %v14747_v25, %v362_v6  ;;  %v365_v19 = vunpack.c.h.bf16 %v323_v4 }
 0x639   : > { %14017 = vpow2.f32 %v13204_v48  ;;  %v364_v48 = vunpack.c.l.bf16 %v323_v4  ;;  %v8533_v13 = vadd.f32 %v14745_v24, %v341_v5  ;;  %v8539_v58 = vadd.f32 %v14751_v32, %v363_v51  ;;  %v8293_v32 = vld [vmem:[#allocation7 + $0xc18] sm:$0xff] }
 0x63a   : > { %11693 = vmatpush1.bf16.msra.mxu0 %v13566_v53  ;;  %11865 = vmatpush1.bf16.msra.mxu1 %v13568_v57  ;;  %v338_v53 = vunpack.c.l.bf16 %v14808_v26  ;;  %v13591_v57 = vcombine.high %v8260_v10, %v8264_v7  ;;  %14019 = vpow2.f32 %v13203_v46  ;;  %v13601_v26 = vcombine.high %v8269_v56, %v8273_v62 }
 0x63b   : > { %11694 = vmatprep.subr.bf16.mxu0 %v13575_v63  ;;  %11866 = vmatprep.subr.bf16.mxu1 %v13577_v38  ;;  %v13210_v63 = vmul.f32 -1.442695, %v8426_v47  ;;  %v13212_v38 = vmul.f32 -1.442695, %v8428_v12  ;;  %14021 = vpow2.f32 %v13205_v35  ;;  %v8280_v47 = vld [vmem:[#allocation7 + $0xbb0] sm:$0xff]  ;;  %v13600_v46 = vcombine.low %v8269_v56, %v8273_v62 }
 0x63c   : > { %v8530_v50 = vadd.f32 %v14739_v14, %v338_v53  ;;  %v13213_v14 = vmul.f32 -1.442695, %v8429_v1  ;;  %v13607_v53 = vcombine.high %v8276_v9, %v8280_v47  ;;  %v8284_v35 = vld [vmem:[#allocation7 + $0xbd0] sm:$0xff]  ;;  %v8540_v24 = vadd.f32 %v14749_v31, %v364_v48 }
 0x63d   : > { %14023 = vpow2.f32 %v13210_v63  ;;  %v8289_v63 = vld [vmem:[#allocation7 + $0xbf8] sm:$0xff]  ;;  %v13221_v25 = vmul.f32 -1.442695, %v8533_v13  ;;  %v8292_v62 = vld [vmem:[#allocation7 + $0xc10] sm:$0xff] }
 0x63e   : > { %11695 = vmatpush1.bf16.msra.mxu0 %v13574_v2  ;;  %11867 = vmatpush1.bf16.msra.mxu1 %v13576_v42  ;;  %v13590_v2 = vcombine.low %v8260_v10, %v8264_v7  ;;  %v13599_v42 = vcombine.high %v8268_v16, %v8272_v61  ;;  %14025 = vpow2.f32 %v13212_v38  ;;  %v8277_v10 = vld [vmem:[#allocation7 + $0xb98] sm:$0xff]  ;;  %v13218_v12 = vmul.f32 -1.442695, %v8530_v50  ;;  %v8296_v50 = vld [vmem:[#allocation7 + $0xc30] sm:$0xff] }
 0x63f   : > { %11696 = vmatprep.subr.bf16.mxu0 %v13583_v8  ;;  %11868 = vmatprep.subr.bf16.mxu1 %v13585_v11  ;;  %v13211_v8 = vmul.f32 -1.442695, %v8427_v52  ;;  %v8531_v11 = vadd.f32 %v14743_v20, %v339_v3  ;;  %v8281_v7 = vld [vmem:[#allocation7 + $0xbb8] sm:$0xff]  ;;  %v8288_v52 = vld [vmem:[#allocation7 + $0xbf0] sm:$0xff]  ;;  %v13226_v61 = vmul.f32 -1.442695, %v8538_v17  ;;  %v8541_v38 = vadd.f32 %v14753_v40, %v365_v19 }
 0x640   : > { %v13609_v20 = vcombine.high %v8277_v10, %v8281_v7  ;;  %v13608_v1 = vcombine.low %v8277_v10, %v8281_v7  ;;  %v13615_v3 = vcombine.high %v8284_v35, %v8288_v52  ;;  %v13228_v4 = vmul.f32 -1.442695, %v8540_v24  ;;  %v8301_v10 = vld [vmem:[#allocation7 + $0xc58] sm:$0xff] }
 0x641   : > { %14027 = vpow2.f32 %v13211_v8  ;;  %v13614_v40 = vcombine.low %v8284_v35, %v8288_v52  ;;  %v13229_v8 = vmul.f32 -1.442695, %v8541_v38  ;;  %v8305_v7 = vld [vmem:[#allocation7 + $0xc78] sm:$0xff]  ;;  %v13622_v51 = vcombine.low %v8292_v62, %v8296_v50  ;;  %v8308_v35 = vld [vmem:[#allocation7 + $0xc90] sm:$0xff] }
 0x642   : > { %11697 = vmatpush1.bf16.msra.mxu0 %v13582_v28  ;;  %11869 = vmatpush1.bf16.msra.mxu1 %v13584_v39  ;;  %v13220_v28 = vmul.f32 -1.442695, %v8532_v60  ;;  %14029 = vpow2.f32 %v13213_v14  ;;  %v13219_v39 = vmul.f32 -1.442695, %v8531_v11  ;;  %v14016_v55 = vpop.eup %14015  ;;  %v8300_v14 = vld [vmem:[#allocation7 + $0xc50] sm:$0xff]  ;;  %v8309_v24 = vld [vmem:[#allocation7 + $0xc98] sm:$0xff] }
 0x643   : > { %11698 = vmatprep.subr.bf16.mxu0 %v13591_v57  ;;  %11870 = vmatprep.subr.bf16.mxu1 %v13593_v18  ;;  %v8285_v57 = vld [vmem:[#allocation7 + $0xbd8] sm:$0xff]  ;;  %14031 = vpow2.f32 %v13218_v12  ;;  %v13606_v18 = vcombine.low %v8276_v9, %v8280_v47  ;;  %v14018_v16 = vpop.eup %14017  ;;  %v8482_v9 = vadd.f32 1.0, %v14016_v55  ;;  %v8304_v11 = vld [vmem:[#allocation7 + $0xc70] sm:$0xff] }
 0x644   : > { %v14020_v56 = vpop.eup %14019  ;;  %14033 = vpow2.f32 %v13220_v28  ;;  %v13617_v31 = vcombine.high %v8285_v57, %v8289_v63  ;;  %v13616_v60 = vcombine.low %v8285_v57, %v8289_v63  ;;  %v8484_v48 = vadd.f32 1.0, %v14018_v16  ;;  %v8312_v52 = vld [vmem:[#allocation7 + $0xcb0] sm:$0xff]  ;;  %v8313_v57 = vld [vmem:[#allocation7 + $0xcb8] sm:$0xff] }
 0x645   : > { %v14022_v5 = vpop.eup %14021  ;;  %14035 = vpow2.f32 %v13219_v39  ;;  %v8483_v13 = vadd.f32 1.0, %v14020_v56  ;;  %v13632_v16 = vcombine.low %v8301_v10, %v8305_v7  ;;  %v8316_v56 = vld [vmem:[#allocation7 + $0xcd0] sm:$0xff] }
 0x646   : > { %11699 = vmatpush1.bf16.msra.mxu0 %v13590_v2  ;;  %11871 = vmatpush1.bf16.msra.mxu1 %v13592_v59  ;;  %v8297_v2 = vld [vmem:[#allocation7 + $0xc38] sm:$0xff]  ;;  %14037 = vpow2.f32 %v13221_v25  ;;  %v13227_v59 = vmul.f32 -1.442695, %v8539_v58  ;;  %v8485_v17 = vadd.f32 1.0, %v14022_v5  ;;  %v13630_v25 = vcombine.low %v8300_v14, %v8304_v11 }
 0x647   : > { %11700 = vmatprep.subr.bf16.mxu0 %v13599_v42  ;;  %11872 = vmatprep.subr.bf16.mxu1 %v13601_v26  ;;  %v14024_v6 = vpop.eup %14023  ;;  %14039 = vpow2.f32 %v13226_v61  ;;  %v13623_v26 = vcombine.high %v8292_v62, %v8296_v50  ;;  %v13625_v47 = vcombine.high %v8293_v32, %v8297_v2  ;;  %v13624_v19 = vcombine.low %v8293_v32, %v8297_v2  ;;  %v8317_v50 = vld [vmem:[#allocation7 + $0xcd8] sm:$0xff] }
 0x648   : > { %v14026_v42 = vpop.eup %14025  ;;  %14041 = vpow2.f32 %v13228_v4  ;;  %v8490_v28 = vadd.f32 1.0, %v14024_v6  ;;  %v13639_v61 = vcombine.high %v8308_v35, %v8312_v52  ;;  %v8321_v5 = vld [vmem:[#allocation7 + $0xcf8] sm:$0xff]  ;;  %v8644_v4 = vlaneseq }
 0x649   : > { %14043 = vpow2.f32 %v13227_v59  ;;  %v8492_v39 = vadd.f32 1.0, %v14026_v42  ;;  %v13638_v2 = vcombine.low %v8308_v35, %v8312_v52  ;;  %v14856_v35 = vld [vmem:[#allocation7 + $0xd70] sm:$0xff] }
 0x64a   : > { %11701 = vmatpush1.bf16.msra.mxu0 %v13598_v21  ;;  %11873 = vmatpush1.bf16.msra.mxu1 %v13600_v46  ;;  %14045 = vpow2.f32 %v13229_v8  ;;  %v13631_v46 = vcombine.high %v8300_v14, %v8304_v11  ;;  %v14835_v14 = vld [vmem:[#allocation7 + $0xd18] sm:$0xff] }
 0x64b   : > { %11702 = vmatprep.subr.bf16.mxu0 %v13607_v53  ;;  %11874 = vmatprep.subr.bf16.mxu1 %v13609_v20  ;;  %v14028_v12 = vpop.eup %14027  ;;  %14047 = vrcp.f32 %v8482_v9  ;;  %v13633_v20 = vcombine.high %v8301_v10, %v8305_v7  ;;  %v14831_v9 = vld [vmem:[#allocation7 + $0xd10] sm:$0xff]  ;;  %v14837_v11 = vld [vmem:[#allocation7 + $0xd38] sm:$0xff] }
 0x64c   : > { %v14030_v21 = vpop.eup %14029  ;;  %14049 = vrcp.f32 %v8484_v48  ;;  %v8491_v55 = vadd.f32 1.0, %v14028_v12  ;;  %v14839_v48 = vshrl.u32 %v8644_v4, 7  ;;  %v14894_v4 = vld [vmem:[#allocation7 + $0xdb8] sm:$0xff] }
 0x64d   : > { %v14032_v53 = vpop.eup %14031  ;;  %14051 = vrcp.f32 %v8483_v13 }
 0x64e   : > { %11703 = vmatpush1.bf16.msra.mxu0 %v13606_v18  ;;  %11875 = vmatpush1.bf16.msra.mxu1 %v13608_v1  ;;  %v14034_v63 = vpop.eup %14033  ;;  %14053 = vrcp.f32 %v8485_v17  ;;  %v8493_v18 = vadd.f32 1.0, %v14030_v21  ;;  %v8594_v1 = vadd.f32 1.0, %v14032_v53  ;;  %15142 = vst [vmem:[#allocation22_spill] sm:$0xff] %v14839_v48  ;;  %v13648_v21 = vcombine.low %v8317_v50, %v8321_v5 }
 0x64f   : > { %11704 = vmatprep.subr.bf16.mxu0 %v13615_v3  ;;  %11876 = vmatprep.subr.bf16.mxu1 %v13617_v31  ;;  %v14036_v58 = vpop.eup %14035  ;;  %14055 = vrcp.f32 %v8490_v28  ;;  %v13641_v3 = vcombine.high %v8309_v24, %v8313_v57  ;;  %v8320_v31 = vld [vmem:[#allocation7 + $0xcf0] sm:$0xff]  ;;  %v13657_v53 = vcombine.high %v14835_v14, %v14837_v11  ;;  %v14852_v28 = vld [vmem:[%s14614_s27 + $0x40] sm:$0xff] }
 0x650   : > { %v14038_v38 = vpop.eup %14037  ;;  %14057 = vrcp.f32 %v8492_v39  ;;  %v8595_v32 = vadd.f32 1.0, %v14036_v58  ;;  %v13647_v42 = vcombine.high %v8316_v56, %v8320_v31  ;;  %v13646_v12 = vcombine.low %v8316_v56, %v8320_v31  ;;  %v14883_v56 = vld [vmem:[#allocation7 + $0xd90] sm:$0xff] }
 0x651   : > { %v14040_v62 = vpop.eup %14039  ;;  %14059 = vrcp.f32 %v8491_v55  ;;  %v8597_v59 = vadd.f32 1.0, %v14038_v38  ;;  %v8646_v39 = vsub.s32 0, %v14839_v48  ;;  %v14864_v55 = vld [vmem:[#allocation7 + $0xd58] sm:$0xff]  ;;  %v13656_v38 = vcombine.low %v14835_v14, %v14837_v11  ;;  %v14885_v31 = vld [vmem:[#allocation7 + $0xdb0] sm:$0xff] }
 0x652   : > { %11705 = vmatpush1.bf16.msra.mxu0 %v13614_v40  ;;  %11877 = vmatpush1.bf16.msra.mxu1 %v13616_v60  ;;  %v14042_v6 = vpop.eup %14041  ;;  %14061 = vrcp.f32 %v8493_v18  ;;  %v13640_v40 = vcombine.low %v8309_v24, %v8313_v57  ;;  %v8602_v60 = vadd.f32 1.0, %v14040_v62  ;;  %v8654_v24 = vsub.s32 2, %v14839_v48  ;;  %v14921_v11 = vld [vmem:[#allocation7 + $0xdf0] sm:$0xff] }
 0x653   : > { %11717 = vmatprep.subr.bf16.mxu0 %v13623_v26  ;;  %11889 = vmatprep.subr.bf16.mxu1 %v13625_v47  ;;  %v14044_v8 = vpop.eup %14043  ;;  %14063 = vrcp.f32 %v8594_v1  ;;  %v13649_v26 = vcombine.high %v8317_v50, %v8321_v5  ;;  %v14833_v47 = vld [vmem:[#allocation7 + $0xd30] sm:$0xff]  ;;  %v8604_v7 = vadd.f32 1.0, %v14042_v6  ;;  %v8650_v57 = vsub.s32 1, %v14839_v48  ;;  %v14879_v1 = vld [vmem:[%s14614_s27 + $0x48] sm:$0xff]  ;;  %v14892_v5 = vld [vmem:[#allocation7 + $0xd98] sm:$0xff] }
 0x654   : > { %v13655_v17 = vcombine.high %v14831_v9, %v14833_v47  ;;  %v13654_v18 = vcombine.low %v14831_v9, %v14833_v47  ;;  %v348_v9 = vunpack.c.l.bf16 %v14879_v1  ;;  %v13671_v14 = vcombine.high %v14883_v56, %v14885_v31 }
 0x655   : > { %11707 = vmatmul.mubr.bf16.vlgmr.msra.gmra.mrb[20].mxu0 %v14649_v44  ;;  %11879 = vmatmul.mubr.bf16.vlgmr.msra.gmra.mrb[20].mxu1 %v14649_v44  ;;  %v8596_v44 = vadd.f32 1.0, %v14034_v63  ;;  %v8658_v63 = vsub.s32 3, %v14839_v48 }
 0x656   : > { %11718 = vmatpush1.bf16.msra.mxu0 %v13622_v51  ;;  %11890 = vmatpush1.bf16.msra.mxu1 %v13624_v19  ;;  %v8603_v51 = vadd.f32 1.0, %v14044_v8  ;;  %v14908_v8 = vld [vmem:[%s14614_s27 + $0xa8] sm:$0xff] }
 0x657   : > { %11719 = vmatprep.subr.bf16.mxu0 %v13631_v46  ;;  %11891 = vmatprep.subr.bf16.mxu1 %v13633_v20  ;;  %14065 = vrcp.f32 %v8596_v44  ;;  %v14854_v20 = vld [vmem:[#allocation7 + $0xd50] sm:$0xff] }
 0x658   : > { %11749 = vmatprep.mubr.bf16.mxu0 %v14651_v54  ;;  %11921 = vmatprep.mubr.bf16.mxu1 %v14651_v54  ;;  %v14046_v54 = vpop.eup %14045  ;;  %14067 = vrcp.f32 %v8595_v32  ;;  %v13662_v47 = vcombine.low %v14854_v20, %v14856_v35 }
 0x659   : > { %v14841_v10 = vpop.eup %14047  ;;  %14069 = vrcp.f32 %v8597_v59  ;;  %v8605_v46 = vadd.f32 1.0, %v14046_v54 }
 0x65a   : > { %11720 = vmatpush1.bf16.msra.mxu0 %v13630_v25  ;;  %11892 = vmatpush1.bf16.msra.mxu1 %v13632_v16  ;;  %v14843_v13 = vpop.eup %14049  ;;  %14071 = vrcp.f32 %v8602_v60  ;;  %v14866_v25 = vld [vmem:[#allocation7 + $0xd78] sm:$0xff]  ;;  %v14872_v16 = vld [vmem:[#allocation8] sm:$0xff]  ;;  %v14910_v60 = vld [vmem:[#allocation7 + $0xdd0] sm:$0xff] }
 0x65b   : > { %11721 = vmatprep.subr.bf16.mxu0 %v13639_v61  ;;  %11893 = vmatprep.subr.bf16.mxu1 %v13641_v3  ;;  %v14847_v19 = vpop.eup %14051  ;;  %14073 = vrcp.f32 %v8604_v7  ;;  %15143 = vst [vmem:[#allocation23_spill] sm:$0xff] %v14872_v16  ;;  %v13663_v3 = vcombine.high %v14854_v20, %v14856_v35  ;;  %v13665_v50 = vcombine.high %v14864_v55, %v14866_v25  ;;  %v14923_v7 = vld [vmem:[#allocation7 + $0xdd8] sm:$0xff]  ;;  %v14935_v20 = vld [vmem:[#allocation7 + $0xe10] sm:$0xff] }
 0x65c   : > { %v14858_v52 = vpop.eup %14053  ;;  %14075 = vrcp.f32 %v8603_v51  ;;  %v8655_v6 = vrot.slane %v14872_v16, %v8654_v24  ;;  %v8651_v59 = vrot.slane %v14872_v16, %v8650_v57  ;;  %v13664_v54 = vcombine.low %v14864_v55, %v14866_v25  ;;  %v14937_v35 = vld [vmem:[#allocation7 + $0xe30] sm:$0xff] }
 0x65d   : > { %v14868_v58 = vpop.eup %14055  ;;  %14077 = vrcp.f32 %v8605_v46  ;;  %v13670_v46 = vcombine.low %v14883_v56, %v14885_v31  ;;  %v13673_v25 = vcombine.high %v14892_v5, %v14894_v4  ;;  %v13678_v56 = vcombine.low %v14910_v60, %v14921_v11 }
 0x65e   : > { %11722 = vmatpush1.bf16.msra.mxu0 %v13638_v2  ;;  %11894 = vmatpush1.bf16.msra.mxu1 %v13640_v40  ;;  %v14874_v61 = vpop.eup %14057  ;;  %v8647_v2 = vrot.slane %v14872_v16, %v8646_v39  ;;  %v14902_v40 = vrot.slane %v14872_v16, %v8658_v63  ;;  %v372_v63 = vunpack.c.l.bf16 %v14908_v8  ;;  %v13679_v31 = vcombine.high %v14910_v60, %v14921_v11 }
 0x65f   : > { %11723 = vmatprep.subr.bf16.mxu0 %v13647_v42  ;;  %11895 = vmatprep.subr.bf16.mxu1 %v13649_v26  ;;  %v14887_v62 = vpop.eup %14059  ;;  %v14905_v42 = vld [vmem:[%s14614_s27 + $0xa0] sm:$0xff] }
 0x660   : > { %v14896_v32 = vpop.eup %14061  ;;  %v370_v57 = vunpack.c.l.bf16 %v14905_v42  ;;  %v371_v55 = vunpack.c.h.bf16 %v14905_v42 }
 0x661   : > { %v14912_v26 = vpop.eup %14063 }
 0x662   : > { %11724 = vmatpush1.bf16.msra.mxu0 %v13646_v12  ;;  %11896 = vmatpush1.bf16.msra.mxu1 %v13648_v21  ;;  %v14925_v12 = vld [vmem:[#allocation7 + $0xdf8] sm:$0xff]  ;;  %v14927_v51 = vpop.eup %14065  ;;  %v347_v21 = vunpack.c.h.bf16 %v14852_v28 }
 0x663   : > { %11725 = vmatprep.subr.bf16.mxu0 %v13655_v17  ;;  %11897 = vmatprep.subr.bf16.mxu1 %v13657_v53  ;;  %v349_v17 = vunpack.c.h.bf16 %v14879_v1  ;;  %v13672_v53 = vcombine.low %v14892_v5, %v14894_v4  ;;  %v14939_v39 = vpop.eup %14067  ;;  %v13681_v4 = vcombine.high %v14923_v7, %v14925_v12 }
 0x666   : > { %11726 = vmatpush1.bf16.msra.mxu0 %v13654_v18  ;;  %11898 = vmatpush1.bf16.msra.mxu1 %v13656_v38  ;;  %v14946_v18 = vpop.eup %14069 }
 0x667   : > { %11727 = vmatprep.subr.bf16.mxu0 %v13663_v3  ;;  %11899 = vmatprep.subr.bf16.mxu1 %v13665_v50  ;;  %v13680_v50 = vcombine.low %v14923_v7, %v14925_v12  ;;  %v14954_v44 = vpop.eup %14071 }
 0x668   : > { %v11407_v24 = vpop.f32.mrb[16].mxu0  ;;  %v11579_v1 = vpop.f32.mrb[16].mxu1 }
 0x669   : > { %v13750_v38 = vadd.f32 %v11407_v24, %v8647_v2  ;;  %v11409_v3 = vpop.f32.mrb[17].mxu0  ;;  %v13754_v42 = vadd.f32 %v11579_v1, %v8655_v6  ;;  %v11581_v48 = vpop.f32.mrb[17].mxu1  ;;  %v13687_v24 = vcombine.high %v14935_v20, %v14937_v35  ;;  %v373_v1 = vunpack.c.h.bf16 %v14908_v8 }
 0x66a   : > { %v13751_v16 = vadd.f32 %v11409_v3, %v8651_v59  ;;  %v11411_v5 = vpop.f32.mrb[18].mxu0  ;;  %11728 = vmatpush1.bf16.msra.mxu0 %v13662_v47  ;;  %v13755_v60 = vadd.f32 %v11581_v48, %v14902_v40  ;;  %v11583_v45 = vpop.f32.mrb[18].mxu1  ;;  %11900 = vmatpush1.bf16.msra.mxu1 %v13664_v54  ;;  %v15144_v48 = vunpack.c.l.bf16 %v14852_v28 }
 0x66b   : > { %v11932_v49 = vmul.f32 %v14841_v10, %v13750_v38  ;;  %v13752_v11 = vadd.f32 %v11411_v5, %v8647_v2  ;;  %v11413_v43 = vpop.f32.mrb[19].mxu0  ;;  %11729 = vmatprep.subr.bf16.mxu0 %v13671_v14  ;;  %v14963_v3 = vpop.eup %14073  ;;  %v11934_v47 = vmul.f32 %v14843_v13, %v13754_v42  ;;  %v13756_v12 = vadd.f32 %v11583_v45, %v8655_v6  ;;  %v8357_v38 = vld [vmem:[#allocation7 + $0xe18] sm:$0xff]  ;;  %v8364_v6 = vld [vmem:[#allocation7 + $0xe50] sm:$0xff] }
 0x66c   : > { %v11933_v7 = vmul.f32 %v14847_v19, %v13751_v16  ;;  %v13753_v27 = vadd.f32 %v11413_v43, %v8651_v59  ;;  %v11585_v22 = vpop.f32.mrb[19].mxu1  ;;  %11901 = vmatprep.subr.bf16.mxu1 %v13673_v25  ;;  %v14967_v10 = vpop.eup %14075  ;;  %v11935_v54 = vmul.f32 %v14858_v52, %v13755_v60  ;;  %v8361_v5 = vld [vmem:[#allocation7 + $0xe38] sm:$0xff]  ;;  %v8368_v59 = vld [vmem:[#allocation7 + $0xe70] sm:$0xff]  ;;  %v11980_v25 = vsub.f32 1.0, %v14912_v26 }
 0x66d   : > { %v11948_v2 = vadd.f32 %v11932_v49, %v15144_v48  ;;  %v11940_v8 = vmul.f32 %v14868_v58, %v13752_v11  ;;  %v13757_v14 = vadd.f32 %v11585_v22, %v14902_v40  ;;  %v14974_v13 = vpop.eup %14077  ;;  %v11950_v19 = vadd.f32 %v11934_v47, %v348_v9  ;;  %v8365_v9 = vld [vmem:[#allocation7 + $0xe58] sm:$0xff] }
 0x66e   : > { %v11949_v45 = vadd.f32 %v11933_v7, %v347_v21  ;;  %v11942_v43 = vmul.f32 %v14874_v61, %v13756_v12  ;;  %v11941_v16 = vmul.f32 %v14887_v62, %v13753_v27  ;;  %11730 = vmatpush1.bf16.msra.mxu0 %v13670_v46  ;;  %v11951_v28 = vadd.f32 %v11935_v54, %v349_v17  ;;  %v8369_v61 = vld [vmem:[#allocation7 + $0xe78] sm:$0xff]  ;;  %v14981_v46 = vld [vmem:[#allocation7 + $0xe90] sm:$0xff] }
 0x66f   : > { %14079 = vtanh.f32 %v11948_v2  ;;  %v11956_v49 = vadd.f32 %v11940_v8, %v370_v57  ;;  %v11943_v52 = vmul.f32 %v14896_v32, %v13757_v14  ;;  %11902 = vmatpush1.bf16.msra.mxu1 %v13672_v53  ;;  %11731 = vmatprep.subr.bf16.mxu0 %v13679_v31  ;;  %v13689_v58 = vcombine.high %v8357_v38, %v8361_v5  ;;  %v14983_v53 = vld [vmem:[#allocation7 + $0xeb0] sm:$0xff]  ;;  %v14985_v57 = vld [vmem:[#allocation7 + $0xe98] sm:$0xff]  ;;  %v14178_v8 = vld [vmem:[#allocation10 + $0x18] sm:$0xff] }
 0x670   : > { %14081 = vtanh.f32 %v11950_v19  ;;  %v11958_v22 = vadd.f32 %v11942_v43, %v372_v63  ;;  %11903 = vmatprep.subr.bf16.mxu1 %v13681_v4  ;;  %v11957_v40 = vadd.f32 %v11941_v16, %v371_v55  ;;  %v13686_v62 = vcombine.low %v14935_v20, %v14937_v35  ;;  %v14987_v63 = vld [vmem:[#allocation7 + $0xeb8] sm:$0xff]  ;;  %v14996_v4 = vld [vmem:[#allocation7 + $0xed0] sm:$0xff] }
 0x671   : > { %14083 = vtanh.f32 %v11949_v45  ;;  %v11959_v27 = vadd.f32 %v11943_v52, %v373_v1  ;;  %v13688_v32 = vcombine.low %v8357_v38, %v8361_v5  ;;  %v13695_v21 = vcombine.high %v8364_v6, %v8368_v59  ;;  %v14176_v11 = vld [vmem:[#allocation10 + $0x10] sm:$0xff]  ;;  %v14177_v7 = vld [vmem:[#allocation10 + $0x8] sm:$0xff]  ;;  %v14179_v38 = vld [vmem:[#allocation10 + $0x40] sm:$0xff] }
 0x672   : > { %14085 = vtanh.f32 %v11951_v28  ;;  %11732 = vmatpush1.bf16.msra.mxu0 %v13678_v56  ;;  %v13697_v17 = vcombine.high %v8365_v9, %v8369_v61  ;;  %v13694_v20 = vcombine.low %v8364_v6, %v8368_v59  ;;  %v13696_v35 = vcombine.low %v8365_v9, %v8369_v61  ;;  %v14175_v56 = vld [vmem:[#allocation10] sm:$0xff]  ;;  %v15004_v48 = vld [vmem:[#allocation7 + $0xed8] sm:$0xff]  ;;  %v8388_v6 = vld [vmem:[#allocation7 + $0xf10] sm:$0xff] }
 0x673   : > { %14087 = vtanh.f32 %v11956_v49  ;;  %11904 = vmatpush1.bf16.msra.mxu1 %v13680_v50  ;;  %11733 = vmatprep.subr.bf16.mxu0 %v13687_v24  ;;  %v13703_v55 = vcombine.high %v14981_v46, %v14983_v53  ;;  %v12012_v31 = vmul.f32 %v14175_v56, %v14912_v26  ;;  %v11982_v50 = vsub.f32 1.0, %v14927_v51  ;;  %v14998_v24 = vld [vmem:[#allocation7 + $0xef0] sm:$0xff]  ;;  %v15006_v2 = vld [vmem:[#allocation7 + $0xef8] sm:$0xff] }
 0x674   : > { %14089 = vtanh.f32 %v11958_v22  ;;  %11905 = vmatprep.subr.bf16.mxu1 %v13689_v58  ;;  %v13705_v42 = vcombine.high %v14985_v57, %v14987_v63  ;;  %v12014_v1 = vmul.f32 %v14176_v11, %v14927_v51  ;;  %v11981_v47 = vsub.f32 1.0, %v14939_v39  ;;  %v8400_v11 = vld [vmem:[#allocation7 + $0xf70] sm:$0xff] }
 0x675   : > { %14091 = vtanh.f32 %v11957_v40  ;;  %v12013_v12 = vmul.f32 %v14177_v7, %v14939_v39  ;;  %v11983_v26 = vsub.f32 1.0, %v14946_v18  ;;  %v12015_v14 = vmul.f32 %v14178_v8, %v14946_v18  ;;  %v14180_v40 = vld [vmem:[#allocation10 + $0x50] sm:$0xff] }
 0x676   : > { %14093 = vtanh.f32 %v11959_v27  ;;  %11734 = vmatpush1.bf16.msra.mxu0 %v13686_v62  ;;  %v12020_v5 = vmul.f32 %v14179_v38, %v14954_v44  ;;  %v13702_v51 = vcombine.low %v14981_v46, %v14983_v53  ;;  %v11988_v39 = vsub.f32 1.0, %v14954_v44  ;;  %v8392_v44 = vld [vmem:[#allocation7 + $0xf30] sm:$0xff] }
 0x677   : > { %11906 = vmatpush1.bf16.msra.mxu1 %v13688_v32  ;;  %11735 = vmatprep.subr.bf16.mxu0 %v13695_v21  ;;  %v13704_v16 = vcombine.low %v14985_v57, %v14987_v63  ;;  %v13711_v18 = vcombine.high %v14996_v4, %v14998_v24  ;;  %v11990_v49 = vsub.f32 1.0, %v14963_v3  ;;  %v13713_v58 = vcombine.high %v15004_v48, %v15006_v2  ;;  %v8389_v32 = vld [vmem:[#allocation7 + $0xf18] sm:$0xff] }
 0x678   : > { %11907 = vmatprep.subr.bf16.mxu1 %v13697_v17  ;;  %v12022_v9 = vmul.f32 %v14180_v40, %v14963_v3  ;;  %v11989_v61 = vsub.f32 1.0, %v14967_v10  ;;  %v8393_v21 = vld [vmem:[#allocation7 + $0xf38] sm:$0xff]  ;;  %v13710_v57 = vcombine.low %v14996_v4, %v14998_v24  ;;  %v13712_v63 = vcombine.low %v15004_v48, %v15006_v2  ;;  %v8396_v24 = vld [vmem:[#allocation7 + $0xf50] sm:$0xff] }
 0x679   : > { %v14080_v60 = vpop.eup %14079  ;;  %v11991_v3 = vsub.f32 1.0, %v14974_v13  ;;  %v13721_v4 = vcombine.high %v8389_v32, %v8393_v21  ;;  %v8401_v48 = vld [vmem:[#allocation7 + $0xf78] sm:$0xff]  ;;  %v13720_v8 = vcombine.low %v8389_v32, %v8393_v21  ;;  %v320_v32 = vld [vmem:[%s14614_s27 + $0x70] sm:$0xff] }
 0x67a   : > { %v14082_v54 = vpop.eup %14081  ;;  %v11996_v19 = vmul.f32 %v14080_v60, %v11980_v25  ;;  %11736 = vmatpush1.bf16.msra.mxu0 %v13694_v20  ;;  %v13719_v25 = vcombine.high %v8388_v6, %v8392_v44 }
 0x67b   : > { %v14084_v45 = vpop.eup %14083  ;;  %v11998_v43 = vmul.f32 %v14082_v54, %v11982_v50  ;;  %11908 = vmatpush1.bf16.msra.mxu1 %v13696_v35  ;;  %11737 = vmatprep.subr.bf16.mxu0 %v13703_v55  ;;  %v13718_v54 = vcombine.low %v8388_v6, %v8392_v44 }
 0x67c   : > { %v14086_v28 = vpop.eup %14085  ;;  %v12028_v52 = vadd.f32 %v12012_v31, %v11996_v19  ;;  %v11997_v22 = vmul.f32 %v14084_v45, %v11981_v47  ;;  %11909 = vmatprep.subr.bf16.mxu1 %v13705_v42  ;;  %v14181_v31 = vld [vmem:[#allocation10 + $0x48] sm:$0xff]  ;;  %v8405_v19 = vld [vmem:[#allocation7 + $0xf98] sm:$0xff]  ;;  %v13726_v45 = vcombine.low %v8396_v24, %v8400_v11 }
 0x67d   : > { %v14088_v59 = vpop.eup %14087  ;;  %v12030_v27 = vadd.f32 %v12014_v1, %v11998_v43  ;;  %v11999_v62 = vmul.f32 %v14086_v28, %v11983_v26  ;;  %v12021_v50 = vmul.f32 %v14181_v31, %v14967_v10  ;;  %v14182_v1 = vld [vmem:[#allocation10 + $0x58] sm:$0xff]  ;;  %v8397_v26 = vld [vmem:[#allocation7 + $0xf58] sm:$0xff]  ;;  %v8416_v28 = vld [vmem:[#allocation7 + $0xff0] sm:$0xff] }
 0x67e   : > { %v14090_v17 = vpop.eup %14089  ;;  %12044 = vst [vmem:[#allocation10] sm:$0xff] %v12028_v52  ;;  %v12029_v46 = vadd.f32 %v12013_v12, %v11997_v22  ;;  %v12004_v53 = vmul.f32 %v14088_v59, %v11988_v39  ;;  %11738 = vmatpush1.bf16.msra.mxu0 %v13702_v51  ;;  %v12023_v47 = vmul.f32 %v14182_v1, %v14974_v13  ;;  %v8408_v13 = vld [vmem:[#allocation7 + $0xfb0] sm:$0xff]  ;;  %v8409_v51 = vld [vmem:[#allocation7 + $0xfb8] sm:$0xff] }
 0x67f   : > { %v14092_v20 = vpop.eup %14091  ;;  %12046 = vst [vmem:[#allocation10 + $0x10] sm:$0xff] %v12030_v27  ;;  %v12031_v35 = vadd.f32 %v12015_v14, %v11999_v62  ;;  %v12006_v55 = vmul.f32 %v14090_v17, %v11990_v49  ;;  %11910 = vmatpush1.bf16.msra.mxu1 %v13704_v16  ;;  %11739 = vmatprep.subr.bf16.mxu0 %v13711_v18  ;;  %v8412_v18 = vld [vmem:[#allocation7 + $0xfd0] sm:$0xff]  ;;  %v8413_v49 = vld [vmem:[#allocation7 + $0xfd8] sm:$0xff] }
 0x680   : > { %v14094_v56 = vpop.eup %14093  ;;  %12045 = vst [vmem:[#allocation10 + $0x8] sm:$0xff] %v12029_v46  ;;  %v12036_v42 = vadd.f32 %v12020_v5, %v12004_v53  ;;  %v12005_v60 = vmul.f32 %v14092_v20, %v11989_v61  ;;  %11911 = vmatprep.subr.bf16.mxu1 %v13713_v58  ;;  %v13727_v14 = vcombine.high %v8396_v24, %v8400_v11  ;;  %v8404_v5 = vld [vmem:[#allocation7 + $0xf90] sm:$0xff]  ;;  %v8417_v52 = vld [vmem:[#allocation7 + $0xff8] sm:$0xff] }
 0x681   : > { %12047 = vst [vmem:[#allocation10 + $0x18] sm:$0xff] %v12031_v35  ;;  %v12038_v7 = vadd.f32 %v12022_v9, %v12006_v55  ;;  %v12007_v12 = vmul.f32 %v14094_v56, %v11991_v3  ;;  %v13729_v38 = vcombine.high %v8397_v26, %v8401_v48  ;;  %v13728_v39 = vcombine.low %v8397_v26, %v8401_v48  ;;  %v308_v9 = vld [vmem:[%s14614_s27 + $0x10] sm:$0xff]  ;;  %v309_v61 = vld [vmem:[%s14614_s27 + $0x18] sm:$0xff] }
 0x682   : > { %12052 = vst [vmem:[#allocation10 + $0x40] sm:$0xff] %v12036_v42  ;;  %v12037_v2 = vadd.f32 %v12021_v50, %v12005_v60  ;;  %11740 = vmatpush1.bf16.msra.mxu0 %v13710_v57  ;;  %v13735_v43 = vcombine.high %v8404_v5, %v8408_v13  ;;  %v13737_v16 = vcombine.high %v8405_v19, %v8409_v51  ;;  %v334_v27 = vunpack.c.l.bf16 %v308_v9  ;;  %v321_v17 = vld [vmem:[%s14614_s27 + $0x78] sm:$0xff]  ;;  %v312_v3 = vld [vmem:[%s14614_s27 + $0x30] sm:$0xff] }
 0x683   : > { %12054 = vst [vmem:[#allocation10 + $0x50] sm:$0xff] %v12038_v7  ;;  %v12039_v10 = vadd.f32 %v12023_v47, %v12007_v12  ;;  %11912 = vmatpush1.bf16.msra.mxu1 %v13712_v63  ;;  %11741 = vmatprep.subr.bf16.mxu0 %v13719_v25  ;;  %v13734_v22 = vcombine.low %v8404_v5, %v8408_v13  ;;  %v336_v62 = vunpack.c.l.bf16 %v309_v61  ;;  %v335_v21 = vunpack.c.h.bf16 %v308_v9  ;;  %v313_v55 = vld [vmem:[%s14614_s27 + $0x38] sm:$0xff]  ;;  %v324_v24 = vld [vmem:[%s14614_s27 + $0x90] sm:$0xff] }
 0x684   : > { %12053 = vst [vmem:[#allocation10 + $0x48] sm:$0xff] %v12037_v2  ;;  %11913 = vmatprep.subr.bf16.mxu1 %v13721_v4  ;;  %v13736_v58 = vcombine.low %v8405_v19, %v8409_v51  ;;  %v13743_v6 = vcombine.high %v8412_v18, %v8416_v28  ;;  %v13745_v44 = vcombine.high %v8413_v49, %v8417_v52  ;;  %v337_v46 = vunpack.c.h.bf16 %v309_v61  ;;  %v325_v47 = vld [vmem:[%s14614_s27 + $0x98] sm:$0xff]  ;;  %v15145_v2 = vld [vmem:[#allocation15_spill] sm:$0xff]  ;;  %v15148_v51 = vld [vmem:[#allocation18_spill] sm:$0xff] }
 0x685   : > { %12055 = vst [vmem:[#allocation10 + $0x58] sm:$0xff] %v12039_v10  ;;  %v13742_v59 = vcombine.low %v8412_v18, %v8416_v28  ;;  %v13744_v40 = vcombine.low %v8413_v49, %v8417_v52  ;;  %v8422_v53 = vadd.f32 %v14707_v23, %v334_v27  ;;  %v358_v57 = vunpack.c.l.bf16 %v320_v32  ;;  %v15147_v5 = vld [vmem:[#allocation17_spill] sm:$0xff]  ;;  %v15150_v18 = vld [vmem:[#allocation20_spill] sm:$0xff] }
 0x686   : > { %11742 = vmatpush1.bf16.msra.mxu0 %v13718_v54  ;;  %v8424_v63 = vadd.f32 %v14709_v29, %v336_v62  ;;  %v360_v20 = vunpack.c.l.bf16 %v321_v17  ;;  %v359_v35 = vunpack.c.h.bf16 %v320_v32  ;;  %v8425_v25 = vadd.f32 %v14713_v33, %v337_v46  ;;  %v15151_v52 = vld [vmem:[#allocation21_spill] sm:$0xff] }
 0x687   : > { %11914 = vmatpush1.bf16.msra.mxu1 %v13720_v8  ;;  %11743 = vmatprep.subr.bf16.mxu0 %v13727_v14  ;;  %v361_v56 = vunpack.c.h.bf16 %v321_v17  ;;  %v13206_v31 = vmul.f32 -1.442695, %v8422_v53  ;;  %v8430_v50 = vadd.f32 %v14715_v34, %v358_v57  ;;  %v342_v42 = vunpack.c.l.bf16 %v312_v3  ;;  %v15146_v8 = vld [vmem:[#allocation16_spill] sm:$0xff] }
 0x688   : > { %11915 = vmatprep.subr.bf16.mxu1 %v13729_v38  ;;  %v13208_v60 = vmul.f32 -1.442695, %v8424_v63  ;;  %v8432_v23 = vadd.f32 %v14717_v36, %v360_v20  ;;  %v344_v4 = vunpack.c.l.bf16 %v313_v55  ;;  %v8431_v11 = vadd.f32 %v14719_v37, %v359_v35 }
 0x689   : > { %v343_v1 = vunpack.c.h.bf16 %v312_v3  ;;  %v8433_v7 = vadd.f32 %v14721_v41, %v361_v56  ;;  %v345_v12 = vunpack.c.h.bf16 %v313_v55  ;;  %14095 = vpow2.f32 %v13206_v31 }
 0x68a   : > { %11744 = vmatpush1.bf16.msra.mxu0 %v13726_v45  ;;  %v13214_v33 = vmul.f32 -1.442695, %v8430_v50  ;;  %v8534_v26 = vadd.f32 %v14771_v15, %v342_v42  ;;  %v366_v34 = vunpack.c.l.bf16 %v324_v24  ;;  %14097 = vpow2.f32 %v13208_v60 }
 0x68b   : > { %11916 = vmatpush1.bf16.msra.mxu1 %v13728_v39  ;;  %11745 = vmatprep.subr.bf16.mxu0 %v13735_v43  ;;  %v13216_v48 = vmul.f32 -1.442695, %v8432_v23  ;;  %v8536_v36 = vadd.f32 %v15145_v2, %v344_v4  ;;  %v368_v54 = vunpack.c.l.bf16 %v325_v47  ;;  %v13215_v10 = vmul.f32 -1.442695, %v8431_v11  ;;  %v15149_v39 = vld [vmem:[#allocation19_spill] sm:$0xff] }
 0x68c   : > { %11917 = vmatprep.subr.bf16.mxu1 %v13737_v16  ;;  %v8535_v37 = vadd.f32 %v15146_v8, %v343_v1  ;;  %v367_v14 = vunpack.c.h.bf16 %v324_v24  ;;  %v13217_v38 = vmul.f32 -1.442695, %v8433_v7  ;;  %v8537_v41 = vadd.f32 %v15147_v5, %v345_v12  ;;  %v15153_v8 = vld [vmem:[#allocation23_spill] sm:$0xff] }
 0x68d   : > { %v369_v13 = vunpack.c.h.bf16 %v325_v47  ;;  %v13222_v19 = vmul.f32 -1.442695, %v8534_v26  ;;  %v8542_v15 = vadd.f32 %v15148_v51, %v366_v34  ;;  %v13224_v45 = vmul.f32 -1.442695, %v8536_v36  ;;  %v15152_v47 = vld [vmem:[#allocation22_spill] sm:$0xff] }
 0x68e   : > { %11746 = vmatpush1.bf16.msra.mxu0 %v13734_v22  ;;  %v8544_v43 = vadd.f32 %v15149_v39, %v368_v54  ;;  %v13223_v16 = vmul.f32 -1.442695, %v8535_v37  ;;  %v8543_v28 = vadd.f32 %v15150_v18, %v367_v14  ;;  %v13225_v49 = vmul.f32 -1.442695, %v8537_v41  ;;  %v317_v14 = vld [vmem:[%s14614_s27 + $0x58] sm:$0xff] }
 0x68f   : > { %11918 = vmatpush1.bf16.msra.mxu1 %v13736_v58  ;;  %11747 = vmatprep.subr.bf16.mxu0 %v13743_v6  ;;  %v8545_v22 = vadd.f32 %v15151_v52, %v369_v13  ;;  %v13230_v58 = vmul.f32 -1.442695, %v8542_v15  ;;  %v8670_v12 = vsub.s32 6, %v15152_v47  ;;  %v328_v13 = vld [vmem:[%s14614_s27 + $0xb0] sm:$0xff]  ;;  %v329_v15 = vld [vmem:[%s14614_s27 + $0xb8] sm:$0xff] }
 0x690   : > { %11919 = vmatprep.subr.bf16.mxu1 %v13745_v44  ;;  %v13232_v6 = vmul.f32 -1.442695, %v8544_v43 }
 0x691   : > { %v13233_v9 = vmul.f32 -1.442695, %v8545_v22  ;;  %v8671_v5 = vrot.slane %v15153_v8, %v8670_v12 }
 0x692   : > { %11748 = vmatpush1.bf16.msra.mxu0 %v13742_v59  ;;  %v13231_v59 = vmul.f32 -1.442695, %v8543_v28 }
 0x693   : > { %11920 = vmatpush1.bf16.msra.mxu1 %v13744_v40  ;;  %v14096_v44 = vpop.eup %14095 }
 0x694   : > { %v14098_v40 = vpop.eup %14097  ;;  %v8486_v62 = vadd.f32 1.0, %v14096_v44 }
 0x695   : > { %11750 = vmatmul.mubr.bf16.vlgmr.msra.gmra.mrb[20].mxu0 %v14657_v0 }
 0x696   : > { %11922 = vmatmul.mubr.bf16.vlgmr.msra.gmra.mrb[20].mxu1 %v14657_v0  ;;  %v8423_v0 = vadd.f32 %v14711_v30, %v335_v21  ;;  %v13209_v30 = vmul.f32 -1.442695, %v8425_v25  ;;  %v8488_v21 = vadd.f32 1.0, %v14098_v40 }
 0x698   : > { %v13207_v29 = vmul.f32 -1.442695, %v8423_v0 }
 0x69a   : > { %14099 = vpow2.f32 %v13207_v29 }
 0x69b   : > { %14101 = vpow2.f32 %v13209_v30  ;;  %v8662_v30 = vsub.s32 4, %v15152_v47 }
 0x69c   : > { %14103 = vpow2.f32 %v13214_v33  ;;  %v8666_v33 = vsub.s32 5, %v15152_v47 }
 0x69d   : > { %14105 = vpow2.f32 %v13216_v48  ;;  %v8674_v48 = vsub.s32 7, %v15152_v47  ;;  %v8663_v37 = vrot.slane %v15153_v8, %v8662_v30 }
 0x69e   : > { %14107 = vpow2.f32 %v13215_v10  ;;  %v316_v10 = vld [vmem:[%s14614_s27 + $0x50] sm:$0xff]  ;;  %v8667_v41 = vrot.slane %v15153_v8, %v8666_v33 }
 0x69f   : > { %14109 = vpow2.f32 %v13217_v38  ;;  %v8675_v51 = vrot.slane %v15153_v8, %v8674_v48  ;;  %v350_v39 = vunpack.c.l.bf16 %v316_v10  ;;  %v351_v52 = vunpack.c.h.bf16 %v316_v10 }
 0x6a0   : > { %14111 = vpow2.f32 %v13222_v19 }
 0x6a1   : > { %14113 = vpow2.f32 %v13224_v45 }
 0x6a2   : > { %14115 = vpow2.f32 %v13223_v16  ;;  %v352_v16 = vunpack.c.l.bf16 %v317_v14 }
 0x6a3   : > { %14117 = vpow2.f32 %v13225_v49 }
 0x6a4   : > { %v14100_v61 = vpop.eup %14099  ;;  %14119 = vpow2.f32 %v13230_v58  ;;  %v353_v58 = vunpack.c.h.bf16 %v317_v14 }
 0x6a5   : > { %v14102_v27 = vpop.eup %14101  ;;  %14121 = vpow2.f32 %v13232_v6  ;;  %v8487_v46 = vadd.f32 1.0, %v14100_v61  ;;  %v374_v6 = vunpack.c.l.bf16 %v328_v13 }
 0x6a6   : > { %v14104_v32 = vpop.eup %14103  ;;  %14123 = vpow2.f32 %v13231_v59  ;;  %v8489_v57 = vadd.f32 1.0, %v14102_v27  ;;  %v376_v27 = vunpack.c.l.bf16 %v329_v15 }
 0x6a7   : > { %v14106_v17 = vpop.eup %14105  ;;  %14125 = vpow2.f32 %v13233_v9  ;;  %v8494_v20 = vadd.f32 1.0, %v14104_v32 }
 0x6a8   : > { %v14108_v53 = vpop.eup %14107  ;;  %14127 = vrcp.f32 %v8486_v62  ;;  %v8496_v0 = vadd.f32 1.0, %v14106_v17  ;;  %v375_v62 = vunpack.c.h.bf16 %v328_v13  ;;  %v14184_v13 = vld [vmem:[#allocation10 + $0x30] sm:$0xff] }
 0x6a9   : > { %v14110_v63 = vpop.eup %14109  ;;  %14129 = vrcp.f32 %v8488_v21  ;;  %v8495_v55 = vadd.f32 1.0, %v14108_v53 }
 0x6aa   : > { %v14112_v3 = vpop.eup %14111  ;;  %14131 = vrcp.f32 %v8487_v46  ;;  %v8497_v56 = vadd.f32 1.0, %v14110_v63  ;;  %v377_v63 = vunpack.c.h.bf16 %v329_v15 }
 0x6ab   : > { %v14114_v35 = vpop.eup %14113  ;;  %14133 = vrcp.f32 %v8489_v57  ;;  %v8598_v50 = vadd.f32 1.0, %v14112_v3 }
 0x6ac   : > { %v14116_v25 = vpop.eup %14115  ;;  %14135 = vrcp.f32 %v8494_v20  ;;  %v8600_v60 = vadd.f32 1.0, %v14114_v35 }
 0x6ad   : > { %v14118_v31 = vpop.eup %14117  ;;  %14137 = vrcp.f32 %v8496_v0  ;;  %v8599_v4 = vadd.f32 1.0, %v14116_v25 }
 0x6ae   : > { %v14120_v42 = vpop.eup %14119  ;;  %14139 = vrcp.f32 %v8495_v55  ;;  %v8601_v29 = vadd.f32 1.0, %v14118_v31 }
 0x6af   : > { %v14122_v23 = vpop.eup %14121  ;;  %14141 = vrcp.f32 %v8497_v56  ;;  %v8606_v1 = vadd.f32 1.0, %v14120_v42 }
 0x6b0   : > { %v14124_v24 = vpop.eup %14123  ;;  %14143 = vrcp.f32 %v8598_v50  ;;  %v8608_v7 = vadd.f32 1.0, %v14122_v23 }
 0x6b1   : > { %v14126_v11 = vpop.eup %14125  ;;  %14145 = vrcp.f32 %v8600_v60  ;;  %v8607_v34 = vadd.f32 1.0, %v14124_v24 }
 0x6b2   : > { %v14128_v26 = vpop.eup %14127  ;;  %14147 = vrcp.f32 %v8599_v4  ;;  %v8609_v36 = vadd.f32 1.0, %v14126_v11 }
 0x6b3   : > { %v14130_v2 = vpop.eup %14129  ;;  %14149 = vrcp.f32 %v8601_v29 }
 0x6b4   : > { %v14132_v54 = vpop.eup %14131  ;;  %14151 = vrcp.f32 %v8606_v1 }
 0x6b5   : > { %v14134_v38 = vpop.eup %14133  ;;  %14153 = vrcp.f32 %v8608_v7 }
 0x6b6   : > { %v14136_v19 = vpop.eup %14135  ;;  %14155 = vrcp.f32 %v8607_v34 }
 0x6b7   : > { %v14138_v45 = vpop.eup %14137  ;;  %14157 = vrcp.f32 %v8609_v36 }
 0x6b8   : > { %v14140_v18 = vpop.eup %14139 }
 0x6b9   : > { %v14142_v44 = vpop.eup %14141 }
 0x6ba   : > { %v14144_v32 = vpop.eup %14143 }
 0x6bb   : > { %v14146_v20 = vpop.eup %14145  ;;  %v11984_v36 = vsub.f32 1.0, %v14144_v32 }
 0x6bc   : > { %v14148_v56 = vpop.eup %14147  ;;  %v11986_v10 = vsub.f32 1.0, %v14146_v20 }
 0x6bd   : > { %v14150_v23 = vpop.eup %14149 }
 0x6be   : > { %v14152_v1 = vpop.eup %14151 }
 0x6bf   : > { %v14154_v12 = vpop.eup %14153 }
 0x768   : > { %v11751_v43 = vpop.f32.mrb[20].mxu0 }
 0x769   : > { %v13758_v28 = vadd.f32 %v11751_v43, %v8663_v37  ;;  %v11923_v49 = vpop.f32.mrb[20].mxu1  ;;  %v11753_v22 = vpop.f32.mrb[21].mxu0 }
 0x76a   : > { %v13762_v59 = vadd.f32 %v11923_v49, %v8671_v5  ;;  %v13759_v40 = vadd.f32 %v11753_v22, %v8667_v41  ;;  %v11925_v9 = vpop.f32.mrb[21].mxu1  ;;  %v11755_v61 = vpop.f32.mrb[22].mxu0 }
 0x76b   : > { %v11936_v21 = vmul.f32 %v14128_v26, %v13758_v28  ;;  %v13763_v17 = vadd.f32 %v11925_v9, %v8675_v51  ;;  %v13760_v46 = vadd.f32 %v11755_v61, %v8663_v37  ;;  %v11927_v53 = vpop.f32.mrb[22].mxu1  ;;  %v11757_v57 = vpop.f32.mrb[23].mxu0  ;;  %v14183_v37 = vld [vmem:[#allocation10 + $0x20] sm:$0xff] }
 0x76c   : > { %v11938_v3 = vmul.f32 %v14130_v2, %v13762_v59  ;;  %v11937_v0 = vmul.f32 %v14132_v54, %v13759_v40  ;;  %v13764_v35 = vadd.f32 %v11927_v53, %v8671_v5  ;;  %v13761_v55 = vadd.f32 %v11757_v57, %v8667_v41  ;;  %v11929_v25 = vpop.f32.mrb[23].mxu1  ;;  %v14156_v26 = vpop.eup %14155  ;;  %v14187_v40 = vld [vmem:[#allocation10 + $0x60] sm:$0xff] }
 0x76d   : > { %v11952_v31 = vadd.f32 %v11936_v21, %v350_v39  ;;  %v11939_v50 = vmul.f32 %v14134_v38, %v13763_v17  ;;  %v11944_v42 = vmul.f32 %v14136_v19, %v13760_v46  ;;  %v13765_v60 = vadd.f32 %v11929_v25, %v8675_v51  ;;  %v14158_v48 = vpop.eup %14157  ;;  %v14185_v39 = vld [vmem:[#allocation10 + $0x28] sm:$0xff]  ;;  %v14188_v21 = vld [vmem:[#allocation10 + $0x70] sm:$0xff] }
 0x76e   : > { %v11954_v4 = vadd.f32 %v11938_v3, %v352_v16  ;;  %v11953_v24 = vadd.f32 %v11937_v0, %v351_v52  ;;  %v11946_v29 = vmul.f32 %v14138_v45, %v13764_v35  ;;  %v11945_v11 = vmul.f32 %v14140_v18, %v13761_v55  ;;  %v14186_v52 = vld [vmem:[#allocation10 + $0x38] sm:$0xff] }
 0x76f   : > { %14159 = vtanh.f32 %v11952_v31  ;;  %v11955_v47 = vadd.f32 %v11939_v50, %v353_v58  ;;  %v11960_v30 = vadd.f32 %v11944_v42, %v374_v6  ;;  %v11947_v7 = vmul.f32 %v14142_v44, %v13765_v60  ;;  %v14190_v55 = vld [vmem:[#allocation10 + $0x78] sm:$0xff] }
 0x770   : > { %14161 = vtanh.f32 %v11954_v4  ;;  %v11962_v33 = vadd.f32 %v11946_v29, %v376_v27  ;;  %v11961_v34 = vadd.f32 %v11945_v11, %v375_v62  ;;  %v12016_v14 = vmul.f32 %v14183_v37, %v14144_v32 }
 0x771   : > { %14163 = vtanh.f32 %v11953_v24  ;;  %v11963_v2 = vadd.f32 %v11947_v7, %v377_v63  ;;  %v11985_v38 = vsub.f32 1.0, %v14148_v56  ;;  %v12018_v19 = vmul.f32 %v14184_v13, %v14146_v20  ;;  %v14189_v20 = vld [vmem:[#allocation10 + $0x68] sm:$0xff] }
 0x772   : > { %14165 = vtanh.f32 %v11955_v47  ;;  %v11987_v51 = vsub.f32 1.0, %v14150_v23  ;;  %v12017_v43 = vmul.f32 %v14185_v39, %v14148_v56  ;;  %v11992_v16 = vsub.f32 1.0, %v14152_v1 }
 0x773   : > { %14167 = vtanh.f32 %v11960_v30  ;;  %v12019_v22 = vmul.f32 %v14186_v52, %v14150_v23  ;;  %v11994_v58 = vsub.f32 1.0, %v14154_v12  ;;  %v12024_v9 = vmul.f32 %v14187_v40, %v14152_v1 }
 0x774   : > { %14169 = vtanh.f32 %v11962_v33  ;;  %v11993_v61 = vsub.f32 1.0, %v14156_v26  ;;  %v12026_v17 = vmul.f32 %v14188_v21, %v14154_v12  ;;  %v11995_v46 = vsub.f32 1.0, %v14158_v48 }
 0x775   : > { %14171 = vtanh.f32 %v11961_v34  ;;  %v12025_v3 = vmul.f32 %v14189_v20, %v14156_v26  ;;  %v12027_v25 = vmul.f32 %v14190_v55, %v14158_v48 }
 0x776   : > { %14173 = vtanh.f32 %v11963_v2 }
 0x779   : > { %v14160_v54 = vpop.eup %14159 }
 0x77a   : > { %v14162_v8 = vpop.eup %14161  ;;  %v12000_v5 = vmul.f32 %v14160_v54, %v11984_v36 }
 0x77b   : > { %v14164_v41 = vpop.eup %14163  ;;  %v12002_v15 = vmul.f32 %v14162_v8, %v11986_v10 }
 0x77c   : > { %v14166_v45 = vpop.eup %14165  ;;  %v12032_v18 = vadd.f32 %v12016_v14, %v12000_v5  ;;  %v12001_v28 = vmul.f32 %v14164_v41, %v11985_v38 }
 0x77d   : > { %v14168_v49 = vpop.eup %14167  ;;  %v12034_v6 = vadd.f32 %v12018_v19, %v12002_v15  ;;  %v12003_v44 = vmul.f32 %v14166_v45, %v11987_v51 }
 0x77e   : > { %v14170_v59 = vpop.eup %14169  ;;  %12048 = vst [vmem:[#allocation10 + $0x20] sm:$0xff] %v12032_v18  ;;  %v12033_v27 = vadd.f32 %v12017_v43, %v12001_v28  ;;  %v12008_v62 = vmul.f32 %v14168_v49, %v11992_v16 }
 0x77f   : > { %v14172_v32 = vpop.eup %14171  ;;  %12050 = vst [vmem:[#allocation10 + $0x30] sm:$0xff] %v12034_v6  ;;  %v12035_v53 = vadd.f32 %v12019_v22, %v12003_v44  ;;  %v12010_v57 = vmul.f32 %v14170_v59, %v11994_v58 }
 0x780   : > { %v14174_v63 = vpop.eup %14173  ;;  %12049 = vst [vmem:[#allocation10 + $0x28] sm:$0xff] %v12033_v27  ;;  %v12040_v0 = vadd.f32 %v12024_v9, %v12008_v62  ;;  %v12009_v35 = vmul.f32 %v14172_v32, %v11993_v61 }
 0x781   : > { %12051 = vst [vmem:[#allocation10 + $0x38] sm:$0xff] %v12035_v53  ;;  %v12042_v56 = vadd.f32 %v12026_v17, %v12010_v57  ;;  %v12011_v31 = vmul.f32 %v14174_v63, %v11995_v46 }
 0x782   : > { %12056 = vst [vmem:[#allocation10 + $0x60] sm:$0xff] %v12040_v0  ;;  %v12041_v50 = vadd.f32 %v12025_v3, %v12009_v35 }
 0x783   : > { %12058 = vst [vmem:[#allocation10 + $0x70] sm:$0xff] %v12042_v56  ;;  %v12043_v42 = vadd.f32 %v12027_v25, %v12011_v31 }
 0x784   : > { %12057 = vst [vmem:[#allocation10 + $0x68] sm:$0xff] %v12041_v50 }
 0x785   : > { %12059 = vst [vmem:[#allocation10 + $0x78] sm:$0xff] %v12043_v42 }
 0x786   : > { %14318 = shalt.err (!%p14315_p13)
}
 0x787   : > { %s14319_s5 = scalar_lea.hbm %s15117_s4, 2048 }
 0x788   : > { %p14320_p2 = scmp.ne.s32.totalorder %s15117_s4, %s14319_s5  ;;  %p14325_p0 = scmp.lt.u32.totalorder %s14319_s5, %s15117_s4 }
 0x78a   : > { %p14321_p3 = pnand %p14320_p2, %p15069_p9 }
 0x78c   : > { %p14322_p12 = pneg %p14321_p3 }
 0x78e   : > { %p14327_p6 = pnand %p14325_p0, %p14322_p12 }
 0x790   : > { %14330 = shalt.err (!%p14327_p6)
}
 0x791   : > { %s14407_s28 = smov 1024   ;;  %s14408_s30 = smov 64  }
 0x792   : > { %13928 = dma.vmem_to_hbm [thread:$0]  (%p15069_p9), %s12071_s22, 2048, %s15117_s4, [#allocation4], %s14407_s28, %s14407_s28, %s14408_s30  }
 0x793   : > { %14368 = dma.done.wait (%p15069_p9), [#allocation4], 2048  }
 0x794   : > { %14370 = vsyncadd (%p15069_p9), [#allocation4], 4294965248 }
 0x795 PF: > { %s20_s20 = sadd.s32 1, %s14393_s20   ;;  %s15155_s15 = smov %s14377_s16 }
 0x796   : > { %p17_p11 = scmp.ge.s32.totalorder %s20_s20, 30   ;;  %s15156_s16 = smov %s14381_s17 }
 0x797   : > { %s15157_s17 = smov %s14573_s25  ;;  %s15158_s18 = smov %s14389_s19 }
 0x798   : > { %s15159_s19 = smov %s15161_s9  ;;  %19 = sbr.rel (!%p17_p11) target bundleno = 7 (0x7), region = 90 }
 0x79f   :  { %12086 = vsyncpa [#allocation3], 1 }
 0x7a0   :  { %12088 = vsyncpa [#allocation3 + $0x1], 1 }
 0x7a1   :  { %12089 = vsyncpa [#allocation6], 1 }
 0x7a2   :  { %12090 = vsyncpa [#allocation9], 1 }
 0x7a3   :  { %12091 = vsyncpa [#allocation4], 1 }
 0x7a4   :  { %12093 = vsyncpa [#allocation4 + $0x1], 1 }

</bundles_post_ra>
